<compile_context>
chip_gen: v6e
topology: v6e:2x2x1
jax: 0.10.0
libtpu: 0.0.40
codegen_flags: <defaults>
</compile_context>

<pallas_src>
import jax
import jax.numpy as jnp
from jax import lax
from jax.experimental import pallas as pl
from jax.experimental.pallas import tpu as pltpu

NEG_SLOPE = 0.01          # nn.LeakyReLU() default negative_slope
BN_EPS = 1e-5             # nn.BatchNorm2d default eps
HIGH = jax.lax.Precision.HIGHEST
LANE = 128


def _leaky(v):
    return jnp.where(v >= 0, v, NEG_SLOPE * v)


def _round_up(x, m):
    return (x + m - 1) // m * m


def _pad_to(a, shape):
    return jnp.pad(a, [(0, s - d) for d, s in zip(a.shape, shape)])


def _fold_bn(gamma, beta, mean, var):
    scale = gamma / jnp.sqrt(var + BN_EPS)
    bias = beta - mean * scale
    return scale, bias


# ----------------------------- Pallas kernel --------------------------------
def _make_aspp_kernel(tile_h, width, pad, cin_p, halo_rows, branch_layout):
    """branch_layout: tuple of (k_offset, k_len, ((dy, dx), ...)) per branch."""
    tile_hw = tile_h * width

    def kernel(x_pad_ref,     # (N, H+2P, W2P_pad, CIN_P) bf16, raw HBM (pl.ANY)
               w_stack_ref,   # (28*CIN_P, HID_P)         bf16 taps stacked on K
               map_s_ref,     # (4, 1, HID_P)             f32  (folded map_bn)
               map_b_ref,     # (4, 1, HID_P)             f32
               red_w_ref,     # (4, HID_P, COUT_P)        bf16 (red_conv K-slices)
               pool_ref,      # (1, COUT_P)               f32  (hoisted pool path)
               red_s_ref,     # (1, COUT_P)               f32  (folded red_bn)
               red_b_ref,     # (1, COUT_P)               f32
               o_ref,         # (TILE_HW, COUT_P)         bf16
               halo_ref,      # scratch (2, halo_rows, W2P_pad, CIN_P) bf16
               dma_sem):      # scratch DMA semaphores (2,)
        n = pl.program_id(0)
        t = pl.program_id(1)
        n_tiles = pl.num_programs(1)
        slot = t % 2

        def halo_copy(tile_idx, dst_slot):
            row_lo = pl.multiple_of(tile_idx * tile_h, tile_h)
            return pltpu.make_async_copy(
                x_pad_ref.at[n, pl.ds(row_lo, halo_rows), :, :],
                halo_ref.at[dst_slot],
                dma_sem.at[dst_slot])

        # Prime the pipeline at the first tile of each image.  (Per-image
        # priming keeps the pattern correct if the batch axis is megacore-
        # sharded across TensorCores.)
        @pl.when(t == 0)
        def _():
            halo_copy(0, 0).start()

        # Wait for this tile's halo, then immediately start the DMA for the
        # next tile's halo so it overlaps with this tile's matmuls.
        halo_copy(t, slot).wait()

        @pl.when(t + 1 < n_tiles)
        def _():
            halo_copy(t + 1, 1 - slot).start()

        cur = halo_ref.at[slot]

        def tap(dy, dx):
            r0 = pad + dy
            c0 = pad + dx
            sl = cur[r0:r0 + tile_h, c0:c0 + width, :]
            return sl.reshape(tile_hw, cin_p)

        out = None
        for b, (k_off, k_len, taps) in enumerate(branch_layout):
            # Stack this branch's shifted windows along K and do one big-K dot.
            if len(taps) == 1:
                lhs = tap(*taps[0])
            else:
                lhs = jnp.concatenate([tap(dy, dx) for dy, dx in taps],
                                      axis=-1)
            hid = jnp.dot(lhs, w_stack_ref[k_off:k_off + k_len, :],
                          preferred_element_type=jnp.float32)
            # per-branch map_bn + leaky_relu, then fold into red_conv accum.
            h = _leaky(hid * map_s_ref[b] + map_b_ref[b])
            red = jnp.dot(h.astype(jnp.bfloat16), red_w_ref[b],
                          preferred_element_type=jnp.float32)
            out = red if out is None else out + red

        out = out + pool_ref[...]                            # pool.repeat bcast
        out = _leaky(out * red_s_ref[...] + red_b_ref[...])  # red_bn + leaky
        o_ref[...] = out.astype(o_ref.dtype)

    return kernel


# ------------------------------- wrapper -------------------------------------
def _pick_tile_h(H, W, P, w2p_pad, cin_p, budget_bytes=16 << 20):
    """Largest divisor of H whose double-buffered halo fits the scratch budget
    (bigger tiles amortize the 2P-row halo over-fetch and per-step overhead)."""
    aligned = [th for th in range(H, 0, -1) if H % th == 0 and (th * W) % 16 == 0]
    for th in aligned:
        if 2 * (th + 2 * P) * w2p_pad * cin_p * 2 <= budget_bytes:
            return th
    return aligned[-1] if aligned else H


def _resident_spec(shape, index_map):
    """Constant-index weight blocks: request a single VMEM buffer (halves the
    resident weight footprint — matters on v7x's 64 MiB VMEM).  Falls back to
    default pipelining if this jax version lacks the pipeline_mode API."""
    if hasattr(pl, "Buffered"):
        try:
            return pl.BlockSpec(shape, index_map, pipeline_mode=pl.Buffered(1))
        except TypeError:
            pass
    return pl.BlockSpec(shape, index_map)


def aspp_pallas(x_nchw, params, dilation_rates=(12, 24, 36), tile_h=None,
                vmem_limit_bytes=None, nchw_output=True):
    N, Cin, H, W = x_nchw.shape
    Hid = params['map0_w'].shape[0]
    Cout = params['red_w'].shape[0]
    P = max(dilation_rates)

    cin_p = _round_up(Cin, LANE)
    hid_p = _round_up(Hid, LANE)
    cout_p = _round_up(Cout, LANE)
    w2p_pad = _round_up(W + 2 * P, 16)      # bf16 sublane-friendly halo width

    if tile_h is None:
        tile_h = _pick_tile_h(H, W, P, w2p_pad, cin_p)
    assert H % tile_h == 0, "tile_h must divide H"
    tile_hw = tile_h * W
    assert tile_hw % 16 == 0, "tile_h * W must be a multiple of 16"
    n_tiles = H // tile_h
    halo_rows = tile_h + 2 * P

    # ---- input: NHWC, bf16 BEFORE the big spatial pad, lane-padded channels --
    x_nhwc = jnp.transpose(x_nchw.astype(jnp.bfloat16), (0, 2, 3, 1))
    x_pad = jnp.pad(x_nhwc, ((0, 0), (P, P), (P, w2p_pad - W - P),
                             (0, cin_p - Cin)))

    # ---- map-conv weights: taps stacked along K per branch ------------------
    mats = []
    branch_layout = []
    k_off = 0

    def add_branch(tap_list):
        nonlocal k_off
        branch_layout.append((k_off, len(tap_list) * cin_p,
                              tuple((dy, dx) for dy, dx, _ in tap_list)))
        for _, _, m in tap_list:
            mats.append(_pad_to(m, (cin_p, hid_p)))
        k_off += len(tap_list) * cin_p

    add_branch([(0, 0, params['map0_w'][:, :, 0, 0].T)])         # 1x1 branch
    for bi, d in enumerate(dilation_rates):                      # dilated 3x3s
        w = params['map%d_w' % (bi + 1)]
        add_branch([((ki - 1) * d, (kj - 1) * d, w[:, :, ki, kj].T)
                    for ki in range(3) for kj in range(3)])
    w_stack = jnp.concatenate(mats, axis=0).astype(jnp.bfloat16)  # (28*cin_p, hid_p)

    # ---- folded BN params / red_conv K-slices --------------------------------
    ms, mb = _fold_bn(*params['map_bn'])                         # (4*Hid,)
    map_s = _pad_to(ms.reshape(4, 1, Hid), (4, 1, hid_p))
    map_b = _pad_to(mb.reshape(4, 1, Hid), (4, 1, hid_p))

    rw = params['red_w'][:, :, 0, 0].T.reshape(4, Hid, Cout)
    red_w = _pad_to(rw, (4, hid_p, cout_p)).astype(jnp.bfloat16)

    rs, rb = _fold_bn(*params['red_bn'])
    red_s = _pad_to(rs.reshape(1, Cout), (1, cout_p))
    red_b = _pad_to(rb.reshape(1, Cout), (1, cout_p))

    # ---- global-pooling branch hoisted to plain JAX (tiny; keeps mean exact) -
    gp_w = params['gp_w'][:, :, 0, 0].T                          # (Cin, Hid)
    prw = params['pool_red_w'][:, :, 0, 0].T                     # (Hid, Cout)
    gs, gb = _fold_bn(*params['gp_bn'])
    pool = jnp.mean(x_nchw, axis=(2, 3))                         # (N, Cin)
    pool = jnp.dot(pool, gp_w, precision=HIGH)
    pool = _leaky(pool * gs + gb)
    pool = jnp.dot(pool, prw, precision=HIGH)                    # (N, Cout)
    pool = _pad_to(pool, (N, cout_p)).reshape(N, 1, cout_p).astype(jnp.float32)

    # ---- pallas_call ---------------------------------------------------------
    kernel = _make_aspp_kernel(tile_h, W, P, cin_p, halo_rows,
                               tuple(branch_layout))

    const2 = lambda n, t: (0, 0)
    const3 = lambda n, t: (0, 0, 0)

    grid_spec = pltpu.PrefetchScalarGridSpec(
        num_scalar_prefetch=0,
        grid=(N, n_tiles),
        in_specs=[
            pl.BlockSpec(memory_space=pl.ANY),          # x_pad stays in HBM
            _resident_spec(w_stack.shape, const2),
            _resident_spec(map_s.shape, const3),
            _resident_spec(map_b.shape, const3),
            _resident_spec(red_w.shape, const3),
            pl.BlockSpec((pl.Squeezed(), 1, cout_p), lambda n, t: (n, 0, 0)),
            _resident_spec(red_s.shape, const2),
            _resident_spec(red_b.shape, const2),
        ],
        out_specs=pl.BlockSpec((pl.Squeezed(), tile_hw, cout_p),
                               lambda n, t: (n, t, 0)),
        scratch_shapes=[
            pltpu.VMEM((2, halo_rows, w2p_pad, cin_p), jnp.bfloat16),
            pltpu.SemaphoreType.DMA((2,)),
        ],
    )

    out = pl.pallas_call(
        kernel,
        out_shape=jax.ShapeDtypeStruct((N, H * W, cout_p), jnp.bfloat16),
        grid_spec=grid_spec,
        compiler_params=pltpu.CompilerParams(
            dimension_semantics=("parallel", "arbitrary"),
            vmem_limit_bytes=vmem_limit_bytes),   # tune per target; None=default
    )(x_pad, w_stack, map_s, map_b, red_w, pool, red_s, red_b)

    out = out[:, :, :Cout].reshape(N, H, W, Cout)
    if nchw_output:
        out = jnp.transpose(out, (0, 3, 1, 2))     # back to NCHW for the test
    return out


# --------------------------- parameter init ---------------------------------
def _bn_params(key, c):
    k1, k2, k3, k4 = jax.random.split(key, 4)
    gamma = 1.0 + 0.1 * jax.random.normal(k1, (c,), jnp.float32)
    beta = 0.1 * jax.random.normal(k2, (c,), jnp.float32)
    mean = 0.1 * jax.random.normal(k3, (c,), jnp.float32)
    var = jax.random.uniform(k4, (c,), jnp.float32, minval=0.5, maxval=1.5)
    return gamma, beta, mean, var


def init_params(key, cin, hid, cout):
    ks = jax.random.split(key, 10)
    w = lambda k, shape: 0.1 * jax.random.normal(k, shape, jnp.float32)
    return {
        'map0_w': w(ks[0], (hid, cin, 1, 1)),
        'map1_w': w(ks[1], (hid, cin, 3, 3)),
        'map2_w': w(ks[2], (hid, cin, 3, 3)),
        'map3_w': w(ks[3], (hid, cin, 3, 3)),
        'map_bn': _bn_params(ks[4], 4 * hid),
        'gp_w': w(ks[5], (hid, cin, 1, 1)),
        'gp_bn': _bn_params(ks[6], hid),
        'red_w': w(ks[7], (cout, 4 * hid, 1, 1)),
        'pool_red_w': w(ks[8], (cout, hid, 1, 1)),
        'red_bn': _bn_params(ks[9], cout),
    }


# ------------------------- pure-JAX reference --------------------------------
def aspp_reference(x, params, dilation_rates=(12, 24, 36)):
    def conv(inp, w, d=1, pad=0):
        return lax.conv_general_dilated(
            inp, w, window_strides=(1, 1), padding=[(pad, pad), (pad, pad)],
            rhs_dilation=(d, d), dimension_numbers=('NCHW', 'OIHW', 'NCHW'),
            precision=HIGH)

    def bn(inp, gamma, beta, mean, var):
        s = gamma / jnp.sqrt(var + BN_EPS)
        return inp * s[None, :, None, None] + (beta - mean * s)[None, :, None, None]

    outs = [conv(x, params['map0_w']),
            conv(x, params['map1_w'], dilation_rates[0], dilation_rates[0]),
            conv(x, params['map2_w'], dilation_rates[1], dilation_rates[1]),
            conv(x, params['map3_w'], dilation_rates[2], dilation_rates[2])]
    out = jnp.concatenate(outs, axis=1)
    out = _leaky(bn(out, *params['map_bn']))
    out = conv(out, params['red_w'])

    pool = jnp.mean(x, axis=(2, 3), keepdims=True)
    pool = conv(pool, params['gp_w'])
    pool = _leaky(bn(pool, *params['gp_bn']))
    pool = conv(pool, params['pool_red_w'])

    out = out + pool                           # == pool.repeat(1, 1, H, W)
    out = _leaky(bn(out, *params['red_bn']))
    return out


if __name__ == "__main__":
    key = jax.random.PRNGKey(0)
    k_x, k_p = jax.random.split(key)
    N, Cin, H, W = 2, 4, 16, 16
    Hid, Cout = 8, 8

    x = jax.random.normal(k_x, (N, Cin, H, W), jnp.float32)
    params = init_params(k_p, Cin, Hid, Cout)

    # tile_h=8 -> 2 spatial tiles per image: exercises both the halo priming
    # and the cross-step double-buffered prefetch path.
    y = jax.block_until_ready(aspp_pallas(x, params, tile_h=8))
    y_ref = jax.block_until_ready(aspp_reference(x, params))

    assert y.shape == (N, Cout, H, W), y.shape
    y32 = y.astype(jnp.float32)
    # bf16 MXU inputs + bf16 output (f32 accumulation / BN math) -> looser
    # tolerance than the pure-f32 reference.
    max_err = float(jnp.max(jnp.abs(y32 - y_ref)))
    assert jnp.allclose(y32, y_ref, rtol=5e-2, atol=5e-2), max_err
    print("KERNEL_OK")
</pallas_src>

<mosaic_0001>
module attributes {stable_mosaic.version = 11 : i64} {
  func.func @kernel(%arg0: i32, %arg1: i32, %arg2: memref<2x88x96x128xbf16, #tpu.memory_space<any>>, %arg3: memref<3584x128xbf16, #tpu.memory_space<vmem>>, %arg4: memref<4x1x128xf32, #tpu.memory_space<vmem>>, %arg5: memref<4x1x128xf32, #tpu.memory_space<vmem>>, %arg6: memref<4x128x128xbf16, #tpu.memory_space<vmem>>, %arg7: memref<1x1x128xf32, #tpu.memory_space<vmem>>, %arg8: memref<1x128xf32, #tpu.memory_space<vmem>>, %arg9: memref<1x128xf32, #tpu.memory_space<vmem>>, %arg10: memref<1x128x128xbf16, #tpu.memory_space<vmem>>, %arg11: memref<2x80x96x128xbf16, #tpu.memory_space<vmem>>, %arg12: memref<2x!tpu.dma_semaphore, #tpu.memory_space<semaphore_mem>>) attributes {dimension_semantics = [#tpu.dimension_semantics<parallel>, #tpu.dimension_semantics<arbitrary>], iteration_bounds = array<i64: 2, 2>, scalar_prefetch = 0 : i64, scratch_operands = 2 : i64, tpu.core_type = #tpu.core_type<tc>, window_params = [{}, {pipeline_mode = #tpu.pipeline_mode<synchronous>, transform_indices = @transform_1, window_bounds = array<i64: 3584, 128>}, {pipeline_mode = #tpu.pipeline_mode<synchronous>, transform_indices = @transform_2, window_bounds = array<i64: 4, 1, 128>}, {pipeline_mode = #tpu.pipeline_mode<synchronous>, transform_indices = @transform_3, window_bounds = array<i64: 4, 1, 128>}, {pipeline_mode = #tpu.pipeline_mode<synchronous>, transform_indices = @transform_4, window_bounds = array<i64: 4, 128, 128>}, {transform_indices = @transform_5, window_bounds = array<i64: 1, 1, 128>}, {pipeline_mode = #tpu.pipeline_mode<synchronous>, transform_indices = @transform_6, window_bounds = array<i64: 1, 128>}, {pipeline_mode = #tpu.pipeline_mode<synchronous>, transform_indices = @transform_7, window_bounds = array<i64: 1, 128>}, {transform_indices = @transform_8, window_bounds = array<i64: 1, 128, 128>}]} {
    %c2_i32 = arith.constant 2 : i32
    %c0_i32 = arith.constant 0 : i32
    %0 = arith.cmpi eq, %c2_i32, %c0_i32 : i32
    %c1_i32 = arith.constant 1 : i32
    %1 = arith.select %0, %c1_i32, %c2_i32 : i32
    %2 = arith.remsi %arg1, %1 : i32
    %c0_i32_0 = arith.constant 0 : i32
    %3 = arith.cmpi ne, %2, %c0_i32_0 : i32
    %c0_i32_1 = arith.constant 0 : i32
    %4 = arith.cmpi slt, %2, %c0_i32_1 : i32
    %c0_i32_2 = arith.constant 0 : i32
    %5 = arith.cmpi slt, %1, %c0_i32_2 : i32
    %6 = arith.xori %4, %5 : i1
    %7 = arith.andi %6, %3 : i1
    %8 = arith.addi %2, %1 : i32
    %9 = arith.select %7, %8, %2 : i32
    %c0_i32_3 = arith.constant 0 : i32
    %10 = arith.cmpi eq, %arg1, %c0_i32_3 : i32
    %11 = arith.extui %10 : i1 to i32
    %c0_i32_4 = arith.constant 0 : i32
    %12 = arith.cmpi ne, %11, %c0_i32_4 : i32
    scf.if %12 {
      %c0_i32_239 = arith.constant 0 : i32
      %238 = tpu.assume_multiple %c0_i32_239, 8 : i32
      %c0_i32_240 = arith.constant 0 : i32
      %c0_i32_241 = arith.constant 0 : i32
      %c0_i32_242 = arith.constant 0 : i32
      %c0_i32_243 = arith.constant 0 : i32
      %239 = tpu.memref_slice %arg2[%arg0, %238, %c0_i32_242, %c0_i32_243] : memref<2x88x96x128xbf16, #tpu.memory_space<any>> -> memref<1x80x96x128xbf16, #tpu.memory_space<any>>
      %240 = tpu.memref_squeeze %239 : memref<1x80x96x128xbf16, #tpu.memory_space<any>> -> memref<80x96x128xbf16, #tpu.memory_space<any>>
      %c0_i32_244 = arith.constant 0 : i32
      %c0_i32_245 = arith.constant 0 : i32
      %c0_i32_246 = arith.constant 0 : i32
      %241 = tpu.memref_slice %arg11[%c0_i32_240, %c0_i32_244, %c0_i32_245, %c0_i32_246] : memref<2x80x96x128xbf16, #tpu.memory_space<vmem>> -> memref<1x80x96x128xbf16, #tpu.memory_space<vmem>>
      %242 = tpu.memref_squeeze %241 : memref<1x80x96x128xbf16, #tpu.memory_space<vmem>> -> memref<80x96x128xbf16, #tpu.memory_space<vmem>>
      %243 = tpu.memref_slice %arg12[%c0_i32_241] : memref<2x!tpu.dma_semaphore, #tpu.memory_space<semaphore_mem>> -> memref<1x!tpu.dma_semaphore, #tpu.memory_space<semaphore_mem>>
      %244 = tpu.memref_squeeze %243 : memref<1x!tpu.dma_semaphore, #tpu.memory_space<semaphore_mem>> -> memref<!tpu.dma_semaphore, #tpu.memory_space<semaphore_mem>>
      tpu.enqueue_dma source(%240 : memref<80x96x128xbf16, #tpu.memory_space<any>>) target(%242 : memref<80x96x128xbf16, #tpu.memory_space<vmem>>) target_semaphore(%244 : memref<!tpu.dma_semaphore, #tpu.memory_space<semaphore_mem>>)
    } else {
    }
    %c8_i32 = arith.constant 8 : i32
    %13 = arith.muli %arg1, %c8_i32 : i32
    %14 = tpu.assume_multiple %13, 8 : i32
    %c0_i32_5 = arith.constant 0 : i32
    %c0_i32_6 = arith.constant 0 : i32
    %15 = tpu.memref_slice %arg2[%arg0, %14, %c0_i32_5, %c0_i32_6] : memref<2x88x96x128xbf16, #tpu.memory_space<any>> -> memref<1x80x96x128xbf16, #tpu.memory_space<any>>
    %16 = tpu.memref_squeeze %15 : memref<1x80x96x128xbf16, #tpu.memory_space<any>> -> memref<80x96x128xbf16, #tpu.memory_space<any>>
    %c0_i32_7 = arith.constant 0 : i32
    %c0_i32_8 = arith.constant 0 : i32
    %c0_i32_9 = arith.constant 0 : i32
    %17 = tpu.memref_slice %arg11[%9, %c0_i32_7, %c0_i32_8, %c0_i32_9] : memref<2x80x96x128xbf16, #tpu.memory_space<vmem>> -> memref<1x80x96x128xbf16, #tpu.memory_space<vmem>>
    %18 = tpu.memref_squeeze %17 : memref<1x80x96x128xbf16, #tpu.memory_space<vmem>> -> memref<80x96x128xbf16, #tpu.memory_space<vmem>>
    %19 = tpu.memref_slice %arg12[%9] : memref<2x!tpu.dma_semaphore, #tpu.memory_space<semaphore_mem>> -> memref<1x!tpu.dma_semaphore, #tpu.memory_space<semaphore_mem>>
    %20 = tpu.memref_squeeze %19 : memref<1x!tpu.dma_semaphore, #tpu.memory_space<semaphore_mem>> -> memref<!tpu.dma_semaphore, #tpu.memory_space<semaphore_mem>>
    tpu.wait_dma2 semaphore(%20 : memref<!tpu.dma_semaphore, #tpu.memory_space<semaphore_mem>>) src(%16 : memref<80x96x128xbf16, #tpu.memory_space<any>>) dst(%18 : memref<80x96x128xbf16, #tpu.memory_space<vmem>>)
    %c1_i32_10 = arith.constant 1 : i32
    %21 = arith.addi %arg1, %c1_i32_10 : i32
    %c2_i32_11 = arith.constant 2 : i32
    %22 = arith.cmpi slt, %21, %c2_i32_11 : i32
    %23 = arith.extui %22 : i1 to i32
    %c0_i32_12 = arith.constant 0 : i32
    %24 = arith.cmpi ne, %23, %c0_i32_12 : i32
    scf.if %24 {
      %c1_i32_239 = arith.constant 1 : i32
      %238 = arith.addi %arg1, %c1_i32_239 : i32
      %c1_i32_240 = arith.constant 1 : i32
      %239 = arith.subi %c1_i32_240, %9 : i32
      %c8_i32_241 = arith.constant 8 : i32
      %240 = arith.muli %238, %c8_i32_241 : i32
      %241 = tpu.assume_multiple %240, 8 : i32
      %c0_i32_242 = arith.constant 0 : i32
      %c0_i32_243 = arith.constant 0 : i32
      %242 = tpu.memref_slice %arg2[%arg0, %241, %c0_i32_242, %c0_i32_243] : memref<2x88x96x128xbf16, #tpu.memory_space<any>> -> memref<1x80x96x128xbf16, #tpu.memory_space<any>>
      %243 = tpu.memref_squeeze %242 : memref<1x80x96x128xbf16, #tpu.memory_space<any>> -> memref<80x96x128xbf16, #tpu.memory_space<any>>
      %c0_i32_244 = arith.constant 0 : i32
      %c0_i32_245 = arith.constant 0 : i32
      %c0_i32_246 = arith.constant 0 : i32
      %244 = tpu.memref_slice %arg11[%239, %c0_i32_244, %c0_i32_245, %c0_i32_246] : memref<2x80x96x128xbf16, #tpu.memory_space<vmem>> -> memref<1x80x96x128xbf16, #tpu.memory_space<vmem>>
      %245 = tpu.memref_squeeze %244 : memref<1x80x96x128xbf16, #tpu.memory_space<vmem>> -> memref<80x96x128xbf16, #tpu.memory_space<vmem>>
      %246 = tpu.memref_slice %arg12[%239] : memref<2x!tpu.dma_semaphore, #tpu.memory_space<semaphore_mem>> -> memref<1x!tpu.dma_semaphore, #tpu.memory_space<semaphore_mem>>
      %247 = tpu.memref_squeeze %246 : memref<1x!tpu.dma_semaphore, #tpu.memory_space<semaphore_mem>> -> memref<!tpu.dma_semaphore, #tpu.memory_space<semaphore_mem>>
      tpu.enqueue_dma source(%243 : memref<80x96x128xbf16, #tpu.memory_space<any>>) target(%245 : memref<80x96x128xbf16, #tpu.memory_space<vmem>>) target_semaphore(%247 : memref<!tpu.dma_semaphore, #tpu.memory_space<semaphore_mem>>)
    } else {
    }
    %c0_i32_13 = arith.constant 0 : i32
    %c0_i32_14 = arith.constant 0 : i32
    %c0_i32_15 = arith.constant 0 : i32
    %25 = tpu.memref_slice %arg11[%9, %c0_i32_13, %c0_i32_14, %c0_i32_15] : memref<2x80x96x128xbf16, #tpu.memory_space<vmem>> -> memref<1x80x96x128xbf16, #tpu.memory_space<vmem>>
    %26 = tpu.memref_squeeze %25 : memref<1x80x96x128xbf16, #tpu.memory_space<vmem>> -> memref<80x96x128xbf16, #tpu.memory_space<vmem>>
    %c36 = arith.constant 36 : index
    %c36_16 = arith.constant 36 : index
    %c0 = arith.constant 0 : index
    %27 = vector.load %26[%c36, %c36_16, %c0] : memref<80x96x128xbf16, #tpu.memory_space<vmem>>, vector<8x16x128xbf16>
    %28 = vector.shape_cast %27 : vector<8x16x128xbf16> to vector<128x128xbf16>
    %c0_17 = arith.constant 0 : index
    %c0_18 = arith.constant 0 : index
    %29 = vector.load %arg3[%c0_17, %c0_18] : memref<3584x128xbf16, #tpu.memory_space<vmem>>, vector<128x128xbf16>
    %cst = arith.constant dense<0.000000e+00> : vector<128x128xf32>
    %30 = tpu.matmul %28, %29, %cst {dimension_numbers = #tpu.dot_dimension_numbers<[1], [0], [0], [1], [0, 0, 1, 1], [], []>} : vector<128x128xbf16>, vector<128x128xbf16>, vector<128x128xf32> -> vector<128x128xf32>
    %c0_19 = arith.constant 0 : index
    %c0_20 = arith.constant 0 : index
    %c0_21 = arith.constant 0 : index
    %31 = vector.load %arg4[%c0_19, %c0_20, %c0_21] : memref<4x1x128xf32, #tpu.memory_space<vmem>>, vector<1x1x128xf32>
    %32 = vector.shape_cast %31 : vector<1x1x128xf32> to vector<1x128xf32>
    %33 = vector.broadcast %32 : vector<1x128xf32> to vector<128x128xf32>
    %34 = arith.mulf %30, %33 : vector<128x128xf32>
    %c0_22 = arith.constant 0 : index
    %c0_23 = arith.constant 0 : index
    %c0_24 = arith.constant 0 : index
    %35 = vector.load %arg5[%c0_22, %c0_23, %c0_24] : memref<4x1x128xf32, #tpu.memory_space<vmem>>, vector<1x1x128xf32>
    %36 = vector.shape_cast %35 : vector<1x1x128xf32> to vector<1x128xf32>
    %37 = vector.broadcast %36 : vector<1x128xf32> to vector<128x128xf32>
    %38 = arith.addf %34, %37 : vector<128x128xf32>
    %cst_25 = arith.constant 0.000000e+00 : f32
    %39 = vector.broadcast %cst_25 : f32 to vector<128x128xf32>
    %40 = arith.cmpf oge, %38, %39 : vector<128x128xf32>
    %cst_26 = arith.constant 0.00999999977 : f32
    %41 = vector.broadcast %cst_26 : f32 to vector<128x128xf32>
    %42 = arith.mulf %41, %38 : vector<128x128xf32>
    %43 = arith.select %40, %38, %42 : vector<128x128xi1>, vector<128x128xf32>
    %44 = arith.truncf %43 : vector<128x128xf32> to vector<128x128xbf16>
    %c0_27 = arith.constant 0 : index
    %c0_28 = arith.constant 0 : index
    %c0_29 = arith.constant 0 : index
    %45 = vector.load %arg6[%c0_27, %c0_28, %c0_29] : memref<4x128x128xbf16, #tpu.memory_space<vmem>>, vector<1x128x128xbf16>
    %46 = vector.shape_cast %45 : vector<1x128x128xbf16> to vector<128x128xbf16>
    %cst_30 = arith.constant dense<0.000000e+00> : vector<128x128xf32>
    %47 = tpu.matmul %44, %46, %cst_30 {dimension_numbers = #tpu.dot_dimension_numbers<[1], [0], [0], [1], [0, 0, 1, 1], [], []>} : vector<128x128xbf16>, vector<128x128xbf16>, vector<128x128xf32> -> vector<128x128xf32>
    %c0_i32_31 = arith.constant 0 : i32
    %c0_i32_32 = arith.constant 0 : i32
    %c0_i32_33 = arith.constant 0 : i32
    %48 = tpu.memref_slice %arg11[%9, %c0_i32_31, %c0_i32_32, %c0_i32_33] : memref<2x80x96x128xbf16, #tpu.memory_space<vmem>> -> memref<1x80x96x128xbf16, #tpu.memory_space<vmem>>
    %49 = tpu.memref_squeeze %48 : memref<1x80x96x128xbf16, #tpu.memory_space<vmem>> -> memref<80x96x128xbf16, #tpu.memory_space<vmem>>
    %c24 = arith.constant 24 : index
    %c24_34 = arith.constant 24 : index
    %c0_35 = arith.constant 0 : index
    %50 = vector.load %49[%c24, %c24_34, %c0_35] : memref<80x96x128xbf16, #tpu.memory_space<vmem>>, vector<8x16x128xbf16>
    %51 = vector.shape_cast %50 : vector<8x16x128xbf16> to vector<128x128xbf16>
    %c0_i32_36 = arith.constant 0 : i32
    %c0_i32_37 = arith.constant 0 : i32
    %c0_i32_38 = arith.constant 0 : i32
    %52 = tpu.memref_slice %arg11[%9, %c0_i32_36, %c0_i32_37, %c0_i32_38] : memref<2x80x96x128xbf16, #tpu.memory_space<vmem>> -> memref<1x80x96x128xbf16, #tpu.memory_space<vmem>>
    %53 = tpu.memref_squeeze %52 : memref<1x80x96x128xbf16, #tpu.memory_space<vmem>> -> memref<80x96x128xbf16, #tpu.memory_space<vmem>>
    %c24_39 = arith.constant 24 : index
    %c36_40 = arith.constant 36 : index
    %c0_41 = arith.constant 0 : index
    %54 = vector.load %53[%c24_39, %c36_40, %c0_41] : memref<80x96x128xbf16, #tpu.memory_space<vmem>>, vector<8x16x128xbf16>
    %55 = vector.shape_cast %54 : vector<8x16x128xbf16> to vector<128x128xbf16>
    %c0_i32_42 = arith.constant 0 : i32
    %c0_i32_43 = arith.constant 0 : i32
    %c0_i32_44 = arith.constant 0 : i32
    %56 = tpu.memref_slice %arg11[%9, %c0_i32_42, %c0_i32_43, %c0_i32_44] : memref<2x80x96x128xbf16, #tpu.memory_space<vmem>> -> memref<1x80x96x128xbf16, #tpu.memory_space<vmem>>
    %57 = tpu.memref_squeeze %56 : memref<1x80x96x128xbf16, #tpu.memory_space<vmem>> -> memref<80x96x128xbf16, #tpu.memory_space<vmem>>
    %c24_45 = arith.constant 24 : index
    %c48 = arith.constant 48 : index
    %c0_46 = arith.constant 0 : index
    %58 = vector.load %57[%c24_45, %c48, %c0_46] : memref<80x96x128xbf16, #tpu.memory_space<vmem>>, vector<8x16x128xbf16>
    %59 = vector.shape_cast %58 : vector<8x16x128xbf16> to vector<128x128xbf16>
    %c0_i32_47 = arith.constant 0 : i32
    %c0_i32_48 = arith.constant 0 : i32
    %c0_i32_49 = arith.constant 0 : i32
    %60 = tpu.memref_slice %arg11[%9, %c0_i32_47, %c0_i32_48, %c0_i32_49] : memref<2x80x96x128xbf16, #tpu.memory_space<vmem>> -> memref<1x80x96x128xbf16, #tpu.memory_space<vmem>>
    %61 = tpu.memref_squeeze %60 : memref<1x80x96x128xbf16, #tpu.memory_space<vmem>> -> memref<80x96x128xbf16, #tpu.memory_space<vmem>>
    %c36_50 = arith.constant 36 : index
    %c24_51 = arith.constant 24 : index
    %c0_52 = arith.constant 0 : index
    %62 = vector.load %61[%c36_50, %c24_51, %c0_52] : memref<80x96x128xbf16, #tpu.memory_space<vmem>>, vector<8x16x128xbf16>
    %63 = vector.shape_cast %62 : vector<8x16x128xbf16> to vector<128x128xbf16>
    %c0_i32_53 = arith.constant 0 : i32
    %c0_i32_54 = arith.constant 0 : i32
    %c0_i32_55 = arith.constant 0 : i32
    %64 = tpu.memref_slice %arg11[%9, %c0_i32_53, %c0_i32_54, %c0_i32_55] : memref<2x80x96x128xbf16, #tpu.memory_space<vmem>> -> memref<1x80x96x128xbf16, #tpu.memory_space<vmem>>
    %65 = tpu.memref_squeeze %64 : memref<1x80x96x128xbf16, #tpu.memory_space<vmem>> -> memref<80x96x128xbf16, #tpu.memory_space<vmem>>
    %c36_56 = arith.constant 36 : index
    %c36_57 = arith.constant 36 : index
    %c0_58 = arith.constant 0 : index
    %66 = vector.load %65[%c36_56, %c36_57, %c0_58] : memref<80x96x128xbf16, #tpu.memory_space<vmem>>, vector<8x16x128xbf16>
    %67 = vector.shape_cast %66 : vector<8x16x128xbf16> to vector<128x128xbf16>
    %c0_i32_59 = arith.constant 0 : i32
    %c0_i32_60 = arith.constant 0 : i32
    %c0_i32_61 = arith.constant 0 : i32
    %68 = tpu.memref_slice %arg11[%9, %c0_i32_59, %c0_i32_60, %c0_i32_61] : memref<2x80x96x128xbf16, #tpu.memory_space<vmem>> -> memref<1x80x96x128xbf16, #tpu.memory_space<vmem>>
    %69 = tpu.memref_squeeze %68 : memref<1x80x96x128xbf16, #tpu.memory_space<vmem>> -> memref<80x96x128xbf16, #tpu.memory_space<vmem>>
    %c36_62 = arith.constant 36 : index
    %c48_63 = arith.constant 48 : index
    %c0_64 = arith.constant 0 : index
    %70 = vector.load %69[%c36_62, %c48_63, %c0_64] : memref<80x96x128xbf16, #tpu.memory_space<vmem>>, vector<8x16x128xbf16>
    %71 = vector.shape_cast %70 : vector<8x16x128xbf16> to vector<128x128xbf16>
    %c0_i32_65 = arith.constant 0 : i32
    %c0_i32_66 = arith.constant 0 : i32
    %c0_i32_67 = arith.constant 0 : i32
    %72 = tpu.memref_slice %arg11[%9, %c0_i32_65, %c0_i32_66, %c0_i32_67] : memref<2x80x96x128xbf16, #tpu.memory_space<vmem>> -> memref<1x80x96x128xbf16, #tpu.memory_space<vmem>>
    %73 = tpu.memref_squeeze %72 : memref<1x80x96x128xbf16, #tpu.memory_space<vmem>> -> memref<80x96x128xbf16, #tpu.memory_space<vmem>>
    %c48_68 = arith.constant 48 : index
    %c24_69 = arith.constant 24 : index
    %c0_70 = arith.constant 0 : index
    %74 = vector.load %73[%c48_68, %c24_69, %c0_70] : memref<80x96x128xbf16, #tpu.memory_space<vmem>>, vector<8x16x128xbf16>
    %75 = vector.shape_cast %74 : vector<8x16x128xbf16> to vector<128x128xbf16>
    %c0_i32_71 = arith.constant 0 : i32
    %c0_i32_72 = arith.constant 0 : i32
    %c0_i32_73 = arith.constant 0 : i32
    %76 = tpu.memref_slice %arg11[%9, %c0_i32_71, %c0_i32_72, %c0_i32_73] : memref<2x80x96x128xbf16, #tpu.memory_space<vmem>> -> memref<1x80x96x128xbf16, #tpu.memory_space<vmem>>
    %77 = tpu.memref_squeeze %76 : memref<1x80x96x128xbf16, #tpu.memory_space<vmem>> -> memref<80x96x128xbf16, #tpu.memory_space<vmem>>
    %c48_74 = arith.constant 48 : index
    %c36_75 = arith.constant 36 : index
    %c0_76 = arith.constant 0 : index
    %78 = vector.load %77[%c48_74, %c36_75, %c0_76] : memref<80x96x128xbf16, #tpu.memory_space<vmem>>, vector<8x16x128xbf16>
    %79 = vector.shape_cast %78 : vector<8x16x128xbf16> to vector<128x128xbf16>
    %c0_i32_77 = arith.constant 0 : i32
    %c0_i32_78 = arith.constant 0 : i32
    %c0_i32_79 = arith.constant 0 : i32
    %80 = tpu.memref_slice %arg11[%9, %c0_i32_77, %c0_i32_78, %c0_i32_79] : memref<2x80x96x128xbf16, #tpu.memory_space<vmem>> -> memref<1x80x96x128xbf16, #tpu.memory_space<vmem>>
    %81 = tpu.memref_squeeze %80 : memref<1x80x96x128xbf16, #tpu.memory_space<vmem>> -> memref<80x96x128xbf16, #tpu.memory_space<vmem>>
    %c48_80 = arith.constant 48 : index
    %c48_81 = arith.constant 48 : index
    %c0_82 = arith.constant 0 : index
    %82 = vector.load %81[%c48_80, %c48_81, %c0_82] : memref<80x96x128xbf16, #tpu.memory_space<vmem>>, vector<8x16x128xbf16>
    %83 = vector.shape_cast %82 : vector<8x16x128xbf16> to vector<128x128xbf16>
    %84 = tpu.concatenate %51, %55, %59, %63, %67, %71, %75, %79, %83 in 1 : vector<128x128xbf16>, vector<128x128xbf16>, vector<128x128xbf16>, vector<128x128xbf16>, vector<128x128xbf16>, vector<128x128xbf16>, vector<128x128xbf16>, vector<128x128xbf16>, vector<128x128xbf16> -> vector<128x1152xbf16>
    %c128 = arith.constant 128 : index
    %c0_83 = arith.constant 0 : index
    %85 = vector.load %arg3[%c128, %c0_83] : memref<3584x128xbf16, #tpu.memory_space<vmem>>, vector<1152x128xbf16>
    %cst_84 = arith.constant dense<0.000000e+00> : vector<128x128xf32>
    %86 = tpu.matmul %84, %85, %cst_84 {dimension_numbers = #tpu.dot_dimension_numbers<[1], [0], [0], [1], [0, 0, 1, 1], [], []>} : vector<128x1152xbf16>, vector<1152x128xbf16>, vector<128x128xf32> -> vector<128x128xf32>
    %c1 = arith.constant 1 : index
    %c0_85 = arith.constant 0 : index
    %c0_86 = arith.constant 0 : index
    %87 = vector.load %arg4[%c1, %c0_85, %c0_86] : memref<4x1x128xf32, #tpu.memory_space<vmem>>, vector<1x1x128xf32>
    %88 = vector.shape_cast %87 : vector<1x1x128xf32> to vector<1x128xf32>
    %89 = vector.broadcast %88 : vector<1x128xf32> to vector<128x128xf32>
    %90 = arith.mulf %86, %89 : vector<128x128xf32>
    %c1_87 = arith.constant 1 : index
    %c0_88 = arith.constant 0 : index
    %c0_89 = arith.constant 0 : index
    %91 = vector.load %arg5[%c1_87, %c0_88, %c0_89] : memref<4x1x128xf32, #tpu.memory_space<vmem>>, vector<1x1x128xf32>
    %92 = vector.shape_cast %91 : vector<1x1x128xf32> to vector<1x128xf32>
    %93 = vector.broadcast %92 : vector<1x128xf32> to vector<128x128xf32>
    %94 = arith.addf %90, %93 : vector<128x128xf32>
    %cst_90 = arith.constant 0.000000e+00 : f32
    %95 = vector.broadcast %cst_90 : f32 to vector<128x128xf32>
    %96 = arith.cmpf oge, %94, %95 : vector<128x128xf32>
    %cst_91 = arith.constant 0.00999999977 : f32
    %97 = vector.broadcast %cst_91 : f32 to vector<128x128xf32>
    %98 = arith.mulf %97, %94 : vector<128x128xf32>
    %99 = arith.select %96, %94, %98 : vector<128x128xi1>, vector<128x128xf32>
    %100 = arith.truncf %99 : vector<128x128xf32> to vector<128x128xbf16>
    %c1_92 = arith.constant 1 : index
    %c0_93 = arith.constant 0 : index
    %c0_94 = arith.constant 0 : index
    %101 = vector.load %arg6[%c1_92, %c0_93, %c0_94] : memref<4x128x128xbf16, #tpu.memory_space<vmem>>, vector<1x128x128xbf16>
    %102 = vector.shape_cast %101 : vector<1x128x128xbf16> to vector<128x128xbf16>
    %cst_95 = arith.constant dense<0.000000e+00> : vector<128x128xf32>
    %103 = tpu.matmul %100, %102, %cst_95 {dimension_numbers = #tpu.dot_dimension_numbers<[1], [0], [0], [1], [0, 0, 1, 1], [], []>} : vector<128x128xbf16>, vector<128x128xbf16>, vector<128x128xf32> -> vector<128x128xf32>
    %104 = arith.addf %47, %103 : vector<128x128xf32>
    %c0_i32_96 = arith.constant 0 : i32
    %c0_i32_97 = arith.constant 0 : i32
    %c0_i32_98 = arith.constant 0 : i32
    %105 = tpu.memref_slice %arg11[%9, %c0_i32_96, %c0_i32_97, %c0_i32_98] : memref<2x80x96x128xbf16, #tpu.memory_space<vmem>> -> memref<1x80x96x128xbf16, #tpu.memory_space<vmem>>
    %106 = tpu.memref_squeeze %105 : memref<1x80x96x128xbf16, #tpu.memory_space<vmem>> -> memref<80x96x128xbf16, #tpu.memory_space<vmem>>
    %c12 = arith.constant 12 : index
    %c12_99 = arith.constant 12 : index
    %c0_100 = arith.constant 0 : index
    %107 = vector.load %106[%c12, %c12_99, %c0_100] : memref<80x96x128xbf16, #tpu.memory_space<vmem>>, vector<8x16x128xbf16>
    %108 = vector.shape_cast %107 : vector<8x16x128xbf16> to vector<128x128xbf16>
    %c0_i32_101 = arith.constant 0 : i32
    %c0_i32_102 = arith.constant 0 : i32
    %c0_i32_103 = arith.constant 0 : i32
    %109 = tpu.memref_slice %arg11[%9, %c0_i32_101, %c0_i32_102, %c0_i32_103] : memref<2x80x96x128xbf16, #tpu.memory_space<vmem>> -> memref<1x80x96x128xbf16, #tpu.memory_space<vmem>>
    %110 = tpu.memref_squeeze %109 : memref<1x80x96x128xbf16, #tpu.memory_space<vmem>> -> memref<80x96x128xbf16, #tpu.memory_space<vmem>>
    %c12_104 = arith.constant 12 : index
    %c36_105 = arith.constant 36 : index
    %c0_106 = arith.constant 0 : index
    %111 = vector.load %110[%c12_104, %c36_105, %c0_106] : memref<80x96x128xbf16, #tpu.memory_space<vmem>>, vector<8x16x128xbf16>
    %112 = vector.shape_cast %111 : vector<8x16x128xbf16> to vector<128x128xbf16>
    %c0_i32_107 = arith.constant 0 : i32
    %c0_i32_108 = arith.constant 0 : i32
    %c0_i32_109 = arith.constant 0 : i32
    %113 = tpu.memref_slice %arg11[%9, %c0_i32_107, %c0_i32_108, %c0_i32_109] : memref<2x80x96x128xbf16, #tpu.memory_space<vmem>> -> memref<1x80x96x128xbf16, #tpu.memory_space<vmem>>
    %114 = tpu.memref_squeeze %113 : memref<1x80x96x128xbf16, #tpu.memory_space<vmem>> -> memref<80x96x128xbf16, #tpu.memory_space<vmem>>
    %c12_110 = arith.constant 12 : index
    %c60 = arith.constant 60 : index
    %c0_111 = arith.constant 0 : index
    %115 = vector.load %114[%c12_110, %c60, %c0_111] : memref<80x96x128xbf16, #tpu.memory_space<vmem>>, vector<8x16x128xbf16>
    %116 = vector.shape_cast %115 : vector<8x16x128xbf16> to vector<128x128xbf16>
    %c0_i32_112 = arith.constant 0 : i32
    %c0_i32_113 = arith.constant 0 : i32
    %c0_i32_114 = arith.constant 0 : i32
    %117 = tpu.memref_slice %arg11[%9, %c0_i32_112, %c0_i32_113, %c0_i32_114] : memref<2x80x96x128xbf16, #tpu.memory_space<vmem>> -> memref<1x80x96x128xbf16, #tpu.memory_space<vmem>>
    %118 = tpu.memref_squeeze %117 : memref<1x80x96x128xbf16, #tpu.memory_space<vmem>> -> memref<80x96x128xbf16, #tpu.memory_space<vmem>>
    %c36_115 = arith.constant 36 : index
    %c12_116 = arith.constant 12 : index
    %c0_117 = arith.constant 0 : index
    %119 = vector.load %118[%c36_115, %c12_116, %c0_117] : memref<80x96x128xbf16, #tpu.memory_space<vmem>>, vector<8x16x128xbf16>
    %120 = vector.shape_cast %119 : vector<8x16x128xbf16> to vector<128x128xbf16>
    %c0_i32_118 = arith.constant 0 : i32
    %c0_i32_119 = arith.constant 0 : i32
    %c0_i32_120 = arith.constant 0 : i32
    %121 = tpu.memref_slice %arg11[%9, %c0_i32_118, %c0_i32_119, %c0_i32_120] : memref<2x80x96x128xbf16, #tpu.memory_space<vmem>> -> memref<1x80x96x128xbf16, #tpu.memory_space<vmem>>
    %122 = tpu.memref_squeeze %121 : memref<1x80x96x128xbf16, #tpu.memory_space<vmem>> -> memref<80x96x128xbf16, #tpu.memory_space<vmem>>
    %c36_121 = arith.constant 36 : index
    %c36_122 = arith.constant 36 : index
    %c0_123 = arith.constant 0 : index
    %123 = vector.load %122[%c36_121, %c36_122, %c0_123] : memref<80x96x128xbf16, #tpu.memory_space<vmem>>, vector<8x16x128xbf16>
    %124 = vector.shape_cast %123 : vector<8x16x128xbf16> to vector<128x128xbf16>
    %c0_i32_124 = arith.constant 0 : i32
    %c0_i32_125 = arith.constant 0 : i32
    %c0_i32_126 = arith.constant 0 : i32
    %125 = tpu.memref_slice %arg11[%9, %c0_i32_124, %c0_i32_125, %c0_i32_126] : memref<2x80x96x128xbf16, #tpu.memory_space<vmem>> -> memref<1x80x96x128xbf16, #tpu.memory_space<vmem>>
    %126 = tpu.memref_squeeze %125 : memref<1x80x96x128xbf16, #tpu.memory_space<vmem>> -> memref<80x96x128xbf16, #tpu.memory_space<vmem>>
    %c36_127 = arith.constant 36 : index
    %c60_128 = arith.constant 60 : index
    %c0_129 = arith.constant 0 : index
    %127 = vector.load %126[%c36_127, %c60_128, %c0_129] : memref<80x96x128xbf16, #tpu.memory_space<vmem>>, vector<8x16x128xbf16>
    %128 = vector.shape_cast %127 : vector<8x16x128xbf16> to vector<128x128xbf16>
    %c0_i32_130 = arith.constant 0 : i32
    %c0_i32_131 = arith.constant 0 : i32
    %c0_i32_132 = arith.constant 0 : i32
    %129 = tpu.memref_slice %arg11[%9, %c0_i32_130, %c0_i32_131, %c0_i32_132] : memref<2x80x96x128xbf16, #tpu.memory_space<vmem>> -> memref<1x80x96x128xbf16, #tpu.memory_space<vmem>>
    %130 = tpu.memref_squeeze %129 : memref<1x80x96x128xbf16, #tpu.memory_space<vmem>> -> memref<80x96x128xbf16, #tpu.memory_space<vmem>>
    %c60_133 = arith.constant 60 : index
    %c12_134 = arith.constant 12 : index
    %c0_135 = arith.constant 0 : index
    %131 = vector.load %130[%c60_133, %c12_134, %c0_135] : memref<80x96x128xbf16, #tpu.memory_space<vmem>>, vector<8x16x128xbf16>
    %132 = vector.shape_cast %131 : vector<8x16x128xbf16> to vector<128x128xbf16>
    %c0_i32_136 = arith.constant 0 : i32
    %c0_i32_137 = arith.constant 0 : i32
    %c0_i32_138 = arith.constant 0 : i32
    %133 = tpu.memref_slice %arg11[%9, %c0_i32_136, %c0_i32_137, %c0_i32_138] : memref<2x80x96x128xbf16, #tpu.memory_space<vmem>> -> memref<1x80x96x128xbf16, #tpu.memory_space<vmem>>
    %134 = tpu.memref_squeeze %133 : memref<1x80x96x128xbf16, #tpu.memory_space<vmem>> -> memref<80x96x128xbf16, #tpu.memory_space<vmem>>
    %c60_139 = arith.constant 60 : index
    %c36_140 = arith.constant 36 : index
    %c0_141 = arith.constant 0 : index
    %135 = vector.load %134[%c60_139, %c36_140, %c0_141] : memref<80x96x128xbf16, #tpu.memory_space<vmem>>, vector<8x16x128xbf16>
    %136 = vector.shape_cast %135 : vector<8x16x128xbf16> to vector<128x128xbf16>
    %c0_i32_142 = arith.constant 0 : i32
    %c0_i32_143 = arith.constant 0 : i32
    %c0_i32_144 = arith.constant 0 : i32
    %137 = tpu.memref_slice %arg11[%9, %c0_i32_142, %c0_i32_143, %c0_i32_144] : memref<2x80x96x128xbf16, #tpu.memory_space<vmem>> -> memref<1x80x96x128xbf16, #tpu.memory_space<vmem>>
    %138 = tpu.memref_squeeze %137 : memref<1x80x96x128xbf16, #tpu.memory_space<vmem>> -> memref<80x96x128xbf16, #tpu.memory_space<vmem>>
    %c60_145 = arith.constant 60 : index
    %c60_146 = arith.constant 60 : index
    %c0_147 = arith.constant 0 : index
    %139 = vector.load %138[%c60_145, %c60_146, %c0_147] : memref<80x96x128xbf16, #tpu.memory_space<vmem>>, vector<8x16x128xbf16>
    %140 = vector.shape_cast %139 : vector<8x16x128xbf16> to vector<128x128xbf16>
    %141 = tpu.concatenate %108, %112, %116, %120, %124, %128, %132, %136, %140 in 1 : vector<128x128xbf16>, vector<128x128xbf16>, vector<128x128xbf16>, vector<128x128xbf16>, vector<128x128xbf16>, vector<128x128xbf16>, vector<128x128xbf16>, vector<128x128xbf16>, vector<128x128xbf16> -> vector<128x1152xbf16>
    %c1280 = arith.constant 1280 : index
    %c0_148 = arith.constant 0 : index
    %142 = vector.load %arg3[%c1280, %c0_148] : memref<3584x128xbf16, #tpu.memory_space<vmem>>, vector<1152x128xbf16>
    %cst_149 = arith.constant dense<0.000000e+00> : vector<128x128xf32>
    %143 = tpu.matmul %141, %142, %cst_149 {dimension_numbers = #tpu.dot_dimension_numbers<[1], [0], [0], [1], [0, 0, 1, 1], [], []>} : vector<128x1152xbf16>, vector<1152x128xbf16>, vector<128x128xf32> -> vector<128x128xf32>
    %c2 = arith.constant 2 : index
    %c0_150 = arith.constant 0 : index
    %c0_151 = arith.constant 0 : index
    %144 = vector.load %arg4[%c2, %c0_150, %c0_151] : memref<4x1x128xf32, #tpu.memory_space<vmem>>, vector<1x1x128xf32>
    %145 = vector.shape_cast %144 : vector<1x1x128xf32> to vector<1x128xf32>
    %146 = vector.broadcast %145 : vector<1x128xf32> to vector<128x128xf32>
    %147 = arith.mulf %143, %146 : vector<128x128xf32>
    %c2_152 = arith.constant 2 : index
    %c0_153 = arith.constant 0 : index
    %c0_154 = arith.constant 0 : index
    %148 = vector.load %arg5[%c2_152, %c0_153, %c0_154] : memref<4x1x128xf32, #tpu.memory_space<vmem>>, vector<1x1x128xf32>
    %149 = vector.shape_cast %148 : vector<1x1x128xf32> to vector<1x128xf32>
    %150 = vector.broadcast %149 : vector<1x128xf32> to vector<128x128xf32>
    %151 = arith.addf %147, %150 : vector<128x128xf32>
    %cst_155 = arith.constant 0.000000e+00 : f32
    %152 = vector.broadcast %cst_155 : f32 to vector<128x128xf32>
    %153 = arith.cmpf oge, %151, %152 : vector<128x128xf32>
    %cst_156 = arith.constant 0.00999999977 : f32
    %154 = vector.broadcast %cst_156 : f32 to vector<128x128xf32>
    %155 = arith.mulf %154, %151 : vector<128x128xf32>
    %156 = arith.select %153, %151, %155 : vector<128x128xi1>, vector<128x128xf32>
    %157 = arith.truncf %156 : vector<128x128xf32> to vector<128x128xbf16>
    %c2_157 = arith.constant 2 : index
    %c0_158 = arith.constant 0 : index
    %c0_159 = arith.constant 0 : index
    %158 = vector.load %arg6[%c2_157, %c0_158, %c0_159] : memref<4x128x128xbf16, #tpu.memory_space<vmem>>, vector<1x128x128xbf16>
    %159 = vector.shape_cast %158 : vector<1x128x128xbf16> to vector<128x128xbf16>
    %cst_160 = arith.constant dense<0.000000e+00> : vector<128x128xf32>
    %160 = tpu.matmul %157, %159, %cst_160 {dimension_numbers = #tpu.dot_dimension_numbers<[1], [0], [0], [1], [0, 0, 1, 1], [], []>} : vector<128x128xbf16>, vector<128x128xbf16>, vector<128x128xf32> -> vector<128x128xf32>
    %161 = arith.addf %104, %160 : vector<128x128xf32>
    %c0_i32_161 = arith.constant 0 : i32
    %c0_i32_162 = arith.constant 0 : i32
    %c0_i32_163 = arith.constant 0 : i32
    %162 = tpu.memref_slice %arg11[%9, %c0_i32_161, %c0_i32_162, %c0_i32_163] : memref<2x80x96x128xbf16, #tpu.memory_space<vmem>> -> memref<1x80x96x128xbf16, #tpu.memory_space<vmem>>
    %163 = tpu.memref_squeeze %162 : memref<1x80x96x128xbf16, #tpu.memory_space<vmem>> -> memref<80x96x128xbf16, #tpu.memory_space<vmem>>
    %c0_164 = arith.constant 0 : index
    %c0_165 = arith.constant 0 : index
    %c0_166 = arith.constant 0 : index
    %164 = vector.load %163[%c0_164, %c0_165, %c0_166] : memref<80x96x128xbf16, #tpu.memory_space<vmem>>, vector<8x16x128xbf16>
    %165 = vector.shape_cast %164 : vector<8x16x128xbf16> to vector<128x128xbf16>
    %c0_i32_167 = arith.constant 0 : i32
    %c0_i32_168 = arith.constant 0 : i32
    %c0_i32_169 = arith.constant 0 : i32
    %166 = tpu.memref_slice %arg11[%9, %c0_i32_167, %c0_i32_168, %c0_i32_169] : memref<2x80x96x128xbf16, #tpu.memory_space<vmem>> -> memref<1x80x96x128xbf16, #tpu.memory_space<vmem>>
    %167 = tpu.memref_squeeze %166 : memref<1x80x96x128xbf16, #tpu.memory_space<vmem>> -> memref<80x96x128xbf16, #tpu.memory_space<vmem>>
    %c0_170 = arith.constant 0 : index
    %c36_171 = arith.constant 36 : index
    %c0_172 = arith.constant 0 : index
    %168 = vector.load %167[%c0_170, %c36_171, %c0_172] : memref<80x96x128xbf16, #tpu.memory_space<vmem>>, vector<8x16x128xbf16>
    %169 = vector.shape_cast %168 : vector<8x16x128xbf16> to vector<128x128xbf16>
    %c0_i32_173 = arith.constant 0 : i32
    %c0_i32_174 = arith.constant 0 : i32
    %c0_i32_175 = arith.constant 0 : i32
    %170 = tpu.memref_slice %arg11[%9, %c0_i32_173, %c0_i32_174, %c0_i32_175] : memref<2x80x96x128xbf16, #tpu.memory_space<vmem>> -> memref<1x80x96x128xbf16, #tpu.memory_space<vmem>>
    %171 = tpu.memref_squeeze %170 : memref<1x80x96x128xbf16, #tpu.memory_space<vmem>> -> memref<80x96x128xbf16, #tpu.memory_space<vmem>>
    %c0_176 = arith.constant 0 : index
    %c72 = arith.constant 72 : index
    %c0_177 = arith.constant 0 : index
    %172 = vector.load %171[%c0_176, %c72, %c0_177] : memref<80x96x128xbf16, #tpu.memory_space<vmem>>, vector<8x16x128xbf16>
    %173 = vector.shape_cast %172 : vector<8x16x128xbf16> to vector<128x128xbf16>
    %c0_i32_178 = arith.constant 0 : i32
    %c0_i32_179 = arith.constant 0 : i32
    %c0_i32_180 = arith.constant 0 : i32
    %174 = tpu.memref_slice %arg11[%9, %c0_i32_178, %c0_i32_179, %c0_i32_180] : memref<2x80x96x128xbf16, #tpu.memory_space<vmem>> -> memref<1x80x96x128xbf16, #tpu.memory_space<vmem>>
    %175 = tpu.memref_squeeze %174 : memref<1x80x96x128xbf16, #tpu.memory_space<vmem>> -> memref<80x96x128xbf16, #tpu.memory_space<vmem>>
    %c36_181 = arith.constant 36 : index
    %c0_182 = arith.constant 0 : index
    %c0_183 = arith.constant 0 : index
    %176 = vector.load %175[%c36_181, %c0_182, %c0_183] : memref<80x96x128xbf16, #tpu.memory_space<vmem>>, vector<8x16x128xbf16>
    %177 = vector.shape_cast %176 : vector<8x16x128xbf16> to vector<128x128xbf16>
    %c0_i32_184 = arith.constant 0 : i32
    %c0_i32_185 = arith.constant 0 : i32
    %c0_i32_186 = arith.constant 0 : i32
    %178 = tpu.memref_slice %arg11[%9, %c0_i32_184, %c0_i32_185, %c0_i32_186] : memref<2x80x96x128xbf16, #tpu.memory_space<vmem>> -> memref<1x80x96x128xbf16, #tpu.memory_space<vmem>>
    %179 = tpu.memref_squeeze %178 : memref<1x80x96x128xbf16, #tpu.memory_space<vmem>> -> memref<80x96x128xbf16, #tpu.memory_space<vmem>>
    %c36_187 = arith.constant 36 : index
    %c36_188 = arith.constant 36 : index
    %c0_189 = arith.constant 0 : index
    %180 = vector.load %179[%c36_187, %c36_188, %c0_189] : memref<80x96x128xbf16, #tpu.memory_space<vmem>>, vector<8x16x128xbf16>
    %181 = vector.shape_cast %180 : vector<8x16x128xbf16> to vector<128x128xbf16>
    %c0_i32_190 = arith.constant 0 : i32
    %c0_i32_191 = arith.constant 0 : i32
    %c0_i32_192 = arith.constant 0 : i32
    %182 = tpu.memref_slice %arg11[%9, %c0_i32_190, %c0_i32_191, %c0_i32_192] : memref<2x80x96x128xbf16, #tpu.memory_space<vmem>> -> memref<1x80x96x128xbf16, #tpu.memory_space<vmem>>
    %183 = tpu.memref_squeeze %182 : memref<1x80x96x128xbf16, #tpu.memory_space<vmem>> -> memref<80x96x128xbf16, #tpu.memory_space<vmem>>
    %c36_193 = arith.constant 36 : index
    %c72_194 = arith.constant 72 : index
    %c0_195 = arith.constant 0 : index
    %184 = vector.load %183[%c36_193, %c72_194, %c0_195] : memref<80x96x128xbf16, #tpu.memory_space<vmem>>, vector<8x16x128xbf16>
    %185 = vector.shape_cast %184 : vector<8x16x128xbf16> to vector<128x128xbf16>
    %c0_i32_196 = arith.constant 0 : i32
    %c0_i32_197 = arith.constant 0 : i32
    %c0_i32_198 = arith.constant 0 : i32
    %186 = tpu.memref_slice %arg11[%9, %c0_i32_196, %c0_i32_197, %c0_i32_198] : memref<2x80x96x128xbf16, #tpu.memory_space<vmem>> -> memref<1x80x96x128xbf16, #tpu.memory_space<vmem>>
    %187 = tpu.memref_squeeze %186 : memref<1x80x96x128xbf16, #tpu.memory_space<vmem>> -> memref<80x96x128xbf16, #tpu.memory_space<vmem>>
    %c72_199 = arith.constant 72 : index
    %c0_200 = arith.constant 0 : index
    %c0_201 = arith.constant 0 : index
    %188 = vector.load %187[%c72_199, %c0_200, %c0_201] : memref<80x96x128xbf16, #tpu.memory_space<vmem>>, vector<8x16x128xbf16>
    %189 = vector.shape_cast %188 : vector<8x16x128xbf16> to vector<128x128xbf16>
    %c0_i32_202 = arith.constant 0 : i32
    %c0_i32_203 = arith.constant 0 : i32
    %c0_i32_204 = arith.constant 0 : i32
    %190 = tpu.memref_slice %arg11[%9, %c0_i32_202, %c0_i32_203, %c0_i32_204] : memref<2x80x96x128xbf16, #tpu.memory_space<vmem>> -> memref<1x80x96x128xbf16, #tpu.memory_space<vmem>>
    %191 = tpu.memref_squeeze %190 : memref<1x80x96x128xbf16, #tpu.memory_space<vmem>> -> memref<80x96x128xbf16, #tpu.memory_space<vmem>>
    %c72_205 = arith.constant 72 : index
    %c36_206 = arith.constant 36 : index
    %c0_207 = arith.constant 0 : index
    %192 = vector.load %191[%c72_205, %c36_206, %c0_207] : memref<80x96x128xbf16, #tpu.memory_space<vmem>>, vector<8x16x128xbf16>
    %193 = vector.shape_cast %192 : vector<8x16x128xbf16> to vector<128x128xbf16>
    %c0_i32_208 = arith.constant 0 : i32
    %c0_i32_209 = arith.constant 0 : i32
    %c0_i32_210 = arith.constant 0 : i32
    %194 = tpu.memref_slice %arg11[%9, %c0_i32_208, %c0_i32_209, %c0_i32_210] : memref<2x80x96x128xbf16, #tpu.memory_space<vmem>> -> memref<1x80x96x128xbf16, #tpu.memory_space<vmem>>
    %195 = tpu.memref_squeeze %194 : memref<1x80x96x128xbf16, #tpu.memory_space<vmem>> -> memref<80x96x128xbf16, #tpu.memory_space<vmem>>
    %c72_211 = arith.constant 72 : index
    %c72_212 = arith.constant 72 : index
    %c0_213 = arith.constant 0 : index
    %196 = vector.load %195[%c72_211, %c72_212, %c0_213] : memref<80x96x128xbf16, #tpu.memory_space<vmem>>, vector<8x16x128xbf16>
    %197 = vector.shape_cast %196 : vector<8x16x128xbf16> to vector<128x128xbf16>
    %198 = tpu.concatenate %165, %169, %173, %177, %181, %185, %189, %193, %197 in 1 : vector<128x128xbf16>, vector<128x128xbf16>, vector<128x128xbf16>, vector<128x128xbf16>, vector<128x128xbf16>, vector<128x128xbf16>, vector<128x128xbf16>, vector<128x128xbf16>, vector<128x128xbf16> -> vector<128x1152xbf16>
    %c2432 = arith.constant 2432 : index
    %c0_214 = arith.constant 0 : index
    %199 = vector.load %arg3[%c2432, %c0_214] : memref<3584x128xbf16, #tpu.memory_space<vmem>>, vector<1152x128xbf16>
    %cst_215 = arith.constant dense<0.000000e+00> : vector<128x128xf32>
    %200 = tpu.matmul %198, %199, %cst_215 {dimension_numbers = #tpu.dot_dimension_numbers<[1], [0], [0], [1], [0, 0, 1, 1], [], []>} : vector<128x1152xbf16>, vector<1152x128xbf16>, vector<128x128xf32> -> vector<128x128xf32>
    %c3 = arith.constant 3 : index
    %c0_216 = arith.constant 0 : index
    %c0_217 = arith.constant 0 : index
    %201 = vector.load %arg4[%c3, %c0_216, %c0_217] : memref<4x1x128xf32, #tpu.memory_space<vmem>>, vector<1x1x128xf32>
    %202 = vector.shape_cast %201 : vector<1x1x128xf32> to vector<1x128xf32>
    %203 = vector.broadcast %202 : vector<1x128xf32> to vector<128x128xf32>
    %204 = arith.mulf %200, %203 : vector<128x128xf32>
    %c3_218 = arith.constant 3 : index
    %c0_219 = arith.constant 0 : index
    %c0_220 = arith.constant 0 : index
    %205 = vector.load %arg5[%c3_218, %c0_219, %c0_220] : memref<4x1x128xf32, #tpu.memory_space<vmem>>, vector<1x1x128xf32>
    %206 = vector.shape_cast %205 : vector<1x1x128xf32> to vector<1x128xf32>
    %207 = vector.broadcast %206 : vector<1x128xf32> to vector<128x128xf32>
    %208 = arith.addf %204, %207 : vector<128x128xf32>
    %cst_221 = arith.constant 0.000000e+00 : f32
    %209 = vector.broadcast %cst_221 : f32 to vector<128x128xf32>
    %210 = arith.cmpf oge, %208, %209 : vector<128x128xf32>
    %cst_222 = arith.constant 0.00999999977 : f32
    %211 = vector.broadcast %cst_222 : f32 to vector<128x128xf32>
    %212 = arith.mulf %211, %208 : vector<128x128xf32>
    %213 = arith.select %210, %208, %212 : vector<128x128xi1>, vector<128x128xf32>
    %214 = arith.truncf %213 : vector<128x128xf32> to vector<128x128xbf16>
    %c3_223 = arith.constant 3 : index
    %c0_224 = arith.constant 0 : index
    %c0_225 = arith.constant 0 : index
    %215 = vector.load %arg6[%c3_223, %c0_224, %c0_225] : memref<4x128x128xbf16, #tpu.memory_space<vmem>>, vector<1x128x128xbf16>
    %216 = vector.shape_cast %215 : vector<1x128x128xbf16> to vector<128x128xbf16>
    %cst_226 = arith.constant dense<0.000000e+00> : vector<128x128xf32>
    %217 = tpu.matmul %214, %216, %cst_226 {dimension_numbers = #tpu.dot_dimension_numbers<[1], [0], [0], [1], [0, 0, 1, 1], [], []>} : vector<128x128xbf16>, vector<128x128xbf16>, vector<128x128xf32> -> vector<128x128xf32>
    %218 = arith.addf %161, %217 : vector<128x128xf32>
    %c0_227 = arith.constant 0 : index
    %c0_228 = arith.constant 0 : index
    %c0_229 = arith.constant 0 : index
    %219 = vector.load %arg7[%c0_227, %c0_228, %c0_229] : memref<1x1x128xf32, #tpu.memory_space<vmem>>, vector<1x1x128xf32>
    %220 = vector.shape_cast %219 : vector<1x1x128xf32> to vector<1x128xf32>
    %221 = vector.broadcast %220 : vector<1x128xf32> to vector<128x128xf32>
    %222 = arith.addf %218, %221 : vector<128x128xf32>
    %c0_230 = arith.constant 0 : index
    %c0_231 = arith.constant 0 : index
    %223 = vector.load %arg8[%c0_230, %c0_231] : memref<1x128xf32, #tpu.memory_space<vmem>>, vector<1x128xf32>
    %224 = vector.broadcast %223 : vector<1x128xf32> to vector<128x128xf32>
    %225 = arith.mulf %222, %224 : vector<128x128xf32>
    %c0_232 = arith.constant 0 : index
    %c0_233 = arith.constant 0 : index
    %226 = vector.load %arg9[%c0_232, %c0_233] : memref<1x128xf32, #tpu.memory_space<vmem>>, vector<1x128xf32>
    %227 = vector.broadcast %226 : vector<1x128xf32> to vector<128x128xf32>
    %228 = arith.addf %225, %227 : vector<128x128xf32>
    %cst_234 = arith.constant 0.000000e+00 : f32
    %229 = vector.broadcast %cst_234 : f32 to vector<128x128xf32>
    %230 = arith.cmpf oge, %228, %229 : vector<128x128xf32>
    %cst_235 = arith.constant 0.00999999977 : f32
    %231 = vector.broadcast %cst_235 : f32 to vector<128x128xf32>
    %232 = arith.mulf %231, %228 : vector<128x128xf32>
    %233 = arith.select %230, %228, %232 : vector<128x128xi1>, vector<128x128xf32>
    %234 = arith.truncf %233 : vector<128x128xf32> to vector<128x128xbf16>
    %c0_236 = arith.constant 0 : index
    %c0_237 = arith.constant 0 : index
    %c0_238 = arith.constant 0 : index
    %235 = vector.load %arg10[%c0_236, %c0_237, %c0_238] : memref<1x128x128xbf16, #tpu.memory_space<vmem>>, vector<1x128x128xbf16>
    %236 = vector.shape_cast %235 : vector<1x128x128xbf16> to vector<128x128xbf16>
    %237 = vector.shape_cast %234 : vector<128x128xbf16> to vector<1x128x128xbf16>
    tpu.vector_store %arg10[%c0_236, %c0_237, %c0_238], %237 {strides = array<i32>} : memref<1x128x128xbf16, #tpu.memory_space<vmem>>, vector<1x128x128xbf16>,
    return
  }
  func.func @transform_1(%arg0: i32, %arg1: i32) -> (i32, i32) {
    %c0_i32 = arith.constant 0 : i32
    %c0_i32_0 = arith.constant 0 : i32
    %c0_i32_1 = arith.constant 0 : i32
    return %c0_i32, %c0_i32_0 : i32, i32
  }
  func.func @transform_2(%arg0: i32, %arg1: i32) -> (i32, i32, i32) {
    %c0_i32 = arith.constant 0 : i32
    %c0_i32_0 = arith.constant 0 : i32
    %c0_i32_1 = arith.constant 0 : i32
    %c0_i32_2 = arith.constant 0 : i32
    return %c0_i32, %c0_i32_0, %c0_i32_1 : i32, i32, i32
  }
  func.func @transform_3(%arg0: i32, %arg1: i32) -> (i32, i32, i32) {
    %c0_i32 = arith.constant 0 : i32
    %c0_i32_0 = arith.constant 0 : i32
    %c0_i32_1 = arith.constant 0 : i32
    %c0_i32_2 = arith.constant 0 : i32
    return %c0_i32, %c0_i32_0, %c0_i32_1 : i32, i32, i32
  }
  func.func @transform_4(%arg0: i32, %arg1: i32) -> (i32, i32, i32) {
    %c0_i32 = arith.constant 0 : i32
    %c0_i32_0 = arith.constant 0 : i32
    %c0_i32_1 = arith.constant 0 : i32
    %c0_i32_2 = arith.constant 0 : i32
    return %c0_i32, %c0_i32_0, %c0_i32_1 : i32, i32, i32
  }
  func.func @transform_5(%arg0: i32, %arg1: i32) -> (i32, i32, i32) {
    %c0_i32 = arith.constant 0 : i32
    %c0_i32_0 = arith.constant 0 : i32
    %c0_i32_1 = arith.constant 0 : i32
    return %arg0, %c0_i32, %c0_i32_0 : i32, i32, i32
  }
  func.func @transform_6(%arg0: i32, %arg1: i32) -> (i32, i32) {
    %c0_i32 = arith.constant 0 : i32
    %c0_i32_0 = arith.constant 0 : i32
    %c0_i32_1 = arith.constant 0 : i32
    return %c0_i32, %c0_i32_0 : i32, i32
  }
  func.func @transform_7(%arg0: i32, %arg1: i32) -> (i32, i32) {
    %c0_i32 = arith.constant 0 : i32
    %c0_i32_0 = arith.constant 0 : i32
    %c0_i32_1 = arith.constant 0 : i32
    return %c0_i32, %c0_i32_0 : i32, i32
  }
  func.func @transform_8(%arg0: i32, %arg1: i32) -> (i32, i32, i32) {
    %c0_i32 = arith.constant 0 : i32
    %c0_i32_0 = arith.constant 0 : i32
    return %arg0, %arg1, %c0_i32 : i32, i32, i32
  }
}

</mosaic_0001>

<bundles_post_ra>
// kernel: tpu_custom_call.1
= control target key start
LH: loop header
LB: loop body
LE: loop exit
PB: predicated region body
PF: predicated region fallthrough
CT: control target
= control target key end

     0   :  { %s13835_s0 = inlined_call_operand.hbm [shape: bf16[2,88,96,128], index: 0, kind: input, shape index: {}]   ;;  %s13836_s1 = inlined_call_operand.hbm [shape: bf16[3584,128], index: 1, kind: input, shape index: {}]   ;;  %s13837_s2 = inlined_call_operand.hbm [shape: f32[4,1,128], index: 2, kind: input, shape index: {}]   ;;  %s13838_s3 = inlined_call_operand.hbm [shape: f32[4,1,128], index: 3, kind: input, shape index: {}]   ;;  %s13839_s4 = inlined_call_operand.hbm [shape: bf16[4,128,128], index: 4, kind: input, shape index: {}]   ;;  %s13840_s5 = inlined_call_operand.hbm [shape: f32[2,1,128], index: 5, kind: input, shape index: {}]   ;;  %s13841_s6 = inlined_call_operand.hbm [shape: f32[1,128], index: 6, kind: input, shape index: {}]   ;;  %s13842_s7 = inlined_call_operand.hbm [shape: f32[1,128], index: 7, kind: input, shape index: {}]   ;;  %s13843_s8 = inlined_call_operand.hbm [shape: bf16[2,256,128], index: 8, kind: output, shape index: {}]  }
   0x1   :  { %13884 = sst [smem:[#allocation87_spill]] %s13835_s0 }
   0x2   :  { %13885 = sst [smem:[#allocation88_spill]] %s13836_s1 }
   0x3   :  { %13886 = sst [smem:[#allocation89_spill]] %s13837_s2 }
   0x4   :  { %13887 = sst [smem:[#allocation90_spill]] %s13838_s3 }
   0x5   :  { %13888 = sst [smem:[#allocation91_spill]] %s13839_s4 }
   0x6   :  { %13889 = sst [smem:[#allocation92_spill]] %s13840_s5 }
   0x7   :  { %13890 = sst [smem:[#allocation93_spill]] %s13841_s6 }
   0x8   :  { %13891 = sst [smem:[#allocation94_spill]] %s13842_s7 }
   0x9   :  { %13892 = sst [smem:[#allocation95_spill]] %s13843_s8 }
   0xa   :  { %13 = vsyncpa [#allocation5], 0 }
   0xb   :  { %14 = vsyncpa [#allocation8], 0 }
   0xc   :  { %15 = vsyncpa [#allocation11], 0 }
   0xd   :  { %16 = vsyncpa [#allocation6], 0 }
   0xe   :  { %18 = vsyncpa [#allocation6 + $0x1], 0  ;;  %s11078_s27 = smov 0   ;;  %s11080_s28 = smov 0  }
   0xf   :  { %s11082_s29 = smov 0   ;;  %s11084_s30 = smov 0  }
  0x10   :  { %s11086_s9 = smov 0   ;;  %s11088_s10 = smov 0  }
  0x11   :  { %s11090_s11 = smov 0   ;;  %s11092_s12 = smov 0  }
  0x12   :  { %s11094_s13 = smov 0   ;;  %s11096_s14 = smov 0  }
  0x13   :  { %s11098_s15 = smov 0  }
  0x14 LB: > { %13893 = sst [smem:[#allocation30_spill]] %s11008_s13  ;;  %s11018_s16 = smov [#allocation7]   ;;  %s11016_s15 = sphi %s11098_s15, %s24_s15   ;;  %s11012_s14 = sphi %s11096_s14, %s14149_s14   ;;  %s11008_s13 = sphi %s11094_s13, %s14148_s13   ;;  %s11004_s12 = sphi %s11092_s12, %s14147_s12   ;;  %s11000_s11 = sphi %s11090_s11, %s14146_s11   ;;  %s10996_s10 = sphi %s11088_s10, %s14155_s10   ;;  %s10992_s9 = sphi %s11086_s9, %s14154_s9   ;;  %s10988_s30 = sphi %s11084_s30, %s14153_s30   ;;  %s10984_s29 = sphi %s11082_s29, %s14152_s29   ;;  %s10980_s28 = sphi %s11080_s28, %s14151_s28   ;;  %s10976_s27 = sphi %s11078_s27, %s14150_s27  }
  0x15   : > { %13894 = sst [smem:[#allocation31_spill]] %s11012_s14  ;;  %s246_s17 = sshll.u32 %s11018_s16, 4  ;;  %s247_s17 = int_to_ptr.vmem [resolvable:$true] %s246_s17 }
  0x16   : > { %s11134_s18 = sadd.s32 4294967295, %s11016_s15   ;;  %p7822_p0 = scmp.ge.s32.totalorder %s11016_s15, 1 }
  0x17   : > { %p13848_p1 = scmp.eq.s32.totalorder %s11134_s18, 0  ;;  %p221_p2 = scmp.lt.s32.totalorder %s11016_s15, 5 }
  0x18   : > { %s11019_s21 = smov [#allocation4]   ;;  %s10648_s24 = scalar_lea.vmem %s247_s17, 64 }
  0x19   : > { %p11139_p3 = pnand %p7822_p0, %p221_p2  ;;  %s233_s22 = sshll.u32 %s11019_s21, 4  ;;  %s234_s22 = int_to_ptr.vmem [resolvable:$true] %s233_s22 }
  0x1a   : > { %p10649_p7 = scmp.ne.s32.totalorder %s247_s17, %s10648_s24  ;;  %p10656_p10 = scmp.lt.s32.totalorder %s247_s17, %s247_s17 }
  0x1b   : > { %s13895_s19 = scalar_select %p11139_p3, 1, 0 }
  0x1c   : > { %p10141_p4 = pneg %p11139_p3  ;;  %p10657_p11 = scmp.lt.s32.totalorder %s10648_s24, %s10648_s24 }
  0x1e   : > { %p11147_p5 = pnand %p10141_p4, %p13848_p1  ;;  %p10658_p12 = por %p10657_p11, %p10656_p10 }
  0x20   : > { %p11153_p6 = pneg %p11147_p5 }
  0x22   : > { %p10651_p8 = pnand %p10649_p7, %p11153_p6 }
  0x24   : > { %p10652_p9 = pneg %p10651_p8 }
  0x26   : > { %p10659_p13 = pnand %p10658_p12, %p10652_p9 }
  0x28   : > { %10662 = shalt.err (!%p10659_p13)
}
  0x29   : > { %s13846_s25 = smov 16   ;;  %s13847_s26 = smov 1  }
  0x2a   : > { %s13898_s2 = sld [smem:[#allocation89_spill]]  ;;  %s10674_s8 = scalar_lea.vmem %s234_s22, 28672 }
  0x2b   : > { %p10675_p0 = scmp.ne.s32.totalorder %s234_s22, %s10674_s8  ;;  %p10682_p7 = scmp.lt.s32.totalorder %s234_s22, %s234_s22 }
  0x2c   : > { %p10683_p8 = scmp.lt.s32.totalorder %s10674_s8, %s10674_s8 }
  0x2d   : > { %p10677_p2 = pnand %p10675_p0, %p11153_p6 }
  0x2e   : > { %p10684_p9 = por %p10683_p8, %p10682_p7 }
  0x2f   : > { %p10678_p4 = pneg %p10677_p2 }
  0x30   : > { %10147 = dma.hbm_to_vmem [thread:$0]  (!%p11147_p5), %s13898_s2, 64, %s247_s17, [#allocation8], %s13846_s25, %s13846_s25, %s13847_s26  }
  0x31   : > { %p10685_p10 = pnand %p10684_p9, %p10678_p4 }
  0x33   : > { %10688 = shalt.err (!%p10685_p10)
}
  0x34   : > { %s11022_s24 = smov 64   ;;  %s11023_s0 = smov 4  }
  0x35   : > { %s13899_s1 = sld [smem:[#allocation88_spill]]  ;;  %s11024_s21 = smov [#allocation9]  }
  0x36   : > { %s259_s25 = sshll.u32 %s11024_s21, 4  ;;  %s11025_s26 = smov [#allocation10]   ;;  %s260_s25 = int_to_ptr.vmem [resolvable:$true] %s259_s25 }
  0x37   : > { %s272_s2 = sshll.u32 %s11025_s26, 4  ;;  %s10700_s8 = scalar_lea.vmem %s260_s25, 64  ;;  %s273_s2 = int_to_ptr.vmem [resolvable:$true] %s272_s2 }
  0x38   : > { %p10701_p11 = scmp.ne.s32.totalorder %s260_s25, %s10700_s8  ;;  %p10708_p0 = scmp.lt.s32.totalorder %s260_s25, %s260_s25 }
  0x39   : > { %p10709_p2 = scmp.lt.s32.totalorder %s10700_s8, %s10700_s8 }
  0x3a   : > { %p10703_p12 = pnand %p10701_p11, %p11153_p6 }
  0x3b   : > { %10144 = dma.hbm_to_vmem [thread:$0]  (!%p11147_p5), %s13899_s1, 28672, %s234_s22, [#allocation5], %s11022_s24, %s11022_s24, %s11023_s0  }
  0x3c   : > { %p10704_p13 = pneg %p10703_p12  ;;  %p10710_p4 = por %p10709_p2, %p10708_p0 }
  0x3e   : > { %p10711_p7 = pnand %p10710_p4, %p10704_p13 }
  0x40   : > { %10714 = shalt.err (!%p10711_p7)
}
  0x41   : > { %s13900_s17 = smov 1   ;;  %s13901_s22 = smov 16  }
  0x42   : > { %s13902_s3 = sld [smem:[#allocation90_spill]]  ;;  %s10726_s26 = scalar_lea.vmem %s273_s2, 4096 }
  0x43   : > { %p10727_p8 = scmp.ne.s32.totalorder %s273_s2, %s10726_s26  ;;  %p10734_p11 = scmp.lt.s32.totalorder %s273_s2, %s273_s2 }
  0x44   : > { %p10735_p12 = scmp.lt.s32.totalorder %s10726_s26, %s10726_s26 }
  0x45   : > { %p10729_p9 = pnand %p10727_p8, %p11153_p6 }
  0x46   : > { %p10736_p0 = por %p10735_p12, %p10734_p11 }
  0x47   : > { %p10730_p10 = pneg %p10729_p9 }
  0x48   : > { %10150 = dma.hbm_to_vmem [thread:$0]  (!%p11147_p5), %s13902_s3, 64, %s260_s25, [#allocation8], %s13901_s22, %s13901_s22, %s13900_s17  }
  0x49   : > { %p10737_p13 = pnand %p10736_p0, %p10730_p10 }
  0x4b   : > { %10740 = shalt.err (!%p10737_p13)
}
  0x4c   : > { %s13903_s4 = sld [smem:[#allocation91_spill]]  ;;  %s11026_s25 = smov [#allocation13]  }
  0x4d   : > { %s286_s17 = sshll.u32 %s11026_s25, 4  ;;  %s11027_s22 = smov [#allocation14]   ;;  %s287_s17 = int_to_ptr.vmem [resolvable:$true] %s286_s17 }
  0x4e   : > { %s297_s16 = sshll.u32 %s11027_s22, 4  ;;  %s10752_s21 = scalar_lea.vmem %s287_s17, 16  ;;  %s298_s16 = int_to_ptr.vmem [resolvable:$true] %s297_s16 }
  0x4f   : > { %p10753_p2 = scmp.ne.s32.totalorder %s287_s17, %s10752_s21  ;;  %s10759_s26 = scalar_lea.vmem %s287_s17, 32 }
  0x50   : > { %p10760_p8 = scmp.lt.s32.totalorder %s287_s17, %s287_s17  ;;  %p10761_p9 = scmp.lt.s32.totalorder %s10759_s26, %s10752_s21 }
  0x51   : > { %p10755_p4 = pnand %p10753_p2, %p11153_p6 }
  0x52   : > { %10153 = dma.hbm_to_vmem [thread:$0]  (!%p11147_p5), %s13903_s4, 4096, %s273_s2, [#allocation11], %s11022_s24, %s11022_s24, %s11023_s0  }
  0x53   : > { %p10756_p7 = pneg %p10755_p4  ;;  %p10762_p10 = por %p10761_p9, %p10760_p8 }
  0x55   : > { %p10763_p11 = pnand %p10762_p10, %p10756_p7 }
  0x57   : > { %10766 = shalt.err (!%p10763_p11)
}
  0x58   : > { %s13904_s6 = sld [smem:[#allocation93_spill]]  ;;  %s10778_s2 = scalar_lea.vmem %s298_s16, 16 }
  0x59   : > { %p10779_p12 = scmp.ne.s32.totalorder %s298_s16, %s10778_s2  ;;  %s10785_s24 = scalar_lea.vmem %s298_s16, 32 }
  0x5a   : > { %p10786_p2 = scmp.lt.s32.totalorder %s298_s16, %s298_s16  ;;  %p10787_p4 = scmp.lt.s32.totalorder %s10785_s24, %s10778_s2 }
  0x5b   : > { %p10781_p0 = pnand %p10779_p12, %p11153_p6 }
  0x5c   : > { %p10788_p1 = por %p10787_p4, %p10786_p2 }
  0x5d   : > { %p10782_p13 = pneg %p10781_p0 }
  0x5e   : > { %10156 = dma.hbm_to_vmem [thread:$0]  (!%p11147_p5), %s13904_s6, 16, %s287_s17, [#allocation8]  }
  0x5f   : > { %p10789_p3 = pnand %p10788_p1, %p10782_p13 }
  0x61   : > { %10792 = shalt.err (!%p10789_p3)
}
  0x62   : > { %s13905_s7 = sld [smem:[#allocation94_spill]]  ;;  %s7821_s23 = sadd.s32 4294967294, %s11016_s15  }
  0x63   : > { %s33_s20 = sadd.s32 1, %s11008_s13  ;;  %s36_s17 = sadd.s32 1, %s11012_s14 }
  0x64   : > { %p34_p1 = scmp.ge.s32.totalorder %s33_s20, 2  ;;  %s127_s22 = sadd.s32 1, %s10996_s10 }
  0x65   : > { %p134_p3 = scmp.ne.s32.totalorder %s10996_s10, %s10992_s9  ;;  %p135_p6 = scmp.eq.s32.totalorder %s11016_s15, 0 }
  0x66   : > { %s14157_s20 = smov (%p34_p1, %s33_s20), 0  ;;  %s14159_s17 = smov (!%p34_p1, %s36_s17), %s11012_s14 }
  0x67   : > { %13906 = sst [smem:[#allocation32_spill]] %s14157_s20  ;;  %p140_p7 = scmp.ne.s32.totalorder %s10992_s9, %s10988_s30 }
  0x68   : > { %10159 = dma.hbm_to_vmem [thread:$0]  (!%p11147_p5), %s13905_s7, 16, %s298_s16, [#allocation11]  }
  0x69   : > { %p38_p5 = scmp.ge.s32.totalorder %s14159_s17, 2  ;;  %s193_s16 = ssub.s32 %s11008_s13, %s14157_s20 }
  0x6a   : > { %p11225_p8 = por %p135_p6, %p134_p3  ;;  %p13908_p9 = scmp.eq.s32.totalorder %s11134_s18, 0 }
  0x6b   : > { %s14161_s17 = smov (%p38_p5, %s14159_s17), 0  ;;  %s197_s30 = sadd.s32 1, %s10984_s29 }
  0x6c   : > { %p11231_p10 = por %p13908_p9, %p140_p7  ;;  %13910 = sst [smem:[#allocation33_spill]] %s14161_s17 }
  0x6d   : > { %p207_p11 = scmp.ne.s32.totalorder %s10984_s29, %s10980_s28  ;;  %s124_s0 = ssub.s32 %s11012_s14, %s14161_s17 }
  0x6e   : > { %p208_p12 = scmp.eq.s32.totalorder %s11134_s18, 3  ;;  %p125_p0 = scmp.eq.s32.totalorder %s124_s0, 0 }
  0x6f   : > { %s194_s1 = sor.u32 %s193_s16, %s124_s0  ;;  %p213_p4 = scmp.ne.s32.totalorder %s10980_s28, %s10976_s27 }
  0x70   : > { %p195_p13 = scmp.eq.s32.totalorder %s194_s1, 0  ;;  %p11243_p2 = por %p208_p12, %p207_p11 }
  0x71   : > { %s11248_s24 = scalar_select %p125_p0, %s10996_s10, %s127_s22  }
  0x72   : > { %s11251_s8 = scalar_select %p195_p13, %s10984_s29, %s197_s30  }
  0x73   : > { %13912 = sst [smem:[#allocation34_spill]] %s11248_s24  ;;  %p214_p1 = scmp.eq.s32.totalorder %s7821_s23, 3 }
  0x74   : > { %p10174_p3 = scmp.lt.s32.totalorder %s11016_s15, 4  ;;  %s308_s25 = sand.u32 1, %s11016_s15  }
  0x75   : > { %p11257_p6 = por %p214_p1, %p213_p4  ;;  %s310_s4 = sand.u32 1, %s10996_s10  }
  0x76   : > { %s7830_s6 = sshll.u32 %s11012_s14, 4  ;;  %s13914_s5 = sld [smem:[#allocation92_spill]] }
  0x77   : > { %s13913_s3 = scalar_select %p11257_p6, 1, 0 }
  0x78   : > { %s311_s7 = scalar_lea.vmem [#allocation12], %s310_s4  ;;  %p11268_p7 = pnand %p10174_p3, %p11225_p8 }
  0x79   : > { %s318_s17 = sshll.u32 %s311_s7, 4  ;;  %s309_s23 = scalar_lea.sflag [#allocation5], %s308_s25  ;;  %s319_s17 = int_to_ptr.vmem [resolvable:$true] %s318_s17 }
  0x7a   : > { %p10795_p5 = pneg %p11268_p7  ;;  %s10806_s30 = scalar_lea.vmem %s319_s17, 16 }
  0x7b   : > { %p10807_p9 = scmp.ne.s32.totalorder %s319_s17, %s10806_s30  ;;  %s11028_s20 = smov [#allocation12]  }
  0x7c   : > { %s316_s1 = scalar_lea.hbm %s13914_s5, %s7830_s6  ;;  %s10811_s14 = sshll.u32 %s11028_s20, 4  ;;  %s10812_s14 = int_to_ptr.vmem [resolvable:$false] %s10811_s14 }
  0x7d   : > { %p10809_p11 = pnand %p10807_p9, %p10795_p5  ;;  %s10813_s6 = scalar_lea.vmem %s10812_s14, 32 }
  0x7e   : > { %p10814_p0 = scmp.lt.s32.totalorder %s319_s17, %s10812_s14  ;;  %p10815_p13 = scmp.lt.s32.totalorder %s10813_s6, %s10806_s30 }
  0x7f   : > { %p10810_p12 = pneg %p10809_p11 }
  0x80   : > { %p10816_p4 = por %p10815_p13, %p10814_p0 }
  0x82   : > { %p10817_p8 = pnand %p10816_p4, %p10810_p12 }
  0x84   : > { %10820 = shalt.err (!%p10817_p8)
}
  0x85   : > { %10163 = dma.hbm_to_vmem [thread:$0]  (!%p11268_p7), %s316_s1, 16, %s319_s17, %s309_s23  }
  0x86   : > { %p13916_p1 = scmp.ne.s32.totalorder %s13895_s19, 0 }
  0x88   : > { %327 = sbr.rel (%p13916_p1) target bundleno = 1559 (0x617), region = 48 }
  0x8d   : > { %p13917_p3 = scmp.eq.s32.totalorder %s11134_s18, 0 }
  0x8f   : > { %10945 = dma.done.wait (%p13917_p3), [#allocation5], 28672   ;;  %p13918_p5 = pmov %p13917_p3 }
  0x90   : > { %p13919_p9 = pmov %p13917_p3 }
  0x91   : > { %10947 = vsyncadd (%p13918_p5), [#allocation5], 4294938624 }
  0x92   : > { %10949 = dma.done.wait (%p13919_p9), [#allocation8], 128   ;;  %p13920_p11 = pmov %p13917_p3 }
  0x93   : > { %p13921_p12 = pmov %p13917_p3 }
  0x94   : > { %10951 = vsyncadd (%p13920_p11), [#allocation8], 4294967168 }
  0x95   : > { %10953 = dma.done.wait (%p13921_p12), [#allocation11], 4096   ;;  %p13922_p7 = pmov %p13917_p3 }
  0x96   : > { %s345_s4 = sand.u32 1, %s11134_s18   ;;  %s347_s7 = sand.u32 1, %s10992_s9  }
  0x97   : > { %10955 = vsyncadd (%p13922_p7), [#allocation11], 4294963200  ;;  %s346_s14 = scalar_lea.sflag [#allocation5], %s345_s4  ;;  %s11292_s19 = scalar_lea.vmem [#allocation12], %s347_s7 }
  0x98   : > { %10957 = dma.done.wait (%p11231_p10), %s346_s14, 16  }
  0x99   : > { %10959 = vsyncadd (%p11231_p10), %s346_s14, 4294967280  ;;  %p13923_p0 = pmov %p13917_p3 }
  0x9b   : > { %10961 = dma.done.wait (%p13923_p0), [#allocation8], 16   ;;  %p13924_p13 = pmov %p13923_p0 }
  0x9c   : > { %p13925_p4 = pmov %p13923_p0 }
  0x9d   : > { %10963 = vsyncadd (%p13924_p13), [#allocation8], 4294967280 }
  0x9e   : > { %10965 = dma.done.wait (%p13925_p4), [#allocation11], 16   ;;  %p13926_p8 = pmov %p13923_p0 }
  0x9f   : > { %s13853_s20 = sand.u32 1, %s10980_s28   ;;  %p388_p10 = scmp.lt.s32.totalorder %s11000_s11, 0 }
  0xa0   : > { %10967 = vsyncadd (%p13926_p8), [#allocation11], 4294967280  ;;  %s11310_s17 = sshll.u32 %s13853_s20, 6  ;;  %s389_s21 = ssub.s32 0, %s11000_s11 }
  0xa1   : > { %s7839_s26 = smin.u32 %s11000_s11, %s389_s21  ;;  %p10181_p1 = scmp.eq.s32.totalorder %s11000_s11, 0 }
  0xa2   : > { %s391_s25 = sand.u32 1, %s7839_s26   ;;  %s8891_s18 = smul.u32 67584, %s11004_s12 }
  0xa3   : > { %s392_s16 = ssub.s32 0, %s391_s25  ;;  %s13927_s23 = sld [smem:[#allocation87_spill]] }
  0xa4   : > { %s14163_s16 = smov (!%p388_p10, %s392_s16), %s391_s25  ;;  %s11029_s6 = smov [#allocation2]  }
  0xa5   : > { %p7841_p3 = scmp.lt.s32.totalorder %s14163_s16, 0  ;;  %s398_s0 = sadd.s32 2, %s14163_s16 }
  0xa6   : > { %s416_s4 = sshll.u32 %s11029_s6, 4  ;;  %s11321_s4 = int_to_ptr.vmem [resolvable:$true] %s416_s4 }
  0xa7   : > { %s14165_s0 = smov (!%p7841_p3, %s398_s0), %s14163_s16 }
  0xa9   : > { %s408_s30 = scalar_lea.hbm %s13927_s23, %s8891_s18  ;;  %s13855_s26 = scalar_lea.hbm %s13927_s23, 135168 }
  0xaa   : > { %s10821_s7 = scalar_lea.hbm %s408_s30, 61440  ;;  %p10826_p12 = scmp.lt.s32.totalorder %s408_s30, %s13927_s23 }
  0xab   : > { %p10822_p5 = scmp.ne.s32.totalorder %s408_s30, %s10821_s7  ;;  %p10827_p7 = scmp.lt.s32.totalorder %s13855_s26, %s10821_s7 }
  0xad   : > { %p10823_p9 = pnand %p10822_p5, %p10181_p1  ;;  %p10828_p0 = por %p10827_p7, %p10826_p12 }
  0xaf   : > { %p10824_p11 = pneg %p10823_p9 }
  0xb1   : > { %p10829_p13 = pnand %p10828_p0, %p10824_p11 }
  0xb3   : > { %10832 = shalt.err (!%p10829_p13)  }
  0xb4   : > { %s10833_s16 = scalar_lea.vmem %s11321_s4, 61440  ;;  %s13854_s20 = scalar_lea.vmem %s11321_s4, 122880 }
  0xb5   : > { %p10834_p4 = scmp.ne.s32.totalorder %s11321_s4, %s10833_s16  ;;  %p10840_p3 = scmp.lt.s32.totalorder %s11321_s4, %s11321_s4 }
  0xb6   : > { %p10841_p5 = scmp.lt.s32.totalorder %s13854_s20, %s10833_s16 }
  0xb7   : > { %p10835_p8 = pnand %p10834_p4, %p10181_p1 }
  0xb8   : > { %p10842_p9 = por %p10841_p5, %p10840_p3 }
  0xb9   : > { %p10836_p10 = pneg %p10835_p8 }
  0xbb   : > { %p10843_p12 = pnand %p10842_p9, %p10836_p10 }
  0xbd   : > { %10846 = shalt.err (!%p10843_p12)  }
  0xbe   : > { %10136 = dma.hbm_to_vmem [thread:$0]  (%p10181_p1), %s408_s30, 61440, %s11321_s4, [#allocation3] }
  0xbf   : > { %s8892_s22 = smul.u32 3840, %s14165_s0  ;;  %s11349_s6 = scalar_lea.vmem [#allocation15], %s11310_s17 }
  0xc0   : > { %s424_s14 = scalar_lea.sflag [#allocation3], %s14165_s0 }
  0xc1   : > { %s11351_s7 = scalar_lea.vmem [#allocation2], %s8892_s22 }
  0xc2   : > { %10968 = dma.done.wait %s424_s14, 61440 }
  0xc3   : > { %10969 = vsyncadd %s424_s14, 4294905856  ;;  %s430_s21 = sadd.s32 1, %s11000_s11  ;;  %s435_s25 = ssub.s32 1, %s14165_s0  ;;  %v10285_v0 = vld [vmem:[#allocation4 + $0x38] sm:$0xff]  }
  0xc4   : > { %s7711_s18 = smul.u32 96, %s11000_s11  ;;  %p11358_p11 = scmp.lt.s32.totalorder %s430_s21, 2  ;;  %v10286_v1 = vld [vmem:[#allocation4 + $0xb8] sm:$0xff]   ;;  %9853 = vmatprep.subr.bf16.mxu0 %v10285_v0 }
  0xc5   : > { %s7712_s1 = smul.u32 1056, %s11004_s12  ;;  %v10287_v2 = vld [vmem:[#allocation4 + $0x78] sm:$0xff]   ;;  %s445_s0 = scalar_lea.sflag [#allocation3], %s435_s25 }
  0xc6   : > { %s8893_s17 = smul.u32 3840, %s435_s25  ;;  %s13929_s20 = scalar_lea.hbm %s13927_s23, 135168 }
  0xc7   : > { %s7713_s30 = sadd.s32 %s7712_s1, %s7711_s18 }
  0xc8   : > { %s7846_s22 = sshll.u32 %s7713_s30, 6  ;;  %s444_s5 = scalar_lea.vmem [#allocation2], %s8893_s17 }
  0xc9   : > { %s7715_s14 = scalar_lea.hbm %s13927_s23, %s7846_s22  ;;  %s453_s13 = sshll.u32 %s444_s5, 4  ;;  %s454_s13 = int_to_ptr.vmem [resolvable:$true] %s453_s13 }
  0xca   : > { %s7716_s24 = scalar_lea.hbm %s7715_s14, 6144  ;;  %s10873_s21 = scalar_lea.hbm %s7715_s14, 67584 }
  0xcb   : > { %p10848_p1 = scmp.ne.s32.totalorder %s7716_s24, %s10873_s21  ;;  %p10852_p13 = scmp.lt.s32.totalorder %s7716_s24, %s13927_s23 }
  0xcc   : > { %p10853_p4 = scmp.lt.s32.totalorder %s13929_s20, %s10873_s21 }
  0xcd   : > { %p10849_p7 = pnand %p10848_p1, %p11358_p11 }
  0xce   : > { %p10854_p8 = por %p10853_p4, %p10852_p13 }
  0xcf   : > { %p10850_p0 = pneg %p10849_p7 }
  0xd1   : > { %p10855_p10 = pnand %p10854_p8, %p10850_p0 }
  0xd3   : > { %10858 = shalt.err (!%p10855_p10)  }
  0xd4   : > { %s10859_s5 = scalar_lea.vmem %s454_s13, 61440  ;;  %p10866_p12 = scmp.lt.s32.totalorder %s454_s13, %s11321_s4 }
  0xd5   : > { %p10860_p3 = scmp.ne.s32.totalorder %s454_s13, %s10859_s5  ;;  %s13930_s25 = scalar_lea.vmem %s11321_s4, 122880 }
  0xd6   : > { %p10867_p1 = scmp.lt.s32.totalorder %s13930_s25, %s10859_s5 }
  0xd7   : > { %p10861_p5 = pnand %p10860_p3, %p11358_p11 }
  0xd8   : > { %p10868_p7 = por %p10867_p1, %p10866_p12 }
  0xd9   : > { %p10862_p9 = pneg %p10861_p5 }
  0xdb   : > { %p10869_p6 = pnand %p10868_p7, %p10862_p9 }
  0xdd   : > { %10872 = shalt.err (!%p10869_p6)  }
  0xde   : > { %10138 = dma.hbm_to_vmem [thread:$0]  (%p11358_p11), %s7716_s24, 61440, %s454_s13, %s445_s0  ;;  %8973 = vmatprep.subr.bf16.mxu1 %v10286_v1  ;;  %9854 = vmatpush3.bf16.msra.mxu0 %v10285_v0  ;;  %v10288_v3 = vld [vmem:[#allocation4 + $0x30] sm:$0xff]   ;;  %v10291_v6 = vld [vmem:[#allocation4 + $0x28] sm:$0xff]   ;;  %v10294_v9 = vld [vmem:[#allocation4 + $0x20] sm:$0xff]   ;;  %vm506_vm0 = vcmask 1041408   ;;  %vm507_vm1 = vcmask 1045508  }
  0xdf   : > { %8974 = vmatpush3.bf16.msra.mxu1 %v10287_v2  ;;  %v10289_v4 = vld [vmem:[#allocation4 + $0xb0] sm:$0xff]   ;;  %9855 = vmatprep.subr.bf16.mxu0 %v10288_v3  ;;  %v10292_v7 = vld [vmem:[#allocation4 + $0xa8] sm:$0xff]   ;;  %v10295_v10 = vld [vmem:[#allocation4 + $0xa0] sm:$0xff]   ;;  %v13931_v17 = vmov 0  ;;  %s8884_s13 = sshll.u32 %s11000_s11, 4  ;;  %s8885_s24 = sshll.u32 %s11004_s12, 5 }
  0xe0   : > { %v10290_v5 = vld [vmem:[#allocation4 + $0x70] sm:$0xff]   ;;  %8975 = vmatprep.subr.bf16.mxu1 %v10289_v4  ;;  %v10293_v8 = vld [vmem:[#allocation4 + $0x68] sm:$0xff]   ;;  %v10296_v11 = vld [vmem:[#allocation4 + $0x60] sm:$0xff]   ;;  %s7652_s12 = sshll.u32 %s11349_s6, 4  ;;  %s14142_s16 = sld [smem:[#allocation95_spill]]  ;;  %s13770_s12 = int_to_ptr.vmem [resolvable:$true] %s7652_s12 }
  0xe1   : > { %v10297_v12 = vld [vmem:[#allocation4 + $0x18] sm:$0xff]   ;;  %v10300_v15 = vld [vmem:[#allocation4 + $0x10] sm:$0xff]   ;;  %vm11381_vm2 = vmor %vm506_vm0, %vm507_vm1  ;;  %s14143_s22 = sand.u32 1, %s10980_s28   ;;  %s10874_s0 = scalar_lea.vmem %s13770_s12, 1024 }
  0xe2   : > { %9856 = vmatpush3.bf16.msra.mxu0 %v10288_v3  ;;  %v10298_v13 = vld [vmem:[#allocation4 + $0x98] sm:$0xff]   ;;  %v10301_v16 = vld [vmem:[#allocation4 + $0x90] sm:$0xff]   ;;  %v13932_v17 = vsel %vm11381_vm2, 4294967295, %v13931_v17  ;;  %v10303_v19 = vld [vmem:[#allocation4 + $0x8] sm:$0xff]   ;;  %s13775_s14 = scalar_lea.sflag [#allocation6], %s14143_s22  ;;  %p10875_p6 = scmp.ne.s32.totalorder %s13770_s12, %s10874_s0 }
  0xe3   : > { %8976 = vmatpush3.bf16.msra.mxu1 %v10290_v5  ;;  %9857 = vmatprep.subr.bf16.mxu0 %v10291_v6  ;;  %v10299_v14 = vld [vmem:[#allocation4 + $0x58] sm:$0xff]   ;;  %13933 = vst [vmem:[#allocation35_spill] sm:$0xff] %v13932_v17  ;;  %v10302_v18 = vld [vmem:[#allocation4 + $0x50] sm:$0xff]   ;;  %v10304_v20 = vld [vmem:[#allocation4 + $0x88] sm:$0xff]   ;;  %s11030_s21 = smov [#allocation15]  }
  0xe4   : > { %8977 = vmatprep.subr.bf16.mxu1 %v10292_v7  ;;  %v10305_v21 = vld [vmem:[#allocation4 + $0x48] sm:$0xff]   ;;  %v10306_v22 = vld [vmem:[#allocation4] sm:$0xff]   ;;  %v7848_v23 = vld [vmem:[%s11351_s7 + $0x6d0] sm:$0xc]  ;;  %p10876_p11 = pnand %p10875_p6, %p11243_p2  ;;  %s10878_s18 = sshll.u32 %s11030_s21, 4  ;;  %s10879_s18 = int_to_ptr.vmem [resolvable:$false] %s10878_s18 }
  0xe5   : > { %v7849_v24 = vld [vmem:[%s11351_s7 + $0x6d4] sm:$0xf]  ;;  %v7850_v25 = vld [vmem:[%s11351_s7 + $0x6d8] sm:$0x3]  ;;  %v10307_v26 = vld [vmem:[#allocation4 + $0x80] sm:$0xff]   ;;  %v7872_v27 = vrot.slane %v7848_v23, 10  ;;  %p10881_p13 = scmp.lt.s32.totalorder %s13770_s12, %s10879_s18 }
  0xe6   : > { %9858 = vmatpush3.bf16.msra.mxu0 %v10291_v6  ;;  %v511_v28 = vrot.slane %v7849_v24, 6  ;;  %v514_v29 = vrot.slane %v7850_v25, 6  ;;  %v7914_v30 = vld [vmem:[%s11351_s7 + $0x490] sm:$0xc]  ;;  %v10308_v31 = vld [vmem:[#allocation4 + $0x40] sm:$0xff]   ;;  %v10310_v40 = vld [vmem:[#allocation4 + $0x138] sm:$0xff]   ;;  %p10877_p0 = pneg %p10876_p11 }
  0xe7   : > { %8978 = vmatpush3.bf16.msra.mxu1 %v10293_v8  ;;  %9859 = vmatprep.subr.bf16.mxu0 %v10294_v9  ;;  %v7915_v32 = vld [vmem:[%s11351_s7 + $0x494] sm:$0xf]  ;;  %v7916_v33 = vld [vmem:[%s11351_s7 + $0x498] sm:$0x3]  ;;  %v7938_v34 = vrot.slane %v7914_v30, 10  ;;  %v10309_v51 = vld [vmem:[%s11351_s7 + $0x48c] sm:$0xff]  }
  0xe8   : > { %8979 = vmatprep.subr.bf16.mxu1 %v10295_v10  ;;  %v512_v35 = vsel %vm11381_vm2, %v7872_v27, %v511_v28  ;;  %v513_v36 = vrot.slane %v511_v28, 4  ;;  %v943_v37 = vrot.slane %v7915_v32, 6  ;;  %v946_v38 = vrot.slane %v7916_v33, 6  ;;  %v7851_v39 = vld [vmem:[%s11351_s7 + $0x700] sm:$0xc]  ;;  %v10312_v44 = vld [vmem:[#allocation4 + $0x1b8] sm:$0xff]  }
  0xe9   : > { %v7852_v41 = vld [vmem:[%s11351_s7 + $0x704] sm:$0xf]  ;;  %v7853_v42 = vld [vmem:[%s11351_s7 + $0x708] sm:$0x3]  ;;  %v7873_v43 = vrot.slane %v7851_v39, 10  ;;  %v10311_v55 = vld [vmem:[#allocation4 + $0xf8] sm:$0xff]  }
  0xea   : > { %9860 = vmatpush3.bf16.msra.mxu0 %v10294_v9  ;;  %v515_v45 = vsel %vm11381_vm2, %v513_v36, %v514_v29  ;;  %v944_v46 = vsel %vm11381_vm2, %v7938_v34, %v943_v37  ;;  %v945_v47 = vrot.slane %v943_v37, 4  ;;  %v518_v48 = vrot.slane %v7852_v41, 6  ;;  %v10314_v56 = vld [vmem:[#allocation4 + $0x178] sm:$0xff]   ;;  %v10313_v60 = vld [vmem:[#allocation4 + $0x130] sm:$0xff]   ;;  %v7917_v3 = vld [vmem:[%s11351_s7 + $0x4c0] sm:$0xc] }
  0xeb   : > { %8980 = vmatpush3.bf16.msra.mxu1 %v10296_v11  ;;  %9861 = vmatprep.subr.bf16.mxu0 %v10297_v12  ;;  %v11400_v49 = vcombine.low %v512_v35, %v515_v45  ;;  %v521_v50 = vrot.slane %v7853_v42, 6  ;;  %v7854_v61 = vld [vmem:[%s11351_s7 + $0x730] sm:$0xc]  ;;  %v7855_v62 = vld [vmem:[%s11351_s7 + $0x734] sm:$0xf]  ;;  %v7939_v7 = vrot.slane %v7917_v3, 10 }
  0xec   : > { %8981 = vmatprep.subr.bf16.mxu1 %v10298_v13  ;;  %v947_v52 = vsel %vm11381_vm2, %v945_v47, %v946_v38  ;;  %v519_v53 = vsel %vm11381_vm2, %v7873_v43, %v518_v48  ;;  %v520_v54 = vrot.slane %v518_v48, 4  ;;  %v7856_v63 = vld [vmem:[%s11351_s7 + $0x738] sm:$0x3]  ;;  %v7874_v0 = vrot.slane %v7854_v61, 10  ;;  %v10315_v4 = vld [vmem:[#allocation4 + $0xf0] sm:$0xff]   ;;  %v10317_v13 = vld [vmem:[#allocation4 + $0x128] sm:$0xff]  }
  0xed   : > { %13934 = vst [vmem:[#allocation36_spill] sm:$0xff] %v11400_v49  ;;  %9869 = vmatprep.mubr.bf16.mxu0 %v11400_v49  ;;  %v8066_v57 = vcombine.low %v944_v46, %v947_v52  ;;  %v525_v1 = vrot.slane %v7855_v62, 6  ;;  %v528_v2 = vrot.slane %v7856_v63, 6  ;;  %v7918_v5 = vld [vmem:[%s11351_s7 + $0x4c4] sm:$0xf]  ;;  %v10316_v24 = vld [vmem:[%s11351_s7 + $0x4bc] sm:$0xff]  }
  0xee   : > { %9862 = vmatpush3.bf16.msra.mxu0 %v10297_v12  ;;  %v522_v58 = vsel %vm11381_vm2, %v520_v54, %v521_v50  ;;  %v7919_v6 = vld [vmem:[%s11351_s7 + $0x4c8] sm:$0x3]  ;;  %v950_v10 = vrot.slane %v7918_v5, 6  ;;  %v7857_v12 = vld [vmem:[%s11351_s7 + $0x760] sm:$0xc]  ;;  %v10324_v46 = vld [vmem:[#allocation4 + $0x118] sm:$0xff]  }
  0xef   : > { %8982 = vmatpush3.bf16.msra.mxu1 %v10299_v14  ;;  %9863 = vmatprep.subr.bf16.mxu0 %v10300_v15  ;;  %v11410_v59 = vcombine.low %v519_v53, %v522_v58  ;;  %v526_v8 = vsel %vm11381_vm2, %v7874_v0, %v525_v1  ;;  %v527_v9 = vrot.slane %v525_v1, 4  ;;  %v953_v11 = vrot.slane %v7919_v6, 6  ;;  %v7858_v14 = vld [vmem:[%s11351_s7 + $0x764] sm:$0xf]  ;;  %v7860_v36 = vld [vmem:[%s11351_s7 + $0x790] sm:$0xc] }
  0xf0   : > { %8983 = vmatprep.subr.bf16.mxu1 %v10301_v16  ;;  %2142 = vmatprep.mubr.bf16.mxu1 %v8066_v57  ;;  %v7875_v16 = vrot.slane %v7857_v12, 10  ;;  %v532_v23 = vrot.slane %v7858_v14, 6  ;;  %v10320_v27 = vld [vmem:[#allocation4 + $0x120] sm:$0xff]   ;;  %v7861_v37 = vld [vmem:[%s11351_s7 + $0x794] sm:$0xf]  ;;  %v7876_v39 = vrot.slane %v7860_v36, 10 }
  0xf1   : > { %13935 = vst [vmem:[#allocation37_spill] sm:$0xff] %v11410_v59  ;;  %v10322_v35 = vld [vmem:[#allocation4 + $0xe0] sm:$0xff]   ;;  %v7862_v38 = vld [vmem:[%s11351_s7 + $0x798] sm:$0x3]  ;;  %v7920_v42 = vld [vmem:[%s11351_s7 + $0x4f0] sm:$0xc] }
  0xf2   : > { %9864 = vmatpush3.bf16.msra.mxu0 %v10300_v15  ;;  %v7859_v15 = vld [vmem:[%s11351_s7 + $0x768] sm:$0x3]  ;;  %v533_v29 = vsel %vm11381_vm2, %v7875_v16, %v532_v23  ;;  %v534_v30 = vrot.slane %v532_v23, 4  ;;  %v542_v41 = vrot.slane %v7862_v38, 6  ;;  %v7921_v43 = vld [vmem:[%s11351_s7 + $0x4f4] sm:$0xf] }
  0xf3   : > { %8984 = vmatpush3.bf16.msra.mxu1 %v10302_v18  ;;  %9865 = vmatprep.subr.bf16.mxu0 %v10303_v19  ;;  %v10318_v18 = vld [vmem:[#allocation4 + $0xe8] sm:$0xff]   ;;  %v7940_v45 = vrot.slane %v7920_v42, 10  ;;  %v957_v50 = vrot.slane %v7921_v43, 6  ;;  %v7863_v52 = vld [vmem:[%s11351_s7 + $0x7c0] sm:$0xc]  ;;  %v10325_v53 = vld [vmem:[#allocation4 + $0xd8] sm:$0xff]  }
  0xf4   : > { %8985 = vmatprep.subr.bf16.mxu1 %v10304_v20  ;;  %v529_v20 = vsel %vm11381_vm2, %v527_v9, %v528_v2  ;;  %v7864_v54 = vld [vmem:[%s11351_s7 + $0x7c4] sm:$0xf]  ;;  %v10326_v57 = vld [vmem:[#allocation4 + $0x1a8] sm:$0xff]   ;;  %v10327_v2 = vld [vmem:[#allocation4 + $0x110] sm:$0xff]   ;;  %s10880_s1 = scalar_lea.vmem %s10879_s18, 2048 }
  0xf5   : > { %v11429_v25 = vcombine.low %v526_v8, %v529_v20  ;;  %v959_v61 = vrot.slane %v957_v50, 4  ;;  %v546_v62 = vrot.slane %v7864_v54, 6  ;;  %v10323_v63 = vld [vmem:[%s11351_s7 + $0x4ec] sm:$0xff]   ;;  %v7867_v12 = vld [vmem:[%s11351_s7 + $0x7f4] sm:$0xf]  ;;  %v10334_v42 = vld [vmem:[#allocation4 + $0x100] sm:$0xff]   ;;  %p10882_p4 = scmp.lt.s32.totalorder %s10880_s1, %s10874_s0 }
  0xf6   : > { %9866 = vmatpush3.bf16.msra.mxu0 %v10303_v19  ;;  %v10319_v19 = vld [vmem:[#allocation4 + $0x1b0] sm:$0xff]   ;;  %v10328_v6 = vld [vmem:[#allocation4 + $0x168] sm:$0xff]   ;;  %v7928_v54 = vld [vmem:[%s11351_s7 + $0x558] sm:$0x3] }
  0xf7   : > { %8986 = vmatpush3.bf16.msra.mxu1 %v10305_v21  ;;  %9867 = vmatprep.subr.bf16.mxu0 %v10306_v22  ;;  %v951_v21 = vsel %vm11381_vm2, %v7939_v7, %v950_v10  ;;  %13936 = vst [vmem:[#allocation38_spill] sm:$0xff] %v11429_v25  ;;  %v548_v5 = vrot.slane %v546_v62, 4  ;;  %v7925_v20 = vld [vmem:[%s11351_s7 + $0x528] sm:$0x3]  ;;  %p10883_p8 = por %p10882_p4, %p10881_p13 }
  0xf8   : > { %8987 = vmatprep.subr.bf16.mxu1 %v10307_v26  ;;  %v535_v26 = vrot.slane %v7859_v15, 6  ;;  %v553_v15 = vrot.slane %v7867_v12, 6 }
  0xf9   : > { %p10884_p10 = pnand %p10883_p8, %p10877_p0 }
  0xfa   : > { %9868 = vmatpush3.bf16.msra.mxu0 %v10306_v22  ;;  %v952_v22 = vrot.slane %v950_v10, 4  ;;  %v536_v33 = vsel %vm11381_vm2, %v534_v30, %v535_v26  ;;  %v10329_v10 = vld [vmem:[#allocation4 + $0xd0] sm:$0xff]   ;;  %v7870_v30 = vld [vmem:[%s11351_s7 + $0x824] sm:$0xf] }
  0xfb   : > { %8988 = vmatpush3.bf16.msra.mxu1 %v10308_v31  ;;  %9037 = vmatprep.subr.bf16.mxu0 %v10310_v40  ;;  %v10321_v31 = vld [vmem:[#allocation4 + $0x170] sm:$0xff]   ;;  %v11438_v34 = vcombine.low %v533_v29, %v536_v33  ;;  %v539_v40 = vrot.slane %v7861_v37, 6  ;;  %v10332_v29 = vld [vmem:[#allocation4 + $0xc8] sm:$0xff]   ;;  %v10333_v33 = vld [vmem:[#allocation4 + $0x1a0] sm:$0xff]   ;;  %v560_v38 = vrot.slane %v7870_v30, 6 }
  0xfc   : > { %9101 = vmatprep.subr.bf16.mxu1 %v10312_v44  ;;  %v954_v28 = vsel %vm11381_vm2, %v952_v22, %v953_v11  ;;  %v7922_v44 = vld [vmem:[%s11351_s7 + $0x4f8] sm:$0x3]  ;;  %v7866_v11 = vld [vmem:[%s11351_s7 + $0x7f0] sm:$0xc]  ;;  %v10331_v22 = vld [vmem:[#allocation4 + $0x108] sm:$0xff]  }
  0xfd   : > { %9870 = vmatmul.mubr.bf16.vlgmr.msra.gmra.mxu0 %v11410_v59  ;;  %v8067_v32 = vcombine.low %v951_v21, %v954_v28  ;;  %13937 = vst [vmem:[#allocation39_spill] sm:$0xff] %v11438_v34  ;;  %v540_v47 = vsel %vm11381_vm2, %v7876_v39, %v539_v40  ;;  %v541_v48 = vrot.slane %v539_v40, 4  ;;  %v7878_v14 = vrot.slane %v7866_v11, 10  ;;  %v7869_v28 = vld [vmem:[%s11351_s7 + $0x820] sm:$0xc] }
  0xfe   : > { %2143 = vmatmul.mubr.bf16.vlgmr.msra.gmra.mxu1 %v10309_v51  ;;  %9038 = vmatpush3.bf16.msra.mxu0 %v10311_v55  ;;  %v960_v51 = vrot.slane %v7922_v44, 6  ;;  %v7865_v55 = vld [vmem:[%s11351_s7 + $0x7c8] sm:$0x3]  ;;  %v10330_v39 = vld [vmem:[%s11351_s7 + $0x51c] sm:$0xff]  }
  0xff   : > { %9102 = vmatpush3.bf16.msra.mxu1 %v10314_v56  ;;  %9039 = vmatprep.subr.bf16.mxu0 %v10313_v60  ;;  %v7877_v56 = vrot.slane %v7863_v52, 10  ;;  %v543_v58 = vsel %vm11381_vm2, %v541_v48, %v542_v41  ;;  %v958_v60 = vsel %vm11381_vm2, %v7940_v45, %v957_v50  ;;  %v549_v1 = vrot.slane %v7865_v55, 6  ;;  %v7926_v52 = vld [vmem:[%s11351_s7 + $0x550] sm:$0xc] }
 0x100   : > { %9103 = vmatprep.subr.bf16.mxu1 %v10319_v19  ;;  %9873 = vmatprep.mubr.bf16.mxu0 %v11429_v25  ;;  %v11457_v0 = vcombine.low %v540_v47, %v543_v58  ;;  %v961_v3 = vsel %vm11381_vm2, %v959_v61, %v960_v51  ;;  %v7924_v19 = vld [vmem:[%s11351_s7 + $0x524] sm:$0xf]  ;;  %v554_v23 = vsel %vm11381_vm2, %v7878_v14, %v553_v15  ;;  %v562_v45 = vrot.slane %v560_v38, 4  ;;  %v10337_v58 = vld [vmem:[%s11351_s7 + $0x6cc] sm:$0xff]   ;;  %v10344_v14 = vld [vmem:[%s11351_s7 + $0x6fc] sm:$0xff]  }
 0x101   : > { %2150 = vmatprep.mubr.bf16.mxu1 %v8067_v32  ;;  %v8068_v7 = vcombine.low %v958_v60, %v961_v3  ;;  %v550_v8 = vsel %vm11381_vm2, %v548_v5, %v549_v1  ;;  %v964_v26 = vrot.slane %v7924_v19, 6  ;;  %v7879_v32 = vrot.slane %v7869_v28, 10  ;;  %v10336_v51 = vld [vmem:[#allocation4 + $0xc0] sm:$0xff]   ;;  %v10342_v5 = vld [vmem:[#allocation4 + $0x198] sm:$0xff]   ;;  %v10346_v19 = vld [vmem:[%s11351_s7 + $0x4c8] sm:$0xff]  }
 0x102   : > { %9040 = vmatpush3.bf16.msra.mxu0 %v10315_v4  ;;  %13938 = vst [vmem:[#allocation40_spill] sm:$0xff] %v11457_v0  ;;  %v547_v4 = vsel %vm11381_vm2, %v7877_v56, %v546_v62  ;;  %v7942_v55 = vrot.slane %v7926_v52, 10  ;;  %v10338_v62 = vld [vmem:[%s11351_s7 + $0x54c] sm:$0xff]   ;;  %v7933_v28 = vld [vmem:[%s11351_s7 + $0x5b4] sm:$0xf] }
 0x103   : > { %9041 = vmatprep.subr.bf16.mxu0 %v10317_v13  ;;  %9104 = vmatpush3.bf16.msra.mxu1 %v10321_v31  ;;  %v11466_v9 = vcombine.low %v547_v4, %v550_v8  ;;  %v7868_v13 = vld [vmem:[%s11351_s7 + $0x7f8] sm:$0x3]  ;;  %v7871_v31 = vld [vmem:[%s11351_s7 + $0x828] sm:$0x3]  ;;  %v966_v37 = vrot.slane %v964_v26, 4  ;;  %v561_v44 = vsel %vm11381_vm2, %v7879_v32, %v560_v38  ;;  %v985_v32 = vrot.slane %v7933_v28, 6 }
 0x104   : > { %9105 = vmatprep.subr.bf16.mxu1 %v10326_v57  ;;  %v556_v16 = vrot.slane %v7868_v13, 6  ;;  %v563_v41 = vrot.slane %v7871_v31, 6  ;;  %v974_v57 = vrot.slane %v7928_v54, 6  ;;  %v10341_v4 = vld [vmem:[#allocation4 + $0x1f8] sm:$0xff]   ;;  %v7930_v8 = vld [vmem:[%s11351_s7 + $0x584] sm:$0xf] }
 0x105   : > { %9874 = vmatmul.mubr.bf16.gmra.mxu0 %v11438_v34  ;;  %13939 = vst [vmem:[#allocation41_spill] sm:$0xff] %v11466_v9  ;;  %v978_v12 = vrot.slane %v7930_v8, 6  ;;  %v10351_v31 = vld [vmem:[%s11351_s7 + $0x72c] sm:$0xff]   ;;  %v10353_v38 = vld [vmem:[%s11351_s7 + $0x4f8] sm:$0xff]   ;;  %v10388_v28 = vld [vmem:[#allocation4 + $0x260] sm:$0xff]  }
 0x106   : > { %9042 = vmatpush3.bf16.msra.mxu0 %v10318_v18  ;;  %2151 = vmatmul.mubr.bf16.gmra.mxu1 %v10316_v24  ;;  %v7923_v18 = vld [vmem:[%s11351_s7 + $0x520] sm:$0xc]  ;;  %v555_v24 = vrot.slane %v553_v15, 4  ;;  %v564_v48 = vsel %vm11381_vm2, %v562_v45, %v563_v41  ;;  %v10357_v45 = vld [vmem:[#allocation4 + $0x148] sm:$0xff]   ;;  %v10370_v8 = vld [vmem:[#allocation4 + $0x278] sm:$0xff]  }
 0x107   : > { %9043 = vmatprep.subr.bf16.mxu0 %v10320_v27  ;;  %9877 = vmatprep.mubr.bf16.mxu0 %v11457_v0  ;;  %v7941_v21 = vrot.slane %v7923_v18, 10  ;;  %v967_v27 = vrot.slane %v7925_v20, 6  ;;  %v11494_v50 = vcombine.low %v561_v44, %v564_v48  ;;  %v10345_v18 = vld [vmem:[%s11351_s7 + $0x57c] sm:$0xff]   ;;  %v10356_v44 = vld [vmem:[#allocation4 + $0x188] sm:$0xff]  }
 0x108   : > { %9106 = vmatpush3.bf16.msra.mxu1 %v10328_v6  ;;  %2158 = vmatprep.mubr.bf16.mxu1 %v8068_v7  ;;  %v10343_v6 = vld [vmem:[#allocation4 + $0x158] sm:$0xff]   ;;  %v7929_v7 = vld [vmem:[%s11351_s7 + $0x580] sm:$0xc]  ;;  %v7937_v48 = vld [vmem:[%s11351_s7 + $0x5e8] sm:$0x3] }
 0x109   : > { %v965_v36 = vsel %vm11381_vm2, %v7941_v21, %v964_v26  ;;  %9107 = vmatprep.subr.bf16.mxu1 %v10333_v33  ;;  %v968_v43 = vsel %vm11381_vm2, %v966_v37, %v967_v27  ;;  %13941 = vst [vmem:[#allocation43_spill] sm:$0xff] %v11494_v50  ;;  %v7943_v11 = vrot.slane %v7929_v7, 10  ;;  %v10347_v21 = vld [vmem:[#allocation4 + $0x230] sm:$0xff]   ;;  %v10358_v54 = vld [vmem:[%s11351_s7 + $0x75c] sm:$0xff]  }
 0x10a   : > { %9044 = vmatpush3.bf16.msra.mxu0 %v10322_v35  ;;  %v557_v35 = vsel %vm11381_vm2, %v555_v24, %v556_v16  ;;  %v8069_v47 = vcombine.low %v965_v36, %v968_v43  ;;  %v980_v16 = vrot.slane %v978_v12, 4  ;;  %v10349_v24 = vld [vmem:[#allocation4 + $0x190] sm:$0xff]   ;;  %v987_v36 = vrot.slane %v985_v32, 4  ;;  %v10369_v7 = vld [vmem:[#allocation4 + $0x1d8] sm:$0xff]  }
 0x10b   : > { %9045 = vmatprep.subr.bf16.mxu0 %v10324_v46  ;;  %v11485_v40 = vcombine.low %v554_v23, %v557_v35  ;;  %v10335_v46 = vld [vmem:[#allocation4 + $0x160] sm:$0xff]   ;;  %v979_v15 = vsel %vm11381_vm2, %v7943_v11, %v978_v12  ;;  %v10348_v23 = vld [vmem:[#allocation4 + $0x1f0] sm:$0xff]   ;;  %v10372_v11 = vld [vmem:[%s11351_s7 + $0x708] sm:$0xff]  }
 0x10c   : > { %9108 = vmatpush3.bf16.msra.mxu1 %v10335_v46  ;;  %v10350_v26 = vld [vmem:[#allocation4 + $0x150] sm:$0xff]   ;;  %v7935_v46 = vld [vmem:[%s11351_s7 + $0x5e0] sm:$0xc]  ;;  %v10373_v12 = vld [vmem:[%s11351_s7 + $0x588] sm:$0xff]  }
 0x10d   : > { %9878 = vmatmul.mubr.bf16.gmra.mxu0 %v11466_v9  ;;  %13940 = vst [vmem:[#allocation42_spill] sm:$0xff] %v11485_v40  ;;  %9109 = vmatprep.subr.bf16.mxu1 %v10342_v5  ;;  %v7932_v27 = vld [vmem:[%s11351_s7 + $0x5b0] sm:$0xc]  ;;  %v10367_v5 = vld [vmem:[%s11351_s7 + $0x558] sm:$0xff]  }
 0x10e   : > { %9046 = vmatpush3.bf16.msra.mxu0 %v10325_v53  ;;  %2159 = vmatmul.mubr.bf16.gmra.mxu1 %v10323_v63  ;;  %v7927_v53 = vld [vmem:[%s11351_s7 + $0x554] sm:$0xf]  ;;  %v10339_v63 = vld [vmem:[%s11351_s7 + $0x498] sm:$0xff]   ;;  %v7944_v30 = vrot.slane %v7932_v27, 10  ;;  %v10352_v37 = vld [vmem:[%s11351_s7 + $0x5ac] sm:$0xff]  }
 0x10f   : > { %9047 = vmatprep.subr.bf16.mxu0 %v10327_v2  ;;  %9881 = vmatprep.mubr.bf16.mxu0 %v11485_v40  ;;  %v971_v56 = vrot.slane %v7927_v53, 6  ;;  %v10340_v2 = vld [vmem:[#allocation4 + $0x238] sm:$0xff]   ;;  %v995_v53 = vrot.slane %v7937_v48, 6  ;;  %v10387_v27 = vld [vmem:[#allocation4 + $0x1c0] sm:$0xff]  }
 0x110   : > { %2166 = vmatprep.mubr.bf16.mxu1 %v8069_v47  ;;  %9110 = vmatpush3.bf16.msra.mxu1 %v10343_v6  ;;  %v986_v35 = vsel %vm11381_vm2, %v7944_v30, %v985_v32  ;;  %v7936_v47 = vld [vmem:[%s11351_s7 + $0x5e4] sm:$0xf]  ;;  %v10368_v6 = vld [vmem:[#allocation4 + $0x218] sm:$0xff]   ;;  %v8011_v30 = vld [vmem:[%s11351_s7 + $0x914] sm:$0xf] }
 0x111   : > { %v972_v60 = vsel %vm11381_vm2, %v7942_v55, %v971_v56  ;;  %v973_v61 = vrot.slane %v971_v56, 4  ;;  %9111 = vmatprep.subr.bf16.mxu1 %v10349_v24  ;;  %v992_v52 = vrot.slane %v7936_v47, 6  ;;  %v10384_v24 = vld [vmem:[%s11351_s7 + $0x768] sm:$0xff]  }
 0x112   : > { %9048 = vmatpush3.bf16.msra.mxu0 %v10329_v10  ;;  %v7931_v10 = vld [vmem:[%s11351_s7 + $0x588] sm:$0x3] }
 0x113   : > { %9049 = vmatprep.subr.bf16.mxu0 %v10331_v22  ;;  %v975_v1 = vsel %vm11381_vm2, %v973_v61, %v974_v57  ;;  %v981_v13 = vrot.slane %v7931_v10, 6  ;;  %v994_v56 = vrot.slane %v992_v52, 4  ;;  %v10359_v57 = vld [vmem:[%s11351_s7 + $0x5dc] sm:$0xff]  }
 0x114   : > { %v8070_v3 = vcombine.low %v972_v60, %v975_v1  ;;  %9112 = vmatpush3.bf16.msra.mxu1 %v10350_v26  ;;  %v10361_v61 = vld [vmem:[#allocation4 + $0x220] sm:$0xff]  }
 0x115   : > { %9882 = vmatmul.mubr.bf16.gmra.mxu0 %v11494_v50  ;;  %v982_v20 = vsel %vm11381_vm2, %v980_v16, %v981_v13  ;;  %9113 = vmatprep.subr.bf16.mxu1 %v10356_v44  ;;  %v996_v60 = vsel %vm11381_vm2, %v994_v56, %v995_v53  ;;  %v10363_v1 = vld [vmem:[#allocation4 + $0x180] sm:$0xff]   ;;  %v10374_v13 = vld [vmem:[#allocation4 + $0x210] sm:$0xff]  }
 0x116   : > { %9050 = vmatpush3.bf16.msra.mxu0 %v10332_v29  ;;  %2167 = vmatmul.mubr.bf16.gmra.mxu1 %v10330_v39  ;;  %v8071_v22 = vcombine.low %v979_v15, %v982_v20  ;;  %v7934_v29 = vld [vmem:[%s11351_s7 + $0x5b8] sm:$0x3]  ;;  %v10354_v39 = vld [vmem:[#allocation4 + $0x228] sm:$0xff]   ;;  %v10371_v10 = vld [vmem:[%s11351_s7 + $0x7bc] sm:$0xff]  }
 0x117   : > { %9051 = vmatprep.subr.bf16.mxu0 %v10334_v42  ;;  %2239 = vmatprep.mubr.bf16.mxu0 %v10337_v58  ;;  %v988_v33 = vrot.slane %v7934_v29, 6  ;;  %v10355_v42 = vld [vmem:[#allocation4 + $0x1e8] sm:$0xff]   ;;  %v10376_v15 = vld [vmem:[#allocation4 + $0x270] sm:$0xff]   ;;  %v10386_v26 = vld [vmem:[#allocation4 + $0x200] sm:$0xff]  }
 0x118   : > { %2174 = vmatprep.mubr.bf16.mxu1 %v8070_v3  ;;  %9114 = vmatpush3.bf16.msra.mxu1 %v10357_v45  ;;  %v10360_v58 = vld [vmem:[%s11351_s7 + $0x528] sm:$0xff]   ;;  %v8010_v29 = vld [vmem:[%s11351_s7 + $0x910] sm:$0xc]  ;;  %v8014_v44 = vld [vmem:[%s11351_s7 + $0x944] sm:$0xf] }
 0x119   : > { %v989_v41 = vsel %vm11381_vm2, %v987_v36, %v988_v33  ;;  %v10365_v3 = vld [vmem:[%s11351_s7 + $0x78c] sm:$0xff]   ;;  %9115 = vmatprep.subr.bf16.mxu1 %v10363_v1  ;;  %v8034_v32 = vrot.slane %v8010_v29, 10  ;;  %v1112_v33 = vrot.slane %v8011_v30, 6  ;;  %v8015_v45 = vld [vmem:[%s11351_s7 + $0x948] sm:$0x3]  ;;  %v1119_v48 = vrot.slane %v8014_v44, 6 }
 0x11a   : > { %9052 = vmatpush3.bf16.msra.mxu0 %v10336_v51  ;;  %v8072_v43 = vcombine.low %v986_v35, %v989_v41  ;;  %v7945_v51 = vrot.slane %v7935_v46, 10  ;;  %v10377_v16 = vld [vmem:[%s11351_s7 + $0x7ec] sm:$0xff]   ;;  %v8013_v41 = vld [vmem:[%s11351_s7 + $0x940] sm:$0xc]  ;;  %v8017_v56 = vld [vmem:[%s11351_s7 + $0x974] sm:$0xf] }
 0x11b   : > { %9165 = vmatprep.subr.bf16.mxu0 %v10340_v2  ;;  %v10364_v2 = vld [vmem:[#allocation4 + $0x140] sm:$0xff]   ;;  %v10381_v20 = vld [vmem:[#allocation4 + $0x1c8] sm:$0xff]   ;;  %v8035_v46 = vrot.slane %v8013_v41, 10  ;;  %v1121_v53 = vrot.slane %v1119_v48, 4 }
 0x11c   : > { %v993_v55 = vsel %vm11381_vm2, %v7945_v51, %v992_v52  ;;  %9116 = vmatpush3.bf16.msra.mxu1 %v10364_v2  ;;  %v10385_v35 = vld [vmem:[%s11351_s7 + $0x5e8] sm:$0xff]   ;;  %v1122_v51 = vrot.slane %v8015_v45, 6  ;;  %v10394_v52 = vld [vmem:[#allocation4 + $0x250] sm:$0xff]   ;;  %v10413_v45 = vld [vmem:[#allocation10 + $0x38] sm:$0xff]  }
 0x11d   : > { %2240 = vmatmul.mubr.bf16.vlgmr.msra.gmra.mxu0 %v10339_v63  ;;  %v10362_v63 = vld [vmem:[#allocation4 + $0x1e0] sm:$0xff]   ;;  %9885 = vmatprep.subr.bf16.mxu1 %v10370_v8  ;;  %v10392_v1 = vld [vmem:[%s11351_s7 + $0x7c8] sm:$0xff]  }
 0x11e   : > { %2175 = vmatmul.mubr.bf16.gmra.mxu1 %v10338_v62  ;;  %9166 = vmatpush3.bf16.msra.mxu0 %v10341_v4  ;;  %v8073_v62 = vcombine.low %v993_v55, %v996_v60  ;;  %v10366_v4 = vld [vmem:[%s11351_s7 + $0x6d8] sm:$0xff]   ;;  %v8016_v55 = vld [vmem:[%s11351_s7 + $0x970] sm:$0xc] }
 0x11f   : > { %2247 = vmatprep.mubr.bf16.mxu0 %v10344_v14  ;;  %9167 = vmatprep.subr.bf16.mxu0 %v10347_v21  ;;  %v10375_v14 = vld [vmem:[#allocation4 + $0x1d0] sm:$0xff]   ;;  %v10382_v21 = vld [vmem:[#allocation4 + $0x268] sm:$0xff]   ;;  %v8018_v60 = vld [vmem:[%s11351_s7 + $0x978] sm:$0x3]  ;;  %v8036_v2 = vrot.slane %v8016_v55, 10 }
 0x120   : > { %2182 = vmatprep.mubr.bf16.mxu1 %v8071_v22  ;;  %v10379_v22 = vld [vmem:[%s11351_s7 + $0x5b8] sm:$0xff]   ;;  %v8031_v55 = vld [vmem:[%s11351_s7 + $0xa60] sm:$0xc] }
 0x122   : > { %9168 = vmatpush3.bf16.msra.mxu0 %v10348_v23  ;;  %v10383_v23 = vld [vmem:[%s11351_s7 + $0x81c] sm:$0xff]  }
 0x123   : > { %9169 = vmatprep.subr.bf16.mxu0 %v10354_v39  ;;  %v10391_v39 = vld [vmem:[#allocation4 + $0x258] sm:$0xff]  }
 0x125   : > { %2248 = vmatmul.mubr.bf16.gmra.mxu0 %v10346_v19  ;;  %v10380_v19 = vld [vmem:[#allocation4 + $0x208] sm:$0xff]  }
 0x126   : > { %2183 = vmatmul.mubr.bf16.gmra.mxu1 %v10345_v18  ;;  %2255 = vmatprep.mubr.bf16.mxu0 %v10351_v31  ;;  %v10378_v18 = vld [vmem:[%s11351_s7 + $0x738] sm:$0xff]  }
 0x127   : > { %9170 = vmatpush3.bf16.msra.mxu0 %v10355_v42  ;;  %2190 = vmatprep.mubr.bf16.mxu1 %v8072_v43  ;;  %v8012_v31 = vld [vmem:[%s11351_s7 + $0x918] sm:$0x3] }
 0x128   : > { %9171 = vmatprep.subr.bf16.mxu0 %v10361_v61  ;;  %v1115_v36 = vrot.slane %v8012_v31, 6  ;;  %v10389_v42 = vld [vmem:[%s11351_s7 + $0x798] sm:$0xff]   ;;  %v1126_v61 = vrot.slane %v8017_v56, 6 }
 0x12b   : > { %9172 = vmatpush3.bf16.msra.mxu0 %v10362_v63  ;;  %v10397_v63 = vld [vmem:[#allocation4 + $0x248] sm:$0xff]  }
 0x12c   : > { %9173 = vmatprep.subr.bf16.mxu0 %v10368_v6  ;;  %v10400_v6 = vld [vmem:[#allocation4 + $0x240] sm:$0xff]  }
 0x12d   : > { %2256 = vmatmul.mubr.bf16.gmra.mxu0 %v10353_v38  ;;  %v1114_v38 = vrot.slane %v1112_v33, 4 }
 0x12e   : > { %2191 = vmatmul.mubr.bf16.gmra.mxu1 %v10352_v37  ;;  %2263 = vmatprep.mubr.bf16.mxu0 %v10358_v54  ;;  %v1113_v37 = vsel %vm11381_vm2, %v8034_v32, %v1112_v33  ;;  %v1120_v54 = vsel %vm11381_vm2, %v8035_v46, %v1119_v48  ;;  %v8025_v33 = vld [vmem:[%s11351_s7 + $0xa00] sm:$0xc]  ;;  %v10401_v46 = vld [vmem:[%s11351_s7 + $0x918] sm:$0xff]   ;;  %v8032_v48 = vld [vmem:[%s11351_s7 + $0xa64] sm:$0xf] }
 0x12f   : > { %2198 = vmatprep.mubr.bf16.mxu1 %v8073_v62  ;;  %9174 = vmatpush3.bf16.msra.mxu0 %v10369_v7  ;;  %v1116_v43 = vsel %vm11381_vm2, %v1114_v38, %v1115_v36  ;;  %v1127_v7 = vsel %vm11381_vm2, %v8036_v2, %v1126_v61  ;;  %v8027_v36 = vld [vmem:[%s11351_s7 + $0xa08] sm:$0x3]  ;;  %v1161_v56 = vrot.slane %v8032_v48, 6  ;;  %v8041_v2 = vrot.slane %v8031_v55, 10  ;;  %v10425_v48 = vld [vmem:[#allocation10 + $0x58] sm:$0xff]  }
 0x130   : > { %9175 = vmatprep.subr.bf16.mxu0 %v10374_v13  ;;  %v8106_v47 = vcombine.low %v1113_v37, %v1116_v43  ;;  %v10393_v13 = vld [vmem:[%s11351_s7 + $0x93c] sm:$0xff]   ;;  %v8039_v37 = vrot.slane %v8025_v33, 10  ;;  %v8029_v43 = vld [vmem:[%s11351_s7 + $0xa34] sm:$0xf]  ;;  %v1150_v44 = vrot.slane %v8027_v36, 6  ;;  %v10424_v36 = vld [vmem:[#allocation10 + $0x60] sm:$0xff]  }
 0x131   : > { %v10422_v33 = vld [vmem:[#allocation10 + $0x70] sm:$0xff]  }
 0x133   : > { %9176 = vmatpush3.bf16.msra.mxu0 %v10375_v14 }
 0x134   : > { %9177 = vmatprep.subr.bf16.mxu0 %v10380_v19 }
 0x135   : > { %2264 = vmatmul.mubr.bf16.gmra.mxu0 %v10360_v58  ;;  %v1123_v58 = vsel %vm11381_vm2, %v1121_v53, %v1122_v51 }
 0x136   : > { %2199 = vmatmul.mubr.bf16.gmra.mxu1 %v10359_v57  ;;  %2271 = vmatprep.mubr.bf16.mxu0 %v10365_v3  ;;  %v10390_v57 = vld [vmem:[%s11351_s7 + $0x90c] sm:$0xff]   ;;  %v8107_v62 = vcombine.low %v1120_v54, %v1123_v58  ;;  %v1128_v3 = vrot.slane %v1126_v61, 4  ;;  %v1154_v54 = vrot.slane %v8029_v43, 6 }
 0x137   : > { %2336 = vmatprep.mubr.bf16.mxu1 %v10366_v4  ;;  %9178 = vmatpush3.bf16.msra.mxu0 %v10381_v20  ;;  %v1129_v4 = vrot.slane %v8018_v60, 6  ;;  %v8023_v20 = vld [vmem:[%s11351_s7 + $0x9d4] sm:$0xf]  ;;  %v10402_v61 = vld [vmem:[%s11351_s7 + $0x9cc] sm:$0xff]  }
 0x138   : > { %9179 = vmatprep.subr.bf16.mxu0 %v10386_v26  ;;  %v8024_v26 = vld [vmem:[%s11351_s7 + $0x9d8] sm:$0x3] }
 0x139   : > { %v1143_v32 = vrot.slane %v8024_v26, 6 }
 0x13b   : > { %9180 = vmatpush3.bf16.msra.mxu0 %v10387_v27  ;;  %v10396_v27 = vld [vmem:[%s11351_s7 + $0x96c] sm:$0xff]  }
 0x13d   : > { %2272 = vmatmul.mubr.bf16.gmra.mxu0 %v10367_v5  ;;  %v8020_v5 = vld [vmem:[%s11351_s7 + $0x9a4] sm:$0xf] }
 0x13e   : > { %2337 = vmatmul.mubr.bf16.vlgmr.msra.gmra.mxu1 %v11400_v49  ;;  %2279 = vmatprep.mubr.bf16.mxu0 %v10371_v10  ;;  %v8019_v10 = vld [vmem:[%s11351_s7 + $0x9a0] sm:$0xc] }
 0x13f   : > { %9886 = vmatpush3.bf16.msra.mxu1 %v10370_v8  ;;  %2344 = vmatprep.mubr.bf16.mxu1 %v10372_v11  ;;  %v1130_v8 = vsel %vm11381_vm2, %v1128_v3, %v1129_v4  ;;  %v1133_v11 = vrot.slane %v8020_v5, 6  ;;  %v10403_v3 = vld [vmem:[%s11351_s7 + $0x948] sm:$0xff]   ;;  %v1163_v4 = vrot.slane %v1161_v56, 4 }
 0x140   : > { %9887 = vmatprep.subr.bf16.mxu1 %v10376_v15  ;;  %v8108_v14 = vcombine.low %v1127_v7, %v1130_v8  ;;  %v10414_v8 = vld [vmem:[#allocation10 + $0x30] sm:$0xff]  }
 0x143   : > { %9888 = vmatpush3.bf16.msra.mxu1 %v10376_v15  ;;  %v10395_v15 = vld [vmem:[%s11351_s7 + $0x7f8] sm:$0xff]  }
 0x144   : > { %9889 = vmatprep.subr.bf16.mxu1 %v10382_v21 }
 0x145   : > { %2280 = vmatmul.mubr.bf16.gmra.mxu0 %v10373_v12  ;;  %v8021_v12 = vld [vmem:[%s11351_s7 + $0x9a8] sm:$0x3] }
 0x146   : > { %2345 = vmatmul.mubr.bf16.gmra.mxu1 %v11410_v59  ;;  %2287 = vmatprep.mubr.bf16.mxu0 %v10377_v16  ;;  %v8037_v16 = vrot.slane %v8019_v10, 10  ;;  %v1136_v19 = vrot.slane %v8021_v12, 6  ;;  %v10415_v10 = vld [vmem:[#allocation10 + $0x28] sm:$0xff]  }
 0x147   : > { %2352 = vmatprep.mubr.bf16.mxu1 %v10378_v18  ;;  %9890 = vmatpush3.bf16.msra.mxu1 %v10382_v21  ;;  %v1135_v18 = vrot.slane %v1133_v11, 4  ;;  %v8022_v21 = vld [vmem:[%s11351_s7 + $0x9d0] sm:$0xc] }
 0x148   : > { %9891 = vmatprep.subr.bf16.mxu1 %v10388_v28  ;;  %v8038_v29 = vrot.slane %v8022_v21, 10  ;;  %v1162_v21 = vsel %vm11381_vm2, %v8041_v2, %v1161_v56 }
 0x14b   : > { %9892 = vmatpush3.bf16.msra.mxu1 %v10388_v28  ;;  %v10398_v28 = vld [vmem:[%s11351_s7 + $0x828] sm:$0xff]  }
 0x14c   : > { %9893 = vmatprep.subr.bf16.mxu1 %v10391_v39 }
 0x14d   : > { %2288 = vmatmul.mubr.bf16.gmra.mxu0 %v10379_v22  ;;  %v1140_v22 = vrot.slane %v8023_v20, 6  ;;  %v10408_v20 = vld [vmem:[%s11351_s7 + $0xa2c] sm:$0xff]  }
 0x14e   : > { %2353 = vmatmul.mubr.bf16.gmra.mxu1 %v11429_v25  ;;  %2295 = vmatprep.mubr.bf16.mxu0 %v10383_v23  ;;  %v1134_v23 = vsel %vm11381_vm2, %v8037_v16, %v1133_v11  ;;  %v10405_v11 = vld [vmem:[%s11351_s7 + $0x9fc] sm:$0xff]   ;;  %v11924_v25 = vld [vmem:[%s11351_s7 + $0x278] sm:$0xf] }
 0x14f   : > { %2360 = vmatprep.mubr.bf16.mxu1 %v10384_v24  ;;  %9894 = vmatpush3.bf16.msra.mxu1 %v10391_v39  ;;  %v1137_v24 = vsel %vm11381_vm2, %v1135_v18, %v1136_v19  ;;  %v1142_v31 = vrot.slane %v1140_v22, 4  ;;  %v10399_v39 = vld [vmem:[%s11351_s7 + $0x99c] sm:$0xff]   ;;  %v1141_v41 = vsel %vm11381_vm2, %v8038_v29, %v1140_v22  ;;  %v10416_v18 = vld [vmem:[#allocation10 + $0x20] sm:$0xff]   ;;  %13950 = vst [vmem:[#allocation52_spill] sm:$0xff] %v11924_v25 }
 0x150   : > { %9895 = vmatprep.subr.bf16.mxu1 %v10394_v52  ;;  %v8109_v30 = vcombine.low %v1134_v23, %v1137_v24  ;;  %v10417_v19 = vld [vmem:[#allocation10 + $0x18] sm:$0xff]   ;;  %v10409_v23 = vld [vmem:[%s11351_s7 + $0xa08] sm:$0xff]   ;;  %v10410_v24 = vld [vmem:[%s11351_s7 + $0xa38] sm:$0xff]  }
 0x151   : > { %v10411_v29 = vld [vmem:[%s11351_s7 + $0xa5c] sm:$0xff]  }
 0x153   : > { %9896 = vmatpush3.bf16.msra.mxu1 %v10394_v52  ;;  %v8030_v52 = vld [vmem:[%s11351_s7 + $0xa38] sm:$0x3] }
 0x154   : > { %9897 = vmatprep.subr.bf16.mxu1 %v10397_v63  ;;  %v1157_v60 = vrot.slane %v8030_v52, 6 }
 0x155   : > { %2296 = vmatmul.mubr.bf16.gmra.mxu0 %v10385_v35  ;;  %v8026_v35 = vld [vmem:[%s11351_s7 + $0xa04] sm:$0xf] }
 0x156   : > { %2361 = vmatmul.mubr.bf16.gmra.mxu1 %v11438_v34  ;;  %2433 = vmatprep.mubr.bf16.mxu0 %v8106_v47  ;;  %v1147_v38 = vrot.slane %v8026_v35, 6  ;;  %v8028_v47 = vld [vmem:[%s11351_s7 + $0xa30] sm:$0xc] }
 0x157   : > { %2368 = vmatprep.mubr.bf16.mxu1 %v10389_v42  ;;  %9898 = vmatpush3.bf16.msra.mxu1 %v10397_v63  ;;  %v1144_v42 = vsel %vm11381_vm2, %v1142_v31, %v1143_v32  ;;  %v8040_v58 = vrot.slane %v8028_v47, 10  ;;  %v10420_v31 = vld [vmem:[#allocation10] sm:$0xff]   ;;  %v10421_v32 = vld [vmem:[#allocation10 + $0x78] sm:$0xff]   ;;  %v10423_v35 = vld [vmem:[#allocation10 + $0x68] sm:$0xff]  }
 0x158   : > { %9899 = vmatprep.subr.bf16.mxu1 %v10400_v6  ;;  %v8110_v51 = vcombine.low %v1141_v41, %v1144_v42  ;;  %v1149_v53 = vrot.slane %v1147_v38, 4  ;;  %9917 = vmatprep.subr.bf16.mxu0 %v10421_v32  ;;  %v11635_v42 = vld [vmem:[#allocation9] ss:$0 sm:$0xff] }
 0x159   : > { %v1155_v12 = vsel %vm11381_vm2, %v8040_v58, %v1154_v54 }
 0x15a   : > { %v1151_v63 = vsel %vm11381_vm2, %v1149_v53, %v1150_v44 }
 0x15b   : > { %9900 = vmatpush3.bf16.msra.mxu1 %v10400_v6  ;;  %v10404_v6 = vld [vmem:[%s11351_s7 + $0x978] sm:$0xff]  }
 0x15c   : > { %9949 = vmatprep.subr.bf16.mxu1 %v10413_v45 }
 0x15d   : > { %2434 = vmatmul.mubr.bf16.vlgmr.msra.gmra.mxu0 %v10390_v57  ;;  %v8033_v57 = vld [vmem:[%s11351_s7 + $0xa68] sm:$0x3] }
 0x15e   : > { %2369 = vmatmul.mubr.bf16.gmra.mxu1 %v11457_v0  ;;  %2441 = vmatprep.mubr.bf16.mxu0 %v8107_v62  ;;  %v1148_v62 = vsel %vm11381_vm2, %v8039_v37, %v1147_v38  ;;  %v1164_v5 = vrot.slane %v8033_v57, 6  ;;  %v11633_v37 = vld [vmem:[#allocation7] ss:$0 sm:$0xff] }
 0x15f   : > { %2376 = vmatprep.mubr.bf16.mxu1 %v10392_v1  ;;  %v1156_v1 = vrot.slane %v1154_v54, 4  ;;  %v8111_v7 = vcombine.low %v1148_v62, %v1151_v63  ;;  %9918 = vmatpush3.bf16.msra.mxu0 %v10421_v32  ;;  %v10427_v32 = vld [vmem:[#allocation10 + $0x48] sm:$0xff]  }
 0x160   : > { %v1165_v22 = vsel %vm11381_vm2, %v1163_v4, %v1164_v5  ;;  %9919 = vmatprep.subr.bf16.mxu0 %v10422_v33 }
 0x161   : > { %v8113_v26 = vcombine.low %v1162_v21, %v1165_v22 }
 0x163   : > { %9920 = vmatpush3.bf16.msra.mxu0 %v10422_v33 }
 0x164   : > { %9921 = vmatprep.subr.bf16.mxu0 %v10423_v35 }
 0x165   : > { %2442 = vmatmul.mubr.bf16.gmra.mxu0 %v10393_v13  ;;  %v1158_v13 = vsel %vm11381_vm2, %v1156_v1, %v1157_v60 }
 0x166   : > { %2377 = vmatmul.mubr.bf16.gmra.mxu1 %v11466_v9  ;;  %2449 = vmatprep.mubr.bf16.mxu0 %v8108_v14  ;;  %v10406_v14 = vld [vmem:[%s11351_s7 + $0x9a8] sm:$0xff]   ;;  %v8112_v16 = vcombine.low %v1155_v12, %v1158_v13 }
 0x167   : > { %2384 = vmatprep.mubr.bf16.mxu1 %v10395_v15  ;;  %v10407_v15 = vld [vmem:[%s11351_s7 + $0x9d8] sm:$0xff]   ;;  %9922 = vmatpush3.bf16.msra.mxu0 %v10423_v35  ;;  %v11913_v9 = vld [vmem:[%s11351_s7 + $0x24c] sm:$0x3] }
 0x168   : > { %9923 = vmatprep.subr.bf16.mxu0 %v10424_v36 }
 0x16b   : > { %9924 = vmatpush3.bf16.msra.mxu0 %v10424_v36 }
 0x16c   : > { %9925 = vmatprep.subr.bf16.mxu0 %v10425_v48 }
 0x16d   : > { %2450 = vmatmul.mubr.bf16.gmra.mxu0 %v10396_v27  ;;  %v10418_v27 = vld [vmem:[#allocation10 + $0x10] sm:$0xff]  }
 0x16e   : > { %2385 = vmatmul.mubr.bf16.gmra.mxu1 %v11485_v40  ;;  %2457 = vmatprep.mubr.bf16.mxu0 %v8109_v30  ;;  %v10412_v30 = vld [vmem:[%s11351_s7 + $0xa68] sm:$0xff]  }
 0x16f   : > { %2392 = vmatprep.mubr.bf16.mxu1 %v10398_v28  ;;  %v10419_v28 = vld [vmem:[#allocation10 + $0x8] sm:$0xff]   ;;  %9926 = vmatpush3.bf16.msra.mxu0 %v10425_v48  ;;  %v11900_v40 = vld [vmem:[%s11351_s7 + $0x248] sm:$0xf] }
 0x170   : > { %v3057_v34 = vrot.slane %v11900_v40, 6  ;;  %v8326_v40 = vld [vmem:[%s11351_s7 + $0x7e4] sm:$0xc] }
 0x175   : > { %2458 = vmatmul.mubr.bf16.gmra.mxu0 %v10399_v39 }
 0x176   : > { %2393 = vmatmul.mubr.bf16.gmra.mxu1 %v11494_v50  ;;  %2465 = vmatprep.mubr.bf16.mxu0 %v8110_v51 }
 0x177   : > { %9901 = vmatprep.mubr.bf16.mxu1 %v10401_v46 }
 0x17d   : > { %2466 = vmatmul.mubr.bf16.gmra.mxu0 %v10402_v61 }
 0x17e   : > { %9902 = vmatmul.mubr.bf16.vlgmr.msra.gmra.mxu1 %v10403_v3  ;;  %2473 = vmatprep.mubr.bf16.mxu0 %v8111_v7  ;;  %v10426_v3 = vld [vmem:[#allocation10 + $0x50] sm:$0xff]  }
 0x17f   : > { %9905 = vmatprep.mubr.bf16.mxu1 %v10404_v6  ;;  %9950 = vmatpush3.bf16.msra.mxu1 %v10413_v45 }
 0x180   : > { %9951 = vmatprep.subr.bf16.mxu1 %v10414_v8  ;;  %9927 = vmatprep.subr.bf16.mxu0 %v10426_v3 }
 0x181   : > { %9928 = vmatpush3.bf16.msra.mxu0 %v10426_v3 }
 0x182   : > { %9929 = vmatprep.subr.bf16.mxu0 %v10427_v32 }
 0x183   : > { %9952 = vmatpush3.bf16.msra.mxu1 %v10414_v8 }
 0x184   : > { %9953 = vmatprep.subr.bf16.mxu1 %v10415_v10 }
 0x185   : > { %2474 = vmatmul.mubr.bf16.gmra.mxu0 %v10405_v11 }
 0x186   : > { %9906 = vmatmul.mubr.bf16.gmra.mxu1 %v10406_v14  ;;  %2481 = vmatprep.mubr.bf16.mxu0 %v8112_v16 }
 0x187   : > { %9909 = vmatprep.mubr.bf16.mxu1 %v10407_v15  ;;  %9954 = vmatpush3.bf16.msra.mxu1 %v10415_v10 }
 0x188   : > { %9955 = vmatprep.subr.bf16.mxu1 %v10416_v18  ;;  %9930 = vmatpush3.bf16.msra.mxu0 %v10427_v32  ;;  %v10434_v32 = vld [vmem:[#allocation4 + $0x370] sm:$0xff]  }
 0x18b   : > { %9956 = vmatpush3.bf16.msra.mxu1 %v10416_v18 }
 0x18c   : > { %9957 = vmatprep.subr.bf16.mxu1 %v10417_v19 }
 0x18d   : > { %2482 = vmatmul.mubr.bf16.gmra.mxu0 %v10408_v20 }
 0x18e   : > { %9910 = vmatmul.mubr.bf16.gmra.mxu1 %v10409_v23  ;;  %2489 = vmatprep.mubr.bf16.mxu0 %v8113_v26 }
 0x18f   : > { %9913 = vmatprep.mubr.bf16.mxu1 %v10410_v24  ;;  %9958 = vmatpush3.bf16.msra.mxu1 %v10417_v19 }
 0x190   : > { %9959 = vmatprep.subr.bf16.mxu1 %v10418_v27 }
 0x193   : > { %9960 = vmatpush3.bf16.msra.mxu1 %v10418_v27 }
 0x194   : > { %9961 = vmatprep.subr.bf16.mxu1 %v10419_v28 }
 0x195   : > { %2490 = vmatmul.mubr.bf16.gmra.mxu0 %v10411_v29 }
 0x196   : > { %9914 = vmatmul.mubr.bf16.gmra.mxu1 %v10412_v30 }
 0x197   : > { %9962 = vmatpush3.bf16.msra.mxu1 %v10419_v28 }
 0x198   : > { %9963 = vmatprep.subr.bf16.mxu1 %v10420_v31 }
 0x19b   : > { %9964 = vmatpush3.bf16.msra.mxu1 %v10420_v31 }
 0x1bd   : > { %v9871_v39 = vpop.f32.mrf.mxu0 }
 0x1be   : > { %v8989_v38 = vpop.f32.mrf.mxu1  ;;  %v767_v45 = vmul.f32 %v9871_v39, %v11633_v37 }
 0x1bf   : > { %v695_v43 = vpop.f32.mrf.mxu0 }
 0x1c0   : > { %v8990_v41 = vpop.f32.mrf.mxu1  ;;  %v765_v46 = vmul.f32 %v11633_v37, %v695_v43  ;;  %v790_v56 = vadd.f32 %v11635_v42, %v767_v45 }
 0x1c1   : > { %v11637_v44 = vadd.f32 %v8990_v41, %v8989_v38  ;;  %v9872_v51 = vpop.f32.mrf.mxu0 }
 0x1c2   : > { %v11641_v47 = vpop.f32.mrf.mxu1  ;;  %v788_v52 = vadd.f32 %v11635_v42, %v765_v46  ;;  %v768_v53 = vmul.f32 %v9872_v51, %v11633_v37  ;;  %v822_v1 = vmul.f32 0.01, %v790_v56  ;;  %vm806_vm5 = vcmp.ge.f32.partialorder %v790_v56, 0.0  ;;  %v10428_v51 = vld [vmem:[#allocation10 + $0x40] sm:$0xff]  }
 0x1c3   : > { %v698_v54 = vpop.f32.mrf.mxu0  ;;  %9931 = vmatprep.subr.bf16.mxu0 %v10428_v51 }
 0x1c4   : > { %v11645_v55 = vpop.f32.mrf.mxu1  ;;  %v820_v57 = vmul.f32 0.01, %v788_v52  ;;  %v791_v58 = vadd.f32 %v11635_v42, %v768_v53  ;;  %v766_v60 = vmul.f32 %v11633_v37, %v698_v54  ;;  %vm804_vm4 = vcmp.ge.f32.partialorder %v788_v52, 0.0  ;;  %9932 = vmatpush3.bf16.msra.mxu0 %v10428_v51 }
 0x1c5   : > { %v9875_v2 = vpop.f32.mrf.mxu0  ;;  %v838_v16 = vsel %vm806_vm5, %v790_v56, %v822_v1 }
 0x1c6   : > { %vm807_vm3 = vcmp.ge.f32.partialorder %v791_v58, 0.0  ;;  %v823_v61 = vmul.f32 0.01, %v791_v58  ;;  %v789_v62 = vadd.f32 %v11635_v42, %v766_v60  ;;  %v8995_v63 = vpop.f32.mrf.mxu1  ;;  %v771_v5 = vmul.f32 %v9875_v2, %v11633_v37 }
 0x1c7   : > { %v711_v8 = vpop.f32.mrf.mxu0  ;;  %v836_v14 = vsel %vm804_vm4, %v788_v52, %v820_v57 }
 0x1c8   : > { %v821_v4 = vmul.f32 0.01, %v789_v62  ;;  %v8996_v6 = vpop.f32.mrf.mxu1  ;;  %vm805_vm6 = vcmp.ge.f32.partialorder %v789_v62, 0.0  ;;  %v839_v7 = vsel %vm807_vm3, %v791_v58, %v823_v61  ;;  %v794_v11 = vadd.f32 %v11635_v42, %v771_v5 }
 0x1c9   : > { %v11652_v10 = vadd.f32 %v8996_v6, %v8995_v63  ;;  %v769_v12 = vmul.f32 %v11633_v37, %v711_v8  ;;  %v9876_v18 = vpop.f32.mrf.mxu0  ;;  %v853_v20 = vpack.c.bf16 %v839_v7, %v838_v16  ;;  %v10432_v16 = vld [vmem:[#allocation4 + $0x338] sm:$0xff]  }
 0x1ca   : > { %v11656_v13 = vpop.f32.mrf.mxu1  ;;  %v837_v15 = vsel %vm805_vm6, %v789_v62, %v821_v4  ;;  %v826_v21 = vmul.f32 0.01, %v794_v11  ;;  %v772_v23 = vmul.f32 %v9876_v18, %v11633_v37  ;;  %vm810_vm9 = vcmp.ge.f32.partialorder %v794_v11, 0.0 }
 0x1cb   : > { %v852_v19 = vpack.c.bf16 %v837_v15, %v836_v14  ;;  %v792_v22 = vadd.f32 %v11635_v42, %v769_v12  ;;  %v714_v24 = vpop.f32.mrf.mxu0  ;;  %v10430_v12 = vld [vmem:[#allocation4 + $0x378] sm:$0xff]  }
 0x1cc   : > { %v11660_v26 = vpop.f32.mrf.mxu1  ;;  %v795_v28 = vadd.f32 %v11635_v42, %v772_v23  ;;  %v770_v29 = vmul.f32 %v11633_v37, %v714_v24  ;;  %v842_v57 = vsel %vm810_vm9, %v794_v11, %v826_v21  ;;  %v10429_v11 = vld [vmem:[#allocation4 + $0x2f8] sm:$0xff]   ;;  %9341 = vmatprep.subr.bf16.mxu1 %v10430_v12 }
 0x1cd   : > { %9965 = vmatprep.mubr.bf16.mxu1 %v852_v19  ;;  %vm808_vm7 = vcmp.ge.f32.partialorder %v792_v22, 0.0  ;;  %v824_v27 = vmul.f32 0.01, %v792_v22  ;;  %v9879_v36 = vpop.f32.mrf.mxu0  ;;  %9277 = vmatprep.subr.bf16.mxu0 %v10429_v11 }
 0x1ce   : > { %9966 = vmatmul.mubr.bf16.vlgmr.msra.gmra.mxu1 %v853_v20  ;;  %vm811_vm8 = vcmp.ge.f32.partialorder %v795_v28, 0.0  ;;  %v827_v30 = vmul.f32 0.01, %v795_v28  ;;  %v793_v31 = vadd.f32 %v11635_v42, %v770_v29  ;;  %v9001_v33 = vpop.f32.mrf.mxu1  ;;  %v775_v38 = vmul.f32 %v9879_v36, %v11633_v37  ;;  %v10436_v36 = vld [vmem:[#allocation4 + $0x330] sm:$0xff]  }
 0x1cf   : > { %v727_v43 = vpop.f32.mrf.mxu0  ;;  %v840_v46 = vsel %vm808_vm7, %v792_v22, %v824_v27  ;;  %9342 = vmatpush3.bf16.msra.mxu1 %v10432_v16 }
 0x1d0   : > { %v825_v35 = vmul.f32 0.01, %v793_v31  ;;  %vm809_vm10 = vcmp.ge.f32.partialorder %v793_v31, 0.0  ;;  %v9002_v39 = vpop.f32.mrf.mxu1  ;;  %v843_v41 = vsel %vm811_vm8, %v795_v28, %v827_v30  ;;  %v798_v52 = vadd.f32 %v11635_v42, %v775_v38  ;;  %9343 = vmatprep.subr.bf16.mxu1 %v10434_v32 }
 0x1d1   : > { %v11666_v45 = vadd.f32 %v9002_v39, %v9001_v33  ;;  %v773_v53 = vmul.f32 %v11633_v37, %v727_v43  ;;  %v9880_v58 = vpop.f32.mrf.mxu0  ;;  %v855_v60 = vpack.c.bf16 %v843_v41, %v842_v57 }
 0x1d2   : > { %v841_v48 = vsel %vm809_vm10, %v793_v31, %v825_v35  ;;  %v11671_v54 = vpop.f32.mrf.mxu1  ;;  %v776_v62 = vmul.f32 %v9880_v58, %v11633_v37  ;;  %v830_v2 = vmul.f32 0.01, %v798_v52  ;;  %vm814_vm13 = vcmp.ge.f32.partialorder %v798_v52, 0.0  ;;  %v10440_v58 = vld [vmem:[#allocation4 + $0x328] sm:$0xff]  }
 0x1d3   : > { %v854_v56 = vpack.c.bf16 %v841_v48, %v840_v46  ;;  %v796_v61 = vadd.f32 %v11635_v42, %v773_v53  ;;  %v730_v63 = vpop.f32.mrf.mxu0  ;;  %9344 = vmatpush3.bf16.msra.mxu1 %v10436_v36 }
 0x1d4   : > { %v11676_v1 = vpop.f32.mrf.mxu1  ;;  %v799_v4 = vadd.f32 %v11635_v42, %v776_v62  ;;  %v774_v5 = vmul.f32 %v11633_v37, %v730_v63  ;;  %v846_v31 = vsel %vm814_vm13, %v798_v52, %v830_v2  ;;  %v10438_v52 = vld [vmem:[#allocation4 + $0x368] sm:$0xff]  }
 0x1d5   : > { %9969 = vmatprep.mubr.bf16.mxu1 %v854_v56  ;;  %v828_v3 = vmul.f32 0.01, %v796_v61  ;;  %vm812_vm12 = vcmp.ge.f32.partialorder %v796_v61, 0.0  ;;  %v9883_v15 = vpop.f32.mrf.mxu0  ;;  %9345 = vmatprep.subr.bf16.mxu1 %v10438_v52  ;;  %v10456_v52 = vld [vmem:[#allocation4 + $0x308] sm:$0xff]  }
 0x1d6   : > { %9970 = vmatmul.mubr.bf16.gmra.mxu1 %v855_v60  ;;  %vm815_vm11 = vcmp.ge.f32.partialorder %v799_v4, 0.0  ;;  %v831_v6 = vmul.f32 0.01, %v799_v4  ;;  %v797_v7 = vadd.f32 %v11635_v42, %v774_v5  ;;  %v9007_v8 = vpop.f32.mrf.mxu1  ;;  %v779_v18 = vmul.f32 %v9883_v15, %v11633_v37 }
 0x1d7   : > { %v743_v21 = vpop.f32.mrf.mxu0  ;;  %v844_v23 = vsel %vm812_vm12, %v796_v61, %v828_v3  ;;  %9346 = vmatpush3.bf16.msra.mxu1 %v10440_v58  ;;  %v8309_v58 = vld [vmem:[%s11351_s7 + $0x6c8] sm:$0xf] }
 0x1d8   : > { %v829_v14 = vmul.f32 0.01, %v797_v7  ;;  %vm813_vm14 = vcmp.ge.f32.partialorder %v797_v7, 0.0  ;;  %v9008_v19 = vpop.f32.mrf.mxu1  ;;  %v847_v20 = vsel %vm815_vm11, %v799_v4, %v831_v6  ;;  %v802_v27 = vadd.f32 %v11635_v42, %v779_v18 }
 0x1d9   : > { %v11682_v22 = vadd.f32 %v9008_v19, %v9007_v8  ;;  %v777_v28 = vmul.f32 %v11633_v37, %v743_v21  ;;  %v9884_v33 = vpop.f32.mrf.mxu0  ;;  %v857_v35 = vpack.c.bf16 %v847_v20, %v846_v31  ;;  %v10444_v8 = vld [vmem:[#allocation4 + $0x320] sm:$0xff]   ;;  %v10446_v19 = vld [vmem:[#allocation4 + $0x358] sm:$0xff]   ;;  %v8994_v20 = vadd.f32 %v11645_v55, %v11641_v47  ;;  %v10452_v55 = vld [vmem:[#allocation4 + $0x310] sm:$0xff]  }
 0x1da   : > { %v845_v24 = vsel %vm813_vm14, %v797_v7, %v829_v14  ;;  %v11687_v29 = vpop.f32.mrf.mxu1  ;;  %v780_v39 = vmul.f32 %v9884_v33, %v11633_v37  ;;  %v834_v46 = vmul.f32 0.01, %v802_v27  ;;  %vm818_vm15 = vcmp.ge.f32.partialorder %v802_v27, 0.0 }
 0x1db   : > { %v856_v30 = vpack.c.bf16 %v845_v24, %v844_v23  ;;  %v800_v38 = vadd.f32 %v11635_v42, %v777_v28  ;;  %v746_v43 = vpop.f32.mrf.mxu0  ;;  %v10448_v24 = vld [vmem:[#allocation4 + $0x318] sm:$0xff]  }
 0x1dc   : > { %v11692_v41 = vpop.f32.mrf.mxu1  ;;  %v803_v48 = vadd.f32 %v11635_v42, %v780_v39  ;;  %v778_v51 = vmul.f32 %v11633_v37, %v746_v43  ;;  %v10442_v37 = vld [vmem:[#allocation4 + $0x360] sm:$0xff]   ;;  %v850_v18 = vsel %vm818_vm15, %v802_v27, %v834_v46  ;;  %v10454_v46 = vld [vmem:[#allocation4 + $0x348] sm:$0xff]  }
 0x1dd   : > { %9973 = vmatprep.mubr.bf16.mxu1 %v856_v30  ;;  %v832_v53 = vmul.f32 0.01, %v800_v38  ;;  %v9053_v57 = vpop.f32.mrf.mxu0  ;;  %vm816_vm0 = vcmp.ge.f32.partialorder %v800_v38, 0.0  ;;  %9347 = vmatprep.subr.bf16.mxu1 %v10442_v37 }
 0x1de   : > { %9974 = vmatmul.mubr.bf16.gmra.mxu1 %v857_v35  ;;  %v9013_v56 = vpop.f32.mrf.mxu1  ;;  %vm819_vm1 = vcmp.ge.f32.partialorder %v803_v48, 0.0  ;;  %v835_v60 = vmul.f32 0.01, %v803_v48  ;;  %v801_v61 = vadd.f32 %v11635_v42, %v778_v51  ;;  %v10450_v35 = vld [vmem:[#allocation4 + $0x350] sm:$0xff]  }
 0x1df   : > { %v9054_v63 = vpop.f32.mrf.mxu0  ;;  %v848_v42 = vsel %vm816_vm0, %v800_v38, %v832_v53  ;;  %9348 = vmatpush3.bf16.msra.mxu1 %v10444_v8 }
 0x1e0   : > { %v9014_v62 = vpop.f32.mrf.mxu1  ;;  %v833_v2 = vmul.f32 0.01, %v801_v61  ;;  %v9055_v4 = vadd.f32 %v9054_v63, %v9053_v57  ;;  %vm817_vm3 = vcmp.ge.f32.partialorder %v801_v61, 0.0  ;;  %v851_v7 = vsel %vm819_vm1, %v803_v48, %v835_v60  ;;  %9349 = vmatprep.subr.bf16.mxu1 %v10446_v19  ;;  %v8277_v19 = vld [vmem:[%s11351_s7 + $0x260] sm:$0xf] }
 0x1e1   : > { %v11697_v3 = vadd.f32 %v9014_v62, %v9013_v56  ;;  %v9056_v6 = vpop.f32.mrf.mxu0  ;;  %v859_v23 = vpack.c.bf16 %v851_v7, %v850_v18  ;;  %v9000_v48 = vadd.f32 %v11660_v26, %v11656_v13  ;;  %v10458_v56 = vld [vmem:[#allocation4 + $0x340] sm:$0xff]   ;;  %v8310_v13 = vld [vmem:[%s11351_s7 + $0x6cc] sm:$0x3] }
 0x1e2   : > { %v11699_v5 = vpop.f32.mrf.mxu1  ;;  %v11702_v11 = vadd.f32 %v9055_v4, %v11637_v44  ;;  %v849_v12 = vsel %vm817_vm3, %v801_v61, %v833_v2  ;;  %v8308_v61 = vld [vmem:[%s11351_s7 + $0x6c4] sm:$0xc]  ;;  %v3372_v7 = vrot.slane %v8310_v13, 6  ;;  %v8279_v13 = vld [vmem:[%s11351_s7 + $0x28c] sm:$0xc] }
 0x1e3   : > { %v9057_v15 = vpop.f32.mrf.mxu0  ;;  %v858_v16 = vpack.c.bf16 %v849_v12, %v848_v42  ;;  %9350 = vmatpush3.bf16.msra.mxu1 %v10448_v24  ;;  %v10460_v2 = vld [vmem:[#allocation4 + $0x300] sm:$0xff]   ;;  %v8332_v37 = vrot.slane %v8308_v61, 10  ;;  %v8276_v12 = vld [vmem:[%s11351_s7 + $0x25c] sm:$0xc] }
 0x1e4   : > { %v11705_v14 = vpop.f32.mrf.mxu1  ;;  %v9058_v21 = vadd.f32 %v9057_v15, %v9056_v6  ;;  %9351 = vmatprep.subr.bf16.mxu1 %v10450_v35  ;;  %v3369_v6 = vrot.slane %v8309_v58, 6  ;;  %v8300_v24 = vrot.slane %v8276_v12, 10 }
 0x1e5   : > { %v9059_v28 = vpop.f32.mrf.mxu0  ;;  %9977 = vmatprep.mubr.bf16.mxu1 %v858_v16 }
 0x1e6   : > { %v9019_v44 = vpop.f32.mrf.mxu1  ;;  %v11710_v30 = vadd.f32 %v9058_v21, %v8994_v20  ;;  %9978 = vmatmul.mubr.bf16.gmra.mxu1 %v859_v23  ;;  %v3370_v16 = vsel %vm11381_vm2, %v8332_v37, %v3369_v6  ;;  %v3371_v18 = vrot.slane %v3369_v6, 4  ;;  %v9006_v20 = vadd.f32 %v11676_v1, %v11671_v54  ;;  %v8280_v37 = vld [vmem:[%s11351_s7 + $0x290] sm:$0xf]  ;;  %v8281_v6 = vld [vmem:[%s11351_s7 + $0x294] sm:$0x3] }
 0x1e7   : > { %v9060_v32 = vpop.f32.mrf.mxu0  ;;  %9352 = vmatpush3.bf16.msra.mxu1 %v10452_v55  ;;  %v8311_v55 = vld [vmem:[%s11351_s7 + $0x6f4] sm:$0xc] }
 0x1e8   : > { %v9020_v31 = vpop.f32.mrf.mxu1  ;;  %v9061_v27 = vadd.f32 %v9060_v32, %v9059_v28  ;;  %9353 = vmatprep.subr.bf16.mxu1 %v10454_v46  ;;  %v8312_v46 = vld [vmem:[%s11351_s7 + $0x6f8] sm:$0xf] }
 0x1e9   : > { %v11712_v33 = vadd.f32 %v9020_v31, %v9019_v44  ;;  %v9062_v47 = vpop.f32.mrf.mxu0  ;;  %v3265_v44 = vrot.slane %v8277_v19, 6  ;;  %v3373_v31 = vsel %vm11381_vm2, %v3371_v18, %v3372_v7  ;;  %v9012_v7 = vadd.f32 %v11692_v41, %v11687_v29 }
 0x1ea   : > { %v11714_v36 = vpop.f32.mrf.mxu1  ;;  %v11717_v38 = vadd.f32 %v9061_v27, %v11652_v10  ;;  %v8492_v35 = vcombine.low %v3370_v16, %v3373_v31  ;;  %v8301_v19 = vrot.slane %v8279_v13, 10  ;;  %v3275_v29 = vrot.slane %v8281_v6, 6  ;;  %v8315_v31 = vld [vmem:[%s11351_s7 + $0x728] sm:$0xf]  ;;  %v8283_v13 = vld [vmem:[%s11351_s7 + $0x2c0] sm:$0xf] }
 0x1eb   : > { %v9063_v43 = vpop.f32.mrf.mxu0  ;;  %9354 = vmatpush3.bf16.msra.mxu1 %v10456_v52  ;;  %v3266_v1 = vsel %vm11381_vm2, %v8300_v24, %v3265_v44  ;;  %v8313_v52 = vld [vmem:[%s11351_s7 + $0x6fc] sm:$0x3]  ;;  %v3272_v24 = vrot.slane %v8280_v37, 6 }
 0x1ec   : > { %v11719_v39 = vpop.f32.mrf.mxu1  ;;  %v9064_v51 = vadd.f32 %v9063_v43, %v9062_v47  ;;  %9355 = vmatprep.subr.bf16.mxu1 %v10458_v56  ;;  %v3267_v47 = vrot.slane %v3265_v44, 4  ;;  %4801 = vmatprep.mubr.bf16.mxu1 %v8492_v35 }
 0x1ed   : > { %v9065_v53 = vpop.f32.mrf.mxu0 }
 0x1ee   : > { %v11723_v57 = vadd.f32 %v9064_v51, %v9000_v48  ;;  %v9025_v10 = vpop.f32.mrf.mxu1 }
 0x1ef   : > { %v9066_v60 = vpop.f32.mrf.mxu0  ;;  %9356 = vmatpush3.bf16.msra.mxu1 %v10460_v2  ;;  %v3379_v2 = vrot.slane %v8313_v52, 6 }
 0x1f0   : > { %v9026_v62 = vpop.f32.mrf.mxu1  ;;  %v9067_v63 = vadd.f32 %v9066_v60, %v9065_v53  ;;  %v8333_v53 = vrot.slane %v8311_v55, 10  ;;  %v3274_v55 = vrot.slane %v3272_v24, 4 }
 0x1f1   : > { %v11728_v26 = vadd.f32 %v9026_v62, %v9025_v10  ;;  %v9068_v4 = vpop.f32.mrf.mxu0 }
 0x1f2   : > { %v11731_v8 = vadd.f32 %v9067_v63, %v11666_v45  ;;  %v11733_v42 = vpop.f32.mrf.mxu1  ;;  %v8278_v45 = vld [vmem:[%s11351_s7 + $0x264] sm:$0x3]  ;;  %v3376_v63 = vrot.slane %v8312_v46, 6 }
 0x1f3   : > { %v9069_v15 = vpop.f32.mrf.mxu0  ;;  %v3268_v43 = vrot.slane %v8278_v45, 6 }
 0x1f4   : > { %v11741_v21 = vpop.f32.mrf.mxu1  ;;  %v9070_v23 = vadd.f32 %v9069_v15, %v9068_v4  ;;  %v3378_v16 = vrot.slane %v3376_v63, 4 }
 0x1f5   : > { %v9071_v28 = vpop.f32.mrf.mxu0  ;;  %v3269_v58 = vsel %vm11381_vm2, %v3267_v47, %v3268_v43  ;;  %v3273_v47 = vsel %vm11381_vm2, %v8301_v19, %v3272_v24 }
 0x1f6   : > { %v11746_v32 = vadd.f32 %v9070_v23, %v9006_v20  ;;  %v9031_v27 = vpop.f32.mrf.mxu1  ;;  %v8484_v62 = vcombine.low %v3266_v1, %v3269_v58  ;;  %v3380_v45 = vsel %vm11381_vm2, %v3378_v16, %v3379_v2  ;;  %v8282_v2 = vld [vmem:[%s11351_s7 + $0x2bc] sm:$0xc] }
 0x1f7   : > { %v9072_v54 = vpop.f32.mrf.mxu0 }
 0x1f8   : > { %v9032_v48 = vpop.f32.mrf.mxu1  ;;  %v9073_v51 = vadd.f32 %v9072_v54, %v9071_v28  ;;  %4802 = vmatmul.mubr.bf16.vlgmr.msra.gmra.mxu1 %v8484_v62  ;;  %v8314_v28 = vld [vmem:[%s11351_s7 + $0x724] sm:$0xc]  ;;  %v8316_v54 = vld [vmem:[%s11351_s7 + $0x72c] sm:$0x3] }
 0x1f9   : > { %v11753_v56 = vadd.f32 %v9032_v48, %v9031_v27  ;;  %v9074_v10 = vpop.f32.mrf.mxu0  ;;  %v8334_v52 = vrot.slane %v8314_v28, 10 }
 0x1fa   : > { %v11758_v60 = vadd.f32 %v9073_v51, %v11682_v22  ;;  %v11760_v61 = vpop.f32.mrf.mxu1  ;;  %v3377_v22 = vsel %vm11381_vm2, %v8333_v53, %v3376_v63  ;;  %v3276_v51 = vsel %vm11381_vm2, %v3274_v55, %v3275_v29  ;;  %v3383_v53 = vrot.slane %v8315_v31, 6  ;;  %v8317_v31 = vld [vmem:[%s11351_s7 + $0x754] sm:$0xc] }
 0x1fb   : > { %v9075_v4 = vpop.f32.mrf.mxu0  ;;  %v8493_v44 = vcombine.low %v3377_v22, %v3380_v45  ;;  %v8485_v62 = vcombine.low %v3273_v47, %v3276_v51  ;;  %v3386_v63 = vrot.slane %v8316_v54, 6 }
 0x1fc   : > { %v11767_v12 = vpop.f32.mrf.mxu1  ;;  %v9076_v15 = vadd.f32 %v9075_v4, %v9074_v10  ;;  %v3384_v6 = vsel %vm11381_vm2, %v8334_v52, %v3383_v53  ;;  %v10469_v52 = vld [vmem:[#allocation4 + $0x478] sm:$0xff]  }
 0x1fd   : > { %v9077_v18 = vpop.f32.mrf.mxu0  ;;  %4809 = vmatprep.mubr.bf16.mxu1 %v8493_v44  ;;  %9469 = vmatprep.subr.bf16.mxu1 %v10469_v52  ;;  %v10473_v52 = vld [vmem:[#allocation4 + $0x470] sm:$0xff]  }
 0x1fe   : > { %v11771_v20 = vadd.f32 %v9076_v15, %v9012_v7  ;;  %v9117_v23 = vpop.f32.mrf.mxu1  ;;  %v3385_v7 = vrot.slane %v3383_v53, 4 }
 0x1ff   : > { %v9078_v41 = vpop.f32.mrf.mxu0 }
 0x200   : > { %v9079_v27 = vadd.f32 %v9078_v41, %v9077_v18  ;;  %v9118_v35 = vpop.f32.mrf.mxu1  ;;  %4810 = vmatmul.mubr.bf16.gmra.mxu1 %v8485_v62  ;;  %v3279_v18 = vrot.slane %v8283_v13, 6  ;;  %v8335_v62 = vrot.slane %v8317_v31, 10 }
 0x201   : > { %v9119_v1 = vadd.f32 %v9118_v35, %v9117_v23  ;;  %v9080_v43 = vpop.f32.mrf.mxu0  ;;  %v8319_v35 = vld [vmem:[%s11351_s7 + $0x75c] sm:$0x3] }
 0x202   : > { %v11781_v46 = vadd.f32 %v9079_v27, %v11697_v3  ;;  %v11783_v48 = vpop.f32.mrf.mxu1  ;;  %v9018_v3 = vadd.f32 %v11705_v14, %v11699_v5  ;;  %v3387_v5 = vsel %vm11381_vm2, %v3385_v7, %v3386_v63  ;;  %v8302_v14 = vrot.slane %v8282_v2, 10  ;;  %v8318_v27 = vld [vmem:[%s11351_s7 + $0x758] sm:$0xf] }
 0x203   : > { %v11788_v10 = vadd.f32 %v9119_v1, %v11702_v11  ;;  %v9081_v58 = vpop.f32.mrf.mxu0  ;;  %v8284_v11 = vld [vmem:[%s11351_s7 + $0x2c4] sm:$0x3]  ;;  %v8494_v23 = vcombine.low %v3384_v6, %v3387_v5  ;;  %v3281_v41 = vrot.slane %v3279_v18, 4  ;;  %v9024_v1 = vadd.f32 %v11719_v39, %v11714_v36  ;;  %v10470_v2 = vld [vmem:[#allocation4 + $0x438] sm:$0xff]  }
 0x204   : > { %13942 = vst [vmem:[#allocation44_spill] sm:$0xff] %v11781_v46  ;;  %v9082_v4 = vadd.f32 %v9081_v58, %v9080_v43  ;;  %v11794_v37 = vpop.f32.mrf.mxu1  ;;  %v3280_v29 = vsel %vm11381_vm2, %v8302_v14, %v3279_v18  ;;  %v3282_v44 = vrot.slane %v8284_v11, 6  ;;  %v3390_v63 = vrot.slane %v8318_v27, 6  ;;  %9470 = vmatpush3.bf16.msra.mxu1 %v10470_v2  ;;  %v10474_v2 = vld [vmem:[#allocation4 + $0x430] sm:$0xff]  }
 0x205   : > { %13943 = vst [vmem:[#allocation45_spill] sm:$0xff] %v11788_v10  ;;  %v9083_v15 = vpop.f32.mrf.mxu0  ;;  %4817 = vmatprep.mubr.bf16.mxu1 %v8494_v23  ;;  %9471 = vmatprep.subr.bf16.mxu1 %v10473_v52  ;;  %v8338_v10 = vrot.slane %v8326_v40, 10 }
 0x206   : > { %v11799_v22 = vadd.f32 %v9082_v4, %v9018_v3  ;;  %v11801_v16 = vpop.f32.mrf.mxu1  ;;  %v3283_v54 = vsel %vm11381_vm2, %v3281_v41, %v3282_v44  ;;  %v8285_v3 = vld [vmem:[%s11351_s7 + $0x2ec] sm:$0xc]  ;;  %v8286_v4 = vld [vmem:[%s11351_s7 + $0x2f0] sm:$0xf]  ;;  %v3391_v39 = vsel %vm11381_vm2, %v8335_v62, %v3390_v63  ;;  %v3392_v7 = vrot.slane %v3390_v63, 4 }
 0x207   : > { %v9084_v19 = vpop.f32.mrf.mxu0  ;;  %v8486_v51 = vcombine.low %v3280_v29, %v3283_v54  ;;  %v3286_v23 = vrot.slane %v8286_v4, 6  ;;  %v8320_v44 = vld [vmem:[%s11351_s7 + $0x784] sm:$0xc] }
 0x208   : > { %13944 = vst [vmem:[#allocation46_spill] sm:$0xff] %v11799_v22  ;;  %v9085_v45 = vadd.f32 %v9084_v19, %v9083_v15  ;;  %v11805_v24 = vpop.f32.mrf.mxu1  ;;  %v8287_v15 = vld [vmem:[%s11351_s7 + $0x2f4] sm:$0x3]  ;;  %v8303_v19 = vrot.slane %v8285_v3, 10  ;;  %v8336_v63 = vrot.slane %v8320_v44, 10  ;;  %9472 = vmatpush3.bf16.msra.mxu1 %v10474_v2 }
 0x209   : > { %v9086_v28 = vpop.f32.mrf.mxu0  ;;  %4818 = vmatmul.mubr.bf16.gmra.mxu1 %v8486_v51  ;;  %v3289_v41 = vrot.slane %v8287_v15, 6  ;;  %v3288_v54 = vrot.slane %v3286_v23, 4  ;;  %v8322_v51 = vld [vmem:[%s11351_s7 + $0x78c] sm:$0x3] }
 0x20a   : > { %v11813_v47 = vadd.f32 %v9085_v45, %v11712_v33  ;;  %v11815_v55 = vpop.f32.mrf.mxu1  ;;  %v3393_v33 = vrot.slane %v8319_v35, 6  ;;  %v3287_v35 = vsel %vm11381_vm2, %v8303_v19, %v3286_v23 }
 0x20b   : > { %v9087_v43 = vpop.f32.mrf.mxu0 }
 0x20c   : > { %13945 = vst [vmem:[#allocation47_spill] sm:$0xff] %v11813_v47  ;;  %v9088_v53 = vadd.f32 %v9087_v43, %v9086_v28  ;;  %v11821_v58 = vpop.f32.mrf.mxu1  ;;  %v3394_v18 = vsel %vm11381_vm2, %v3392_v7, %v3393_v33  ;;  %v8321_v28 = vld [vmem:[%s11351_s7 + $0x788] sm:$0xf]  ;;  %v3400_v7 = vrot.slane %v8322_v51, 6  ;;  %v8323_v51 = vld [vmem:[%s11351_s7 + $0x7b4] sm:$0xc] }
 0x20d   : > { %v9089_v13 = vpop.f32.mrf.mxu0  ;;  %v8495_v29 = vcombine.low %v3391_v39, %v3394_v18  ;;  %v3397_v33 = vrot.slane %v8321_v28, 6  ;;  %v8290_v18 = vld [vmem:[%s11351_s7 + $0x324] sm:$0x3]  ;;  %v3059_v47 = vrot.slane %v3057_v34, 4 }
 0x20e   : > { %v11825_v6 = vadd.f32 %v9088_v53, %v9024_v1  ;;  %v11827_v36 = vpop.f32.mrf.mxu1  ;;  %v9030_v1 = vadd.f32 %v11741_v21, %v11733_v42 }
 0x20f   : > { %v9090_v11 = vpop.f32.mrf.mxu0  ;;  %4825 = vmatprep.mubr.bf16.mxu1 %v8495_v29  ;;  %v3398_v4 = vsel %vm11381_vm2, %v8336_v63, %v3397_v33  ;;  %v3399_v39 = vrot.slane %v3397_v33, 4  ;;  %v10477_v63 = vld [vmem:[#allocation4 + $0x468] sm:$0xff]  }
 0x210   : > { %13946 = vst [vmem:[#allocation48_spill] sm:$0xff] %v11825_v6  ;;  %v9091_v5 = vadd.f32 %v9090_v11, %v9089_v13  ;;  %v11832_v14 = vpop.f32.mrf.mxu1  ;;  %v8288_v11 = vld [vmem:[%s11351_s7 + $0x31c] sm:$0xc]  ;;  %9473 = vmatprep.subr.bf16.mxu1 %v10477_v63  ;;  %v10480_v63 = vld [vmem:[#allocation4 + $0x420] sm:$0xff]  }
 0x211   : > { %v9092_v45 = vpop.f32.mrf.mxu0 }
 0x212   : > { %v11839_v31 = vadd.f32 %v9091_v5, %v11728_v26  ;;  %v11841_v27 = vpop.f32.mrf.mxu1  ;;  %v3290_v26 = vsel %vm11381_vm2, %v3288_v54, %v3289_v41  ;;  %v8289_v5 = vld [vmem:[%s11351_s7 + $0x320] sm:$0xf]  ;;  %v11868_v41 = vld [vmem:[%s11351_s7 + $0x254] sm:$0xf]  ;;  %v8304_v54 = vrot.slane %v8288_v11, 10 }
 0x213   : > { %v9093_v43 = vpop.f32.mrf.mxu0  ;;  %v8487_v3 = vcombine.low %v3287_v35, %v3290_v26  ;;  %v8325_v26 = vld [vmem:[%s11351_s7 + $0x7bc] sm:$0x3]  ;;  %v8246_v11 = vld [vmem:[%s11351_s7 + $0x258] sm:$0x3] }
 0x214   : > { %13947 = vst [vmem:[#allocation49_spill] sm:$0xff] %v11839_v31  ;;  %v9094_v53 = vadd.f32 %v9093_v43, %v9092_v45  ;;  %v11848_v62 = vpop.f32.mrf.mxu1  ;;  %v3401_v45 = vsel %vm11381_vm2, %v3399_v39, %v3400_v7  ;;  %v3296_v43 = vrot.slane %v8290_v18, 6  ;;  %v10479_v39 = vld [vmem:[#allocation4 + $0x460] sm:$0xff]   ;;  %v8337_v18 = vrot.slane %v8323_v51, 10 }
 0x215   : > { %v9095_v13 = vpop.f32.mrf.mxu0  ;;  %4826 = vmatmul.mubr.bf16.gmra.mxu1 %v8487_v3  ;;  %v8496_v44 = vcombine.low %v3398_v4, %v3401_v45  ;;  %v3161_v4 = vrot.slane %v11868_v41, 6  ;;  %v8291_v41 = vld [vmem:[%s11351_s7 + $0x34c] sm:$0xc] }
 0x216   : > { %v11852_v42 = vadd.f32 %v9094_v53, %v9030_v1  ;;  %v11854_v21 = vpop.f32.mrf.mxu1  ;;  %v3293_v1 = vrot.slane %v8289_v5, 6  ;;  %v8324_v53 = vld [vmem:[%s11351_s7 + $0x7b8] sm:$0xf] }
 0x217   : > { %v9096_v15 = vpop.f32.mrf.mxu0  ;;  %4833 = vmatprep.mubr.bf16.mxu1 %v8496_v44 }
 0x218   : > { %13948 = vst [vmem:[#allocation50_spill] sm:$0xff] %v11852_v42  ;;  %v9097_v19 = vadd.f32 %v9096_v15, %v9095_v13  ;;  %v11861_v23 = vpop.f32.mrf.mxu1  ;;  %v3295_v2 = vrot.slane %v3293_v1, 4  ;;  %v10478_v13 = vld [vmem:[#allocation4 + $0x428] sm:$0xff]   ;;  %v8244_v15 = vld [vmem:[%s11351_s7 + $0x250] sm:$0xc] }
 0x219   : > { %v11865_v29 = vpop.f32.mrf.mxu0  ;;  %9474 = vmatpush3.bf16.msra.mxu1 %v10478_v13  ;;  %v8293_v13 = vld [vmem:[%s11351_s7 + $0x354] sm:$0x3]  ;;  %v8328_v42 = vld [vmem:[%s11351_s7 + $0x7ec] sm:$0x3] }
 0x21a   : > { %v11871_v28 = vadd.f32 %v9097_v19, %v11753_v56  ;;  %v11873_v35 = vpop.f32.mrf.mxu1  ;;  %v3294_v56 = vsel %vm11381_vm2, %v8304_v54, %v3293_v1  ;;  %v3297_v5 = vsel %vm11381_vm2, %v3295_v2, %v3296_v43  ;;  %v3404_v19 = vrot.slane %v8324_v53, 6  ;;  %v8292_v1 = vld [vmem:[%s11351_s7 + $0x350] sm:$0xf]  ;;  %9475 = vmatprep.subr.bf16.mxu1 %v10479_v39 }
 0x21b   : > { %v11876_v52 = vpop.f32.mrf.mxu0  ;;  %v8488_v44 = vcombine.low %v3294_v56, %v3297_v5  ;;  %v3407_v54 = vrot.slane %v8325_v26, 6  ;;  %v8268_v2 = vrot.slane %v8244_v15, 10  ;;  %v3163_v56 = vrot.slane %v3161_v4, 4  ;;  %v11907_v26 = vld [vmem:[%s11351_s7 + $0x244] sm:$0xc] }
 0x21c   : > { %13949 = vst [vmem:[#allocation51_spill] sm:$0xff] %v11871_v28  ;;  %v11880_v33 = vpop.f32.mrf.mxu1  ;;  %v3405_v43 = vsel %vm11381_vm2, %v8337_v18, %v3404_v19  ;;  %v3406_v51 = vrot.slane %v3404_v19, 4  ;;  %v3164_v5 = vrot.slane %v8246_v11, 6  ;;  %v8305_v18 = vrot.slane %v8291_v41, 10  ;;  %v8327_v28 = vld [vmem:[%s11351_s7 + $0x7e8] sm:$0xf] }
 0x21d   : > { %v11884_v3 = vpop.f32.mrf.mxu0  ;;  %4834 = vmatmul.mubr.bf16.gmra.mxu1 %v8488_v44  ;;  %v3300_v19 = vrot.slane %v8292_v1, 6  ;;  %v11921_v44 = vld [vmem:[%s11351_s7 + $0x284] sm:$0xf] }
 0x21e   : > { %v11887_v7 = vpop.f32.mrf.mxu1  ;;  %v3408_v0 = vsel %vm11381_vm2, %v3406_v51, %v3407_v54  ;;  %9476 = vmatpush3.bf16.msra.mxu1 %v10480_v63  ;;  %v8236_v54 = vrot.slane %v11907_v26, 10  ;;  %v3303_v63 = vrot.slane %v8293_v13, 6  ;;  %v10483_v51 = vld [vmem:[#allocation4 + $0x458] sm:$0xff]   ;;  %v11947_v26 = vld [vmem:[%s11351_s7 + $0x280] sm:$0xc] }
 0x21f   : > { %v11893_v45 = vpop.f32.mrf.mxu0  ;;  %v8497_v11 = vcombine.low %v3405_v43, %v3408_v0  ;;  %v3301_v41 = vsel %vm11381_vm2, %v8305_v18, %v3300_v19  ;;  %v3302_v1 = vrot.slane %v3300_v19, 4  ;;  %v11940_v0 = vsel %vm11381_vm2, %v8268_v2, %v3161_v4  ;;  %13954 = vst [vmem:[#allocation56_spill] sm:$0xff] %v11947_v26  ;;  %v11950_v13 = vld [vmem:[%s11351_s7 + $0x288] sm:$0x3]  ;;  %9477 = vmatprep.subr.bf16.mxu1 %v10483_v51  ;;  %v11959_v2 = vld [vmem:[%s11351_s7 + $0x274] sm:$0xc] }
 0x220   : > { %v11897_v50 = vpop.f32.mrf.mxu1  ;;  %13952 = vst [vmem:[#allocation54_spill] sm:$0xff] %v11940_v0  ;;  %v11944_v43 = vsel %vm11381_vm2, %v3163_v56, %v3164_v5  ;;  %13955 = vst [vmem:[#allocation57_spill] sm:$0xff] %v11950_v13  ;;  %v3060_v4 = vrot.slane %v11913_v9, 6  ;;  %v11965_v18 = vld [vmem:[%s11351_s7 + $0x27c] sm:$0x3]  ;;  %v10485_v51 = vld [vmem:[#allocation4 + $0x450] sm:$0xff]   ;;  %v9122_v56 = vadd.f32 %v11794_v37, %v11783_v48  ;;  %v11991_v13 = vsel %vm11381_vm2, %v8236_v54, %v3057_v34 }
 0x221   : > { %v11904_v53 = vpop.f32.mrf.mxu0  ;;  %4841 = vmatprep.mubr.bf16.mxu1 %v8497_v11  ;;  %13953 = vst [vmem:[#allocation55_spill] sm:$0xff] %v11944_v43  ;;  %v3304_v19 = vsel %vm11381_vm2, %v3302_v1, %v3303_v63  ;;  %v10484_v11 = vld [vmem:[#allocation4 + $0x418] sm:$0xff]   ;;  %13956 = vst [vmem:[#allocation58_spill] sm:$0xff] %v11959_v2  ;;  %v3411_v1 = vrot.slane %v8327_v28, 6  ;;  %v3414_v63 = vrot.slane %v8328_v42, 6  ;;  %v13958_v42 = vrot.slane %v11921_v44, 6 }
 0x222   : > { %v11910_v39 = vpop.f32.mrf.mxu1  ;;  %v8489_v5 = vcombine.low %v3301_v41, %v3304_v19  ;;  %13957 = vst [vmem:[#allocation59_spill] sm:$0xff] %v11965_v18  ;;  %9478 = vmatpush3.bf16.msra.mxu1 %v10484_v11  ;;  %v8294_v41 = vld [vmem:[%s11351_s7 + $0x37c] sm:$0xc]  ;;  %v8295_v19 = vld [vmem:[%s11351_s7 + $0x380] sm:$0xf]  ;;  %13960 = vst [vmem:[#allocation61_spill] sm:$0xff] %v11991_v13  ;;  %v12008_v48 = vsel %vm11381_vm2, %v3059_v47, %v3060_v4  ;;  %v9036_v18 = vadd.f32 %v11767_v12, %v11760_v61 }
 0x223   : > { %v11917_v15 = vpop.f32.mrf.mxu0  ;;  %v11979_v28 = vrot.slane %v13958_v42, 4  ;;  %v3412_v9 = vsel %vm11381_vm2, %v8338_v10, %v3411_v1  ;;  %v3413_v46 = vrot.slane %v3411_v1, 4  ;;  %v8296_v43 = vld [vmem:[%s11351_s7 + $0x384] sm:$0x3]  ;;  %9479 = vmatprep.subr.bf16.mxu1 %v10485_v51  ;;  %v13961_v42 = vrot.slane %v11924_v25, 6  ;;  %13963 = vst [vmem:[#allocation63_spill] sm:$0xff] %v12008_v48 }
 0x224   : > { %v11926_v59 = vpop.f32.mrf.mxu1  ;;  %v11999_v10 = vld [vmem:[%s11351_s7 + $0x2b0] sm:$0xc]  ;;  %v12002_v1 = vld [vmem:[%s11351_s7 + $0x2b4] sm:$0xf]  ;;  %v12011_v34 = vld [vmem:[%s11351_s7 + $0x2a8] sm:$0xf]  ;;  %v9125_v2 = vadd.f32 %v11805_v24, %v11801_v16  ;;  %v2342_v16 = vadd.f32 %v9122_v56, %v11710_v30  ;;  %v9128_v24 = vadd.f32 %v11821_v58, %v11815_v55 }
 0x225   : > { %v11931_v49 = vpop.f32.mrf.mxu0  ;;  %4842 = vmatmul.mubr.bf16.gmra.mxu1 %v8489_v5  ;;  %13959 = vst [vmem:[#allocation60_spill] sm:$0xff] %v11979_v28  ;;  %v10486_v5 = vld [vmem:[#allocation4 + $0x410] sm:$0xff]   ;;  %v11995_v28 = vrot.slane %v13961_v42, 4  ;;  %v3415_v37 = vsel %vm11381_vm2, %v3413_v46, %v3414_v63  ;;  %v8306_v54 = vrot.slane %v8294_v41, 10  ;;  %v3307_v42 = vrot.slane %v8295_v19, 6  ;;  %v10489_v11 = vld [vmem:[#allocation4 + $0x448] sm:$0xff]  }
 0x226   : > { %v11936_v31 = vpop.f32.mrf.mxu1  ;;  %9480 = vmatpush3.bf16.msra.mxu1 %v10486_v5  ;;  %v8498_v47 = vcombine.low %v3412_v9, %v3415_v37  ;;  %v3310_v4 = vrot.slane %v8296_v43, 6  ;;  %v8329_v13 = vld [vmem:[%s11351_s7 + $0x814] sm:$0xc]  ;;  %v8330_v48 = vld [vmem:[%s11351_s7 + $0x818] sm:$0xf]  ;;  %v10491_v26 = vld [vmem:[#allocation4 + $0x440] sm:$0xff]   ;;  %v9131_v43 = vadd.f32 %v11832_v14, %v11827_v36  ;;  %v9134_v37 = vadd.f32 %v11848_v62, %v11841_v27 }
 0x227   : > { %13951 = vst [vmem:[#allocation53_spill] sm:$0xff] %v11936_v31  ;;  %v11955_v6 = vpop.f32.mrf.mxu0  ;;  %13962 = vst [vmem:[#allocation62_spill] sm:$0xff] %v11995_v28  ;;  %v10490_v28 = vld [vmem:[#allocation4 + $0x408] sm:$0xff]   ;;  %v8270_v63 = vrot.slane %v11999_v10, 10  ;;  %v3175_v41 = vrot.slane %v12002_v1, 6  ;;  %v3308_v61 = vsel %vm11381_vm2, %v8306_v54, %v3307_v42  ;;  %v3309_v12 = vrot.slane %v3307_v42, 4  ;;  %9481 = vmatprep.subr.bf16.mxu1 %v10489_v11 }
 0x228   : > { %v11962_v22 = vpop.f32.mrf.mxu1  ;;  %v3071_v19 = vrot.slane %v12011_v34, 6  ;;  %4849 = vmatprep.mubr.bf16.mxu1 %v8498_v47  ;;  %v8331_v5 = vld [vmem:[%s11351_s7 + $0x81c] sm:$0x3]  ;;  %v8339_v30 = vrot.slane %v8329_v13, 10  ;;  %v3418_v56 = vrot.slane %v8330_v48, 6  ;;  %v10492_v55 = vld [vmem:[#allocation4 + $0x400] sm:$0xff]   ;;  %v2347_v58 = vadd.f32 %v9125_v2, %v11717_v38 }
 0x229   : > { %v11967_v31 = vpop.f32.mrf.mxu0  ;;  %v3311_v11 = vsel %vm11381_vm2, %v3309_v12, %v3310_v4  ;;  %v9137_v36 = vadd.f32 %v11861_v23, %v11854_v21  ;;  %v9100_v14 = vadd.f32 %v11876_v52, %v11865_v29  ;;  %v9140_v62 = vadd.f32 %v11880_v33, %v11873_v35  ;;  %v8298_v2 = vld [vmem:[%s11351_s7 + $0x3b0] sm:$0xf]  ;;  %v8297_v35 = vld [vmem:[%s11351_s7 + $0x3ac] sm:$0xc]  ;;  %v8299_v33 = vld [vmem:[%s11351_s7 + $0x3b4] sm:$0x3] }
 0x22a   : > { %v11975_v40 = vpop.f32.mrf.mxu1  ;;  %9482 = vmatpush3.bf16.msra.mxu1 %v10490_v28  ;;  %v8490_v27 = vcombine.low %v3308_v61, %v3311_v11  ;;  %v3419_v28 = vsel %vm11381_vm2, %v8339_v30, %v3418_v56  ;;  %v3420_v48 = vrot.slane %v3418_v56, 4  ;;  %v3421_v38 = vrot.slane %v8331_v5, 6  ;;  %v13967_v30 = vld [vmem:[#allocation46_spill] sm:$0xff]  ;;  %v8387_v10 = vld [vmem:[%s11351_s7 + $0xc34] sm:$0xc] }
 0x22b   : > { %v11987_v0 = vpop.f32.mrf.mxu0  ;;  %9483 = vmatprep.subr.bf16.mxu1 %v10491_v26  ;;  %v2350_v21 = vadd.f32 %v9128_v24, %v11723_v57  ;;  %v9143_v23 = vadd.f32 %v11897_v50, %v11887_v7  ;;  %v9183_v29 = vadd.f32 %v11893_v45, %v11884_v3  ;;  %v9186_v52 = vadd.f32 %v11917_v15, %v11904_v53  ;;  %v13964_v24 = vld [vmem:[#allocation44_spill] sm:$0xff] }
 0x22c   : > { %v12004_v51 = vpop.f32.mrf.mxu1  ;;  %v2355_v47 = vadd.f32 %v9131_v43, %v11731_v8  ;;  %v12063_v4 = vadd.f32 %v9134_v37, %v11746_v32  ;;  %v9146_v57 = vadd.f32 %v11926_v59, %v11910_v39  ;;  %v3422_v50 = vsel %vm11381_vm2, %v3420_v48, %v3421_v38  ;;  %v13966_v37 = vld [vmem:[#allocation45_spill] sm:$0xff] }
 0x22d   : > { %v12019_v25 = vpop.f32.mrf.mxu0  ;;  %4850 = vmatmul.mubr.bf16.gmra.mxu1 %v8490_v27  ;;  %v12070_v3 = vadd.f32 %v9137_v36, %v11758_v60  ;;  %v12072_v7 = vadd.f32 %v9100_v14, %v9036_v18  ;;  %v9189_v8 = vadd.f32 %v11955_v6, %v11931_v49  ;;  %v8499_v45 = vcombine.low %v3419_v28, %v3422_v50  ;;  %v8404_v6 = vld [vmem:[%s11351_s7 + $0xb50] sm:$0xc]  ;;  %v8406_v27 = vld [vmem:[%s11351_s7 + $0xb58] sm:$0x3] }
 0x22e   : > { %v12023_v46 = vpop.f32.mrf.mxu1  ;;  %9484 = vmatpush3.bf16.msra.mxu1 %v10492_v55  ;;  %v12077_v53 = vadd.f32 %v9140_v62, %v11771_v20  ;;  %v8307_v39 = vrot.slane %v8297_v35, 10  ;;  %v3314_v15 = vrot.slane %v8298_v2, 6  ;;  %v3317_v12 = vrot.slane %v8299_v33, 6  ;;  %v13965_v43 = vld [vmem:[#allocation53_spill] sm:$0xff]  ;;  %v8405_v20 = vld [vmem:[%s11351_s7 + $0xb54] sm:$0xf] }
 0x22f   : > { %v12034_v9 = vpop.f32.mrf.mxu0  ;;  %v12080_v60 = vadd.f32 %v9143_v23, %v13964_v24  ;;  %v9149_v18 = vadd.f32 %v11962_v22, %v13965_v43  ;;  %v2436_v11 = vadd.f32 %v9183_v29, %v13966_v37  ;;  %v12085_v49 = vadd.f32 %v9186_v52, %v2342_v16  ;;  %4857 = vmatprep.mubr.bf16.mxu1 %v8499_v45  ;;  %v8372_v52 = vld [vmem:[%s11351_s7 + $0xb44] sm:$0xc]  ;;  %v8373_v35 = vld [vmem:[%s11351_s7 + $0xb48] sm:$0xf]  ;;  %v13968_v33 = vld [vmem:[#allocation47_spill] sm:$0xff] }
 0x230   : > { %v9154_v54 = vpop.f32.mrf.mxu1  ;;  %v12090_v56 = vadd.f32 %v9146_v57, %v13967_v30  ;;  %v9192_v55 = vadd.f32 %v11987_v0, %v11967_v31  ;;  %v3315_v22 = vsel %vm11381_vm2, %v8307_v39, %v3314_v15  ;;  %v3316_v14 = vrot.slane %v3314_v15, 4  ;;  %v13969_v45 = vld [vmem:[#allocation48_spill] sm:$0xff]  ;;  %v8407_v24 = vld [vmem:[%s11351_s7 + $0xb80] sm:$0xc] }
 0x231   : > { %v9196_v42 = vpop.f32.mrf.mxu0  ;;  %v9152_v16 = vadd.f32 %v12004_v51, %v11975_v40  ;;  %v9155_v62 = vadd.f32 %v9154_v54, %v12023_v46  ;;  %v9195_v28 = vadd.f32 %v12034_v9, %v12019_v25  ;;  %v2444_v38 = vadd.f32 %v9189_v8, %v2347_v58  ;;  %v8374_v9 = vld [vmem:[%s11351_s7 + $0xb4c] sm:$0x3]  ;;  %v13970_v43 = vld [vmem:[#allocation49_spill] sm:$0xff] }
 0x232   : > { %v9156_v13 = vpop.f32.mrf.mxu1  ;;  %v3318_v0 = vsel %vm11381_vm2, %v3316_v14, %v3317_v12  ;;  %v8428_v23 = vrot.slane %v8404_v6, 10  ;;  %v3682_v29 = vrot.slane %v8405_v20, 6  ;;  %v12107_v57 = vadd.f32 %v9149_v18, %v13968_v33  ;;  %v13971_v20 = vld [vmem:[#allocation50_spill] sm:$0xff] }
 0x233   : > { %v9197_v26 = vpop.f32.mrf.mxu0  ;;  %v8491_v46 = vcombine.low %v3315_v22, %v3318_v0  ;;  %v3685_v25 = vrot.slane %v8406_v27, 6  ;;  %v12115_v39 = vadd.f32 %v9152_v16, %v13969_v45  ;;  %v3578_v12 = vrot.slane %v8373_v35, 6  ;;  %v8409_v27 = vld [vmem:[%s11351_s7 + $0xb88] sm:$0x3] }
 0x234   : > { %v9157_v61 = vpop.f32.mrf.mxu1  ;;  %v9198_v2 = vadd.f32 %v9197_v26, %v9196_v42  ;;  %v12110_v42 = vld [vmem:[#allocation7 + $0x1] ss:$0 sm:$0xff]  ;;  %v2447_v26 = vadd.f32 %v9192_v55, %v2350_v21  ;;  %v3683_v50 = vsel %vm11381_vm2, %v8428_v23, %v3682_v29  ;;  %v3684_v8 = vrot.slane %v3682_v29, 4 }
 0x235   : > { %v9199_v32 = vpop.f32.mrf.mxu0  ;;  %v9158_v40 = vadd.f32 %v9157_v61, %v9156_v13  ;;  %v12117_v13 = vadd.f32 %v9195_v28, %v2355_v47  ;;  %4858 = vmatmul.mubr.bf16.gmra.mxu1 %v8491_v46  ;;  %v8396_v61 = vrot.slane %v8372_v52, 10  ;;  %v12122_v18 = vadd.f32 %v9155_v62, %v13970_v43  ;;  %v12133_v28 = vld [vmem:[#allocation9 + $0x1] ss:$0 sm:$0xff] }
 0x236   : > { %v9159_v59 = vpop.f32.mrf.mxu1  ;;  %v3686_v37 = vsel %vm11381_vm2, %v3684_v8, %v3685_v25  ;;  %v3581_v6 = vrot.slane %v8374_v9, 6  ;;  %v13972_v9 = vld [vmem:[#allocation51_spill] sm:$0xff] }
 0x237   : > { %v9200_v5 = vpop.f32.mrf.mxu0  ;;  %v12130_v47 = vadd.f32 %v9158_v40, %v13971_v20  ;;  %v8516_v14 = vcombine.low %v3683_v50, %v3686_v37  ;;  %v3692_v40 = vrot.slane %v8409_v27, 6 }
 0x238   : > { %v9160_v36 = vpop.f32.mrf.mxu1  ;;  %v9201_v54 = vadd.f32 %v9200_v5, %v9199_v32  ;;  %v8408_v32 = vld [vmem:[%s11351_s7 + $0xb84] sm:$0xf]  ;;  %v12125_v5 = vadd.f32 %v9198_v2, %v12063_v4  ;;  %v3579_v4 = vsel %vm11381_vm2, %v8396_v61, %v3578_v12  ;;  %v3580_v2 = vrot.slane %v3578_v12, 4 }
 0x239   : > { %v9202_v48 = vpop.f32.mrf.mxu0  ;;  %v9161_v30 = vadd.f32 %v9160_v36, %v9159_v59  ;;  %4995 = vmatprep.mubr.bf16.mxu1 %v8516_v14  ;;  %v8429_v59 = vrot.slane %v8407_v24, 10  ;;  %v3689_v33 = vrot.slane %v8408_v32, 6 }
 0x23a   : > { %v9162_v31 = vpop.f32.mrf.mxu1  ;;  %v2460_v0 = vadd.f32 %v9201_v54, %v12070_v3 }
 0x23b   : > { %v9203_v51 = vpop.f32.mrf.mxu0  ;;  %v12144_v54 = vadd.f32 %v9161_v30, %v13972_v9  ;;  %v3691_v8 = vrot.slane %v3689_v33, 4  ;;  %v3690_v12 = vsel %vm11381_vm2, %v8429_v59, %v3689_v33  ;;  %v8376_v33 = vld [vmem:[%s11351_s7 + $0xb78] sm:$0xf] }
 0x23c   : > { %v9163_v58 = vpop.f32.mrf.mxu1  ;;  %v9204_v16 = vadd.f32 %v9203_v51, %v9202_v48  ;;  %v3582_v48 = vsel %vm11381_vm2, %v3580_v2, %v3581_v6 }
 0x23d   : > { %v9205_v15 = vpop.f32.mrf.mxu0  ;;  %v9164_v23 = vadd.f32 %v9163_v58, %v9162_v31  ;;  %v8508_v31 = vcombine.low %v3579_v4, %v3582_v48 }
 0x23e   : > { %v9903_v21 = vpop.f32.mrf.mxu1  ;;  %v2463_v50 = vadd.f32 %v9204_v16, %v12077_v53  ;;  %v3693_v53 = vsel %vm11381_vm2, %v3691_v8, %v3692_v40 }
 0x23f   : > { %v2541_v55 = vadd.f32 %v9903_v21, %v2444_v38  ;;  %v9206_v22 = vpop.f32.mrf.mxu0  ;;  %4996 = vmatmul.mubr.bf16.vlgmr.msra.gmra.mxu1 %v8508_v31  ;;  %v8517_v14 = vcombine.low %v3690_v12, %v3693_v53  ;;  %v10431_v53 = vld [vmem:[#allocation4 + $0x2b8] sm:$0xff]  }
 0x240   : > { %v2532_v62 = vpop.f32.mrf.mxu1  ;;  %v9207_v36 = vadd.f32 %v9206_v22, %v9205_v15 }
 0x241   : > { %v2605_v29 = vmul.f32 %v12110_v42, %v2541_v55  ;;  %v2533_v52 = vadd.f32 %v2532_v62, %v2436_v11  ;;  %v9208_v35 = vpop.f32.mrf.mxu0  ;;  %5003 = vmatprep.mubr.bf16.mxu1 %v8517_v14 }
 0x242   : > { %v9904_v38 = vpop.f32.mrf.mxu1  ;;  %v2468_v20 = vadd.f32 %v9207_v36, %v12080_v60 }
 0x243   : > { %v2629_v3 = vadd.f32 %v12133_v28, %v2605_v29  ;;  %v2603_v51 = vmul.f32 %v12110_v42, %v2533_v52  ;;  %v2544_v46 = vadd.f32 %v9904_v38, %v2447_v26  ;;  %v9209_v25 = vpop.f32.mrf.mxu0  ;;  %v12151_v26 = vadd.f32 %v9164_v23, %v12072_v7 }
 0x244   : > { %v9210_v11 = vadd.f32 %v9209_v25, %v9208_v35  ;;  %v2535_v58 = vpop.f32.mrf.mxu1 }
 0x245   : > { %vm2645_vm4 = vcmp.ge.f32.partialorder %v2629_v3, 0.0  ;;  %v2661_v45 = vmul.f32 0.01, %v2629_v3  ;;  %v2606_v15 = vmul.f32 %v12110_v42, %v2544_v46  ;;  %v9211_v61 = vpop.f32.mrf.mxu0  ;;  %v2627_v24 = vadd.f32 %v12133_v28, %v2603_v51 }
 0x246   : > { %v2536_v32 = vadd.f32 %v2535_v58, %v12085_v49  ;;  %v9907_v43 = vpop.f32.mrf.mxu1  ;;  %v12160_v30 = vadd.f32 %v9210_v11, %v12090_v56 }
 0x247   : > { %v2630_v21 = vadd.f32 %v12133_v28, %v2606_v15  ;;  %v2557_v37 = vadd.f32 %v9907_v43, %v2460_v0  ;;  %v9212_v6 = vpop.f32.mrf.mxu0  ;;  %v12163_v7 = vsel %vm2645_vm4, %v2629_v3, %v2661_v45  ;;  %v2659_v4 = vmul.f32 0.01, %v2627_v24  ;;  %v8375_v15 = vld [vmem:[%s11351_s7 + $0xb74] sm:$0xc] }
 0x248   : > { %v2604_v55 = vmul.f32 %v12110_v42, %v2536_v32  ;;  %v9213_v22 = vadd.f32 %v9212_v6, %v9211_v61  ;;  %v2548_v49 = vpop.f32.mrf.mxu1  ;;  %vm2643_vm6 = vcmp.ge.f32.partialorder %v2627_v24, 0.0  ;;  %v3585_v61 = vrot.slane %v8376_v33, 6 }
 0x249   : > { %vm2646_vm5 = vcmp.ge.f32.partialorder %v2630_v21, 0.0  ;;  %v2662_v27 = vmul.f32 0.01, %v2630_v21  ;;  %v2609_v16 = vmul.f32 %v12110_v42, %v2557_v37  ;;  %v2549_v62 = vadd.f32 %v2548_v49, %v12117_v13  ;;  %v9214_v0 = vpop.f32.mrf.mxu0 }
 0x24a   : > { %v2628_v60 = vadd.f32 %v12133_v28, %v2604_v55  ;;  %v9908_v56 = vpop.f32.mrf.mxu1  ;;  %v2476_v2 = vadd.f32 %v9213_v22, %v12107_v57  ;;  %v2675_v31 = vsel %vm2643_vm6, %v2627_v24, %v2659_v4  ;;  %v8397_v14 = vrot.slane %v8375_v15, 10 }
 0x24b   : > { %v2678_v23 = vsel %vm2646_vm5, %v2630_v21, %v2662_v27  ;;  %v2633_v29 = vadd.f32 %v12133_v28, %v2609_v16  ;;  %v2607_v52 = vmul.f32 %v12110_v42, %v2549_v62  ;;  %v2560_v35 = vadd.f32 %v9908_v56, %v2463_v50  ;;  %v9215_v59 = vpop.f32.mrf.mxu0 }
 0x24c   : > { %v2692_v36 = vpack.c.bf16 %v2678_v23, %v12163_v7  ;;  %v9216_v13 = vadd.f32 %v9215_v59, %v9214_v0  ;;  %v2551_v38 = vpop.f32.mrf.mxu1  ;;  %vm2644_vm7 = vcmp.ge.f32.partialorder %v2628_v60, 0.0  ;;  %v2660_v48 = vmul.f32 0.01, %v2628_v60  ;;  %v10433_v7 = vld [vmem:[#allocation4 + $0x2f0] sm:$0xff]   ;;  %v8377_v23 = vld [vmem:[%s11351_s7 + $0xb7c] sm:$0x3] }
 0x24d   : > { %v2665_v40 = vmul.f32 0.01, %v2633_v29  ;;  %v2631_v57 = vadd.f32 %v12133_v28, %v2607_v52  ;;  %v2610_v3 = vmul.f32 %v12110_v42, %v2560_v35  ;;  %v2552_v51 = vadd.f32 %v2551_v38, %v12125_v5  ;;  %v9217_v46 = vpop.f32.mrf.mxu0 }
 0x24e   : > { %v9911_v25 = vpop.f32.mrf.mxu1  ;;  %v2676_v9 = vsel %vm2644_vm7, %v2628_v60, %v2660_v48  ;;  %v2479_v11 = vadd.f32 %v9216_v13, %v12115_v39  ;;  %vm2649_vm8 = vcmp.ge.f32.partialorder %v2633_v29, 0.0  ;;  %v3587_v13 = vrot.slane %v3585_v61, 4 }
 0x24f   : > { %v2634_v58 = vadd.f32 %v12133_v28, %v2610_v3  ;;  %v2608_v50 = vmul.f32 %v12110_v42, %v2552_v51  ;;  %v2573_v8 = vadd.f32 %v9911_v25, %v2476_v2  ;;  %v9218_v45 = vpop.f32.mrf.mxu0  ;;  %v2663_v12 = vmul.f32 0.01, %v2631_v57  ;;  %v10435_v2 = vld [vmem:[#allocation4 + $0x2b0] sm:$0xff]  }
 0x250   : > { %v9219_v32 = vadd.f32 %v9218_v45, %v9217_v46  ;;  %v2564_v43 = vpop.f32.mrf.mxu1  ;;  %v2691_v5 = vpack.c.bf16 %v2676_v9, %v2675_v31  ;;  %vm2647_vm9 = vcmp.ge.f32.partialorder %v2631_v57, 0.0  ;;  %v2681_v49 = vsel %vm2649_vm8, %v2633_v29, %v2665_v40 }
 0x251   : > { %v2666_v21 = vmul.f32 0.01, %v2634_v58  ;;  %v2632_v24 = vadd.f32 %v12133_v28, %v2608_v50  ;;  %v2613_v39 = vmul.f32 %v12110_v42, %v2573_v8  ;;  %v2565_v37 = vadd.f32 %v2564_v43, %v2468_v20  ;;  %v9220_v6 = vpop.f32.mrf.mxu0 }
 0x252   : > { %9933 = vmatprep.mubr.bf16.mxu0 %v2691_v5  ;;  %v9912_v55 = vpop.f32.mrf.mxu1  ;;  %v2484_v22 = vadd.f32 %v9219_v32, %v12122_v18  ;;  %vm2650_vm10 = vcmp.ge.f32.partialorder %v2634_v58, 0.0  ;;  %v2679_v56 = vsel %vm2647_vm9, %v2631_v57, %v2663_v12  ;;  %v3586_v57 = vsel %vm11381_vm2, %v8397_v14, %v3585_v61  ;;  %v10441_v12 = vld [vmem:[#allocation4 + $0x2e0] sm:$0xff]  }
 0x253   : > { %v2637_v27 = vadd.f32 %v12133_v28, %v2613_v39  ;;  %v2611_v16 = vmul.f32 %v12110_v42, %v2565_v37  ;;  %9934 = vmatmul.mubr.bf16.vlgmr.msra.gmra.mxu0 %v2692_v36  ;;  %v2576_v62 = vadd.f32 %v9912_v55, %v2479_v11  ;;  %v9221_v0 = vpop.f32.mrf.mxu0  ;;  %vm2648_vm11 = vcmp.ge.f32.partialorder %v2632_v24, 0.0  ;;  %v10437_v36 = vld [vmem:[#allocation4 + $0x2e8] sm:$0xff]   ;;  %v12209_v14 = vld [vmem:[%s11351_s7 + $0x2a4] sm:$0xc] }
 0x254   : > { %v9222_v20 = vadd.f32 %v9221_v0, %v9220_v6  ;;  %v2567_v4 = vpop.f32.mrf.mxu1  ;;  %9278 = vmatpush3.bf16.msra.mxu0 %v10431_v53  ;;  %v2664_v60 = vmul.f32 0.01, %v2632_v24  ;;  %v2682_v18 = vsel %vm2650_vm10, %v2634_v58, %v2666_v21  ;;  %v10439_v58 = vld [vmem:[#allocation4 + $0x2a8] sm:$0xff]   ;;  %v3588_v50 = vrot.slane %v8377_v23, 6  ;;  %v10445_v6 = vld [vmem:[#allocation4 + $0x2d8] sm:$0xff]  }
 0x255   : > { %v2635_v29 = vadd.f32 %v12133_v28, %v2611_v16  ;;  %v2614_v52 = vmul.f32 %v12110_v42, %v2576_v62  ;;  %v2568_v35 = vadd.f32 %v2567_v4, %v12160_v30  ;;  %v9223_v59 = vpop.f32.mrf.mxu0  ;;  %9279 = vmatprep.subr.bf16.mxu0 %v10433_v7  ;;  %v2669_v38 = vmul.f32 0.01, %v2637_v27 }
 0x256   : > { %v9915_v48 = vpop.f32.mrf.mxu1  ;;  %v2680_v33 = vsel %vm2648_vm11, %v2632_v24, %v2664_v60  ;;  %v2694_v40 = vpack.c.bf16 %v2682_v18, %v2681_v49  ;;  %vm2653_vm12 = vcmp.ge.f32.partialorder %v2637_v27, 0.0  ;;  %v2487_v11 = vadd.f32 %v9222_v20, %v12130_v47  ;;  %v10443_v47 = vld [vmem:[#allocation4 + $0x2a0] sm:$0xff]   ;;  %v8410_v60 = vld [vmem:[%s11351_s7 + $0xbb0] sm:$0xc] }
 0x257   : > { %v2638_v3 = vadd.f32 %v12133_v28, %v2614_v52  ;;  %v2612_v51 = vmul.f32 %v12110_v42, %v2568_v35  ;;  %v9224_v46 = vpop.f32.mrf.mxu0  ;;  %v2693_v25 = vpack.c.bf16 %v2680_v33, %v2679_v56  ;;  %v2667_v30 = vmul.f32 0.01, %v2635_v29  ;;  %v13974_v52 = vld [vmem:[#allocation56_spill] sm:$0xff] }
 0x258   : > { %v9225_v31 = vadd.f32 %v9224_v46, %v9223_v59  ;;  %v2580_v9 = vpop.f32.mrf.mxu1  ;;  %9280 = vmatpush3.bf16.msra.mxu0 %v10435_v2  ;;  %vm2651_vm13 = vcmp.ge.f32.partialorder %v2635_v29, 0.0  ;;  %v2685_v5 = vsel %vm2653_vm12, %v2637_v27, %v2669_v38  ;;  %v3589_v53 = vsel %vm11381_vm2, %v3587_v13, %v3588_v50  ;;  %v12212_v27 = vld [vmem:[%s11351_s7 + $0x2ac] sm:$0x3]  ;;  %v13978_v50 = vld [vmem:[#allocation60_spill] sm:$0xff] }
 0x259   : > { %v2670_v8 = vmul.f32 0.01, %v2638_v3  ;;  %v2636_v45 = vadd.f32 %v12133_v28, %v2612_v51  ;;  %v2581_v15 = vadd.f32 %v2580_v9, %v2484_v22  ;;  %9937 = vmatprep.mubr.bf16.mxu0 %v2693_v25  ;;  %v9226_v61 = vpop.f32.mrf.mxu0  ;;  %9281 = vmatprep.subr.bf16.mxu0 %v10437_v36  ;;  %vm2654_vm14 = vcmp.ge.f32.partialorder %v2638_v3, 0.0  ;;  %v8411_v36 = vld [vmem:[%s11351_s7 + $0xbb4] sm:$0xf] }
 0x25a   : > { %v2492_v32 = vadd.f32 %v9225_v31, %v12144_v54  ;;  %v9916_v43 = vpop.f32.mrf.mxu1  ;;  %v12206_v54 = vld [vmem:[%s11351_s7 + $0x2b8] sm:$0x3]  ;;  %v8509_v16 = vcombine.low %v3586_v57, %v3589_v53  ;;  %v2683_v20 = vsel %vm2651_vm13, %v2635_v29, %v2667_v30  ;;  %v13973_v23 = vrot.slane %v11921_v44, 6  ;;  %v10449_v51 = vld [vmem:[#allocation4 + $0x2d0] sm:$0xff]   ;;  %v8378_v31 = vld [vmem:[%s11351_s7 + $0xba4] sm:$0xc] }
 0x25b   : > { %v2615_v21 = vmul.f32 %v12110_v42, %v2581_v15  ;;  %9938 = vmatmul.mubr.bf16.gmra.mxu0 %v2694_v40  ;;  %v9227_v24 = vpop.f32.mrf.mxu0  ;;  %vm2652_vm15 = vcmp.ge.f32.partialorder %v2636_v45, 0.0  ;;  %v2668_v39 = vmul.f32 0.01, %v2636_v45  ;;  %v2686_v37 = vsel %vm2654_vm14, %v2638_v3, %v2670_v8  ;;  %v10447_v40 = vld [vmem:[#allocation4 + $0x298] sm:$0xff]   ;;  %v12254_v15 = vld [vmem:[%s11351_s7 + $0x2e4] sm:$0xf] }
 0x25c   : > { %v2589_v7 = vadd.f32 %v9915_v48, %v2492_v32  ;;  %v9228_v55 = vadd.f32 %v9227_v24, %v9226_v61  ;;  %v2583_v22 = vpop.f32.mrf.mxu1  ;;  %9282 = vmatpush3.bf16.msra.mxu0 %v10439_v58  ;;  %v2696_v49 = vpack.c.bf16 %v2686_v37, %v2685_v5  ;;  %v13975_v35 = vrot.slane %v13974_v52, 10  ;;  %5004 = vmatmul.mubr.bf16.gmra.mxu1 %v8509_v16  ;;  %v8412_v48 = vld [vmem:[%s11351_s7 + $0xbb8] sm:$0x3]  ;;  %v8380_v32 = vld [vmem:[%s11351_s7 + $0xbac] sm:$0x3]  ;;  %v10451_v5 = vld [vmem:[#allocation4 + $0x290] sm:$0xff]  }
 0x25d   : > { %v2639_v62 = vadd.f32 %v12133_v28, %v2615_v21  ;;  %v2584_v0 = vadd.f32 %v2583_v22, %v2487_v11  ;;  %v2684_v4 = vsel %vm2652_vm15, %v2636_v45, %v2668_v39  ;;  %9283 = vmatprep.subr.bf16.mxu0 %v10441_v12  ;;  %v12232_v38 = vrot.slane %v3175_v41, 4  ;;  %v13976_v11 = vld [vmem:[#allocation57_spill] sm:$0xff]  ;;  %v8379_v12 = vld [vmem:[%s11351_s7 + $0xba8] sm:$0xf]  ;;  %v12264_v24 = vld [vmem:[%s11351_s7 + $0x2d8] sm:$0xf] }
 0x25e   : > { %v2617_v56 = vmul.f32 %v12110_v42, %v2589_v7  ;;  %v2495_v18 = vadd.f32 %v9228_v55, %v12151_v26  ;;  %v2695_v2 = vpack.c.bf16 %v2684_v4, %v2683_v20  ;;  %v12226_v59 = vsel %vm11381_vm2, %v13975_v35, %v13973_v23  ;;  %v12261_v21 = vld [vmem:[%s11351_s7 + $0x2e0] sm:$0xc]  ;;  %v8414_v7 = vld [vmem:[%s11351_s7 + $0xbe4] sm:$0xf]  ;;  %v10453_v22 = vld [vmem:[#allocation4 + $0x2c8] sm:$0xff]  }
 0x25f   : > { %v2671_v29 = vmul.f32 0.01, %v2639_v62  ;;  %v2616_v13 = vmul.f32 %v12110_v42, %v2584_v0  ;;  %v3178_v26 = vrot.slane %v12206_v54, 6  ;;  %vm2655_vm0 = vcmp.ge.f32.partialorder %v2639_v62, 0.0  ;;  %v10455_v20 = vld [vmem:[#allocation4 + $0x288] sm:$0xff]  }
 0x260   : > { %v2641_v44 = vadd.f32 %v12133_v28, %v2617_v56  ;;  %v2592_v33 = vadd.f32 %v9916_v43, %v2495_v18  ;;  %9941 = vmatprep.mubr.bf16.mxu0 %v2695_v2  ;;  %9284 = vmatpush3.bf16.msra.mxu0 %v10443_v47  ;;  %v8430_v57 = vrot.slane %v8410_v60, 10  ;;  %v8238_v46 = vrot.slane %v12209_v14, 10  ;;  %v12271_v4 = vld [vmem:[%s11351_s7 + $0x2e8] sm:$0x3]  ;;  %v8382_v56 = vld [vmem:[%s11351_s7 + $0xbd8] sm:$0xf] }
 0x261   : > { %v2640_v3 = vadd.f32 %v12133_v28, %v2616_v13  ;;  %9285 = vmatprep.subr.bf16.mxu0 %v10445_v6  ;;  %v3074_v25 = vrot.slane %v12212_v27, 6  ;;  %v3696_v30 = vrot.slane %v8411_v36, 6  ;;  %v13977_v58 = vrot.slane %v13976_v11, 6  ;;  %v8415_v35 = vld [vmem:[%s11351_s7 + $0xbe8] sm:$0x3] }
 0x262   : > { %v2618_v9 = vmul.f32 %v12110_v42, %v2592_v33  ;;  %v12251_v45 = vrot.slane %v3071_v19, 4  ;;  %v3699_v61 = vrot.slane %v8412_v48, 6  ;;  %v2687_v43 = vsel %vm2655_vm0, %v2639_v62, %v2671_v29  ;;  %v8381_v33 = vld [vmem:[%s11351_s7 + $0xbd4] sm:$0xc]  ;;  %v8422_v14 = vld [vmem:[%s11351_s7 + $0xc70] sm:$0xc] }
 0x263   : > { %v12247_v8 = vsel %vm11381_vm2, %v13978_v50, %v13977_v58  ;;  %9942 = vmatmul.mubr.bf16.gmra.mxu0 %v2696_v49  ;;  %vm2656_vm1 = vcmp.ge.f32.partialorder %v2640_v3, 0.0  ;;  %v2672_v42 = vmul.f32 0.01, %v2640_v3  ;;  %v2673_v47 = vmul.f32 0.01, %v2641_v44 }
 0x264   : > { %9286 = vmatpush3.bf16.msra.mxu0 %v10447_v40  ;;  %v2642_v53 = vadd.f32 %v12133_v28, %v2618_v9  ;;  %v3697_v39 = vsel %vm11381_vm2, %v8430_v57, %v3696_v30  ;;  %v3698_v37 = vrot.slane %v3696_v30, 4  ;;  %v8398_v6 = vrot.slane %v8378_v31, 10  ;;  %v8413_v28 = vld [vmem:[%s11351_s7 + $0xbe0] sm:$0xc]  ;;  %v8383_v40 = vld [vmem:[%s11351_s7 + $0xbdc] sm:$0x3] }
 0x265   : > { %v2688_v55 = vsel %vm2656_vm1, %v2640_v3, %v2672_v42  ;;  %9287 = vmatprep.subr.bf16.mxu0 %v10449_v51  ;;  %vm2657_vm3 = vcmp.ge.f32.partialorder %v2641_v44, 0.0  ;;  %v3592_v49 = vrot.slane %v8379_v12, 6  ;;  %v3595_v16 = vrot.slane %v8380_v32, 6  ;;  %v10457_v3 = vld [vmem:[#allocation4 + $0x2c0] sm:$0xff]   ;;  %v12285_v30 = vld [vmem:[%s11351_s7 + $0x2d4] sm:$0xc] }
 0x266   : > { %v2697_v62 = vpack.c.bf16 %v2688_v55, %v2687_v43  ;;  %vm2658_vm4 = vcmp.ge.f32.partialorder %v2642_v53, 0.0  ;;  %v2674_v0 = vmul.f32 0.01, %v2642_v53  ;;  %v3700_v60 = vsel %vm11381_vm2, %v3698_v37, %v3699_v61  ;;  %v10459_v9 = vld [vmem:[#allocation4 + $0x280] sm:$0xff]   ;;  %v8417_v12 = vld [vmem:[%s11351_s7 + $0xc14] sm:$0xf] }
 0x267   : > { %v3182_v18 = vrot.slane %v12254_v15, 6  ;;  %v8518_v2 = vcombine.low %v3697_v39, %v3700_v60  ;;  %v3593_v23 = vsel %vm11381_vm2, %v8398_v6, %v3592_v49  ;;  %v3594_v52 = vrot.slane %v3592_v49, 4  ;;  %v10461_v32 = vld [vmem:[#allocation4 + $0x3f8] sm:$0xff]   ;;  %v13979_v39 = vld [vmem:[#allocation54_spill] sm:$0xff]  ;;  %v13980_v37 = vld [vmem:[#allocation55_spill] sm:$0xff] }
 0x268   : > { %9945 = vmatprep.mubr.bf16.mxu0 %v2697_v62  ;;  %9288 = vmatpush3.bf16.msra.mxu0 %v10451_v5  ;;  %v2689_v36 = vsel %vm2657_vm3, %v2641_v44, %v2673_v47  ;;  %v2690_v29 = vsel %vm2658_vm4, %v2642_v53, %v2674_v0  ;;  %v8431_v13 = vrot.slane %v8413_v28, 10  ;;  %v3703_v48 = vrot.slane %v8414_v7, 6  ;;  %v8416_v53 = vld [vmem:[%s11351_s7 + $0xc10] sm:$0xc]  ;;  %v8418_v49 = vld [vmem:[%s11351_s7 + $0xc18] sm:$0x3] }
 0x269   : > { %v2698_v57 = vpack.c.bf16 %v2690_v29, %v2689_v36  ;;  %9289 = vmatprep.subr.bf16.mxu0 %v10453_v22  ;;  %v8271_v51 = vrot.slane %v12261_v21, 10  ;;  %v3078_v31 = vrot.slane %v12264_v24, 6  ;;  %5011 = vmatprep.mubr.bf16.mxu1 %v8518_v2  ;;  %v3596_v44 = vsel %vm11381_vm2, %v3594_v52, %v3595_v16  ;;  %v12307_v16 = vld [vmem:[%s11351_s7 + $0xc08] sm:$0xf]  ;;  %v13982_v28 = vld [vmem:[#allocation63_spill] sm:$0xff]  ;;  %v13983_v62 = vld [vmem:[#allocation61_spill] sm:$0xff] }
 0x26a   : > { %v8510_v11 = vcombine.low %v3593_v23, %v3596_v44  ;;  %v3704_v58 = vsel %vm11381_vm2, %v8431_v13, %v3703_v48  ;;  %v3705_v50 = vrot.slane %v3703_v48, 4  ;;  %v3706_v61 = vrot.slane %v8415_v35, 6  ;;  %v12316_v60 = vld [vmem:[%s11351_s7 + $0x314] sm:$0xf]  ;;  %v8384_v23 = vld [vmem:[%s11351_s7 + $0xc04] sm:$0xc] }
 0x26b   : > { %9946 = vmatmul.mubr.bf16.gmra.mxu0 %v2698_v57  ;;  %v3185_v42 = vrot.slane %v12271_v4, 6  ;;  %v8399_v43 = vrot.slane %v8381_v33, 10  ;;  %v3599_v5 = vrot.slane %v8382_v56, 6  ;;  %v3602_v47 = vrot.slane %v8383_v40, 6  ;;  %v10462_v52 = vld [vmem:[#allocation4 + $0x3b8] sm:$0xff]  }
 0x26c   : > { %9290 = vmatpush3.bf16.msra.mxu0 %v10455_v20  ;;  %v13981_v6 = vcombine.low %v13979_v39, %v13980_v37  ;;  %v12300_v7 = vrot.slane %v3182_v18, 4  ;;  %v8239_v55 = vrot.slane %v12285_v30, 10  ;;  %v3707_v22 = vsel %vm11381_vm2, %v3705_v50, %v3706_v61  ;;  %5012 = vmatmul.mubr.bf16.gmra.mxu1 %v8510_v11  ;;  %v8386_v48 = vld [vmem:[%s11351_s7 + $0xc0c] sm:$0x3]  ;;  %v8420_v33 = vld [vmem:[%s11351_s7 + $0xc44] sm:$0xf] }
 0x26d   : > { %9291 = vmatprep.subr.bf16.mxu0 %v10457_v3  ;;  %v8468_v0 = vcombine.low %v13983_v62, %v13982_v28  ;;  %v12313_v20 = vrot.slane %v3078_v31, 4  ;;  %v8519_v56 = vcombine.low %v3704_v58, %v3707_v22  ;;  %v3601_v2 = vrot.slane %v3599_v5, 4  ;;  %v13984_v40 = vld [vmem:[#allocation52_spill] sm:$0xff]  ;;  %v13986_v3 = vld [vmem:[#allocation58_spill] sm:$0xff] }
 0x26e   : > { %4704 = vmatprep.mubr.bf16.mxu0 %v13981_v6  ;;  %v8477_v35 = vcombine.low %v12226_v59, %v12247_v8  ;;  %v3600_v36 = vsel %vm11381_vm2, %v8399_v43, %v3599_v5  ;;  %v8432_v29 = vrot.slane %v8416_v53, 10  ;;  %v3710_v13 = vrot.slane %v8417_v12, 6  ;;  %v10463_v58 = vld [vmem:[#allocation4 + $0x3f0] sm:$0xff]   ;;  %v12334_v50 = vld [vmem:[%s11351_s7 + $0x2dc] sm:$0x3]  ;;  %v13990_v37 = vld [vmem:[#allocation62_spill] sm:$0xff] }
 0x26f   : > { %v13985_v57 = vrot.slane %v13984_v40, 6  ;;  %v13987_v44 = vrot.slane %v13986_v3, 10  ;;  %v12337_v59 = vld [vmem:[%s11351_s7 + $0x310] sm:$0xc]  ;;  %v12340_v8 = vld [vmem:[%s11351_s7 + $0x318] sm:$0x3]  ;;  %5019 = vmatprep.mubr.bf16.mxu1 %v8519_v56  ;;  %v3603_v61 = vsel %vm11381_vm2, %v3601_v2, %v3602_v47 }
 0x270   : > { %v3713_v12 = vrot.slane %v8418_v49, 6  ;;  %v3606_v43 = vrot.slane %v12307_v16, 6  ;;  %v8419_v5 = vld [vmem:[%s11351_s7 + $0xc40] sm:$0xc]  ;;  %9292 = vmatpush3.bf16.msra.mxu0 %v10459_v9  ;;  %v13988_v53 = vld [vmem:[#allocation59_spill] sm:$0xff]  ;;  %v3189_v22 = vrot.slane %v12316_v60, 6  ;;  %v3711_v28 = vsel %vm11381_vm2, %v8432_v29, %v3710_v13 }
 0x271   : > { %v12331_v11 = vsel %vm11381_vm2, %v13987_v44, %v13985_v57  ;;  %v13989_v39 = vrot.slane %v13988_v53, 6  ;;  %v3712_v47 = vrot.slane %v3710_v13, 4  ;;  %9405 = vmatprep.subr.bf16.mxu0 %v10461_v32  ;;  %v8511_v49 = vcombine.low %v3600_v36, %v3603_v61  ;;  %v8421_v16 = vld [vmem:[%s11351_s7 + $0xc48] sm:$0x3]  ;;  %v12365_v13 = vld [vmem:[%s11351_s7 + $0xc38] sm:$0xf] }
 0x272   : > { %v8400_v62 = vrot.slane %v8384_v23, 10  ;;  %v3608_v56 = vrot.slane %v3606_v43, 4  ;;  %v3609_v2 = vrot.slane %v8386_v48, 6  ;;  %v12362_v57 = vld [vmem:[%s11351_s7 + $0x308] sm:$0xf]  ;;  %v8433_v44 = vrot.slane %v8419_v5, 10 }
 0x273   : > { %v12351_v6 = vsel %vm11381_vm2, %v13990_v37, %v13989_v39  ;;  %v3714_v9 = vsel %vm11381_vm2, %v3712_v47, %v3713_v12  ;;  %4705 = vmatmul.mubr.bf16.vlgmr.msra.gmra.mxu0 %v8468_v0  ;;  %v3717_v29 = vrot.slane %v8420_v33, 6  ;;  %v10464_v32 = vld [vmem:[#allocation4 + $0x3b0] sm:$0xff]   ;;  %v10465_v23 = vld [vmem:[#allocation4 + $0x3e8] sm:$0xff]   ;;  %v3081_v36 = vrot.slane %v12334_v50, 6  ;;  %v12390_v12 = vld [vmem:[%s11351_s7 + $0x304] sm:$0xc] }
 0x274   : > { %v8469_v40 = vcombine.low %v12331_v11, %v12351_v6  ;;  %v8520_v3 = vcombine.low %v3711_v28, %v3714_v9  ;;  %9406 = vmatpush3.bf16.msra.mxu0 %v10462_v52  ;;  %4712 = vmatprep.mubr.bf16.mxu0 %v8477_v35  ;;  %v8272_v0 = vrot.slane %v12337_v59, 10  ;;  %v3192_v48 = vrot.slane %v12340_v8, 6  ;;  %v10466_v61 = vld [vmem:[#allocation4 + $0x3a8] sm:$0xff]   ;;  %v8423_v5 = vld [vmem:[%s11351_s7 + $0xc74] sm:$0xf] }
 0x275   : > { %v3720_v11 = vrot.slane %v8421_v16, 6  ;;  %9407 = vmatprep.subr.bf16.mxu0 %v10463_v58  ;;  %v3176_v52 = vsel %vm11381_vm2, %v8270_v63, %v3175_v41  ;;  %v3179_v35 = vsel %vm11381_vm2, %v12232_v38, %v3178_v26  ;;  %v12383_v33 = vrot.slane %v3189_v22, 4  ;;  %v12386_v58 = vld [vmem:[%s11351_s7 + $0x344] sm:$0xf]  ;;  %5020 = vmatmul.mubr.bf16.gmra.mxu1 %v8511_v49  ;;  %v8389_v38 = vld [vmem:[%s11351_s7 + $0xc3c] sm:$0x3] }
 0x276   : > { %v3719_v1 = vrot.slane %v3717_v29, 4  ;;  %v3085_v63 = vrot.slane %v12362_v57, 6  ;;  %5027 = vmatprep.mubr.bf16.mxu1 %v8520_v3  ;;  %v3607_v41 = vsel %vm11381_vm2, %v8400_v62, %v3606_v43  ;;  %v3610_v54 = vsel %vm11381_vm2, %v3608_v56, %v3609_v2  ;;  %v12416_v39 = vld [vmem:[%s11351_s7 + $0x30c] sm:$0x3]  ;;  %v12430_v27 = vld [vmem:[%s11351_s7 + $0x334] sm:$0xc] }
 0x277   : > { %v3613_v26 = vrot.slane %v12365_v13, 6  ;;  %v12406_v53 = vsel %vm11381_vm2, %v8238_v46, %v3071_v19  ;;  %v12413_v43 = vsel %vm11381_vm2, %v12251_v45, %v3074_v25  ;;  %v3718_v37 = vsel %vm11381_vm2, %v8433_v44, %v3717_v29  ;;  %v12424_v19 = vld [vmem:[%s11351_s7 + $0x340] sm:$0xc]  ;;  %v12427_v46 = vld [vmem:[%s11351_s7 + $0x348] sm:$0x3]  ;;  %v10471_v13 = vld [vmem:[#allocation4 + $0x3d8] sm:$0xff]  }
 0x278   : > { %v3721_v34 = vsel %vm11381_vm2, %v3719_v1, %v3720_v11  ;;  %9408 = vmatpush3.bf16.msra.mxu0 %v10464_v32  ;;  %v8478_v6 = vcombine.low %v3176_v52, %v3179_v35  ;;  %v8424_v28 = vld [vmem:[%s11351_s7 + $0xc78] sm:$0x3]  ;;  %v10467_v25 = vld [vmem:[#allocation4 + $0x3e0] sm:$0xff]   ;;  %v3196_v45 = vrot.slane %v12386_v58, 6  ;;  %v8512_v49 = vcombine.low %v3607_v41, %v3610_v54  ;;  %v12441_v52 = vld [vmem:[%s11351_s7 + $0xc68] sm:$0xf] }
 0x279   : > { %9409 = vmatprep.subr.bf16.mxu0 %v10465_v23  ;;  %v12435_v47 = vld [vmem:[%s11351_s7 + $0x338] sm:$0xf]  ;;  %v8401_v16 = vrot.slane %v8387_v10, 10  ;;  %v3724_v9 = vrot.slane %v8423_v5, 6  ;;  %v8470_v62 = vcombine.low %v12406_v53, %v12413_v43  ;;  %v10468_v56 = vld [vmem:[#allocation4 + $0x3a0] sm:$0xff]   ;;  %v8521_v2 = vcombine.low %v3718_v37, %v3721_v34  ;;  %v10475_v34 = vld [vmem:[#allocation4 + $0x3d0] sm:$0xff]  }
 0x27a   : > { %v3615_v3 = vrot.slane %v3613_v26, 4  ;;  %v3616_v44 = vrot.slane %v8389_v38, 6  ;;  %v8240_v29 = vrot.slane %v12390_v12, 10  ;;  %v8434_v32 = vrot.slane %v8422_v14, 10  ;;  %v12463_v15 = vld [vmem:[%s11351_s7 + $0xca4] sm:$0xf] }
 0x27b   : > { %4713 = vmatmul.mubr.bf16.gmra.mxu0 %v8469_v40  ;;  %v3726_v23 = vrot.slane %v3724_v9, 4  ;;  %v3727_v11 = vrot.slane %v8424_v28, 6  ;;  %v3183_v35 = vsel %vm11381_vm2, %v8271_v51, %v3182_v18  ;;  %v3186_v40 = vsel %vm11381_vm2, %v12300_v7, %v3185_v42  ;;  %v12473_v42 = vld [vmem:[%s11351_s7 + $0x368] sm:$0xf]  ;;  %v10472_v7 = vld [vmem:[#allocation4 + $0x398] sm:$0xff]  }
 0x27c   : > { %4720 = vmatprep.mubr.bf16.mxu0 %v8478_v6  ;;  %9410 = vmatpush3.bf16.msra.mxu0 %v10466_v61  ;;  %v12456_v1 = vrot.slane %v3085_v63, 4  ;;  %v3088_v10 = vrot.slane %v12416_v39, 6  ;;  %v12460_v61 = vld [vmem:[%s11351_s7 + $0x374] sm:$0xf]  ;;  %v8273_v21 = vrot.slane %v12424_v19, 10  ;;  %v12468_v4 = vrot.slane %v3196_v45, 4 }
 0x27d   : > { %9411 = vmatprep.subr.bf16.mxu0 %v10467_v25  ;;  %v3199_v18 = vrot.slane %v12427_v46, 6  ;;  %5028 = vmatmul.mubr.bf16.gmra.mxu1 %v8512_v49  ;;  %v12476_v41 = vld [vmem:[%s11351_s7 + $0x33c] sm:$0x3]  ;;  %v3092_v54 = vrot.slane %v12435_v47, 6  ;;  %v3614_v38 = vsel %vm11381_vm2, %v8401_v16, %v3613_v26  ;;  %v3617_v5 = vsel %vm11381_vm2, %v3615_v3, %v3616_v44  ;;  %v8390_v53 = vld [vmem:[%s11351_s7 + $0xc64] sm:$0xc] }
 0x27e   : > { %5035 = vmatprep.mubr.bf16.mxu1 %v8521_v2  ;;  %v8392_v43 = vld [vmem:[%s11351_s7 + $0xc6c] sm:$0x3]  ;;  %v3620_v37 = vrot.slane %v12441_v52, 6  ;;  %v12487_v14 = vld [vmem:[%s11351_s7 + $0x370] sm:$0xc]  ;;  %v13881_v28 = vrot.slane %v12460_v61, 6  ;;  %v3725_v26 = vsel %vm11381_vm2, %v8434_v32, %v3724_v9  ;;  %v3728_v25 = vsel %vm11381_vm2, %v3726_v23, %v3727_v11 }
 0x27f   : > { %v12490_v6 = vld [vmem:[%s11351_s7 + $0x378] sm:$0x3]  ;;  %v3731_v49 = vrot.slane %v12463_v15, 6  ;;  %v8479_v16 = vcombine.low %v3183_v35, %v3186_v40  ;;  %v12504_v2 = vsel %vm11381_vm2, %v8239_v55, %v3078_v31  ;;  %v12507_v3 = vld [vmem:[%s11351_s7 + $0x364] sm:$0xc]  ;;  %v12519_v23 = vsel %vm11381_vm2, %v12313_v20, %v3081_v36 }
 0x280   : > { %9412 = vmatpush3.bf16.msra.mxu0 %v10468_v56  ;;  %v12510_v44 = vld [vmem:[%s11351_s7 + $0x36c] sm:$0x3]  ;;  %v8425_v9 = vld [vmem:[%s11351_s7 + $0xca0] sm:$0xc]  ;;  %v8427_v32 = vld [vmem:[%s11351_s7 + $0xca8] sm:$0x3]  ;;  %v8513_v31 = vcombine.low %v3614_v38, %v3617_v5  ;;  %v12531_v50 = vsel %vm11381_vm2, %v8272_v0, %v3189_v22  ;;  %v8522_v11 = vcombine.low %v3725_v26, %v3728_v25  ;;  %v3193_v60 = vsel %vm11381_vm2, %v12383_v33, %v3192_v48 }
 0x281   : > { %9413 = vmatprep.subr.bf16.mxu0 %v10471_v13  ;;  %v13880_v24 = vrot.slane %v12473_v42, 6  ;;  %v12523_v30 = vld [vmem:[%s11351_s7 + $0x3a4] sm:$0xf]  ;;  %v8402_v55 = vrot.slane %v8390_v53, 10  ;;  %v10476_v56 = vld [vmem:[#allocation4 + $0x390] sm:$0xff]   ;;  %v3622_v20 = vrot.slane %v3620_v37, 4  ;;  %v3197_v57 = vsel %vm11381_vm2, %v8273_v21, %v3196_v45 }
 0x282   : > { %v3623_v36 = vrot.slane %v8392_v43, 6  ;;  %v8435_v52 = vrot.slane %v8425_v9, 10  ;;  %v3733_v35 = vrot.slane %v3731_v49, 4  ;;  %v3734_v40 = vrot.slane %v8427_v32, 6  ;;  %v12535_v15 = vld [vmem:[%s11351_s7 + $0xc98] sm:$0xf] }
 0x283   : > { %4721 = vmatmul.mubr.bf16.gmra.mxu0 %v8470_v62  ;;  %v12544_v59 = vrot.slane %v3092_v54, 4  ;;  %v10481_v62 = vld [vmem:[#allocation4 + $0x3c8] sm:$0xff]   ;;  %v12549_v38 = vld [vmem:[%s11351_s7 + $0x398] sm:$0xf]  ;;  %v12553_v8 = vrot.slane %v13881_v28, 4  ;;  %v12558_v33 = vrot.slane %v13880_v24, 4  ;;  %v3621_v9 = vsel %vm11381_vm2, %v8402_v55, %v3620_v37 }
 0x284   : > { %4728 = vmatprep.mubr.bf16.mxu0 %v8479_v16  ;;  %9414 = vmatpush3.bf16.msra.mxu0 %v10472_v7  ;;  %v12562_v5 = vld [vmem:[%s11351_s7 + $0x3a0] sm:$0xc]  ;;  %v10482_v43 = vld [vmem:[#allocation4 + $0x388] sm:$0xff]   ;;  %v3210_v26 = vrot.slane %v12523_v30, 6  ;;  %v12571_v25 = vld [vmem:[%s11351_s7 + $0x394] sm:$0xc]  ;;  %v3624_v32 = vsel %vm11381_vm2, %v3622_v20, %v3623_v36  ;;  %v8471_v7 = vcombine.low %v12504_v2, %v12519_v23  ;;  %v3732_v48 = vsel %vm11381_vm2, %v8435_v52, %v3731_v49 }
 0x285   : > { %9415 = vmatprep.subr.bf16.mxu0 %v10475_v34  ;;  %5036 = vmatmul.mubr.bf16.gmra.mxu1 %v8513_v31  ;;  %v12567_v34 = vld [vmem:[%s11351_s7 + $0x3a8] sm:$0x3]  ;;  %v12574_v16 = vld [vmem:[%s11351_s7 + $0x6e0] sm:$0xf]  ;;  %v3627_v31 = vrot.slane %v12535_v15, 6  ;;  %v3735_v24 = vsel %vm11381_vm2, %v3733_v35, %v3734_v40  ;;  %v8480_v37 = vcombine.low %v12531_v50, %v3193_v60  ;;  %v8275_v55 = vrot.slane %v12562_v5, 10 }
 0x286   : > { %5043 = vmatprep.mubr.bf16.mxu1 %v8522_v11  ;;  %v8393_v0 = vld [vmem:[%s11351_s7 + $0xc94] sm:$0xc]  ;;  %v8395_v11 = vld [vmem:[%s11351_s7 + $0xc9c] sm:$0x3]  ;;  %v10487_v36 = vld [vmem:[#allocation4 + $0x3c0] sm:$0xff]   ;;  %v3106_v2 = vrot.slane %v12549_v38, 6  ;;  %v8514_v52 = vcombine.low %v3621_v9, %v3624_v32  ;;  %v8523_v50 = vcombine.low %v3732_v48, %v3735_v24  ;;  %v3086_v24 = vsel %vm11381_vm2, %v8240_v29, %v3085_v63 }
 0x287   : > { %v12594_v20 = vld [vmem:[%s11351_s7 + $0x39c] sm:$0x3]  ;;  %v12598_v49 = vld [vmem:[%s11351_s7 + $0x6dc] sm:$0xc]  ;;  %v3473_v23 = vrot.slane %v12574_v16, 6  ;;  %v10488_v40 = vld [vmem:[#allocation4 + $0x380] sm:$0xff]   ;;  %v3200_v12 = vsel %vm11381_vm2, %v12468_v4, %v3199_v18 }
 0x288   : > { %9416 = vmatpush3.bf16.msra.mxu0 %v10476_v56  ;;  %v8403_v56 = vrot.slane %v8393_v0, 10  ;;  %v3629_v15 = vrot.slane %v3627_v31, 4  ;;  %v3630_v60 = vrot.slane %v8395_v11, 6  ;;  %v3212_v5 = vrot.slane %v3210_v26, 4  ;;  %v8342_v13 = vld [vmem:[%s11351_s7 + $0x6e4] sm:$0x3] }
 0x289   : > { %9417 = vmatprep.subr.bf16.mxu0 %v10481_v62  ;;  %v3213_v62 = vrot.slane %v12567_v34, 6  ;;  %v8243_v28 = vrot.slane %v12571_v25, 10  ;;  %v12608_v51 = vld [vmem:[#allocation4 + $0x4b8] sm:$0xff]   ;;  %v3089_v0 = vsel %vm11381_vm2, %v12456_v1, %v3088_v10  ;;  %v3108_v63 = vrot.slane %v3106_v2, 4  ;;  %v8345_v38 = vld [vmem:[%s11351_s7 + $0x714] sm:$0x3] }
 0x28a   : > { %v3109_v39 = vrot.slane %v12594_v20, 6  ;;  %v8364_v58 = vrot.slane %v12598_v49, 10  ;;  %v3475_v19 = vrot.slane %v3473_v23, 4  ;;  %v3628_v46 = vsel %vm11381_vm2, %v8403_v56, %v3627_v31  ;;  %v8347_v16 = vld [vmem:[%s11351_s7 + $0x740] sm:$0xf] }
 0x28b   : > { %4729 = vmatmul.mubr.bf16.gmra.mxu0 %v8471_v7  ;;  %v8344_v7 = vld [vmem:[%s11351_s7 + $0x710] sm:$0xf]  ;;  %v3631_v45 = vsel %vm11381_vm2, %v3629_v15, %v3630_v60  ;;  %v8472_v29 = vcombine.low %v3086_v24, %v3089_v0  ;;  %v8481_v10 = vcombine.low %v3197_v57, %v3200_v12  ;;  %v3476_v21 = vrot.slane %v8342_v13, 6  ;;  %v8348_v57 = vld [vmem:[%s11351_s7 + $0x744] sm:$0x3] }
 0x28c   : > { %4736 = vmatprep.mubr.bf16.mxu0 %v8480_v37  ;;  %9418 = vmatpush3.bf16.msra.mxu0 %v10482_v43  ;;  %v3480_v4 = vrot.slane %v8344_v7, 6  ;;  %v8515_v18 = vcombine.low %v3628_v46, %v3631_v45  ;;  %v13997_v34 = vrot.slane %v12430_v27, 10  ;;  %v13998_v9 = vrot.slane %v12476_v41, 6  ;;  %v8346_v7 = vld [vmem:[%s11351_s7 + $0x73c] sm:$0xc] }
 0x28d   : > { %9419 = vmatprep.subr.bf16.mxu0 %v10487_v36  ;;  %5044 = vmatmul.mubr.bf16.gmra.mxu1 %v8514_v52  ;;  %v13999_v32 = vrot.slane %v12460_v61, 6  ;;  %v14000_v31 = vrot.slane %v12487_v14, 10  ;;  %v14001_v47 = vrot.slane %v12490_v6, 6  ;;  %v14004_v61 = vrot.slane %v12473_v42, 6  ;;  %v8350_v45 = vld [vmem:[%s11351_s7 + $0x770] sm:$0xf] }
 0x28e   : > { %v12564_v53 = vpop.f32.mrf.mxu1  ;;  %5051 = vmatprep.mubr.bf16.mxu1 %v8523_v50  ;;  %v3093_v25 = vsel %vm11381_vm2, %v13997_v34, %v3092_v54  ;;  %v3096_v13 = vsel %vm11381_vm2, %v12544_v59, %v13998_v9  ;;  %v14005_v14 = vrot.slane %v12507_v3, 10  ;;  %v14006_v20 = vrot.slane %v12510_v44, 6  ;;  %v8351_v9 = vld [vmem:[%s11351_s7 + $0x774] sm:$0x3] }
 0x28f   : > { %13991 = vst [vmem:[#allocation44_spill] sm:$0xff] %v12564_v53  ;;  %v3204_v11 = vsel %vm11381_vm2, %v14000_v31, %v13999_v32  ;;  %v3207_v27 = vsel %vm11381_vm2, %v12553_v8, %v14001_v47  ;;  %v8473_v41 = vcombine.low %v3093_v25, %v3096_v13  ;;  %v3211_v36 = vsel %vm11381_vm2, %v8275_v55, %v3210_v26  ;;  %v8349_v25 = vld [vmem:[%s11351_s7 + $0x76c] sm:$0xc] }
 0x290   : > { %v12589_v22 = vpop.f32.mrf.mxu1  ;;  %9420 = vmatpush3.bf16.msra.mxu0 %v10488_v40  ;;  %v8482_v37 = vcombine.low %v3204_v11, %v3207_v27  ;;  %v3100_v6 = vsel %vm11381_vm2, %v14005_v14, %v14004_v61  ;;  %v3103_v8 = vsel %vm11381_vm2, %v12558_v33, %v14006_v20  ;;  %v3214_v42 = vsel %vm11381_vm2, %v3212_v5, %v3213_v62  ;;  %v8343_v33 = vld [vmem:[%s11351_s7 + $0x70c] sm:$0xc]  ;;  %v10496_v11 = vld [vmem:[#allocation4 + $0x4a0] sm:$0xff]   ;;  %v10497_v20 = vld [vmem:[#allocation4 + $0x498] sm:$0xff]  }
 0x291   : > { %13992 = vst [vmem:[#allocation53_spill] sm:$0xff] %v12589_v22  ;;  %9981 = vmatprep.subr.bf16.mxu0 %v12608_v51  ;;  %v8474_v3 = vcombine.low %v3100_v6, %v3103_v8  ;;  %v8483_v52 = vcombine.low %v3211_v36, %v3214_v42  ;;  %v3107_v44 = vsel %vm11381_vm2, %v8243_v28, %v3106_v2  ;;  %v8365_v28 = vrot.slane %v8343_v33, 10  ;;  %v8353_v27 = vld [vmem:[%s11351_s7 + $0x7a0] sm:$0xf]  ;;  %v8352_v8 = vld [vmem:[%s11351_s7 + $0x79c] sm:$0xc] }
 0x292   : > { %v12601_v35 = vpop.f32.mrf.mxu1  ;;  %v3110_v30 = vsel %vm11381_vm2, %v3108_v63, %v3109_v39  ;;  %v3474_v26 = vsel %vm11381_vm2, %v8364_v58, %v3473_v23  ;;  %v3477_v55 = vsel %vm11381_vm2, %v3475_v19, %v3476_v21  ;;  %v3482_v2 = vrot.slane %v3480_v4, 4  ;;  %v10494_v63 = vld [vmem:[#allocation4 + $0x4b0] sm:$0xff]   ;;  %v8354_v36 = vld [vmem:[%s11351_s7 + $0x7a4] sm:$0x3] }
 0x293   : > { %13993 = vst [vmem:[#allocation45_spill] sm:$0xff] %v12601_v35  ;;  %4737 = vmatmul.mubr.bf16.gmra.mxu0 %v8472_v29  ;;  %v8475_v56 = vcombine.low %v3107_v44, %v3110_v30  ;;  %v8500_v15 = vcombine.low %v3474_v26, %v3477_v55  ;;  %v3483_v60 = vrot.slane %v8345_v38, 6  ;;  %v3481_v23 = vsel %vm11381_vm2, %v8365_v28, %v3480_v4  ;;  %v14013_v29 = vld [vmem:[#allocation36_spill] sm:$0xff]  ;;  %v10495_v4 = vld [vmem:[#allocation4 + $0x4a8] sm:$0xff]   ;;  %v8356_v38 = vld [vmem:[%s11351_s7 + $0x7d0] sm:$0xf] }
 0x294   : > { %v12621_v48 = vpop.f32.mrf.mxu1  ;;  %4744 = vmatprep.mubr.bf16.mxu0 %v8481_v10  ;;  %v3487_v24 = vrot.slane %v8347_v16, 6  ;;  %v8366_v39 = vrot.slane %v8346_v7, 10  ;;  %v3490_v19 = vrot.slane %v8348_v57, 6  ;;  %v3497_v31 = vrot.slane %v8351_v9, 6  ;;  %v10498_v55 = vld [vmem:[#allocation4 + $0x490] sm:$0xff]   ;;  %v10499_v16 = vld [vmem:[#allocation4 + $0x488] sm:$0xff]  }
 0x295   : > { %13994 = vst [vmem:[#allocation46_spill] sm:$0xff] %v12621_v48  ;;  %5052 = vmatmul.mubr.bf16.gmra.mxu1 %v8515_v18  ;;  %v3484_v62 = vsel %vm11381_vm2, %v3482_v2, %v3483_v60  ;;  %v3494_v18 = vrot.slane %v8350_v45, 6  ;;  %v3501_v6 = vrot.slane %v8353_v27, 6  ;;  %v8368_v30 = vrot.slane %v8352_v8, 10  ;;  %v14019_v8 = vld [vmem:[#allocation40_spill] sm:$0xff] }
 0x296   : > { %v12645_v1 = vpop.f32.mrf.mxu1  ;;  %v8501_v12 = vcombine.low %v3481_v23, %v3484_v62  ;;  %v3489_v58 = vrot.slane %v3487_v24, 4  ;;  %v3488_v10 = vsel %vm11381_vm2, %v8366_v39, %v3487_v24  ;;  %v3504_v26 = vrot.slane %v8354_v36, 6  ;;  %v8355_v62 = vld [vmem:[%s11351_s7 + $0x7cc] sm:$0xc]  ;;  %v8357_v24 = vld [vmem:[%s11351_s7 + $0x7d4] sm:$0x3] }
 0x297   : > { %13995 = vst [vmem:[#allocation47_spill] sm:$0xff] %v12645_v1  ;;  %v3496_v32 = vrot.slane %v3494_v18, 4  ;;  %v3503_v33 = vrot.slane %v3501_v6, 4  ;;  %v3502_v28 = vsel %vm11381_vm2, %v8368_v30, %v3501_v6  ;;  %v3508_v60 = vrot.slane %v8356_v38, 6  ;;  %v10590_v48 = vld [vmem:[#allocation4 + $0x6f8] sm:$0xff]   ;;  %v10594_v22 = vld [vmem:[#allocation4 + $0x6f0] sm:$0xff]  }
 0x298   : > { %v12648_v43 = vpop.f32.mrf.mxu1  ;;  %v3491_v21 = vsel %vm11381_vm2, %v3489_v58, %v3490_v19  ;;  %v3511_v58 = vrot.slane %v8357_v24, 6  ;;  %v10500_v19 = vld [vmem:[#allocation4 + $0x480] sm:$0xff]  }
 0x299   : > { %13996 = vst [vmem:[#allocation48_spill] sm:$0xff] %v12648_v43  ;;  %v8502_v13 = vcombine.low %v3488_v10, %v3491_v21  ;;  %v3498_v14 = vsel %vm11381_vm2, %v3496_v32, %v3497_v31  ;;  %v3505_v2 = vsel %vm11381_vm2, %v3503_v33, %v3504_v26  ;;  %v3510_v39 = vrot.slane %v3508_v60, 4  ;;  %v8359_v10 = vld [vmem:[%s11351_s7 + $0x800] sm:$0xf]  ;;  %v14018_v21 = vld [vmem:[#allocation39_spill] sm:$0xff] }
 0x29a   : > { %v12672_v54 = vpop.f32.mrf.mxu1  ;;  %v8504_v57 = vcombine.low %v3502_v28, %v3505_v2  ;;  %v3515_v9 = vrot.slane %v8359_v10, 6  ;;  %v8360_v32 = vld [vmem:[%s11351_s7 + $0x804] sm:$0x3]  ;;  %v8361_v33 = vld [vmem:[%s11351_s7 + $0x82c] sm:$0xc] }
 0x29b   : > { %14002 = vst [vmem:[#allocation49_spill] sm:$0xff] %v12672_v54  ;;  %4745 = vmatmul.mubr.bf16.gmra.mxu0 %v8473_v41  ;;  %v14016_v41 = vld [vmem:[#allocation37_spill] sm:$0xff]  ;;  %v8363_v26 = vld [vmem:[%s11351_s7 + $0x834] sm:$0x3]  ;;  %v8371_v28 = vrot.slane %v8361_v33, 10 }
 0x29c   : > { %v12674_v59 = vpop.f32.mrf.mxu1  ;;  %4752 = vmatprep.mubr.bf16.mxu0 %v8482_v37  ;;  %v14020_v24 = vld [vmem:[#allocation41_spill] sm:$0xff] }
 0x29d   : > { %14003 = vst [vmem:[#allocation50_spill] sm:$0xff] %v12674_v59  ;;  %v8438_v10 = vld [vmem:[%s11351_s7 + $0xb64] sm:$0x3] }
 0x29e   : > { %v12693_v49 = vpop.f32.mrf.mxu1  ;;  %v5465_v59 = vld [vmem:[%s11351_s7 + $0xa4] sm:$0xf] }
 0x29f   : > { %14007 = vst [vmem:[#allocation51_spill] sm:$0xff] %v12693_v49 }
 0x2a0   : > { %v12695_v40 = vpop.f32.mrf.mxu1 }
 0x2a1   : > { %14008 = vst [vmem:[#allocation56_spill] sm:$0xff] %v12695_v40  ;;  %v10522_v40 = vld [vmem:[%s11351_s7] sm:$0xff]  }
 0x2a2   : > { %v12710_v50 = vpop.f32.mrf.mxu1 }
 0x2a3   : > { %4753 = vmatmul.mubr.bf16.gmra.mxu0 %v8474_v3  ;;  %14009 = vst [vmem:[#allocation57_spill] sm:$0xff] %v12710_v50 }
 0x2a4   : > { %4760 = vmatprep.mubr.bf16.mxu0 %v8483_v52  ;;  %v12713_v5 = vpop.f32.mrf.mxu1 }
 0x2a5   : > { %14010 = vst [vmem:[#allocation60_spill] sm:$0xff] %v12713_v5 }
 0x2a6   : > { %v12720_v0 = vpop.f32.mrf.mxu1 }
 0x2a7   : > { %14011 = vst [vmem:[#allocation54_spill] sm:$0xff] %v12720_v0 }
 0x2a8   : > { %v12724_v46 = vpop.f32.mrf.mxu1 }
 0x2a9   : > { %14012 = vst [vmem:[#allocation55_spill] sm:$0xff] %v12724_v46  ;;  %v8458_v46 = vld [vmem:[%s11351_s7 + $0xcb0] sm:$0xf] }
 0x2aa   : > { %v12733_v34 = vpop.f32.mrf.mxu1 }
 0x2ab   : > { %4761 = vmatmul.mubr.bf16.gmra.mxu0 %v8475_v56  ;;  %14014 = vst [vmem:[#allocation63_spill] sm:$0xff] %v12733_v34 }
 0x2ac   : > { %4898 = vmatprep.mubr.bf16.mxu0 %v8500_v15  ;;  %v12737_v47 = vpop.f32.mrf.mxu1  ;;  %v14017_v15 = vld [vmem:[#allocation38_spill] sm:$0xff] }
 0x2ad   : > { %14015 = vst [vmem:[#allocation61_spill] sm:$0xff] %v12737_v47  ;;  %v8454_v47 = vld [vmem:[%s11351_s7 + $0xc7c] sm:$0xc] }
 0x2b3   : > { %4899 = vmatmul.mubr.bf16.vlgmr.msra.gmra.mxu0 %v14013_v29 }
 0x2b4   : > { %9982 = vmatpush3.bf16.msra.mxu0 %v12608_v51  ;;  %4906 = vmatprep.mubr.bf16.mxu0 %v8501_v12  ;;  %v8367_v51 = vrot.slane %v8349_v25, 10  ;;  %v3512_v25 = vsel %vm11381_vm2, %v3510_v39, %v3511_v58 }
 0x2b5   : > { %9983 = vmatprep.subr.bf16.mxu0 %v10494_v63 }
 0x2b6   : > { %v3495_v61 = vsel %vm11381_vm2, %v8367_v51, %v3494_v18  ;;  %v8358_v51 = vld [vmem:[%s11351_s7 + $0x7fc] sm:$0xc] }
 0x2b7   : > { %v8503_v52 = vcombine.low %v3495_v61, %v3498_v14  ;;  %v3517_v61 = vrot.slane %v3515_v9, 4  ;;  %v3518_v14 = vrot.slane %v8360_v32, 6 }
 0x2b8   : > { %9984 = vmatpush3.bf16.msra.mxu0 %v10494_v63  ;;  %v9357_v37 = vpop.f32.mrf.mxu1  ;;  %v8369_v63 = vrot.slane %v8355_v62, 10 }
 0x2b9   : > { %9985 = vmatprep.subr.bf16.mxu0 %v10495_v4 }
 0x2ba   : > { %v9358_v42 = vpop.f32.mrf.mxu1  ;;  %v3509_v18 = vsel %vm11381_vm2, %v8369_v63, %v3508_v60  ;;  %v3525_v60 = vrot.slane %v8363_v26, 6 }
 0x2bb   : > { %4907 = vmatmul.mubr.bf16.gmra.mxu0 %v14016_v41  ;;  %v12747_v3 = vadd.f32 %v9358_v42, %v9357_v37  ;;  %v8370_v37 = vrot.slane %v8358_v51, 10  ;;  %v8440_v51 = vld [vmem:[%s11351_s7 + $0xb90] sm:$0xf] }
 0x2bc   : > { %4914 = vmatprep.mubr.bf16.mxu0 %v8502_v13  ;;  %9986 = vmatpush3.bf16.msra.mxu0 %v10495_v4  ;;  %v12749_v44 = vpop.f32.mrf.mxu1 }
 0x2bd   : > { %9987 = vmatprep.subr.bf16.mxu0 %v10496_v11  ;;  %v3516_v42 = vsel %vm11381_vm2, %v8370_v37, %v3515_v9 }
 0x2be   : > { %v12752_v56 = vpop.f32.mrf.mxu1 }
 0x2c0   : > { %9988 = vmatpush3.bf16.msra.mxu0 %v10496_v11  ;;  %v9363_v23 = vpop.f32.mrf.mxu1  ;;  %v8505_v11 = vcombine.low %v3509_v18, %v3512_v25 }
 0x2c1   : > { %9989 = vmatprep.subr.bf16.mxu0 %v10497_v20 }
 0x2c2   : > { %v9364_v7 = vpop.f32.mrf.mxu1 }
 0x2c3   : > { %4915 = vmatmul.mubr.bf16.gmra.mxu0 %v14017_v15  ;;  %v12761_v12 = vadd.f32 %v9364_v7, %v9363_v23  ;;  %v8437_v23 = vld [vmem:[%s11351_s7 + $0xb60] sm:$0xf] }
 0x2c4   : > { %4922 = vmatprep.mubr.bf16.mxu0 %v8503_v52  ;;  %9990 = vmatpush3.bf16.msra.mxu0 %v10497_v20  ;;  %v12763_v45 = vpop.f32.mrf.mxu1  ;;  %v8362_v20 = vld [vmem:[%s11351_s7 + $0x830] sm:$0xf]  ;;  %v3519_v52 = vsel %vm11381_vm2, %v3517_v61, %v3518_v14  ;;  %v3786_v39 = vrot.slane %v8437_v23, 6  ;;  %v3793_v61 = vrot.slane %v8440_v51, 6 }
 0x2c5   : > { %9991 = vmatprep.subr.bf16.mxu0 %v10498_v55  ;;  %v3522_v30 = vrot.slane %v8362_v20, 6  ;;  %v8506_v38 = vcombine.low %v3516_v42, %v3519_v52  ;;  %v8439_v52 = vld [vmem:[%s11351_s7 + $0xb8c] sm:$0xc] }
 0x2c6   : > { %v12767_v4 = vpop.f32.mrf.mxu1  ;;  %v3788_v9 = vrot.slane %v3786_v39, 4 }
 0x2c7   : > { %v3524_v2 = vrot.slane %v3522_v30, 4 }
 0x2c8   : > { %9992 = vmatpush3.bf16.msra.mxu0 %v10498_v55 }
 0x2c9   : > { %9993 = vmatprep.subr.bf16.mxu0 %v10499_v16  ;;  %v9369_v13 = vpop.f32.mrf.mxu1  ;;  %v3526_v63 = vsel %vm11381_vm2, %v3524_v2, %v3525_v60  ;;  %v8461_v60 = vrot.slane %v8439_v52, 10  ;;  %v8447_v52 = vld [vmem:[%s11351_s7 + $0xbf4] sm:$0x3] }
 0x2cb   : > { %4923 = vmatmul.mubr.bf16.gmra.mxu0 %v14018_v21  ;;  %v9370_v31 = vpop.f32.mrf.mxu1 }
 0x2cc   : > { %4930 = vmatprep.mubr.bf16.mxu0 %v8504_v57  ;;  %9994 = vmatpush3.bf16.msra.mxu0 %v10499_v16  ;;  %v12775_v27 = vadd.f32 %v9370_v31, %v9369_v13  ;;  %v3523_v57 = vsel %vm11381_vm2, %v8371_v28, %v3522_v30  ;;  %v3789_v13 = vrot.slane %v8438_v10, 6  ;;  %v8443_v31 = vld [vmem:[%s11351_s7 + $0xbc0] sm:$0xf]  ;;  %v8441_v30 = vld [vmem:[%s11351_s7 + $0xb94] sm:$0x3] }
 0x2cd   : > { %9995 = vmatprep.subr.bf16.mxu0 %v10500_v19  ;;  %v12777_v6 = vpop.f32.mrf.mxu1  ;;  %v8507_v18 = vcombine.low %v3523_v57, %v3526_v63  ;;  %v3800_v33 = vrot.slane %v8443_v31, 6  ;;  %v3796_v23 = vrot.slane %v8441_v30, 6 }
 0x2ce   : > { %v3790_v42 = vsel %vm11381_vm2, %v3788_v9, %v3789_v13  ;;  %v3794_v13 = vsel %vm11381_vm2, %v8461_v60, %v3793_v61 }
 0x2cf   : > { %v12781_v36 = vpop.f32.mrf.mxu1  ;;  %v3802_v63 = vrot.slane %v3800_v33, 4 }
 0x2d0   : > { %9996 = vmatpush3.bf16.msra.mxu0 %v10500_v19  ;;  %v8436_v19 = vld [vmem:[%s11351_s7 + $0xb5c] sm:$0xc] }
 0x2d1   : > { %v8460_v25 = vrot.slane %v8436_v19, 10  ;;  %v8446_v19 = vld [vmem:[%s11351_s7 + $0xbf0] sm:$0xf] }
 0x2d3   : > { %4931 = vmatmul.mubr.bf16.gmra.mxu0 %v14019_v8  ;;  %v3787_v20 = vsel %vm11381_vm2, %v8460_v25, %v3786_v39  ;;  %v14022_v25 = vld [vmem:[#allocation43_spill] sm:$0xff] }
 0x2d4   : > { %4938 = vmatprep.mubr.bf16.mxu0 %v8505_v11  ;;  %v14021_v11 = vld [vmem:[#allocation42_spill] sm:$0xff]  ;;  %v8524_v2 = vcombine.low %v3787_v20, %v3790_v42  ;;  %v8445_v42 = vld [vmem:[%s11351_s7 + $0xbec] sm:$0xc] }
 0x2d5   : > { %v9375_v55 = vpop.f32.mrf.mxu1 }
 0x2d7   : > { %v9376_v16 = vpop.f32.mrf.mxu1 }
 0x2d8   : > { %v12790_v62 = vadd.f32 %v9376_v16, %v9375_v55  ;;  %v8442_v55 = vld [vmem:[%s11351_s7 + $0xbbc] sm:$0xc]  ;;  %v3795_v16 = vrot.slane %v3793_v61, 4 }
 0x2d9   : > { %v12793_v7 = vpop.f32.mrf.mxu1  ;;  %v8462_v57 = vrot.slane %v8442_v55, 10  ;;  %v8448_v61 = vld [vmem:[%s11351_s7 + $0xc1c] sm:$0xc] }
 0x2da   : > { %v3797_v51 = vsel %vm11381_vm2, %v3795_v16, %v3796_v23  ;;  %v8463_v23 = vrot.slane %v8445_v42, 10 }
 0x2db   : > { %4939 = vmatmul.mubr.bf16.gmra.mxu0 %v14020_v24  ;;  %v12799_v58 = vpop.f32.mrf.mxu1 }
 0x2dc   : > { %4946 = vmatprep.mubr.bf16.mxu0 %v8506_v38  ;;  %v8444_v38 = vld [vmem:[%s11351_s7 + $0xbc4] sm:$0x3] }
 0x2dd   : > { %v9381_v32 = vpop.f32.mrf.mxu1  ;;  %v3803_v39 = vrot.slane %v8444_v38, 6  ;;  %v8450_v38 = vld [vmem:[%s11351_s7 + $0xc24] sm:$0x3] }
 0x2df   : > { %v9382_v37 = vpop.f32.mrf.mxu1  ;;  %v3804_v20 = vsel %vm11381_vm2, %v3802_v63, %v3803_v39  ;;  %v3817_v39 = vrot.slane %v8450_v38, 6 }
 0x2e0   : > { %v12806_v14 = vadd.f32 %v9382_v37, %v9381_v32  ;;  %v3807_v32 = vrot.slane %v8446_v19, 6  ;;  %v3801_v37 = vsel %vm11381_vm2, %v8462_v57, %v3800_v33  ;;  %v3810_v33 = vrot.slane %v8447_v52, 6  ;;  %v8451_v52 = vld [vmem:[%s11351_s7 + $0xc4c] sm:$0xc] }
 0x2e1   : > { %v12814_v26 = vpop.f32.mrf.mxu1  ;;  %v8526_v16 = vcombine.low %v3801_v37, %v3804_v20  ;;  %v8464_v57 = vrot.slane %v8448_v61, 10  ;;  %v8453_v61 = vld [vmem:[%s11351_s7 + $0xc54] sm:$0x3] }
 0x2e2   : > { %v3809_v19 = vrot.slane %v3807_v32, 4 }
 0x2e3   : > { %4947 = vmatmul.mubr.bf16.gmra.mxu0 %v14021_v11  ;;  %v12818_v28 = vpop.f32.mrf.mxu1 }
 0x2e4   : > { %4954 = vmatprep.mubr.bf16.mxu0 %v8507_v18  ;;  %v8449_v18 = vld [vmem:[%s11351_s7 + $0xc20] sm:$0xf] }
 0x2e5   : > { %v9387_v10 = vpop.f32.mrf.mxu1  ;;  %v3814_v30 = vrot.slane %v8449_v18, 6  ;;  %v8455_v18 = vld [vmem:[%s11351_s7 + $0xc80] sm:$0xf] }
 0x2e6   : > { %v3828_v38 = vrot.slane %v8455_v18, 6 }
 0x2e7   : > { %v9388_v9 = vpop.f32.mrf.mxu1  ;;  %v3816_v63 = vrot.slane %v3814_v30, 4  ;;  %v3815_v20 = vsel %vm11381_vm2, %v8464_v57, %v3814_v30  ;;  %v3824_v57 = vrot.slane %v8453_v61, 6 }
 0x2e8   : > { %v12827_v31 = vadd.f32 %v9388_v9, %v9387_v10  ;;  %v8452_v10 = vld [vmem:[%s11351_s7 + $0xc50] sm:$0xf] }
 0x2e9   : > { %v12835_v55 = vpop.f32.mrf.mxu1  ;;  %v3821_v37 = vrot.slane %v8452_v10, 6  ;;  %v3818_v42 = vsel %vm11381_vm2, %v3816_v63, %v3817_v39  ;;  %v8466_v10 = vrot.slane %v8454_v47, 10  ;;  %v3830_v63 = vrot.slane %v3828_v38, 4 }
 0x2eb   : > { %4955 = vmatmul.mubr.bf16.gmra.mxu0 %v14022_v25  ;;  %v12839_v60 = vpop.f32.mrf.mxu1  ;;  %v3823_v30 = vrot.slane %v3821_v37, 4 }
 0x2ec   : > { %9997 = vmatprep.mubr.bf16.mxu0 %v8524_v2  ;;  %v8525_v2 = vcombine.low %v3794_v13, %v3797_v51  ;;  %v3808_v13 = vsel %vm11381_vm2, %v8463_v23, %v3807_v32  ;;  %v3811_v51 = vsel %vm11381_vm2, %v3809_v19, %v3810_v33  ;;  %v8528_v19 = vcombine.low %v3815_v20, %v3818_v42  ;;  %v8459_v42 = vld [vmem:[%s11351_s7 + $0xcb4] sm:$0x3] }
 0x2ed   : > { %v9393_v9 = vpop.f32.mrf.mxu1  ;;  %v8527_v32 = vcombine.low %v3808_v13, %v3811_v51  ;;  %v8465_v33 = vrot.slane %v8451_v52, 10  ;;  %v8457_v13 = vld [vmem:[%s11351_s7 + $0xcac] sm:$0xc]  ;;  %v3835_v51 = vrot.slane %v8458_v46, 6  ;;  %v3829_v20 = vsel %vm11381_vm2, %v8466_v10, %v3828_v38  ;;  %v10503_v10 = vld [vmem:[#allocation4 + $0x4f8] sm:$0xff]  }
 0x2ee   : > { %v3838_v5 = vrot.slane %v8459_v42, 6 }
 0x2ef   : > { %v3822_v18 = vsel %vm11381_vm2, %v8465_v33, %v3821_v37 }
 0x2f3   : > { %9998 = vmatmul.mubr.bf16.vlgmr.msra.gmra.mxu0 %v8525_v2  ;;  %v9394_v2 = vpop.f32.mrf.mxu1 }
 0x2f4   : > { %10001 = vmatprep.mubr.bf16.mxu0 %v8526_v16  ;;  %v8456_v16 = vld [vmem:[%s11351_s7 + $0xc84] sm:$0x3]  ;;  %v12855_v34 = vadd.f32 %v9394_v2, %v9393_v9  ;;  %v3825_v9 = vsel %vm11381_vm2, %v3823_v30, %v3824_v57  ;;  %v8467_v2 = vrot.slane %v8457_v13, 10  ;;  %v10502_v57 = vld [vmem:[#allocation4 + $0x538] sm:$0xff]   ;;  %v10508_v13 = vld [vmem:[#allocation4 + $0x4e8] sm:$0xff]  }
 0x2f5   : > { %v12857_v23 = vpop.f32.mrf.mxu1  ;;  %v3831_v39 = vrot.slane %v8456_v16, 6  ;;  %v8529_v61 = vcombine.low %v3822_v18, %v3825_v9  ;;  %v10501_v30 = vld [vmem:[#allocation10 + $0xb8] sm:$0xff]   ;;  %9565 = vmatprep.subr.bf16.mxu0 %v10502_v57  ;;  %v10506_v18 = vld [vmem:[#allocation10 + $0xb0] sm:$0xff]   ;;  %v10507_v9 = vld [vmem:[#allocation4 + $0x528] sm:$0xff]  }
 0x2f6   : > { %v3836_v46 = vsel %vm11381_vm2, %v8467_v2, %v3835_v51  ;;  %10013 = vmatprep.subr.bf16.mxu1 %v10501_v30  ;;  %9566 = vmatpush3.bf16.msra.mxu0 %v10503_v10  ;;  %v10517_v57 = vld [vmem:[#allocation4 + $0x508] sm:$0xff]  }
 0x2f7   : > { %v12860_v0 = vpop.f32.mrf.mxu1  ;;  %v3832_v47 = vsel %vm11381_vm2, %v3830_v63, %v3831_v39  ;;  %10014 = vmatpush3.bf16.msra.mxu1 %v10501_v30  ;;  %v10504_v63 = vld [vmem:[#allocation4 + $0x530] sm:$0xff]   ;;  %v10516_v30 = vld [vmem:[#allocation10 + $0xa0] sm:$0xff]  }
 0x2f8   : > { %9567 = vmatprep.subr.bf16.mxu0 %v10504_v63  ;;  %v10505_v39 = vld [vmem:[#allocation4 + $0x4f0] sm:$0xff]   ;;  %10015 = vmatprep.subr.bf16.mxu1 %v10506_v18  ;;  %v10518_v63 = vld [vmem:[#allocation4 + $0x4c8] sm:$0xff]  }
 0x2f9   : > { %v9399_v52 = vpop.f32.mrf.mxu1 }
 0x2fa   : > { %9568 = vmatpush3.bf16.msra.mxu0 %v10505_v39  ;;  %v5456_v39 = vld [vmem:[%s11351_s7 + $0x14] sm:$0xf] }
 0x2fb   : > { %10002 = vmatmul.mubr.bf16.gmra.mxu0 %v8527_v32  ;;  %v9400_v16 = vpop.f32.mrf.mxu1  ;;  %v8530_v32 = vcombine.low %v3829_v20, %v3832_v47  ;;  %9569 = vmatprep.subr.bf16.mxu0 %v10507_v9  ;;  %v10510_v47 = vld [vmem:[#allocation4 + $0x4e0] sm:$0xff]   ;;  %v5505_v9 = vrot.slane %v5456_v39, 6 }
 0x2fc   : > { %10005 = vmatprep.mubr.bf16.mxu0 %v8528_v19  ;;  %v3837_v19 = vrot.slane %v3835_v51, 4  ;;  %v12872_v37 = vadd.f32 %v9400_v16, %v9399_v52  ;;  %10016 = vmatpush3.bf16.msra.mxu1 %v10506_v18  ;;  %v10511_v52 = vld [vmem:[#allocation10 + $0xa8] sm:$0xff]   ;;  %v10513_v16 = vld [vmem:[#allocation4 + $0x4d8] sm:$0xff]   ;;  %v10521_v39 = vld [vmem:[#allocation10 + $0x98] sm:$0xff]  }
 0x2fd   : > { %10017 = vmatprep.subr.bf16.mxu1 %v10511_v52 }
 0x2fe   : > { %v3839_v38 = vsel %vm11381_vm2, %v3837_v19, %v3838_v5  ;;  %9570 = vmatpush3.bf16.msra.mxu0 %v10508_v13  ;;  %v10509_v5 = vld [vmem:[#allocation4 + $0x520] sm:$0xff]   ;;  %v10514_v19 = vld [vmem:[#allocation4 + $0x510] sm:$0xff]  }
 0x2ff   : > { %v8531_v33 = vcombine.low %v3836_v46, %v3839_v38  ;;  %9571 = vmatprep.subr.bf16.mxu0 %v10509_v5  ;;  %v10515_v38 = vld [vmem:[#allocation4 + $0x4d0] sm:$0xff]   ;;  %v10519_v13 = vld [vmem:[#allocation4 + $0x500] sm:$0xff]  }
 0x300   : > { %10018 = vmatpush3.bf16.msra.mxu1 %v10511_v52  ;;  %v5455_v5 = vld [vmem:[%s11351_s7 + $0x10] sm:$0xc] }
 0x301   : > { %10019 = vmatprep.subr.bf16.mxu1 %v10516_v30 }
 0x302   : > { %9572 = vmatpush3.bf16.msra.mxu0 %v10510_v47  ;;  %v5457_v47 = vld [vmem:[%s11351_s7 + $0x18] sm:$0x3] }
 0x303   : > { %10006 = vmatmul.mubr.bf16.gmra.mxu0 %v8529_v61  ;;  %v10512_v61 = vld [vmem:[#allocation4 + $0x518] sm:$0xff]  }
 0x304   : > { %10009 = vmatprep.mubr.bf16.mxu0 %v8530_v32  ;;  %9573 = vmatprep.subr.bf16.mxu0 %v10512_v61  ;;  %v8614_v61 = vrot.slane %v5455_v5, 10 }
 0x305   : > { %10020 = vmatpush3.bf16.msra.mxu1 %v10516_v30 }
 0x306   : > { %9574 = vmatpush3.bf16.msra.mxu0 %v10513_v16  ;;  %v5507_v16 = vrot.slane %v5505_v9, 4  ;;  %v5506_v30 = vsel %vm11381_vm2, %v8614_v61, %v5505_v9  ;;  %10021 = vmatprep.subr.bf16.mxu1 %v10521_v39  ;;  %v5460_v9 = vld [vmem:[%s11351_s7 + $0x48] sm:$0x3] }
 0x307   : > { %9575 = vmatprep.subr.bf16.mxu0 %v10514_v19  ;;  %v5508_v19 = vrot.slane %v5457_v47, 6 }
 0x309   : > { %10022 = vmatpush3.bf16.msra.mxu1 %v10521_v39 }
 0x30a   : > { %9576 = vmatpush3.bf16.msra.mxu0 %v10515_v38  ;;  %v10520_v38 = vld [vmem:[#allocation4 + $0x4c0] sm:$0xff]  }
 0x30b   : > { %10010 = vmatmul.mubr.bf16.gmra.mxu0 %v8531_v33  ;;  %9577 = vmatprep.subr.bf16.mxu0 %v10517_v57 }
 0x30e   : > { %9578 = vmatpush3.bf16.msra.mxu0 %v10518_v63  ;;  %v5509_v63 = vsel %vm11381_vm2, %v5507_v16, %v5508_v19 }
 0x30f   : > { %9579 = vmatprep.subr.bf16.mxu0 %v10519_v13  ;;  %v8726_v50 = vcombine.low %v5506_v30, %v5509_v63  ;;  %v5459_v13 = vld [vmem:[%s11351_s7 + $0x44] sm:$0xf] }
 0x310   : > { %v5512_v47 = vrot.slane %v5459_v13, 6  ;;  %v10524_v13 = vld [vmem:[%s11351_s7 + $0x30] sm:$0xff]  }
 0x311   : > { %6704 = vmatprep.mubr.bf16.mxu0 %v8726_v50 }
 0x312   : > { %9580 = vmatpush3.bf16.msra.mxu0 %v10520_v38  ;;  %v5514_v19 = vrot.slane %v5512_v47, 4  ;;  %v5515_v38 = vrot.slane %v5460_v9, 6 }
 0x313   : > { %v12878_v51 = vpop.f32.mrf.mxu0 }
 0x314   : > { %14023 = vst [vmem:[#allocation52_spill] sm:$0xff] %v12878_v51  ;;  %v5516_v63 = vsel %vm11381_vm2, %v5514_v19, %v5515_v38  ;;  %v10597_v51 = vld [vmem:[#allocation4 + $0x6e8] sm:$0xff]  }
 0x315   : > { %v12880_v20 = vpop.f32.mrf.mxu0  ;;  %6705 = vmatmul.mubr.bf16.vlgmr.msra.gmra.mxu0 %v10522_v40  ;;  %v10523_v40 = vld [vmem:[#allocation10 + $0x90] sm:$0xff]  }
 0x316   : > { %14024 = vst [vmem:[#allocation58_spill] sm:$0xff] %v12880_v20  ;;  %10023 = vmatprep.subr.bf16.mxu1 %v10523_v40  ;;  %v10595_v20 = vld [vmem:[%s11351_s7 + $0x7d4] sm:$0xff]  }
 0x317   : > { %v12882_v42 = vpop.f32.mrf.mxu0  ;;  %10024 = vmatpush3.bf16.msra.mxu1 %v10523_v40 }
 0x318   : > { %14025 = vst [vmem:[#allocation59_spill] sm:$0xff] %v12882_v42 }
 0x319   : > { %v12884_v2 = vpop.f32.mrf.mxu0 }
 0x31a   : > { %14026 = vst [vmem:[#allocation62_spill] sm:$0xff] %v12884_v2 }
 0x31b   : > { %v12886_v32 = vpop.f32.mrf.mxu0 }
 0x31c   : > { %14027 = vst [vmem:[#allocation36_spill] sm:$0xff] %v12886_v32 }
 0x31d   : > { %v12888_v46 = vpop.f32.mrf.mxu0 }
 0x31e   : > { %14028 = vst [vmem:[#allocation37_spill] sm:$0xff] %v12888_v46 }
 0x31f   : > { %v12890_v33 = vpop.f32.mrf.mxu0 }
 0x320   : > { %14029 = vst [vmem:[#allocation38_spill] sm:$0xff] %v12890_v33 }
 0x321   : > { %v12892_v10 = vpop.f32.mrf.mxu0 }
 0x322   : > { %14030 = vst [vmem:[#allocation39_spill] sm:$0xff] %v12892_v10  ;;  %v5466_v10 = vld [vmem:[%s11351_s7 + $0xa8] sm:$0x3] }
 0x323   : > { %v12895_v18 = vpop.f32.mrf.mxu0 }
 0x324   : > { %14031 = vst [vmem:[#allocation40_spill] sm:$0xff] %v12895_v18 }
 0x325   : > { %v12899_v52 = vpop.f32.mrf.mxu0 }
 0x326   : > { %14032 = vst [vmem:[#allocation41_spill] sm:$0xff] %v12899_v52 }
 0x327   : > { %v12901_v57 = vpop.f32.mrf.mxu0 }
 0x328   : > { %14033 = vst [vmem:[#allocation42_spill] sm:$0xff] %v12901_v57  ;;  %v5458_v57 = vld [vmem:[%s11351_s7 + $0x40] sm:$0xc] }
 0x329   : > { %v12908_v52 = vpop.f32.mrf.mxu0  ;;  %v8615_v16 = vrot.slane %v5458_v57, 10  ;;  %v5462_v57 = vld [vmem:[%s11351_s7 + $0x74] sm:$0xf] }
 0x32a   : > { %14034 = vst [vmem:[#allocation43_spill] sm:$0xff] %v12908_v52  ;;  %v12926_v52 = vpop.f32.mrf.mxu1 }
 0x32b   : > { %v12911_v5 = vpop.f32.mrf.mxu0  ;;  %v5513_v50 = vsel %vm11381_vm2, %v8615_v16, %v5512_v47  ;;  %v5463_v47 = vld [vmem:[%s11351_s7 + $0x78] sm:$0x3] }
 0x32c   : > { %14035 = vst [vmem:[#allocation64_spill] sm:$0xff] %v12911_v5  ;;  %v8727_v39 = vcombine.low %v5513_v50, %v5516_v63  ;;  %v5522_v38 = vrot.slane %v5463_v47, 6  ;;  %v12931_v63 = vpop.f32.mrf.mxu1 }
 0x32d   : > { %v12915_v61 = vpop.f32.mrf.mxu0 }
 0x32e   : > { %14036 = vst [vmem:[#allocation65_spill] sm:$0xff] %v12915_v61  ;;  %6712 = vmatprep.mubr.bf16.mxu0 %v8727_v39  ;;  %v5461_v61 = vld [vmem:[%s11351_s7 + $0x70] sm:$0xc] }
 0x32f   : > { %v12917_v30 = vpop.f32.mrf.mxu0  ;;  %6713 = vmatmul.mubr.bf16.gmra.mxu0 %v10524_v13  ;;  %v8616_v49 = vrot.slane %v5461_v61, 10  ;;  %v9362_v61 = vadd.f32 %v12752_v56, %v12749_v44 }
 0x330   : > { %14037 = vst [vmem:[#allocation66_spill] sm:$0xff] %v12917_v30  ;;  %v5519_v30 = vrot.slane %v5462_v57, 6  ;;  %v12942_v57 = vpop.f32.mrf.mxu1 }
 0x331   : > { %v12924_v5 = vpop.f32.mrf.mxu0 }
 0x332   : > { %14038 = vst [vmem:[#allocation67_spill] sm:$0xff] %v12924_v5  ;;  %v5521_v19 = vrot.slane %v5519_v30, 4  ;;  %v5520_v39 = vsel %vm11381_vm2, %v8616_v49, %v5519_v30  ;;  %v5526_v30 = vrot.slane %v5465_v59, 6 }
 0x333   : > { %v9293_v9 = vpop.f32.mrf.mxu0 }
 0x334   : > { %v5523_v40 = vsel %vm11381_vm2, %v5521_v19, %v5522_v38  ;;  %v12948_v38 = vpop.f32.mrf.mxu1  ;;  %v5528_v54 = vrot.slane %v5526_v30, 4 }
 0x335   : > { %v9294_v16 = vpop.f32.mrf.mxu0 }
 0x336   : > { %v9295_v50 = vadd.f32 %v9294_v16, %v9293_v9  ;;  %v8728_v9 = vcombine.low %v5520_v39, %v5523_v40  ;;  %v10526_v16 = vld [vmem:[%s11351_s7 + $0x60] sm:$0xff]   ;;  %v5529_v39 = vrot.slane %v5466_v10, 6 }
 0x337   : > { %v9296_v5 = vpop.f32.mrf.mxu0 }
 0x338   : > { %v12938_v13 = vadd.f32 %v12747_v3, %v9295_v50  ;;  %6720 = vmatprep.mubr.bf16.mxu0 %v8728_v9  ;;  %v10525_v3 = vld [vmem:[#allocation10 + $0x88] sm:$0xff]   ;;  %v5464_v50 = vld [vmem:[%s11351_s7 + $0xa0] sm:$0xc]  ;;  %v9368_v9 = vadd.f32 %v12767_v4, %v12763_v45 }
 0x339   : > { %v9297_v47 = vpop.f32.mrf.mxu0  ;;  %6721 = vmatmul.mubr.bf16.gmra.mxu0 %v10526_v16  ;;  %v8617_v56 = vrot.slane %v5464_v50, 10  ;;  %10025 = vmatprep.subr.bf16.mxu1 %v10525_v3  ;;  %v5468_v50 = vld [vmem:[%s11351_s7 + $0xd4] sm:$0xf] }
 0x33a   : > { %v9298_v18 = vadd.f32 %v9297_v47, %v9296_v5  ;;  %10026 = vmatpush3.bf16.msra.mxu1 %v10525_v3  ;;  %v12961_v47 = vpop.f32.mrf.mxu1 }
 0x33b   : > { %v9299_v49 = vpop.f32.mrf.mxu0  ;;  %v5527_v59 = vsel %vm11381_vm2, %v8617_v56, %v5526_v30 }
 0x33c   : > { %v12946_v19 = vadd.f32 %v9362_v61, %v9298_v18  ;;  %v5530_v18 = vsel %vm11381_vm2, %v5528_v54, %v5529_v39  ;;  %v5533_v54 = vrot.slane %v5468_v50, 6  ;;  %v5467_v39 = vld [vmem:[%s11351_s7 + $0xd0] sm:$0xc] }
 0x33d   : > { %v9300_v44 = vpop.f32.mrf.mxu0  ;;  %v8729_v10 = vcombine.low %v5527_v59, %v5530_v18  ;;  %v8618_v45 = vrot.slane %v5467_v39, 10 }
 0x33e   : > { %v9301_v40 = vadd.f32 %v9300_v44, %v9299_v49  ;;  %v10528_v49 = vld [vmem:[%s11351_s7 + $0x90] sm:$0xff]   ;;  %v10527_v44 = vld [vmem:[#allocation10 + $0x80] sm:$0xff]   ;;  %v5535_v4 = vrot.slane %v5533_v54, 4 }
 0x33f   : > { %v9302_v5 = vpop.f32.mrf.mxu0  ;;  %6728 = vmatprep.mubr.bf16.mxu0 %v8729_v10  ;;  %10027 = vmatprep.subr.bf16.mxu1 %v10527_v44  ;;  %v10529_v10 = vld [vmem:[#allocation4 + $0x5b8] sm:$0xff]  }
 0x340   : > { %v12957_v61 = vadd.f32 %v12761_v12, %v9301_v40  ;;  %v12967_v12 = vpop.f32.mrf.mxu1  ;;  %v5469_v40 = vld [vmem:[%s11351_s7 + $0xd8] sm:$0x3]  ;;  %10028 = vmatpush3.bf16.msra.mxu1 %v10527_v44 }
 0x341   : > { %v9303_v16 = vpop.f32.mrf.mxu0  ;;  %6729 = vmatmul.mubr.bf16.gmra.mxu0 %v10528_v49  ;;  %v5536_v59 = vrot.slane %v5469_v40, 6  ;;  %9629 = vmatprep.subr.bf16.mxu1 %v10529_v10  ;;  %v10532_v44 = vld [vmem:[#allocation4 + $0x638] sm:$0xff]  }
 0x342   : > { %v9304_v3 = vadd.f32 %v9303_v16, %v9302_v5  ;;  %v5534_v16 = vsel %vm11381_vm2, %v8618_v45, %v5533_v54  ;;  %v12980_v50 = vpop.f32.mrf.mxu1  ;;  %v10533_v54 = vld [vmem:[#allocation4 + $0x5f8] sm:$0xff]   ;;  %v5471_v45 = vld [vmem:[%s11351_s7 + $0x104] sm:$0xf]  ;;  %9693 = vmatprep.subr.bf16.mxu0 %v10532_v44 }
 0x343   : > { %v9305_v30 = vpop.f32.mrf.mxu0  ;;  %9694 = vmatpush3.bf16.msra.mxu0 %v10533_v54 }
 0x344   : > { %v12965_v56 = vadd.f32 %v9368_v9, %v9304_v3  ;;  %v5537_v9 = vsel %vm11381_vm2, %v5535_v4, %v5536_v59  ;;  %v9374_v3 = vadd.f32 %v12781_v36, %v12777_v6  ;;  %v12986_v6 = vpop.f32.mrf.mxu1  ;;  %v5470_v36 = vld [vmem:[%s11351_s7 + $0x100] sm:$0xc] }
 0x345   : > { %v9306_v33 = vpop.f32.mrf.mxu0  ;;  %v8730_v39 = vcombine.low %v5534_v16, %v5537_v9  ;;  %v10536_v9 = vld [vmem:[#allocation4 + $0x630] sm:$0xff]   ;;  %v8619_v10 = vrot.slane %v5470_v36, 10 }
 0x346   : > { %v9307_v18 = vadd.f32 %v9306_v33, %v9305_v30  ;;  %v10531_v30 = vld [vmem:[%s11351_s7 + $0xc0] sm:$0xff]   ;;  %9695 = vmatprep.subr.bf16.mxu0 %v10536_v9  ;;  %v12999_v54 = vpop.f32.mrf.mxu1  ;;  %v10540_v36 = vld [vmem:[%s11351_s7 + $0xf0] sm:$0xff]  }
 0x347   : > { %v9308_v5 = vpop.f32.mrf.mxu0  ;;  %6736 = vmatprep.mubr.bf16.mxu0 %v8730_v39  ;;  %v5474_v9 = vld [vmem:[%s11351_s7 + $0x134] sm:$0xf] }
 0x348   : > { %v12976_v49 = vadd.f32 %v12775_v27, %v9307_v18  ;;  %v5540_v27 = vrot.slane %v5471_v45, 6  ;;  %v5472_v18 = vld [vmem:[%s11351_s7 + $0x108] sm:$0x3] }
 0x349   : > { %v9309_v33 = vpop.f32.mrf.mxu0  ;;  %6737 = vmatmul.mubr.bf16.gmra.mxu0 %v10531_v30 }
 0x34a   : > { %v9310_v40 = vadd.f32 %v9309_v33, %v9308_v5  ;;  %v5542_v43 = vrot.slane %v5540_v27, 4  ;;  %v5543_v5 = vrot.slane %v5472_v18, 6  ;;  %v10537_v33 = vld [vmem:[#allocation4 + $0x5f0] sm:$0xff]   ;;  %v10541_v18 = vld [vmem:[#allocation4 + $0x628] sm:$0xff]  }
 0x34b   : > { %v9311_v4 = vpop.f32.mrf.mxu0  ;;  %9696 = vmatpush3.bf16.msra.mxu0 %v10537_v33  ;;  %v10545_v33 = vld [vmem:[#allocation4 + $0x620] sm:$0xff]  }
 0x34c   : > { %v12984_v59 = vadd.f32 %v9374_v3, %v9310_v40  ;;  %v5541_v3 = vsel %vm11381_vm2, %v8619_v10, %v5540_v27  ;;  %v5544_v30 = vsel %vm11381_vm2, %v5542_v43, %v5543_v5  ;;  %v9380_v40 = vadd.f32 %v12799_v58, %v12793_v7  ;;  %v10542_v27 = vld [vmem:[#allocation4 + $0x5e8] sm:$0xff]   ;;  %9697 = vmatprep.subr.bf16.mxu0 %v10541_v18  ;;  %v13005_v7 = vpop.f32.mrf.mxu1  ;;  %v5473_v58 = vld [vmem:[%s11351_s7 + $0x130] sm:$0xc]  ;;  %v5475_v5 = vld [vmem:[%s11351_s7 + $0x138] sm:$0x3] }
 0x34d   : > { %v9312_v16 = vpop.f32.mrf.mxu0  ;;  %v8731_v45 = vcombine.low %v5541_v3, %v5544_v30  ;;  %v8620_v3 = vrot.slane %v5473_v58, 10  ;;  %v10549_v58 = vld [vmem:[%s11351_s7 + $0x120] sm:$0xff]  }
 0x34e   : > { %14039 = vst [vmem:[#allocation68_spill] sm:$0xff] %v12984_v59  ;;  %v9313_v39 = vadd.f32 %v9312_v16, %v9311_v4 }
 0x34f   : > { %v9314_v46 = vpop.f32.mrf.mxu0  ;;  %6744 = vmatprep.mubr.bf16.mxu0 %v8731_v45  ;;  %9698 = vmatpush3.bf16.msra.mxu0 %v10542_v27  ;;  %v13018_v27 = vpop.f32.mrf.mxu1 }
 0x350   : > { %v12995_v44 = vadd.f32 %v12790_v62, %v9313_v39  ;;  %v5547_v62 = vrot.slane %v5474_v9, 6  ;;  %9699 = vmatprep.subr.bf16.mxu0 %v10545_v33  ;;  %v5477_v33 = vld [vmem:[%s11351_s7 + $0x164] sm:$0xf] }
 0x351   : > { %v9315_v4 = vpop.f32.mrf.mxu0  ;;  %6745 = vmatmul.mubr.bf16.gmra.mxu0 %v10540_v36 }
 0x352   : > { %14040 = vst [vmem:[#allocation69_spill] sm:$0xff] %v12995_v44  ;;  %v9316_v16 = vadd.f32 %v9315_v4, %v9314_v46  ;;  %v5549_v30 = vrot.slane %v5547_v62, 4  ;;  %v5550_v46 = vrot.slane %v5475_v5, 6  ;;  %v10546_v4 = vld [vmem:[#allocation4 + $0x5e0] sm:$0xff]   ;;  %v10550_v5 = vld [vmem:[#allocation4 + $0x618] sm:$0xff]   ;;  %v10611_v44 = vld [vmem:[#allocation4 + $0x6c8] sm:$0xff]  }
 0x353   : > { %v9317_v43 = vpop.f32.mrf.mxu0  ;;  %9700 = vmatpush3.bf16.msra.mxu0 %v10546_v4 }
 0x354   : > { %v13003_v10 = vadd.f32 %v9380_v40, %v9316_v16  ;;  %v5548_v40 = vsel %vm11381_vm2, %v8620_v3, %v5547_v62  ;;  %v5551_v36 = vsel %vm11381_vm2, %v5549_v30, %v5550_v46  ;;  %v9386_v16 = vadd.f32 %v12818_v28, %v12814_v26  ;;  %9701 = vmatprep.subr.bf16.mxu0 %v10550_v5  ;;  %v13024_v26 = vpop.f32.mrf.mxu1  ;;  %v10554_v28 = vld [vmem:[#allocation4 + $0x610] sm:$0xff]   ;;  %v5476_v46 = vld [vmem:[%s11351_s7 + $0x160] sm:$0xc] }
 0x355   : > { %v9318_v39 = vpop.f32.mrf.mxu0  ;;  %v8732_v9 = vcombine.low %v5548_v40, %v5551_v36  ;;  %v8621_v40 = vrot.slane %v5476_v46, 10  ;;  %v10560_v46 = vld [vmem:[#allocation4 + $0x5c8] sm:$0xff]  }
 0x356   : > { %14041 = vst [vmem:[#allocation70_spill] sm:$0xff] %v13003_v10  ;;  %v9319_v45 = vadd.f32 %v9318_v39, %v9317_v43  ;;  %v10551_v39 = vld [vmem:[#allocation4 + $0x5d8] sm:$0xff]  }
 0x357   : > { %v9320_v1 = vpop.f32.mrf.mxu0  ;;  %6752 = vmatprep.mubr.bf16.mxu0 %v8732_v9  ;;  %9702 = vmatpush3.bf16.msra.mxu0 %v10551_v39  ;;  %v10555_v9 = vld [vmem:[#allocation4 + $0x5d0] sm:$0xff]   ;;  %v9392_v39 = vadd.f32 %v12839_v60, %v12835_v55  ;;  %v10563_v55 = vld [vmem:[#allocation4 + $0x600] sm:$0xff]  }
 0x358   : > { %v13014_v18 = vadd.f32 %v12806_v14, %v9319_v45  ;;  %v5554_v14 = vrot.slane %v5477_v33, 6  ;;  %v5478_v45 = vld [vmem:[%s11351_s7 + $0x168] sm:$0x3]  ;;  %9703 = vmatprep.subr.bf16.mxu0 %v10554_v28  ;;  %v10565_v60 = vld [vmem:[#allocation4 + $0x5c0] sm:$0xff]  }
 0x359   : > { %v9321_v43 = vpop.f32.mrf.mxu0  ;;  %6753 = vmatmul.mubr.bf16.gmra.mxu0 %v10549_v58  ;;  %v5557_v32 = vrot.slane %v5478_v45, 6  ;;  %v10559_v28 = vld [vmem:[#allocation4 + $0x608] sm:$0xff]  }
 0x35a   : > { %14042 = vst [vmem:[#allocation71_spill] sm:$0xff] %v13014_v18  ;;  %v9322_v62 = vadd.f32 %v9321_v43, %v9320_v1  ;;  %v5556_v36 = vrot.slane %v5554_v14, 4  ;;  %v5555_v58 = vsel %vm11381_vm2, %v8621_v40, %v5554_v14  ;;  %v10608_v18 = vld [vmem:[#allocation4 + $0x6d0] sm:$0xff]  }
 0x35b   : > { %v9323_v3 = vpop.f32.mrf.mxu0  ;;  %9704 = vmatpush3.bf16.msra.mxu0 %v10555_v9  ;;  %v10568_v9 = vld [vmem:[%s11351_s7 + $0x6e4] sm:$0xff]  }
 0x35c   : > { %v13022_v30 = vadd.f32 %v9386_v16, %v9322_v62  ;;  %v5558_v16 = vsel %vm11381_vm2, %v5556_v36, %v5557_v32  ;;  %v13037_v62 = vpop.f32.mrf.mxu1  ;;  %9705 = vmatprep.subr.bf16.mxu0 %v10559_v28 }
 0x35d   : > { %v9324_v4 = vpop.f32.mrf.mxu0  ;;  %v8733_v33 = vcombine.low %v5555_v58, %v5558_v16 }
 0x35e   : > { %14043 = vst [vmem:[#allocation72_spill] sm:$0xff] %v13022_v30  ;;  %v9325_v1 = vadd.f32 %v9324_v4, %v9323_v3  ;;  %v10558_v3 = vld [vmem:[%s11351_s7 + $0x150] sm:$0xff]  }
 0x35f   : > { %v9326_v43 = vpop.f32.mrf.mxu0  ;;  %6760 = vmatprep.mubr.bf16.mxu0 %v8733_v33  ;;  %9706 = vmatpush3.bf16.msra.mxu0 %v10560_v46 }
 0x360   : > { %v13033_v5 = vadd.f32 %v12827_v31, %v9325_v1  ;;  %v13042_v31 = vpop.f32.mrf.mxu1  ;;  %9707 = vmatprep.subr.bf16.mxu0 %v10563_v55 }
 0x361   : > { %v9327_v45 = vpop.f32.mrf.mxu0  ;;  %6761 = vmatmul.mubr.bf16.gmra.mxu0 %v10558_v3 }
 0x362   : > { %14044 = vst [vmem:[#allocation73_spill] sm:$0xff] %v13033_v5  ;;  %v9328_v4 = vadd.f32 %v9327_v45, %v9326_v43  ;;  %v9398_v43 = vadd.f32 %v12860_v0, %v12857_v23  ;;  %v13050_v16 = vpop.f32.mrf.mxu1  ;;  %6898 = vmatprep.mubr.bf16.mxu0 %v10568_v9  ;;  %v10604_v5 = vld [vmem:[#allocation4 + $0x6d8] sm:$0xff]  }
 0x363   : > { %v9329_v14 = vpop.f32.mrf.mxu0  ;;  %9708 = vmatpush3.bf16.msra.mxu0 %v10565_v60 }
 0x364   : > { %v13040_v32 = vadd.f32 %v9392_v39, %v9328_v4  ;;  %v13055_v46 = vpop.f32.mrf.mxu1  ;;  %10045 = vmatprep.subr.bf16.mxu0 %v10590_v48 }
 0x365   : > { %v9330_v40 = vpop.f32.mrf.mxu0 }
 0x366   : > { %14045 = vst [vmem:[#allocation74_spill] sm:$0xff] %v13040_v32  ;;  %v9331_v36 = vadd.f32 %v9330_v40, %v9329_v14  ;;  %v10573_v14 = vld [vmem:[%s11351_s7 + $0x714] sm:$0xff]   ;;  %v13061_v23 = vpop.f32.mrf.mxu1 }
 0x367   : > { %v9332_v1 = vpop.f32.mrf.mxu0 }
 0x368   : > { %v13046_v58 = vadd.f32 %v12855_v34, %v9331_v36 }
 0x369   : > { %v9333_v39 = vpop.f32.mrf.mxu0  ;;  %6899 = vmatmul.mubr.bf16.vlgmr.msra.gmra.mxu0 %v14013_v29  ;;  %v13066_v29 = vpop.f32.mrf.mxu1 }
 0x36a   : > { %14046 = vst [vmem:[#allocation75_spill] sm:$0xff] %v13046_v58  ;;  %v9334_v33 = vadd.f32 %v9333_v39, %v9332_v1  ;;  %6906 = vmatprep.mubr.bf16.mxu0 %v10573_v14  ;;  %10046 = vmatpush3.bf16.msra.mxu0 %v10590_v48  ;;  %v10602_v58 = vld [vmem:[%s11351_s7 + $0x804] sm:$0xff]  }
 0x36b   : > { %v9335_v3 = vpop.f32.mrf.mxu0  ;;  %v13074_v39 = vpop.f32.mrf.mxu1  ;;  %10047 = vmatprep.subr.bf16.mxu0 %v10594_v22 }
 0x36c   : > { %v13053_v28 = vadd.f32 %v9398_v43, %v9334_v33  ;;  %v10578_v43 = vld [vmem:[%s11351_s7 + $0x744] sm:$0xff]  }
 0x36d   : > { %v9336_v45 = vpop.f32.mrf.mxu0 }
 0x36e   : > { %14047 = vst [vmem:[#allocation76_spill] sm:$0xff] %v13053_v28  ;;  %v9337_v34 = vadd.f32 %v9336_v45, %v9335_v3  ;;  %10048 = vmatpush3.bf16.msra.mxu0 %v10594_v22 }
 0x36f   : > { %v9338_v4 = vpop.f32.mrf.mxu0  ;;  %10049 = vmatprep.subr.bf16.mxu0 %v10597_v51 }
 0x370   : > { %v13059_v0 = vadd.f32 %v12872_v37, %v9337_v34 }
 0x371   : > { %v9339_v55 = vpop.f32.mrf.mxu0  ;;  %6907 = vmatmul.mubr.bf16.gmra.mxu0 %v14016_v41  ;;  %v13081_v41 = vpop.f32.mrf.mxu1 }
 0x372   : > { %14048 = vst [vmem:[#allocation77_spill] sm:$0xff] %v13059_v0  ;;  %v13063_v60 = vadd.f32 %v9339_v55, %v9338_v4  ;;  %6914 = vmatprep.mubr.bf16.mxu0 %v10578_v43  ;;  %v10583_v4 = vld [vmem:[%s11351_s7 + $0x774] sm:$0xff]   ;;  %10050 = vmatpush3.bf16.msra.mxu0 %v10597_v51  ;;  %v10601_v0 = vld [vmem:[#allocation4 + $0x6e0] sm:$0xff]  }
 0x373   : > { %v9421_v40 = vpop.f32.mrf.mxu0  ;;  %v13088_v14 = vpop.f32.mrf.mxu1  ;;  %10051 = vmatprep.subr.bf16.mxu0 %v10601_v0 }
 0x374   : > { %14049 = vst [vmem:[#allocation78_spill] sm:$0xff] %v13063_v60  ;;  %v10609_v60 = vld [vmem:[%s11351_s7 + $0x834] sm:$0xff]  }
 0x375   : > { %v9422_v36 = vpop.f32.mrf.mxu0 }
 0x376   : > { %v9423_v1 = vadd.f32 %v9422_v36, %v9421_v40  ;;  %v13095_v40 = vpop.f32.mrf.mxu1  ;;  %10052 = vmatpush3.bf16.msra.mxu0 %v10601_v0 }
 0x377   : > { %v13068_v9 = vpop.f32.mrf.mxu0  ;;  %10053 = vmatprep.subr.bf16.mxu0 %v10604_v5 }
 0x378   : > { %v13072_v37 = vadd.f32 %v9423_v1, %v12938_v13  ;;  %v10588_v1 = vld [vmem:[%s11351_s7 + $0x7a4] sm:$0xff]   ;;  %v13102_v43 = vpop.f32.mrf.mxu1 }
 0x379   : > { %v13076_v33 = vpop.f32.mrf.mxu0  ;;  %6915 = vmatmul.mubr.bf16.gmra.mxu0 %v14017_v15 }
 0x37a   : > { %6922 = vmatprep.mubr.bf16.mxu0 %v10583_v4  ;;  %10054 = vmatpush3.bf16.msra.mxu0 %v10604_v5 }
 0x37b   : > { %v13078_v3 = vpop.f32.mrf.mxu0  ;;  %10055 = vmatprep.subr.bf16.mxu0 %v10608_v18 }
 0x37d   : > { %v13083_v45 = vpop.f32.mrf.mxu0 }
 0x37e   : > { %10056 = vmatpush3.bf16.msra.mxu0 %v10608_v18  ;;  %v10615_v18 = vld [vmem:[%s11351_s7 + $0xdd4] sm:$0xff]  }
 0x37f   : > { %v13085_v34 = vpop.f32.mrf.mxu0  ;;  %10057 = vmatprep.subr.bf16.mxu0 %v10611_v44 }
 0x381   : > { %v13090_v13 = vpop.f32.mrf.mxu0  ;;  %6923 = vmatmul.mubr.bf16.gmra.mxu0 %v14018_v21  ;;  %v13109_v21 = vpop.f32.mrf.mxu1 }
 0x382   : > { %6930 = vmatprep.mubr.bf16.mxu0 %v10588_v1  ;;  %10058 = vmatpush3.bf16.msra.mxu0 %v10611_v44  ;;  %v9432_v44 = vadd.f32 %v13090_v13, %v13085_v34  ;;  %v9499_v34 = vadd.f32 %v13024_v26, %v13018_v27 }
 0x383   : > { %v13092_v55 = vpop.f32.mrf.mxu0  ;;  %v13116_v53 = vpop.f32.mrf.mxu1 }
 0x385   : > { %v13097_v15 = vpop.f32.mrf.mxu0  ;;  %v13123_v48 = vpop.f32.mrf.mxu1 }
 0x387   : > { %v13099_v36 = vpop.f32.mrf.mxu0  ;;  %v13130_v32 = vpop.f32.mrf.mxu1 }
 0x389   : > { %v13104_v2 = vpop.f32.mrf.mxu0  ;;  %6931 = vmatmul.mubr.bf16.gmra.mxu0 %v14019_v8 }
 0x38a   : > { %6938 = vmatprep.mubr.bf16.mxu0 %v10595_v20 }
 0x38b   : > { %v13106_v4 = vpop.f32.mrf.mxu0 }
 0x38d   : > { %v13111_v35 = vpop.f32.mrf.mxu0 }
 0x38f   : > { %v13113_v42 = vpop.f32.mrf.mxu0 }
 0x391   : > { %v13118_v17 = vpop.f32.mrf.mxu0  ;;  %6939 = vmatmul.mubr.bf16.gmra.mxu0 %v14020_v24  ;;  %v9522_v24 = vpop.f32.mrf.mxu1 }
 0x392   : > { %6946 = vmatprep.mubr.bf16.mxu0 %v10602_v58  ;;  %v9444_v27 = vadd.f32 %v13118_v17, %v13113_v42 }
 0x393   : > { %v13120_v1 = vpop.f32.mrf.mxu0  ;;  %v13142_v10 = vpop.f32.mrf.mxu1 }
 0x394   : > { %14052 = vst [vmem:[#allocation81_spill] sm:$0xff] %v13142_v10  ;;  %v10613_v10 = vld [vmem:[#allocation4 + $0x6c0] sm:$0xff]  }
 0x395   : > { %v13125_v8 = vpop.f32.mrf.mxu0  ;;  %v13149_v5 = vpop.f32.mrf.mxu1  ;;  %10059 = vmatprep.subr.bf16.mxu0 %v10613_v10 }
 0x396   : > { %14054 = vst [vmem:[#allocation83_spill] sm:$0xff] %v13149_v5  ;;  %10060 = vmatpush3.bf16.msra.mxu0 %v10613_v10  ;;  %v9487_v10 = vadd.f32 %v12948_v38, %v12942_v57  ;;  %v9505_v57 = vadd.f32 %v13055_v46, %v13050_v16  ;;  %v9508_v38 = vadd.f32 %v13066_v29, %v13061_v23  ;;  %v13216_v46 = vld [vmem:[#allocation7 + $0x2] ss:$0 sm:$0xff] }
 0x397   : > { %v13127_v28 = vpop.f32.mrf.mxu0  ;;  %v13214_v16 = vadd.f32 %v9522_v24, %v13130_v32  ;;  %v14064_v24 = vld [vmem:[#allocation72_spill] sm:$0xff] }
 0x398   : > { %v4998_v29 = vadd.f32 %v9487_v10, %v13072_v37  ;;  %v14065_v10 = vld [vmem:[#allocation73_spill] sm:$0xff] }
 0x399   : > { %v13132_v20 = vpop.f32.mrf.mxu0  ;;  %6947 = vmatmul.mubr.bf16.gmra.mxu0 %v14021_v11 }
 0x39a   : > { %6954 = vmatprep.mubr.bf16.mxu0 %v10609_v60  ;;  %v9429_v60 = vadd.f32 %v13083_v45, %v13078_v3  ;;  %v9490_v3 = vadd.f32 %v12967_v12, %v12961_v47  ;;  %v9496_v45 = vadd.f32 %v13005_v7, %v12999_v54  ;;  %v4912_v47 = vadd.f32 %v9432_v44, %v12965_v56 }
 0x39b   : > { %v13134_v22 = vpop.f32.mrf.mxu0  ;;  %v9435_v12 = vadd.f32 %v13097_v15, %v13092_v55  ;;  %v9441_v7 = vadd.f32 %v13111_v35, %v13106_v4  ;;  %v9514_v56 = vadd.f32 %v13095_v40, %v13088_v14  ;;  %v9450_v42 = vadd.f32 %v13132_v20, %v13127_v28  ;;  %v14060_v55 = vld [vmem:[#allocation69_spill] sm:$0xff]  ;;  %v14061_v28 = vld [vmem:[#allocation70_spill] sm:$0xff] }
 0x39c   : > { %v4928_v15 = vadd.f32 %v9444_v27, %v14061_v28  ;;  %v10618_v20 = vld [vmem:[%s11351_s7 + $0xe04] sm:$0xff]  }
 0x39d   : > { %v13137_v51 = vpop.f32.mrf.mxu0  ;;  %v4925_v40 = vadd.f32 %v9441_v7, %v14060_v55 }
 0x39e   : > { %14050 = vst [vmem:[#allocation79_spill] sm:$0xff] %v13137_v51  ;;  %v9527_v51 = vpop.f32.mrf.mxu1  ;;  %v5025_v7 = vadd.f32 %v9508_v38, %v4928_v15 }
 0x39f   : > { %v13139_v30 = vpop.f32.mrf.mxu0 }
 0x3a0   : > { %14051 = vst [vmem:[#allocation80_spill] sm:$0xff] %v13139_v30  ;;  %v10614_v30 = vld [vmem:[%s11351_s7 + $0xda4] sm:$0xff]   ;;  %v9528_v5 = vpop.f32.mrf.mxu1 }
 0x3a1   : > { %v13144_v59 = vpop.f32.mrf.mxu0  ;;  %6955 = vmatmul.mubr.bf16.gmra.mxu0 %v14022_v25 }
 0x3a2   : > { %14053 = vst [vmem:[#allocation82_spill] sm:$0xff] %v13144_v59  ;;  %10061 = vmatprep.mubr.bf16.mxu0 %v10614_v30  ;;  %v9493_v30 = vadd.f32 %v12986_v6, %v12980_v50  ;;  %v9438_v50 = vadd.f32 %v13104_v2, %v13099_v36  ;;  %v9511_v6 = vadd.f32 %v13081_v41, %v13074_v39  ;;  %v13226_v41 = vld [vmem:[#allocation9 + $0x2] ss:$0 sm:$0xff] }
 0x3a3   : > { %v13146_v11 = vpop.f32.mrf.mxu0  ;;  %v9517_v2 = vadd.f32 %v13109_v21, %v13102_v43  ;;  %v14062_v43 = vld [vmem:[#allocation78_spill] sm:$0xff] }
 0x3a5   : > { %v13151_v58 = vpop.f32.mrf.mxu0  ;;  %v14059_v32 = vld [vmem:[#allocation79_spill] sm:$0xff] }
 0x3a6   : > { %14055 = vst [vmem:[#allocation84_spill] sm:$0xff] %v13151_v58 }
 0x3a7   : > { %v13153_v0 = vpop.f32.mrf.mxu0 }
 0x3a8   : > { %14056 = vst [vmem:[#allocation85_spill] sm:$0xff] %v13153_v0  ;;  %v9404_v0 = vadd.f32 %v12931_v63, %v12926_v52  ;;  %v9426_v52 = vadd.f32 %v13076_v33, %v13068_v9  ;;  %v9502_v63 = vadd.f32 %v13042_v31, %v13037_v62  ;;  %v9447_v62 = vadd.f32 %v13125_v8, %v13120_v1 }
 0x3a9   : > { %v13156_v59 = vpop.f32.mrf.mxu0  ;;  %10062 = vmatmul.mubr.bf16.vlgmr.msra.gmra.mxu0 %v10615_v18  ;;  %v13211_v31 = vadd.f32 %v13123_v48, %v13116_v53  ;;  %v4917_v9 = vadd.f32 %v9435_v12, %v12976_v49  ;;  %v14058_v53 = vld [vmem:[#allocation68_spill] sm:$0xff]  ;;  %v9453_v33 = vadd.f32 %v14059_v32, %v13134_v22  ;;  %v14063_v49 = vld [vmem:[#allocation71_spill] sm:$0xff]  ;;  %v13235_v1 = vadd.f32 %v9528_v5, %v9527_v51 }
 0x3aa   : > { %14057 = vst [vmem:[#allocation86_spill] sm:$0xff] %v13156_v59  ;;  %v4909_v59 = vadd.f32 %v9429_v60, %v12957_v61  ;;  %v9530_v61 = vpop.f32.mrf.mxu1  ;;  %v4904_v17 = vadd.f32 %v9426_v52, %v12946_v19  ;;  %v4920_v39 = vadd.f32 %v9438_v50, %v14058_v53  ;;  %v5009_v19 = vadd.f32 %v9496_v45, %v4912_v47  ;;  %v10619_v22 = vld [vmem:[%s11351_s7 + $0xe34] sm:$0xff]   ;;  %v14067_v52 = vld [vmem:[#allocation82_spill] sm:$0xff] }
 0x3ab   : > { %v13161_v25 = vpop.f32.mrf.mxu0  ;;  %v13232_v4 = vadd.f32 %v9404_v0, %v14062_v43  ;;  %v4933_v21 = vadd.f32 %v9447_v62, %v14063_v49  ;;  %v4936_v18 = vadd.f32 %v9450_v42, %v14064_v24  ;;  %v4941_v45 = vadd.f32 %v9453_v33, %v14065_v10  ;;  %v14066_v0 = vld [vmem:[#allocation80_spill] sm:$0xff]  ;;  %10065 = vmatprep.mubr.bf16.mxu0 %v10618_v20  ;;  %v14070_v43 = vld [vmem:[#allocation75_spill] sm:$0xff] }
 0x3ac   : > { %v5006_v26 = vadd.f32 %v9493_v30, %v4909_v59  ;;  %v9531_v59 = vpop.f32.mrf.mxu1  ;;  %v9456_v47 = vadd.f32 %v14067_v52, %v14066_v0  ;;  %v5001_v12 = vadd.f32 %v9490_v3, %v4904_v17  ;;  %v5014_v5 = vadd.f32 %v9499_v34, %v4917_v9  ;;  %v14068_v34 = vld [vmem:[#allocation74_spill] sm:$0xff]  ;;  %v10530_v10 = vld [vmem:[#allocation4 + $0x578] sm:$0xff]  }
 0x3ad   : > { %v13165_v58 = vpop.f32.mrf.mxu0  ;;  %v13237_v48 = vadd.f32 %v9531_v59, %v9530_v61  ;;  %v5022_v50 = vadd.f32 %v9505_v57, %v4925_v40  ;;  %v5017_v27 = vadd.f32 %v9502_v63, %v4920_v39  ;;  %v5030_v59 = vadd.f32 %v9511_v6, %v4933_v21  ;;  %v14069_v9 = vld [vmem:[#allocation84_spill] sm:$0xff] }
 0x3ae   : > { %v13250_v3 = vadd.f32 %v9514_v56, %v4936_v18  ;;  %v4944_v17 = vadd.f32 %v9456_v47, %v14068_v34  ;;  %v9459_v57 = vadd.f32 %v14069_v9, %v13146_v11  ;;  %v5038_v53 = vadd.f32 %v9517_v2, %v4941_v45  ;;  %v14071_v45 = vld [vmem:[#allocation77_spill] sm:$0xff] }
 0x3af   : > { %v13180_v13 = vpop.f32.mrf.mxu0  ;;  %v9465_v2 = vadd.f32 %v13165_v58, %v13161_v25 }
 0x3b0   : > { %v4949_v49 = vadd.f32 %v9459_v57, %v14070_v43  ;;  %v5041_v20 = vadd.f32 %v13211_v31, %v4944_v17 }
 0x3b1   : > { %v13197_v54 = vpop.f32.mrf.mxu0  ;;  %10066 = vmatmul.mubr.bf16.gmra.mxu0 %v10619_v22  ;;  %v4957_v0 = vadd.f32 %v9465_v2, %v14071_v45  ;;  %v10539_v2 = vld [vmem:[#allocation4 + $0x568] sm:$0xff]  }
 0x3b2   : > { %v9468_v52 = vadd.f32 %v13197_v54, %v13180_v13 }
 0x3b3   : > { %v9999_v35 = vpop.f32.mrf.mxu0 }
 0x3b4   : > { %v5103_v23 = vadd.f32 %v9999_v35, %v5006_v26  ;;  %v4960_v9 = vadd.f32 %v9468_v52, %v13232_v4 }
 0x3b5   : > { %v5094_v14 = vpop.f32.mrf.mxu0 }
 0x3b6   : > { %v5167_v36 = vmul.f32 %v13216_v46, %v5103_v23  ;;  %v5095_v37 = vadd.f32 %v5094_v14, %v4998_v29 }
 0x3b7   : > { %v10000_v8 = vpop.f32.mrf.mxu0 }
 0x3b8   : > { %v5191_v60 = vadd.f32 %v13226_v41, %v5167_v36  ;;  %v5165_v44 = vmul.f32 %v13216_v46, %v5095_v37  ;;  %v5106_v30 = vadd.f32 %v10000_v8, %v5009_v19 }
 0x3b9   : > { %v5097_v51 = vpop.f32.mrf.mxu0 }
 0x3ba   : > { %v5168_v61 = vmul.f32 %v13216_v46, %v5106_v30  ;;  %v5223_v26 = vmul.f32 0.01, %v5191_v60  ;;  %v5189_v62 = vadd.f32 %v13226_v41, %v5165_v44  ;;  %v5098_v35 = vadd.f32 %v5097_v51, %v5001_v12  ;;  %v10534_v51 = vld [vmem:[#allocation4 + $0x5b0] sm:$0xff]  }
 0x3bb   : > { %v10003_v42 = vpop.f32.mrf.mxu0  ;;  %vm5207_vm5 = vcmp.ge.f32.partialorder %v5191_v60, 0.0 }
 0x3bc   : > { %v5192_v23 = vadd.f32 %v13226_v41, %v5168_v61  ;;  %v5119_v29 = vadd.f32 %v10003_v42, %v5022_v50  ;;  %v5166_v63 = vmul.f32 %v13216_v46, %v5098_v35  ;;  %v5239_v33 = vsel %vm5207_vm5, %v5191_v60, %v5223_v26  ;;  %v10622_v35 = vld [vmem:[%s11351_s7 + $0xe64] sm:$0xff]   ;;  %v10623_v42 = vld [vmem:[%s11351_s7 + $0xe94] sm:$0xff]  }
 0x3bd   : > { %v5110_v38 = vpop.f32.mrf.mxu0  ;;  %v5221_v14 = vmul.f32 0.01, %v5189_v62  ;;  %vm5205_vm7 = vcmp.ge.f32.partialorder %v5189_v62, 0.0  ;;  %10069 = vmatprep.mubr.bf16.mxu0 %v10622_v35 }
 0x3be   : > { %vm5208_vm6 = vcmp.ge.f32.partialorder %v5192_v23, 0.0  ;;  %v5224_v39 = vmul.f32 0.01, %v5192_v23  ;;  %v5171_v32 = vmul.f32 %v13216_v46, %v5119_v29  ;;  %v5111_v6 = vadd.f32 %v5110_v38, %v5014_v5  ;;  %10070 = vmatmul.mubr.bf16.gmra.mxu0 %v10623_v42 }
 0x3bf   : > { %v5190_v19 = vadd.f32 %v13226_v41, %v5166_v63  ;;  %v10004_v56 = vpop.f32.mrf.mxu0  ;;  %v5237_v60 = vsel %vm5205_vm7, %v5189_v62, %v5221_v14 }
 0x3c0   : > { %v5240_v55 = vsel %vm5208_vm6, %v5192_v23, %v5224_v39  ;;  %v5195_v40 = vadd.f32 %v13226_v41, %v5171_v32  ;;  %v5169_v11 = vmul.f32 %v13216_v46, %v5111_v6  ;;  %v5122_v28 = vadd.f32 %v10004_v56, %v5025_v7  ;;  %v14072_v7 = vld [vmem:[#allocation85_spill] sm:$0xff] }
 0x3c1   : > { %v5254_v15 = vpack.c.bf16 %v5240_v55, %v5239_v33  ;;  %v5222_v36 = vmul.f32 0.01, %v5190_v19  ;;  %v5113_v37 = vpop.f32.mrf.mxu0  ;;  %vm5206_vm8 = vcmp.ge.f32.partialorder %v5190_v19, 0.0  ;;  %v5054_v32 = vadd.f32 %v13235_v1, %v4957_v0  ;;  %v14074_v1 = vld [vmem:[#allocation76_spill] sm:$0xff] }
 0x3c2   : > { %v5193_v21 = vadd.f32 %v13226_v41, %v5169_v11  ;;  %v5172_v8 = vmul.f32 %v13216_v46, %v5122_v28  ;;  %v5227_v22 = vmul.f32 0.01, %v5195_v40  ;;  %v5114_v24 = vadd.f32 %v5113_v37, %v5017_v27  ;;  %v14073_v27 = vld [vmem:[#allocation86_spill] sm:$0xff] }
 0x3c3   : > { %v10007_v18 = vpop.f32.mrf.mxu0  ;;  %v5238_v44 = vsel %vm5206_vm8, %v5190_v19, %v5222_v36  ;;  %vm5211_vm9 = vcmp.ge.f32.partialorder %v5195_v40, 0.0  ;;  %v9462_v26 = vadd.f32 %v14073_v27, %v14072_v7  ;;  %v5046_v6 = vadd.f32 %v13214_v16, %v4949_v49  ;;  %v14075_v16 = vld [vmem:[#allocation81_spill] sm:$0xff]  ;;  %v14076_v36 = vld [vmem:[#allocation83_spill] sm:$0xff] }
 0x3c4   : > { %v5196_v58 = vadd.f32 %v13226_v41, %v5172_v8  ;;  %v5135_v25 = vadd.f32 %v10007_v18, %v5038_v53  ;;  %v5253_v30 = vpack.c.bf16 %v5238_v44, %v5237_v60  ;;  %v5225_v47 = vmul.f32 0.01, %v5193_v21  ;;  %v10538_v53 = vld [vmem:[#allocation4 + $0x5a8] sm:$0xff]  }
 0x3c5   : > { %v5170_v31 = vmul.f32 %v13216_v46, %v5114_v24  ;;  %v5126_v12 = vpop.f32.mrf.mxu0  ;;  %vm5209_vm11 = vcmp.ge.f32.partialorder %v5193_v21, 0.0  ;;  %v5243_v54 = vsel %vm5211_vm9, %v5195_v40, %v5227_v22  ;;  %v9526_v37 = vadd.f32 %v14076_v36, %v14075_v16  ;;  %v10582_v16 = vld [vmem:[#allocation4 + $0x6a0] sm:$0xff]  }
 0x3c6   : > { %vm5212_vm10 = vcmp.ge.f32.partialorder %v5196_v58, 0.0  ;;  %v5228_v5 = vmul.f32 0.01, %v5196_v58  ;;  %v5175_v61 = vmul.f32 %v13216_v46, %v5135_v25  ;;  %v5127_v50 = vadd.f32 %v5126_v12, %v5030_v59  ;;  %10029 = vmatprep.mubr.bf16.mxu1 %v5253_v30  ;;  %v10535_v59 = vld [vmem:[#allocation4 + $0x570] sm:$0xff]   ;;  %v10544_v30 = vld [vmem:[#allocation4 + $0x560] sm:$0xff]  }
 0x3c7   : > { %v5194_v62 = vadd.f32 %v13226_v41, %v5170_v31  ;;  %10030 = vmatmul.mubr.bf16.vlgmr.msra.gmra.mxu1 %v5254_v15  ;;  %v10008_v13 = vpop.f32.mrf.mxu0  ;;  %v5241_v33 = vsel %vm5209_vm11, %v5193_v21, %v5225_v47  ;;  %v4952_v15 = vadd.f32 %v9462_v26, %v14074_v1  ;;  %v10543_v21 = vld [vmem:[#allocation4 + $0x5a0] sm:$0xff]   ;;  %v10547_v31 = vld [vmem:[#allocation4 + $0x598] sm:$0xff]  }
 0x3c8   : > { %v5199_v23 = vadd.f32 %v13226_v41, %v5175_v61  ;;  %v5173_v29 = vmul.f32 %v13216_v46, %v5127_v50  ;;  %v5138_v34 = vadd.f32 %v10008_v13, %v5041_v20  ;;  %9630 = vmatpush3.bf16.msra.mxu1 %v10530_v10  ;;  %v5244_v17 = vsel %vm5212_vm10, %v5196_v58, %v5228_v5  ;;  %v10575_v1 = vld [vmem:[%s11351_s7 + $0x720] sm:$0xff]  }
 0x3c9   : > { %v5226_v57 = vmul.f32 0.01, %v5194_v62  ;;  %v5129_v63 = vpop.f32.mrf.mxu0  ;;  %9631 = vmatprep.subr.bf16.mxu1 %v10534_v51  ;;  %vm5210_vm12 = vcmp.ge.f32.partialorder %v5194_v62, 0.0  ;;  %v5256_v38 = vpack.c.bf16 %v5244_v17, %v5243_v54  ;;  %v5049_v0 = vadd.f32 %v9526_v37, %v4952_v15  ;;  %v10552_v54 = vld [vmem:[#allocation4 + $0x590] sm:$0xff]   ;;  %v10579_v15 = vld [vmem:[#allocation4 + $0x668] sm:$0xff]  }
 0x3ca   : > { %v5176_v39 = vmul.f32 %v13216_v46, %v5138_v34  ;;  %v5231_v14 = vmul.f32 0.01, %v5199_v23  ;;  %v5197_v19 = vadd.f32 %v13226_v41, %v5173_v29  ;;  %v5130_v4 = vadd.f32 %v5129_v63, %v13250_v3  ;;  %v10626_v29 = vld [vmem:[%s11351_s7 + $0xec4] sm:$0xff]   ;;  %v10627_v34 = vld [vmem:[%s11351_s7 + $0xef4] sm:$0xff]  }
 0x3cb   : > { %v10011_v56 = vpop.f32.mrf.mxu0  ;;  %v5242_v55 = vsel %vm5210_vm12, %v5194_v62, %v5226_v57  ;;  %vm5215_vm13 = vcmp.ge.f32.partialorder %v5199_v23, 0.0  ;;  %v5057_v3 = vadd.f32 %v13237_v48, %v4960_v9  ;;  %v10548_v62 = vld [vmem:[#allocation4 + $0x558] sm:$0xff]   ;;  %v10556_v63 = vld [vmem:[#allocation4 + $0x588] sm:$0xff]   ;;  %10073 = vmatprep.mubr.bf16.mxu0 %v10626_v29 }
 0x3cc   : > { %v5200_v40 = vadd.f32 %v13226_v41, %v5176_v39  ;;  %v5151_v11 = vadd.f32 %v10011_v56, %v5054_v32  ;;  %9632 = vmatpush3.bf16.msra.mxu1 %v10535_v59  ;;  %v5255_v28 = vpack.c.bf16 %v5242_v55, %v5241_v33  ;;  %v5174_v43 = vmul.f32 %v13216_v46, %v5130_v4  ;;  %v10553_v59 = vld [vmem:[#allocation4 + $0x550] sm:$0xff]   ;;  %v10557_v39 = vld [vmem:[#allocation4 + $0x548] sm:$0xff]   ;;  %v10564_v32 = vld [vmem:[%s11351_s7 + $0x6c0] sm:$0xff]  }
 0x3cd   : > { %v5142_v49 = vpop.f32.mrf.mxu0  ;;  %9633 = vmatprep.subr.bf16.mxu1 %v10538_v53  ;;  %v5229_v24 = vmul.f32 0.01, %v5197_v19  ;;  %vm5213_vm15 = vcmp.ge.f32.partialorder %v5197_v19, 0.0  ;;  %v5247_v44 = vsel %vm5215_vm13, %v5199_v23, %v5231_v14  ;;  %10074 = vmatmul.mubr.bf16.gmra.mxu0 %v10627_v34  ;;  %v10562_v33 = vld [vmem:[#allocation4 + $0x540] sm:$0xff]   ;;  %v10567_v14 = vld [vmem:[#allocation4 + $0x6b8] sm:$0xff]   ;;  %v10570_v56 = vld [vmem:[%s11351_s7 + $0x6f0] sm:$0xff]  }
 0x3ce   : > { %vm5216_vm14 = vcmp.ge.f32.partialorder %v5200_v40, 0.0  ;;  %v5232_v8 = vmul.f32 0.01, %v5200_v40  ;;  %v5179_v20 = vmul.f32 %v13216_v46, %v5151_v11  ;;  %v5143_v22 = vadd.f32 %v5142_v49, %v5046_v6  ;;  %10033 = vmatprep.mubr.bf16.mxu1 %v5255_v28  ;;  %v10561_v6 = vld [vmem:[#allocation4 + $0x580] sm:$0xff]   ;;  %v10569_v4 = vld [vmem:[#allocation4 + $0x678] sm:$0xff]   ;;  %v10572_v55 = vld [vmem:[#allocation4 + $0x6b0] sm:$0xff]  }
 0x3cf   : > { %v5198_v18 = vadd.f32 %v13226_v41, %v5174_v43  ;;  %10034 = vmatmul.mubr.bf16.gmra.mxu1 %v5256_v38  ;;  %v10012_v60 = vpop.f32.mrf.mxu0  ;;  %v5245_v61 = vsel %vm5213_vm15, %v5197_v19, %v5229_v24  ;;  %v10566_v19 = vld [vmem:[%s11351_s7 + $0x24] sm:$0xff]   ;;  %v10571_v28 = vld [vmem:[%s11351_s7 + $0x54] sm:$0xff]  }
 0x3d0   : > { %v5203_v58 = vadd.f32 %v13226_v41, %v5179_v20  ;;  %v5177_v25 = vmul.f32 %v13216_v46, %v5143_v22  ;;  %v5154_v48 = vadd.f32 %v10012_v60, %v5057_v3  ;;  %9634 = vmatpush3.bf16.msra.mxu1 %v10539_v2  ;;  %v5248_v10 = vsel %vm5216_vm14, %v5200_v40, %v5232_v8  ;;  %v10574_v40 = vld [vmem:[#allocation4 + $0x670] sm:$0xff]   ;;  %v10577_v11 = vld [vmem:[#allocation4 + $0x6a8] sm:$0xff]   ;;  %v10584_v49 = vld [vmem:[#allocation4 + $0x660] sm:$0xff]  }
 0x3d1   : > { %v5230_v45 = vmul.f32 0.01, %v5198_v18  ;;  %v5145_v52 = vpop.f32.mrf.mxu0  ;;  %9635 = vmatprep.subr.bf16.mxu1 %v10543_v21  ;;  %vm5214_vm0 = vcmp.ge.f32.partialorder %v5198_v18, 0.0  ;;  %v5258_v47 = vpack.c.bf16 %v5248_v10, %v5247_v44  ;;  %v10587_v3 = vld [vmem:[#allocation4 + $0x698] sm:$0xff]   ;;  %v10576_v20 = vld [vmem:[%s11351_s7 + $0x84] sm:$0xff]   ;;  %v10580_v24 = vld [vmem:[%s11351_s7 + $0x750] sm:$0xff]  }
 0x3d2   : > { %v5180_v12 = vmul.f32 %v13216_v46, %v5154_v48  ;;  %v5201_v51 = vadd.f32 %v13226_v41, %v5177_v25  ;;  %v5146_v5 = vadd.f32 %v5145_v52, %v5049_v0  ;;  %v5235_v7 = vmul.f32 0.01, %v5203_v58  ;;  %v10593_v60 = vld [vmem:[#allocation4 + $0x690] sm:$0xff]  }
 0x3d3   : > { %v5246_v50 = vsel %vm5214_vm0, %v5198_v18, %v5230_v45  ;;  %vm5219_vm1 = vcmp.ge.f32.partialorder %v5203_v58, 0.0  ;;  %v10589_v18 = vld [vmem:[#allocation4 + $0x658] sm:$0xff]   ;;  %v10596_v48 = vld [vmem:[#allocation4 + $0x650] sm:$0xff]  }
 0x3d4   : > { %v5204_v27 = vadd.f32 %v13226_v41, %v5180_v12  ;;  %9636 = vmatpush3.bf16.msra.mxu1 %v10544_v30  ;;  %v5257_v26 = vpack.c.bf16 %v5246_v50, %v5245_v61  ;;  %v5178_v13 = vmul.f32 %v13216_v46, %v5146_v5  ;;  %v5233_v42 = vmul.f32 0.01, %v5201_v51  ;;  %v10600_v30 = vld [vmem:[#allocation4 + $0x688] sm:$0xff]   ;;  %v10581_v0 = vld [vmem:[%s11351_s7 + $0xb4] sm:$0xff]   ;;  %v10607_v12 = vld [vmem:[#allocation4 + $0x680] sm:$0xff]  }
 0x3d5   : > { %9637 = vmatprep.subr.bf16.mxu1 %v10547_v31  ;;  %vm5217_vm4 = vcmp.ge.f32.partialorder %v5201_v51, 0.0  ;;  %v5251_v17 = vsel %vm5219_vm1, %v5203_v58, %v5235_v7  ;;  %v9581_v2 = vpop.f32.mrf.mxu0  ;;  %v10603_v31 = vld [vmem:[#allocation4 + $0x648] sm:$0xff]   ;;  %v10610_v50 = vld [vmem:[#allocation4 + $0x640] sm:$0xff]   ;;  %v10592_v34 = vld [vmem:[%s11351_s7 + $0x114] sm:$0xff]  }
 0x3d6   : > { %vm5220_vm3 = vcmp.ge.f32.partialorder %v5204_v27, 0.0  ;;  %v5236_v35 = vmul.f32 0.01, %v5204_v27  ;;  %10037 = vmatprep.mubr.bf16.mxu1 %v5257_v26  ;;  %v5202_v23 = vadd.f32 %v13226_v41, %v5178_v13  ;;  %v5249_v38 = vsel %vm5217_vm4, %v5201_v51, %v5233_v42  ;;  %v10586_v26 = vld [vmem:[%s11351_s7 + $0xe4] sm:$0xff]   ;;  %v10591_v13 = vld [vmem:[%s11351_s7 + $0x7b0] sm:$0xff]  }
 0x3d7   : > { %10038 = vmatmul.mubr.bf16.gmra.mxu1 %v5258_v47  ;;  %v9582_v36 = vpop.f32.mrf.mxu0  ;;  %v10585_v47 = vld [vmem:[%s11351_s7 + $0x780] sm:$0xff]  }
 0x3d8   : > { %9638 = vmatpush3.bf16.msra.mxu1 %v10548_v62  ;;  %v5252_v9 = vsel %vm5220_vm3, %v5204_v27, %v5236_v35  ;;  %v5234_v57 = vmul.f32 0.01, %v5202_v23  ;;  %vm5218_vm5 = vcmp.ge.f32.partialorder %v5202_v23, 0.0  ;;  %v13314_v37 = vadd.f32 %v9582_v36, %v9581_v2  ;;  %v10631_v2 = vld [vmem:[#allocation10 + $0xe8] sm:$0xff]  }
 0x3d9   : > { %9639 = vmatprep.subr.bf16.mxu1 %v10552_v54  ;;  %v5260_v46 = vpack.c.bf16 %v5252_v9, %v5251_v17  ;;  %v9584_v43 = vpop.f32.mrf.mxu0  ;;  %v10598_v17 = vld [vmem:[%s11351_s7 + $0x7e0] sm:$0xff]  }
 0x3da   : > { %v5250_v53 = vsel %vm5218_vm5, %v5202_v23, %v5234_v57  ;;  %v8671_v57 = vld [vmem:[%s11351_s7 + $0xd94] sm:$0xf] }
 0x3db   : > { %v5259_v41 = vpack.c.bf16 %v5250_v53, %v5249_v38  ;;  %v9585_v21 = vpop.f32.mrf.mxu0  ;;  %v5674_v38 = vrot.slane %v8671_v57, 6 }
 0x3dc   : > { %9640 = vmatpush3.bf16.msra.mxu1 %v10553_v59  ;;  %v13316_v8 = vadd.f32 %v9585_v21, %v9584_v43  ;;  %v8673_v43 = vld [vmem:[%s11351_s7 + $0xdc0] sm:$0xc]  ;;  %v10606_v21 = vld [vmem:[%s11351_s7 + $0x174] sm:$0xff]  }
 0x3dd   : > { %9641 = vmatprep.subr.bf16.mxu1 %v10556_v63  ;;  %10041 = vmatprep.mubr.bf16.mxu1 %v5259_v41  ;;  %v8670_v41 = vld [vmem:[%s11351_s7 + $0xd90] sm:$0xc] }
 0x3df   : > { %10042 = vmatmul.mubr.bf16.gmra.mxu1 %v5260_v46 }
 0x3e0   : > { %9642 = vmatpush3.bf16.msra.mxu1 %v10557_v39  ;;  %6801 = vmatprep.mubr.bf16.mxu1 %v10564_v32  ;;  %v8672_v39 = vld [vmem:[%s11351_s7 + $0xd98] sm:$0x3] }
 0x3e1   : > { %9643 = vmatprep.subr.bf16.mxu1 %v10561_v6  ;;  %v10599_v6 = vld [vmem:[%s11351_s7 + $0x144] sm:$0xff]  }
 0x3e4   : > { %9644 = vmatpush3.bf16.msra.mxu1 %v10562_v33 }
 0x3e5   : > { %9757 = vmatprep.subr.bf16.mxu1 %v10567_v14  ;;  %v10605_v14 = vld [vmem:[%s11351_s7 + $0x810] sm:$0xff]  }
 0x3e7   : > { %6802 = vmatmul.mubr.bf16.vlgmr.msra.gmra.mxu1 %v10566_v19  ;;  %v8694_v19 = vrot.slane %v8670_v41, 10  ;;  %v10616_v41 = vld [vmem:[%s11351_s7 + $0xdb0] sm:$0xff]  }
 0x3e8   : > { %9758 = vmatpush3.bf16.msra.mxu1 %v10569_v4  ;;  %6809 = vmatprep.mubr.bf16.mxu1 %v10570_v56  ;;  %v5676_v4 = vrot.slane %v5674_v38, 4  ;;  %v5677_v56 = vrot.slane %v8672_v39, 6 }
 0x3e9   : > { %9759 = vmatprep.subr.bf16.mxu1 %v10572_v55 }
 0x3ec   : > { %9760 = vmatpush3.bf16.msra.mxu1 %v10574_v40  ;;  %v8674_v40 = vld [vmem:[%s11351_s7 + $0xdc4] sm:$0xf] }
 0x3ed   : > { %9761 = vmatprep.subr.bf16.mxu1 %v10577_v11 }
 0x3ef   : > { %6810 = vmatmul.mubr.bf16.gmra.mxu1 %v10571_v28  ;;  %v9587_v22 = vpop.f32.mrf.mxu0 }
 0x3f0   : > { %6817 = vmatprep.mubr.bf16.mxu1 %v10575_v1  ;;  %9762 = vmatpush3.bf16.msra.mxu1 %v10579_v15  ;;  %v5675_v1 = vsel %vm11381_vm2, %v8694_v19, %v5674_v38  ;;  %v5678_v15 = vsel %vm11381_vm2, %v5676_v4, %v5677_v56  ;;  %v8681_v38 = vld [vmem:[%s11351_s7 + $0xe28] sm:$0x3]  ;;  %v8683_v19 = vld [vmem:[%s11351_s7 + $0xe54] sm:$0xf] }
 0x3f1   : > { %9763 = vmatprep.subr.bf16.mxu1 %v10582_v16  ;;  %v9588_v44 = vpop.f32.mrf.mxu0  ;;  %v5681_v16 = vrot.slane %v8674_v40, 6  ;;  %v8682_v40 = vld [vmem:[%s11351_s7 + $0xe50] sm:$0xc] }
 0x3f2   : > { %v13320_v58 = vadd.f32 %v9588_v44, %v9587_v22  ;;  %v8766_v22 = vcombine.low %v5675_v1, %v5678_v15  ;;  %v10617_v1 = vld [vmem:[%s11351_s7 + $0xde0] sm:$0xff]  }
 0x3f3   : > { %v9590_v25 = vpop.f32.mrf.mxu0 }
 0x3f4   : > { %9764 = vmatpush3.bf16.msra.mxu1 %v10584_v49  ;;  %v8675_v49 = vld [vmem:[%s11351_s7 + $0xdc8] sm:$0x3] }
 0x3f5   : > { %9765 = vmatprep.subr.bf16.mxu1 %v10587_v3  ;;  %v9591_v10 = vpop.f32.mrf.mxu0 }
 0x3f6   : > { %v13322_v45 = vadd.f32 %v9591_v10, %v9590_v25  ;;  %v8677_v25 = vld [vmem:[%s11351_s7 + $0xdf4] sm:$0xf] }
 0x3f7   : > { %6818 = vmatmul.mubr.bf16.gmra.mxu1 %v10576_v20 }
 0x3f8   : > { %6825 = vmatprep.mubr.bf16.mxu1 %v10580_v24  ;;  %9766 = vmatpush3.bf16.msra.mxu1 %v10589_v18  ;;  %v8695_v24 = vrot.slane %v8673_v43, 10  ;;  %v5683_v18 = vrot.slane %v5681_v16, 4 }
 0x3f9   : > { %9767 = vmatprep.subr.bf16.mxu1 %v10593_v60  ;;  %v9593_v52 = vpop.f32.mrf.mxu0  ;;  %v5684_v60 = vrot.slane %v8675_v49, 6  ;;  %v8686_v49 = vld [vmem:[%s11351_s7 + $0xe84] sm:$0xf] }
 0x3fa   : > { %v5682_v10 = vsel %vm11381_vm2, %v8695_v24, %v5681_v16  ;;  %v8698_v16 = vrot.slane %v8682_v40, 10  ;;  %v8685_v24 = vld [vmem:[%s11351_s7 + $0xe80] sm:$0xc]  ;;  %v10630_v40 = vld [vmem:[#allocation10 + $0xf0] sm:$0xff]  }
 0x3fb   : > { %v9594_v51 = vpop.f32.mrf.mxu0 }
 0x3fc   : > { %9768 = vmatpush3.bf16.msra.mxu1 %v10596_v48  ;;  %v13326_v5 = vadd.f32 %v9594_v51, %v9593_v52  ;;  %v5688_v52 = vrot.slane %v8677_v25, 6  ;;  %v8699_v25 = vrot.slane %v8685_v24, 10 }
 0x3fd   : > { %9769 = vmatprep.subr.bf16.mxu1 %v10600_v30  ;;  %v9596_v61 = vpop.f32.mrf.mxu0 }
 0x3ff   : > { %6826 = vmatmul.mubr.bf16.gmra.mxu1 %v10581_v0  ;;  %v9597_v7 = vpop.f32.mrf.mxu0  ;;  %v5685_v0 = vsel %vm11381_vm2, %v5683_v18, %v5684_v60  ;;  %v8687_v18 = vld [vmem:[%s11351_s7 + $0xe88] sm:$0x3]  ;;  %v10620_v60 = vld [vmem:[%s11351_s7 + $0xe10] sm:$0xff]  }
 0x400   : > { %6833 = vmatprep.mubr.bf16.mxu1 %v10585_v47  ;;  %9770 = vmatpush3.bf16.msra.mxu1 %v10603_v31  ;;  %v13328_v27 = vadd.f32 %v9597_v7, %v9596_v61  ;;  %v8676_v31 = vld [vmem:[%s11351_s7 + $0xdf0] sm:$0xc]  ;;  %v10612_v61 = vld [vmem:[%s11351_s7 + $0xd80] sm:$0xff]   ;;  %v8767_v7 = vcombine.low %v5682_v10, %v5685_v0  ;;  %v5712_v10 = vrot.slane %v8687_v18, 6  ;;  %v8689_v0 = vld [vmem:[%s11351_s7 + $0xeb4] sm:$0xf] }
 0x401   : > { %9771 = vmatprep.subr.bf16.mxu1 %v10607_v12  ;;  %v9599_v62 = vpop.f32.mrf.mxu0  ;;  %v8678_v12 = vld [vmem:[%s11351_s7 + $0xdf8] sm:$0x3]  ;;  %v10636_v18 = vld [vmem:[#allocation10 + $0xc0] sm:$0xff]  }
 0x403   : > { %v9600_v54 = vpop.f32.mrf.mxu0 }
 0x404   : > { %9772 = vmatpush3.bf16.msra.mxu1 %v10610_v50  ;;  %v13332_v35 = vadd.f32 %v9600_v54, %v9599_v62  ;;  %v5690_v62 = vrot.slane %v5688_v52, 4 }
 0x405   : > { %v9602_v42 = vpop.f32.mrf.mxu0 }
 0x407   : > { %6834 = vmatmul.mubr.bf16.gmra.mxu1 %v10586_v26  ;;  %v9603_v23 = vpop.f32.mrf.mxu0  ;;  %v8696_v26 = vrot.slane %v8676_v31, 10  ;;  %v5716_v31 = vrot.slane %v8689_v0, 6  ;;  %v14080_v0 = vld [vmem:[#allocation58_spill] sm:$0xff] }
 0x408   : > { %6841 = vmatprep.mubr.bf16.mxu1 %v10591_v13  ;;  %v13334_v29 = vadd.f32 %v9603_v23, %v9602_v42  ;;  %v5691_v13 = vrot.slane %v8678_v12, 6  ;;  %v8680_v42 = vld [vmem:[%s11351_s7 + $0xe24] sm:$0xf]  ;;  %v8688_v12 = vld [vmem:[%s11351_s7 + $0xeb0] sm:$0xc] }
 0x409   : > { %v9605_v59 = vpop.f32.mrf.mxu0 }
 0x40b   : > { %v9606_v9 = vpop.f32.mrf.mxu0 }
 0x40c   : > { %v13339_v46 = vadd.f32 %v9606_v9, %v9605_v59  ;;  %v5689_v59 = vsel %vm11381_vm2, %v8696_v26, %v5688_v52  ;;  %v5695_v9 = vrot.slane %v8680_v42, 6  ;;  %v8700_v26 = vrot.slane %v8688_v12, 10 }
 0x40d   : > { %v9608_v63 = vpop.f32.mrf.mxu0 }
 0x40e   : > { %v5717_v42 = vsel %vm11381_vm2, %v8700_v26, %v5716_v31 }
 0x40f   : > { %6842 = vmatmul.mubr.bf16.gmra.mxu1 %v10592_v34  ;;  %v9609_v53 = vpop.f32.mrf.mxu0 }
 0x410   : > { %6849 = vmatprep.mubr.bf16.mxu1 %v10598_v17  ;;  %v13343_v32 = vadd.f32 %v9609_v53, %v9608_v63  ;;  %v5692_v17 = vsel %vm11381_vm2, %v5690_v62, %v5691_v13  ;;  %v8679_v63 = vld [vmem:[%s11351_s7 + $0xe20] sm:$0xc]  ;;  %v5718_v62 = vrot.slane %v5716_v31, 4 }
 0x411   : > { %v9611_v33 = vpop.f32.mrf.mxu0  ;;  %v8768_v39 = vcombine.low %v5689_v59, %v5692_v17  ;;  %v8691_v17 = vld [vmem:[%s11351_s7 + $0xee0] sm:$0xc] }
 0x413   : > { %v9612_v55 = vpop.f32.mrf.mxu0 }
 0x414   : > { %v13348_v11 = vadd.f32 %v9612_v55, %v9611_v33  ;;  %v5697_v33 = vrot.slane %v5695_v9, 4  ;;  %v5702_v55 = vrot.slane %v8683_v19, 6 }
 0x415   : > { %v9614_v28 = vpop.f32.mrf.mxu0 }
 0x417   : > { %6850 = vmatmul.mubr.bf16.gmra.mxu1 %v10599_v6  ;;  %v9615_v36 = vpop.f32.mrf.mxu0  ;;  %v8697_v6 = vrot.slane %v8679_v63, 10 }
 0x418   : > { %6857 = vmatprep.mubr.bf16.mxu1 %v10605_v14  ;;  %v13356_v3 = vadd.f32 %v9615_v36, %v9614_v28  ;;  %v5698_v14 = vrot.slane %v8681_v38, 6  ;;  %v8684_v28 = vld [vmem:[%s11351_s7 + $0xe58] sm:$0x3]  ;;  %v5704_v36 = vrot.slane %v5702_v55, 4  ;;  %v8701_v38 = vrot.slane %v8691_v17, 10 }
 0x419   : > { %v9617_v20 = vpop.f32.mrf.mxu0  ;;  %v5696_v4 = vsel %vm11381_vm2, %v8697_v6, %v5695_v9  ;;  %v5705_v43 = vrot.slane %v8684_v28, 6  ;;  %v8693_v9 = vld [vmem:[%s11351_s7 + $0xee8] sm:$0x3] }
 0x41a   : > { %v5699_v56 = vsel %vm11381_vm2, %v5697_v33, %v5698_v14  ;;  %v10625_v14 = vld [vmem:[%s11351_s7 + $0xea0] sm:$0xff]  }
 0x41b   : > { %v9618_v44 = vpop.f32.mrf.mxu0  ;;  %v8769_v15 = vcombine.low %v5696_v4, %v5699_v56  ;;  %v10628_v4 = vld [vmem:[%s11351_s7 + $0xed0] sm:$0xff]   ;;  %v10629_v56 = vld [vmem:[#allocation10 + $0xf8] sm:$0xff]  }
 0x41c   : > { %v13360_v48 = vadd.f32 %v9618_v44, %v9617_v20  ;;  %v5706_v20 = vsel %vm11381_vm2, %v5704_v36, %v5705_v43  ;;  %10077 = vmatprep.subr.bf16.mxu1 %v10629_v56  ;;  %v10633_v43 = vld [vmem:[#allocation10 + $0xd8] sm:$0xff]  }
 0x41d   : > { %v9620_v30 = vpop.f32.mrf.mxu0 }
 0x41f   : > { %6858 = vmatmul.mubr.bf16.gmra.mxu1 %v10606_v21  ;;  %v9621_v47 = vpop.f32.mrf.mxu0  ;;  %v5703_v21 = vsel %vm11381_vm2, %v8698_v16, %v5702_v55  ;;  %v10632_v16 = vld [vmem:[#allocation10 + $0xe0] sm:$0xff]  }
 0x420   : > { %6995 = vmatprep.mubr.bf16.mxu1 %v8766_v22  ;;  %v13368_v51 = vadd.f32 %v9621_v47, %v9620_v30  ;;  %v5709_v22 = vrot.slane %v8686_v49, 6  ;;  %v8770_v44 = vcombine.low %v5703_v21, %v5706_v20  ;;  %v10634_v21 = vld [vmem:[#allocation10 + $0xd0] sm:$0xff]  }
 0x421   : > { %v9623_v50 = vpop.f32.mrf.mxu0 }
 0x422   : > { %v5711_v30 = vrot.slane %v5709_v22, 4  ;;  %v5710_v52 = vsel %vm11381_vm2, %v8699_v25, %v5709_v22  ;;  %v10635_v22 = vld [vmem:[#allocation10 + $0xc8] sm:$0xff]  }
 0x423   : > { %v9624_v54 = vpop.f32.mrf.mxu0  ;;  %v14079_v25 = vld [vmem:[#allocation44_spill] sm:$0xff] }
 0x424   : > { %v13372_v23 = vadd.f32 %v9624_v54, %v9623_v50  ;;  %v5713_v47 = vsel %vm11381_vm2, %v5711_v30, %v5712_v10  ;;  %v10621_v50 = vld [vmem:[%s11351_s7 + $0xe40] sm:$0xff]  }
 0x425   : > { %v9626_v34 = vpop.f32.mrf.mxu0  ;;  %v8692_v54 = vld [vmem:[%s11351_s7 + $0xee4] sm:$0xf] }
 0x426   : > { %v5723_v59 = vrot.slane %v8692_v54, 6  ;;  %v14086_v54 = vld [vmem:[#allocation62_spill] sm:$0xff] }
 0x427   : > { %6996 = vmatmul.mubr.bf16.vlgmr.msra.gmra.mxu1 %v10612_v61  ;;  %v9627_v57 = vpop.f32.mrf.mxu0  ;;  %v8690_v61 = vld [vmem:[%s11351_s7 + $0xeb8] sm:$0x3] }
 0x428   : > { %7003 = vmatprep.mubr.bf16.mxu1 %v8767_v7  ;;  %v13380_v53 = vadd.f32 %v9627_v57, %v9626_v34  ;;  %v8771_v7 = vcombine.low %v5710_v52, %v5713_v47  ;;  %v5719_v13 = vrot.slane %v8690_v61, 6  ;;  %v10624_v57 = vld [vmem:[%s11351_s7 + $0xe70] sm:$0xff]   ;;  %v5724_v6 = vsel %vm11381_vm2, %v8701_v38, %v5723_v59  ;;  %10078 = vmatpush3.bf16.msra.mxu1 %v10629_v56  ;;  %v14081_v52 = vld [vmem:[#allocation53_spill] sm:$0xff] }
 0x429   : > { %v13421_v55 = vpop.f32.mrf.mxu0  ;;  %10079 = vmatprep.subr.bf16.mxu1 %v10630_v40  ;;  %v2944_v47 = vadd.f32 %v14081_v52, %v14080_v0  ;;  %v14101_v0 = vld [vmem:[#allocation40_spill] sm:$0xff]  ;;  %v14102_v52 = vld [vmem:[#allocation51_spill] sm:$0xff] }
 0x42a   : > { %v5720_v34 = vsel %vm11381_vm2, %v5718_v62, %v5719_v13 }
 0x42b   : > { %v8772_v63 = vcombine.low %v5717_v42, %v5720_v34  ;;  %v13423_v28 = vpop.f32.mrf.mxu0  ;;  %v14087_v42 = vld [vmem:[#allocation46_spill] sm:$0xff] }
 0x42c   : > { %10080 = vmatpush3.bf16.msra.mxu1 %v10630_v40  ;;  %v2947_v34 = vadd.f32 %v14087_v42, %v14086_v54  ;;  %v14095_v40 = vld [vmem:[#allocation38_spill] sm:$0xff] }
 0x42d   : > { %10081 = vmatprep.subr.bf16.mxu1 %v10631_v2 }
 0x42f   : > { %7004 = vmatmul.mubr.bf16.gmra.mxu1 %v10616_v41  ;;  %v5725_v41 = vrot.slane %v5723_v59, 4 }
 0x430   : > { %7011 = vmatprep.mubr.bf16.mxu1 %v8768_v39  ;;  %v5726_v39 = vrot.slane %v8693_v9, 6  ;;  %10082 = vmatpush3.bf16.msra.mxu1 %v10631_v2  ;;  %v14096_v2 = vld [vmem:[#allocation49_spill] sm:$0xff] }
 0x431   : > { %10083 = vmatprep.subr.bf16.mxu1 %v10632_v16 }
 0x432   : > { %v5727_v33 = vsel %vm11381_vm2, %v5725_v41, %v5726_v39 }
 0x433   : > { %v8773_v19 = vcombine.low %v5724_v6, %v5727_v33  ;;  %v14092_v6 = vld [vmem:[#allocation37_spill] sm:$0xff]  ;;  %v14093_v33 = vld [vmem:[#allocation48_spill] sm:$0xff] }
 0x434   : > { %10084 = vmatpush3.bf16.msra.mxu1 %v10632_v16  ;;  %v2971_v16 = vadd.f32 %v14096_v2, %v14095_v40 }
 0x435   : > { %10085 = vmatprep.subr.bf16.mxu1 %v10633_v43 }
 0x437   : > { %7012 = vmatmul.mubr.bf16.gmra.mxu1 %v10617_v1  ;;  %v13425_v1 = vpop.f32.mrf.mxu0 }
 0x438   : > { %7019 = vmatprep.mubr.bf16.mxu1 %v8769_v15  ;;  %10086 = vmatpush3.bf16.msra.mxu1 %v10633_v43 }
 0x439   : > { %v13427_v15 = vpop.f32.mrf.mxu0  ;;  %10087 = vmatprep.subr.bf16.mxu1 %v10634_v21 }
 0x43b   : > { %v13429_v36 = vpop.f32.mrf.mxu0 }
 0x43c   : > { %10088 = vmatpush3.bf16.msra.mxu1 %v10634_v21 }
 0x43d   : > { %v13431_v49 = vpop.f32.mrf.mxu0  ;;  %10089 = vmatprep.subr.bf16.mxu1 %v10635_v22 }
 0x43f   : > { %7020 = vmatmul.mubr.bf16.gmra.mxu1 %v10620_v60  ;;  %v13433_v20 = vpop.f32.mrf.mxu0 }
 0x440   : > { %7027 = vmatprep.mubr.bf16.mxu1 %v8770_v44  ;;  %10090 = vmatpush3.bf16.msra.mxu1 %v10635_v22  ;;  %v14078_v44 = vld [vmem:[#allocation52_spill] sm:$0xff]  ;;  %v14098_v22 = vld [vmem:[#allocation39_spill] sm:$0xff] }
 0x441   : > { %v13435_v24 = vpop.f32.mrf.mxu0  ;;  %10091 = vmatprep.subr.bf16.mxu1 %v10636_v18  ;;  %v2952_v30 = vadd.f32 %v14079_v25, %v14078_v44 }
 0x443   : > { %v13437_v60 = vpop.f32.mrf.mxu0 }
 0x444   : > { %10092 = vmatpush3.bf16.msra.mxu1 %v10636_v18  ;;  %v14099_v18 = vld [vmem:[#allocation50_spill] sm:$0xff] }
 0x445   : > { %v13445_v61 = vpop.f32.mrf.mxu0  ;;  %v2963_v44 = vadd.f32 %v14099_v18, %v14098_v22 }
 0x447   : > { %7028 = vmatmul.mubr.bf16.gmra.mxu1 %v10621_v50  ;;  %v14083_v50 = vld [vmem:[#allocation59_spill] sm:$0xff]  ;;  %v13455_v9 = vpop.f32.mrf.mxu0 }
 0x448   : > { %7035 = vmatprep.mubr.bf16.mxu1 %v8771_v7  ;;  %v14084_v7 = vld [vmem:[#allocation45_spill] sm:$0xff] }
 0x449   : > { %v2955_v26 = vadd.f32 %v14084_v7, %v14083_v50  ;;  %v13465_v56 = vpop.f32.mrf.mxu0  ;;  %v14104_v7 = vld [vmem:[#allocation41_spill] sm:$0xff] }
 0x44f   : > { %7036 = vmatmul.mubr.bf16.gmra.mxu1 %v10624_v57  ;;  %v14089_v57 = vld [vmem:[#allocation36_spill] sm:$0xff] }
 0x450   : > { %7043 = vmatprep.mubr.bf16.mxu1 %v8772_v63  ;;  %v14090_v63 = vld [vmem:[#allocation47_spill] sm:$0xff] }
 0x451   : > { %v2968_v38 = vadd.f32 %v14090_v63, %v14089_v57  ;;  %v14108_v57 = vld [vmem:[#allocation57_spill] sm:$0xff] }
 0x457   : > { %7044 = vmatmul.mubr.bf16.gmra.mxu1 %v10625_v14  ;;  %v2960_v14 = vadd.f32 %v14093_v33, %v14092_v6  ;;  %v14110_v6 = vld [vmem:[#allocation43_spill] sm:$0xff]  ;;  %v14111_v33 = vld [vmem:[#allocation60_spill] sm:$0xff] }
 0x458   : > { %7051 = vmatprep.mubr.bf16.mxu1 %v8773_v19 }
 0x45f   : > { %7052 = vmatmul.mubr.bf16.gmra.mxu1 %v10628_v4 }
 0x487   : > { %v10031_v10 = vpop.f32.mrf.mxu1 }
 0x488   : > { %v13443_v31 = vadd.f32 %v10031_v10, %v2952_v30  ;;  %v13475_v10 = vpop.f32.mrf.mxu0 }
 0x489   : > { %v5360_v12 = vpop.f32.mrf.mxu1 }
 0x48a   : > { %14082 = vst [vmem:[#allocation68_spill] sm:$0xff] %v13443_v31  ;;  %v13449_v62 = vadd.f32 %v5360_v12, %v2944_v47  ;;  %v2984_v47 = vadd.f32 %v14102_v52, %v14101_v0  ;;  %v14117_v0 = vld [vmem:[#allocation55_spill] sm:$0xff]  ;;  %v13604_v31 = vld [vmem:[#allocation9 + $0x3] ss:$0 sm:$0xff] }
 0x48b   : > { %v10032_v13 = vpop.f32.mrf.mxu1 }
 0x48c   : > { %14085 = vst [vmem:[#allocation79_spill] sm:$0xff] %v13449_v62  ;;  %v13453_v59 = vadd.f32 %v10032_v13, %v2955_v26  ;;  %v14105_v26 = vld [vmem:[#allocation56_spill] sm:$0xff] }
 0x48d   : > { %v5363_v17 = vpop.f32.mrf.mxu1  ;;  %v2976_v13 = vadd.f32 %v14105_v26, %v14104_v7  ;;  %v14119_v26 = vld [vmem:[#allocation66_spill] sm:$0xff] }
 0x48e   : > { %14088 = vst [vmem:[#allocation69_spill] sm:$0xff] %v13453_v59  ;;  %v13459_v41 = vadd.f32 %v5363_v17, %v2947_v34  ;;  %v9728_v34 = vpop.f32.mrf.mxu0  ;;  %v14107_v17 = vld [vmem:[#allocation42_spill] sm:$0xff] }
 0x48f   : > { %v10035_v39 = vpop.f32.mrf.mxu1  ;;  %v2987_v63 = vadd.f32 %v14108_v57, %v14107_v17 }
 0x490   : > { %14091 = vst [vmem:[#allocation70_spill] sm:$0xff] %v13459_v41  ;;  %v13463_v19 = vadd.f32 %v10035_v39, %v2968_v38  ;;  %v13493_v2 = vpop.f32.mrf.mxu0 }
 0x491   : > { %v5376_v4 = vpop.f32.mrf.mxu1 }
 0x492   : > { %14094 = vst [vmem:[#allocation78_spill] sm:$0xff] %v13463_v19  ;;  %v13469_v43 = vadd.f32 %v5376_v4, %v2960_v14  ;;  %v2979_v14 = vadd.f32 %v14111_v33, %v14110_v6  ;;  %v13503_v7 = vpop.f32.mrf.mxu0 }
 0x493   : > { %v10036_v21 = vpop.f32.mrf.mxu1 }
 0x494   : > { %14097 = vst [vmem:[#allocation71_spill] sm:$0xff] %v13469_v43  ;;  %v13473_v25 = vadd.f32 %v10036_v21, %v2971_v16  ;;  %v14113_v16 = vld [vmem:[#allocation64_spill] sm:$0xff]  ;;  %v14114_v21 = vld [vmem:[#allocation54_spill] sm:$0xff] }
 0x495   : > { %v5379_v30 = vpop.f32.mrf.mxu1  ;;  %v3000_v22 = vadd.f32 %v14114_v21, %v14113_v16 }
 0x496   : > { %14100 = vst [vmem:[#allocation72_spill] sm:$0xff] %v13473_v25  ;;  %v13479_v12 = vadd.f32 %v5379_v30, %v2963_v44  ;;  %v14116_v30 = vld [vmem:[#allocation65_spill] sm:$0xff] }
 0x497   : > { %v10039_v50 = vpop.f32.mrf.mxu1  ;;  %v2992_v52 = vadd.f32 %v14117_v0, %v14116_v30  ;;  %v9711_v0 = vadd.f32 %v13423_v28, %v13421_v55 }
 0x498   : > { %14103 = vst [vmem:[#allocation73_spill] sm:$0xff] %v13479_v12  ;;  %v13483_v54 = vadd.f32 %v10039_v50, %v2984_v47 }
 0x499   : > { %v5392_v42 = vpop.f32.mrf.mxu1 }
 0x49a   : > { %14106 = vst [vmem:[#allocation80_spill] sm:$0xff] %v13483_v54  ;;  %v13487_v38 = vadd.f32 %v5392_v42, %v2976_v13  ;;  %v14120_v13 = vld [vmem:[#allocation63_spill] sm:$0xff] }
 0x49b   : > { %v10040_v39 = vpop.f32.mrf.mxu1  ;;  %v3003_v42 = vadd.f32 %v14120_v13, %v14119_v26 }
 0x49c   : > { %14109 = vst [vmem:[#allocation82_spill] sm:$0xff] %v13487_v38  ;;  %v13491_v4 = vadd.f32 %v10040_v39, %v2987_v63  ;;  %v14122_v63 = vld [vmem:[#allocation67_spill] sm:$0xff]  ;;  %v14123_v39 = vld [vmem:[#allocation61_spill] sm:$0xff] }
 0x49d   : > { %v5395_v40 = vpop.f32.mrf.mxu1  ;;  %v2995_v6 = vadd.f32 %v14123_v39, %v14122_v63 }
 0x49e   : > { %14112 = vst [vmem:[#allocation74_spill] sm:$0xff] %v13491_v4  ;;  %v13497_v18 = vadd.f32 %v5395_v40, %v2979_v14  ;;  %v9733_v40 = vpop.f32.mrf.mxu0 }
 0x49f   : > { %v10043_v44 = vpop.f32.mrf.mxu1 }
 0x4a0   : > { %14115 = vst [vmem:[#allocation84_spill] sm:$0xff] %v13497_v18  ;;  %v13501_v47 = vadd.f32 %v10043_v44, %v3000_v22  ;;  %v9734_v44 = vpop.f32.mrf.mxu0 }
 0x4a1   : > { %v5408_v50 = vpop.f32.mrf.mxu1  ;;  %v9735_v4 = vadd.f32 %v9734_v44, %v9733_v40 }
 0x4a2   : > { %14118 = vst [vmem:[#allocation75_spill] sm:$0xff] %v13501_v47  ;;  %v13507_v17 = vadd.f32 %v5408_v50, %v2992_v52  ;;  %v13522_v13 = vpop.f32.mrf.mxu0 }
 0x4a3   : > { %v10044_v57 = vpop.f32.mrf.mxu1 }
 0x4a4   : > { %14121 = vst [vmem:[#allocation77_spill] sm:$0xff] %v13507_v17  ;;  %v13511_v33 = vadd.f32 %v10044_v57, %v3003_v42  ;;  %v13526_v39 = vpop.f32.mrf.mxu0 }
 0x4a5   : > { %v5411_v14 = vpop.f32.mrf.mxu1 }
 0x4a6   : > { %14124 = vst [vmem:[#allocation85_spill] sm:$0xff] %v13511_v33  ;;  %v13513_v16 = vadd.f32 %v5411_v14, %v2995_v6  ;;  %v9717_v14 = vadd.f32 %v13431_v49, %v13429_v36  ;;  %v9723_v33 = vadd.f32 %v13445_v61, %v13437_v60 }
 0x4a7   : > { %v9645_v21 = vpop.f32.mrf.mxu1 }
 0x4a8   : > { %14125 = vst [vmem:[#allocation86_spill] sm:$0xff] %v13513_v16 }
 0x4a9   : > { %v9646_v22 = vpop.f32.mrf.mxu1 }
 0x4aa   : > { %v9647_v30 = vadd.f32 %v9646_v22, %v9645_v21 }
 0x4ab   : > { %v13517_v26 = vpop.f32.mrf.mxu1 }
 0x4ac   : > { %v6804_v52 = vadd.f32 %v9647_v30, %v13314_v37  ;;  %v9739_v37 = vpop.f32.mrf.mxu0 }
 0x4ad   : > { %v13520_v50 = vpop.f32.mrf.mxu1 }
 0x4ae   : > { %v13524_v42 = vadd.f32 %v9711_v0, %v6804_v52  ;;  %v9740_v52 = vpop.f32.mrf.mxu0 }
 0x4af   : > { %v9651_v57 = vpop.f32.mrf.mxu1 }
 0x4b1   : > { %v9652_v63 = vpop.f32.mrf.mxu1 }
 0x4b2   : > { %v9653_v6 = vadd.f32 %v9652_v63, %v9651_v57  ;;  %v13544_v63 = vpop.f32.mrf.mxu0 }
 0x4b3   : > { %v13530_v21 = vpop.f32.mrf.mxu1 }
 0x4b4   : > { %v6812_v55 = vadd.f32 %v9653_v6, %v13320_v58 }
 0x4b5   : > { %v13533_v28 = vpop.f32.mrf.mxu1 }
 0x4b6   : > { %v13535_v22 = vadd.f32 %v9717_v14, %v6812_v55  ;;  %v13548_v55 = vpop.f32.mrf.mxu0 }
 0x4b7   : > { %v9657_v30 = vpop.f32.mrf.mxu1 }
 0x4b9   : > { %v9658_v0 = vpop.f32.mrf.mxu1 }
 0x4ba   : > { %v9659_v16 = vadd.f32 %v9658_v0, %v9657_v30  ;;  %v9729_v30 = vadd.f32 %v9728_v34, %v13475_v10 }
 0x4bb   : > { %v13539_v57 = vpop.f32.mrf.mxu1 }
 0x4bc   : > { %v6820_v36 = vadd.f32 %v9659_v16, %v13326_v5  ;;  %v9745_v5 = vpop.f32.mrf.mxu0 }
 0x4bd   : > { %v13542_v49 = vpop.f32.mrf.mxu1 }
 0x4be   : > { %v13546_v58 = vadd.f32 %v9723_v33, %v6820_v36  ;;  %v9746_v33 = vpop.f32.mrf.mxu0 }
 0x4bf   : > { %v9663_v6 = vpop.f32.mrf.mxu1 }
 0x4c0   : > { %v13563_v10 = vpop.f32.mrf.mxu0 }
 0x4c1   : > { %v9664_v14 = vpop.f32.mrf.mxu1 }
 0x4c2   : > { %v9665_v17 = vadd.f32 %v9664_v14, %v9663_v6  ;;  %v13567_v54 = vpop.f32.mrf.mxu0 }
 0x4c3   : > { %v13551_v0 = vpop.f32.mrf.mxu1 }
 0x4c4   : > { %v6828_v60 = vadd.f32 %v9665_v17, %v13332_v35  ;;  %v9751_v40 = vpop.f32.mrf.mxu0 }
 0x4c5   : > { %v13554_v61 = vpop.f32.mrf.mxu1 }
 0x4c6   : > { %v13556_v16 = vadd.f32 %v9729_v30, %v6828_v60  ;;  %v9741_v60 = vadd.f32 %v9740_v52, %v9739_v37  ;;  %v9752_v25 = vpop.f32.mrf.mxu0 }
 0x4c7   : > { %v9669_v47 = vpop.f32.mrf.mxu1 }
 0x4c8   : > { %v13581_v37 = vpop.f32.mrf.mxu0 }
 0x4c9   : > { %v9670_v18 = vpop.f32.mrf.mxu1 }
 0x4ca   : > { %v9671_v36 = vadd.f32 %v9670_v18, %v9669_v47 }
 0x4cb   : > { %v13558_v38 = vpop.f32.mrf.mxu1 }
 0x4cc   : > { %v6836_v6 = vadd.f32 %v9671_v36, %v13339_v46 }
 0x4cd   : > { %v13561_v14 = vpop.f32.mrf.mxu1 }
 0x4ce   : > { %v13565_v34 = vadd.f32 %v9735_v4, %v6836_v6  ;;  %v9747_v6 = vadd.f32 %v9746_v33, %v9745_v5 }
 0x4cf   : > { %v9675_v35 = vpop.f32.mrf.mxu1 }
 0x4d1   : > { %v9676_v17 = vpop.f32.mrf.mxu1 }
 0x4d2   : > { %v9677_v30 = vadd.f32 %v9676_v17, %v9675_v35 }
 0x4d3   : > { %v13569_v12 = vpop.f32.mrf.mxu1 }
 0x4d4   : > { %v6844_v18 = vadd.f32 %v9677_v30, %v13348_v11  ;;  %v13585_v30 = vpop.f32.mrf.mxu0 }
 0x4d5   : > { %v13572_v47 = vpop.f32.mrf.mxu1 }
 0x4d6   : > { %v13574_v46 = vadd.f32 %v9741_v60, %v6844_v18  ;;  %v9753_v18 = vadd.f32 %v9752_v25, %v9751_v40  ;;  %v9714_v25 = vadd.f32 %v13427_v15, %v13425_v1 }
 0x4d7   : > { %v9681_v44 = vpop.f32.mrf.mxu1 }
 0x4d9   : > { %v9682_v36 = vpop.f32.mrf.mxu1 }
 0x4da   : > { %v9683_v4 = vadd.f32 %v9682_v36, %v9681_v44  ;;  %v10063_v44 = vpop.f32.mrf.mxu0 }
 0x4db   : > { %v13576_v43 = vpop.f32.mrf.mxu1 }
 0x4dc   : > { %v6852_v19 = vadd.f32 %v9683_v4, %v13360_v48  ;;  %v9650_v48 = vadd.f32 %v13520_v50, %v13517_v26  ;;  %v7094_v4 = vpop.f32.mrf.mxu0  ;;  %v13602_v26 = vld [vmem:[#allocation7 + $0x3] ss:$0 sm:$0xff] }
 0x4dd   : > { %v13579_v35 = vpop.f32.mrf.mxu1 }
 0x4de   : > { %v13583_v52 = vadd.f32 %v9747_v6, %v6852_v19  ;;  %v6807_v59 = vadd.f32 %v9650_v48, %v13316_v8 }
 0x4df   : > { %v9687_v11 = vpop.f32.mrf.mxu1 }
 0x4e0   : > { %v6904_v50 = vadd.f32 %v9714_v25, %v6807_v59 }
 0x4e1   : > { %v9688_v17 = vpop.f32.mrf.mxu1 }
 0x4e2   : > { %v9689_v60 = vadd.f32 %v9688_v17, %v9687_v11  ;;  %v10064_v17 = vpop.f32.mrf.mxu0 }
 0x4e3   : > { %v13587_v41 = vpop.f32.mrf.mxu1 }
 0x4e4   : > { %v6860_v5 = vadd.f32 %v9689_v60, %v13372_v23  ;;  %v9656_v60 = vadd.f32 %v13533_v28, %v13530_v21  ;;  %v7097_v48 = vpop.f32.mrf.mxu0 }
 0x4e5   : > { %v13590_v33 = vpop.f32.mrf.mxu1 }
 0x4e6   : > { %v13594_v36 = vadd.f32 %v9753_v18, %v6860_v5 }
 0x4e7   : > { %v9773_v19 = vpop.f32.mrf.mxu1 }
 0x4e9   : > { %v9774_v6 = vpop.f32.mrf.mxu1 }
 0x4ea   : > { %v9775_v40 = vadd.f32 %v9774_v6, %v9773_v19  ;;  %v6815_v19 = vadd.f32 %v9656_v60, %v13322_v45 }
 0x4eb   : > { %v9776_v11 = vpop.f32.mrf.mxu1 }
 0x4ec   : > { %v6998_v23 = vadd.f32 %v9775_v40, %v13524_v42  ;;  %v9720_v42 = vadd.f32 %v13435_v24, %v13433_v20 }
 0x4ed   : > { %v9777_v62 = vpop.f32.mrf.mxu1 }
 0x4ee   : > { %v9778_v18 = vadd.f32 %v9777_v62, %v9776_v11  ;;  %v7095_v5 = vadd.f32 %v7094_v4, %v6998_v23  ;;  %v13611_v62 = vpop.f32.mrf.mxu0  ;;  %v6912_v11 = vadd.f32 %v9720_v42, %v6815_v19  ;;  %v9662_v23 = vadd.f32 %v13542_v49, %v13539_v57 }
 0x4ef   : > { %v9779_v8 = vpop.f32.mrf.mxu1 }
 0x4f0   : > { %v7165_v1 = vmul.f32 %v13602_v26, %v7095_v5  ;;  %v7001_v15 = vadd.f32 %v9778_v18, %v6904_v50  ;;  %v7110_v5 = vpop.f32.mrf.mxu0 }
 0x4f1   : > { %v9780_v6 = vpop.f32.mrf.mxu1 }
 0x4f2   : > { %v7189_v21 = vadd.f32 %v13604_v31, %v7165_v1  ;;  %v9781_v28 = vadd.f32 %v9780_v6, %v9779_v8  ;;  %v7098_v40 = vadd.f32 %v7097_v48, %v7001_v15  ;;  %v9726_v15 = vadd.f32 %v13465_v56, %v13455_v9 }
 0x4f3   : > { %v9782_v59 = vpop.f32.mrf.mxu1 }
 0x4f4   : > { %v7006_v4 = vadd.f32 %v9781_v28, %v13535_v22  ;;  %v7166_v25 = vmul.f32 %v13602_v26, %v7098_v40  ;;  %v7221_v45 = vmul.f32 0.01, %v7189_v21  ;;  %vm7205_vm2 = vcmp.ge.f32.partialorder %v7189_v21, 0.0 }
 0x4f5   : > { %v9783_v60 = vpop.f32.mrf.mxu1  ;;  %v6823_v22 = vadd.f32 %v9662_v23, %v13328_v27  ;;  %v9668_v27 = vadd.f32 %v13554_v61, %v13551_v0  ;;  %v9732_v0 = vadd.f32 %v13503_v7, %v13493_v2 }
 0x4f6   : > { %v7103_v50 = vadd.f32 %v10063_v44, %v7006_v4  ;;  %v7190_v20 = vadd.f32 %v13604_v31, %v7166_v25  ;;  %v9784_v24 = vadd.f32 %v9783_v60, %v9782_v59  ;;  %v7237_v49 = vsel %vm7205_vm2, %v7189_v21, %v7221_v45  ;;  %v10068_v59 = vpop.f32.mrf.mxu0 }
 0x4f7   : > { %v9785_v18 = vpop.f32.mrf.mxu1 }
 0x4f8   : > { %v7167_v8 = vmul.f32 %v13602_v26, %v7103_v50  ;;  %v7222_v48 = vmul.f32 0.01, %v7190_v20  ;;  %v7009_v1 = vadd.f32 %v9784_v24, %v6912_v11  ;;  %vm7206_vm6 = vcmp.ge.f32.partialorder %v7190_v20, 0.0  ;;  %v7113_v60 = vpop.f32.mrf.mxu0 }
 0x4f9   : > { %v9786_v57 = vpop.f32.mrf.mxu1  ;;  %v6920_v11 = vadd.f32 %v9726_v15, %v6823_v22 }
 0x4fa   : > { %v7191_v44 = vadd.f32 %v13604_v31, %v7167_v8  ;;  %v7106_v19 = vadd.f32 %v10064_v17, %v7009_v1  ;;  %v9787_v42 = vadd.f32 %v9786_v57, %v9785_v18  ;;  %v7238_v6 = vsel %vm7206_vm6, %v7190_v20, %v7222_v48  ;;  %v13633_v57 = vpop.f32.mrf.mxu0 }
 0x4fb   : > { %v9788_v28 = vpop.f32.mrf.mxu1  ;;  %v7253_v40 = vpack.c.bf16 %v7238_v6, %v7237_v49 }
 0x4fc   : > { %v7168_v4 = vmul.f32 %v13602_v26, %v7106_v19  ;;  %v7014_v25 = vadd.f32 %v9787_v42, %v13546_v58  ;;  %v7223_v23 = vmul.f32 0.01, %v7191_v44  ;;  %vm7207_vm7 = vcmp.ge.f32.partialorder %v7191_v44, 0.0 }
 0x4fd   : > { %v9789_v9 = vpop.f32.mrf.mxu1  ;;  %10093 = vmatprep.mubr.bf16.mxu1 %v7253_v40  ;;  %v6831_v58 = vadd.f32 %v9668_v27, %v13334_v29  ;;  %v9674_v29 = vadd.f32 %v13561_v14, %v13558_v38  ;;  %v9738_v38 = vadd.f32 %v13526_v39, %v13522_v13 }
 0x4fe   : > { %v7192_v56 = vadd.f32 %v13604_v31, %v7168_v4  ;;  %v9790_v17 = vadd.f32 %v9789_v9, %v9788_v28  ;;  %v7111_v21 = vadd.f32 %v7110_v5, %v7014_v25  ;;  %v7239_v61 = vsel %vm7207_vm7, %v7191_v44, %v7223_v23  ;;  %v7126_v4 = vpop.f32.mrf.mxu0 }
 0x4ff   : > { %v9791_v45 = vpop.f32.mrf.mxu1  ;;  %v6928_v42 = vadd.f32 %v9732_v0, %v6831_v58  ;;  %v6839_v27 = vadd.f32 %v9674_v29, %v13343_v32  ;;  %v9680_v32 = vadd.f32 %v13572_v47, %v13569_v12  ;;  %v9744_v12 = vadd.f32 %v13548_v55, %v13544_v63 }
 0x500   : > { %vm7208_vm8 = vcmp.ge.f32.partialorder %v7192_v56, 0.0  ;;  %v7224_v50 = vmul.f32 0.01, %v7192_v56  ;;  %v7169_v20 = vmul.f32 %v13602_v26, %v7111_v21  ;;  %v7017_v24 = vadd.f32 %v9790_v17, %v6920_v11 }
 0x501   : > { %v9792_v18 = vpop.f32.mrf.mxu1 }
 0x502   : > { %v7240_v8 = vsel %vm7208_vm8, %v7192_v56, %v7224_v50  ;;  %v7193_v48 = vadd.f32 %v13604_v31, %v7169_v20  ;;  %v9793_v1 = vadd.f32 %v9792_v18, %v9791_v45  ;;  %v7114_v22 = vadd.f32 %v7113_v60, %v7017_v24  ;;  %v10072_v60 = vpop.f32.mrf.mxu0 }
 0x503   : > { %v7254_v5 = vpack.c.bf16 %v7240_v8, %v7239_v61  ;;  %v9794_v15 = vpop.f32.mrf.mxu1  ;;  %v6936_v24 = vadd.f32 %v9738_v38, %v6839_v27 }
 0x504   : > { %v7022_v49 = vadd.f32 %v9793_v1, %v13556_v16  ;;  %v7170_v19 = vmul.f32 %v13602_v26, %v7114_v22  ;;  %v7225_v2 = vmul.f32 0.01, %v7193_v48  ;;  %vm7209_vm9 = vcmp.ge.f32.partialorder %v7193_v48, 0.0  ;;  %v7129_v18 = vpop.f32.mrf.mxu0 }
 0x505   : > { %v9795_v7 = vpop.f32.mrf.mxu1  ;;  %10094 = vmatmul.mubr.bf16.vlgmr.msra.gmra.mxu1 %v7254_v5 }
 0x506   : > { %v7119_v44 = vadd.f32 %v13611_v62, %v7022_v49  ;;  %v7194_v6 = vadd.f32 %v13604_v31, %v7170_v19  ;;  %v9796_v28 = vadd.f32 %v9795_v7, %v9794_v15  ;;  %v7241_v23 = vsel %vm7209_vm9, %v7193_v48, %v7225_v2  ;;  %v10075_v2 = vpop.f32.mrf.mxu0 }
 0x507   : > { %v9797_v40 = vpop.f32.mrf.mxu1 }
 0x508   : > { %v7171_v25 = vmul.f32 %v13602_v26, %v7119_v44  ;;  %v7226_v16 = vmul.f32 0.01, %v7194_v6  ;;  %v7025_v11 = vadd.f32 %v9796_v28, %v6928_v42  ;;  %vm7210_vm10 = vcmp.ge.f32.partialorder %v7194_v6, 0.0 }
 0x509   : > { %v9798_v14 = vpop.f32.mrf.mxu1 }
 0x50a   : > { %v7195_v62 = vadd.f32 %v13604_v31, %v7171_v25  ;;  %v7122_v9 = vadd.f32 %v10068_v59, %v7025_v11  ;;  %v9799_v56 = vadd.f32 %v9798_v14, %v9797_v40  ;;  %v7242_v17 = vsel %vm7210_vm10, %v7194_v6, %v7226_v16  ;;  %v7142_v16 = vpop.f32.mrf.mxu0 }
 0x50b   : > { %v9800_v21 = vpop.f32.mrf.mxu1  ;;  %v7255_v45 = vpack.c.bf16 %v7242_v17, %v7241_v23 }
 0x50c   : > { %v7172_v50 = vmul.f32 %v13602_v26, %v7122_v9  ;;  %v7030_v20 = vadd.f32 %v9799_v56, %v13565_v34  ;;  %v7227_v13 = vmul.f32 0.01, %v7195_v62  ;;  %vm7211_vm11 = vcmp.ge.f32.partialorder %v7195_v62, 0.0 }
 0x50d   : > { %v9801_v58 = vpop.f32.mrf.mxu1  ;;  %10097 = vmatprep.mubr.bf16.mxu1 %v7255_v45  ;;  %v6847_v34 = vadd.f32 %v9680_v32, %v13356_v3  ;;  %v9686_v3 = vadd.f32 %v13579_v35, %v13576_v43  ;;  %v9750_v43 = vadd.f32 %v13567_v54, %v13563_v10 }
 0x50e   : > { %v7196_v39 = vadd.f32 %v13604_v31, %v7172_v50  ;;  %v9802_v0 = vadd.f32 %v9801_v58, %v9800_v21  ;;  %v7127_v59 = vadd.f32 %v7126_v4, %v7030_v20  ;;  %v7243_v22 = vsel %vm7211_vm11, %v7195_v62, %v7227_v13  ;;  %v10076_v21 = vpop.f32.mrf.mxu0 }
 0x50f   : > { %v9803_v61 = vpop.f32.mrf.mxu1  ;;  %v6944_v6 = vadd.f32 %v9744_v12, %v6847_v34  ;;  %v6855_v38 = vadd.f32 %v9686_v3, %v13368_v51  ;;  %v9692_v51 = vadd.f32 %v13590_v33, %v13587_v41  ;;  %v9756_v41 = vadd.f32 %v13585_v30, %v13581_v37 }
 0x510   : > { %v7173_v8 = vmul.f32 %v13602_v26, %v7127_v59  ;;  %v7033_v48 = vadd.f32 %v9802_v0, %v6936_v24  ;;  %vm7212_vm12 = vcmp.ge.f32.partialorder %v7196_v39, 0.0  ;;  %v7228_v1 = vmul.f32 0.01, %v7196_v39  ;;  %v7145_v13 = vpop.f32.mrf.mxu0 }
 0x511   : > { %v9804_v47 = vpop.f32.mrf.mxu1  ;;  %v6952_v20 = vadd.f32 %v9750_v43, %v6855_v38  ;;  %v13688_v38 = vld [vmem:[#allocation13] ss:$0 sm:$0xff] }
 0x512   : > { %v7197_v5 = vadd.f32 %v13604_v31, %v7173_v8  ;;  %v9805_v15 = vadd.f32 %v9804_v47, %v9803_v61  ;;  %v7130_v49 = vadd.f32 %v7129_v18, %v7033_v48  ;;  %v7244_v19 = vsel %vm7212_vm12, %v7196_v39, %v7228_v1 }
 0x513   : > { %v9806_v42 = vpop.f32.mrf.mxu1  ;;  %v7256_v29 = vpack.c.bf16 %v7244_v19, %v7243_v22 }
 0x514   : > { %v7038_v7 = vadd.f32 %v9805_v15, %v13574_v46  ;;  %v7174_v44 = vmul.f32 %v13602_v26, %v7130_v49  ;;  %v7229_v28 = vmul.f32 0.01, %v7197_v5  ;;  %vm7213_vm13 = vcmp.ge.f32.partialorder %v7197_v5, 0.0 }
 0x515   : > { %v9807_v63 = vpop.f32.mrf.mxu1  ;;  %10098 = vmatmul.mubr.bf16.gmra.mxu1 %v7256_v29 }
 0x516   : > { %v7135_v55 = vadd.f32 %v13633_v57, %v7038_v7  ;;  %v7198_v40 = vadd.f32 %v13604_v31, %v7174_v44  ;;  %v9808_v4 = vadd.f32 %v9807_v63, %v9806_v42  ;;  %v7245_v14 = vsel %vm7213_vm13, %v7197_v5, %v7229_v28 }
 0x517   : > { %v9809_v25 = vpop.f32.mrf.mxu1 }
 0x518   : > { %v7175_v11 = vmul.f32 %v13602_v26, %v7135_v55  ;;  %v7230_v46 = vmul.f32 0.01, %v7198_v40  ;;  %v7041_v27 = vadd.f32 %v9808_v4, %v6944_v6  ;;  %vm7214_vm14 = vcmp.ge.f32.partialorder %v7198_v40, 0.0 }
 0x519   : > { %v9810_v35 = vpop.f32.mrf.mxu1 }
 0x51a   : > { %v7199_v57 = vadd.f32 %v13604_v31, %v7175_v11  ;;  %v7138_v23 = vadd.f32 %v10072_v60, %v7041_v27  ;;  %v9811_v62 = vadd.f32 %v9810_v35, %v9809_v25  ;;  %v7246_v9 = vsel %vm7214_vm14, %v7198_v40, %v7230_v46  ;;  %v13685_v11 = vld [vmem:[%s11292_s19] ss:$0 sm:$0xff]  ;;  %v14126_v46 = vld [vmem:[#allocation68_spill] sm:$0xff]  ;;  %v14127_v35 = vld [vmem:[#allocation79_spill] sm:$0xff]  ;;  %s7649_s19 = sadd.s32 %s8885_s24, %s8884_s13 }
 0x51b   : > { %v9812_v56 = vpop.f32.mrf.mxu1  ;;  %v7257_v17 = vpack.c.bf16 %v7246_v9, %v7245_v14  ;;  %v13692_v14 = vld [vmem:[#allocation14] ss:$0 sm:$0xff]  ;;  %v14128_v9 = vld [vmem:[#allocation69_spill] sm:$0xff]  ;;  %s8886_s11 = sshll.u32 %s7649_s19, 6 }
 0x51c   : > { %v7176_v45 = vmul.f32 %v13602_v26, %v7138_v23  ;;  %v7046_v50 = vadd.f32 %v9811_v62, %v13583_v52  ;;  %v7231_v54 = vmul.f32 0.01, %v7199_v57  ;;  %vm7215_vm15 = vcmp.ge.f32.partialorder %v7199_v57, 0.0  ;;  %s13768_s17 = scalar_lea.hbm %s14142_s16, %s8886_s11 }
 0x51d   : > { %v9813_v24 = vpop.f32.mrf.mxu1  ;;  %10101 = vmatprep.mubr.bf16.mxu1 %v7257_v17  ;;  %v6863_v52 = vadd.f32 %v9692_v51, %v13380_v53 }
 0x51e   : > { %v7200_v10 = vadd.f32 %v13604_v31, %v7176_v45  ;;  %v9814_v32 = vadd.f32 %v9813_v24, %v9812_v56  ;;  %v7143_v60 = vadd.f32 %v7142_v16, %v7046_v50  ;;  %v7247_v61 = vsel %vm7215_vm15, %v7199_v57, %v7231_v54 }
 0x51f   : > { %v9815_v58 = vpop.f32.mrf.mxu1  ;;  %v6960_v5 = vadd.f32 %v9756_v41, %v6863_v52 }
 0x520   : > { %v7177_v39 = vmul.f32 %v13602_v26, %v7143_v60  ;;  %v7049_v0 = vadd.f32 %v9814_v32, %v6952_v20  ;;  %vm7216_vm0 = vcmp.ge.f32.partialorder %v7200_v10, 0.0  ;;  %v7232_v59 = vmul.f32 0.01, %v7200_v10  ;;  %v14129_v20 = vld [vmem:[#allocation70_spill] sm:$0xff] }
 0x521   : > { %v9816_v33 = vpop.f32.mrf.mxu1 }
 0x522   : > { %v7201_v18 = vadd.f32 %v13604_v31, %v7177_v39  ;;  %v9817_v8 = vadd.f32 %v9816_v33, %v9815_v58  ;;  %v7146_v48 = vadd.f32 %v7145_v13, %v7049_v0  ;;  %v7248_v1 = vsel %vm7216_vm0, %v7200_v10, %v7232_v59 }
 0x523   : > { %v9818_v34 = vpop.f32.mrf.mxu1  ;;  %v7258_v12 = vpack.c.bf16 %v7248_v1, %v7247_v61 }
 0x524   : > { %v7054_v47 = vadd.f32 %v9817_v8, %v13594_v36  ;;  %v7178_v22 = vmul.f32 %v13602_v26, %v7146_v48  ;;  %v7233_v53 = vmul.f32 0.01, %v7201_v18  ;;  %vm7217_vm1 = vcmp.ge.f32.partialorder %v7201_v18, 0.0 }
 0x525   : > { %v9819_v15 = vpop.f32.mrf.mxu1  ;;  %10102 = vmatmul.mubr.bf16.gmra.mxu1 %v7258_v12 }
 0x526   : > { %v7151_v49 = vadd.f32 %v10075_v2, %v7054_v47  ;;  %v7202_v37 = vadd.f32 %v13604_v31, %v7178_v22  ;;  %v9820_v30 = vadd.f32 %v9819_v15, %v9818_v34  ;;  %v7249_v36 = vsel %vm7217_vm1, %v7201_v18, %v7233_v53  ;;  %v14130_v18 = vld [vmem:[#allocation78_spill] sm:$0xff]  ;;  %v14131_v22 = vld [vmem:[#allocation71_spill] sm:$0xff] }
 0x528   : > { %v7179_v19 = vmul.f32 %v13602_v26, %v7151_v49  ;;  %v7234_v42 = vmul.f32 0.01, %v7202_v37  ;;  %v7057_v29 = vadd.f32 %v9820_v30, %v6960_v5  ;;  %vm7218_vm3 = vcmp.ge.f32.partialorder %v7202_v37, 0.0 }
 0x52a   : > { %v7203_v7 = vadd.f32 %v13604_v31, %v7179_v19  ;;  %v7154_v44 = vadd.f32 %v10076_v21, %v7057_v29  ;;  %v7250_v6 = vsel %vm7218_vm3, %v7202_v37, %v7234_v42  ;;  %v14132_v37 = vld [vmem:[#allocation72_spill] sm:$0xff] }
 0x52b   : > { %v7259_v3 = vpack.c.bf16 %v7250_v6, %v7249_v36 }
 0x52c   : > { %v7180_v28 = vmul.f32 %v13602_v26, %v7154_v44  ;;  %v7235_v63 = vmul.f32 0.01, %v7203_v7  ;;  %vm7219_vm4 = vcmp.ge.f32.partialorder %v7203_v7, 0.0  ;;  %v14133_v44 = vld [vmem:[#allocation73_spill] sm:$0xff] }
 0x52d   : > { %10105 = vmatprep.mubr.bf16.mxu1 %v7259_v3 }
 0x52e   : > { %v7204_v2 = vadd.f32 %v13604_v31, %v7180_v28  ;;  %v7251_v40 = vsel %vm7219_vm4, %v7203_v7, %v7235_v63 }
 0x530   : > { %vm7220_vm5 = vcmp.ge.f32.partialorder %v7204_v2, 0.0  ;;  %v7236_v55 = vmul.f32 0.01, %v7204_v2 }
 0x532   : > { %v7252_v4 = vsel %vm7220_vm5, %v7204_v2, %v7236_v55 }
 0x533   : > { %v7260_v25 = vpack.c.bf16 %v7252_v4, %v7251_v40 }
 0x535   : > { %10106 = vmatmul.mubr.bf16.gmra.mxu1 %v7260_v25 }
 0x5c5   : > { %v10095_v16 = vpop.f32.mrf.mxu1 }
 0x5c6   : > { %v7425_v27 = vadd.f32 %v10095_v16, %v14126_v46 }
 0x5c7   : > { %v7360_v43 = vpop.f32.mrf.mxu1 }
 0x5c8   : > { %v7448_v26 = vadd.f32 %v13685_v11, %v7425_v27  ;;  %v7423_v31 = vadd.f32 %v7360_v43, %v14127_v35  ;;  %v14134_v35 = vld [vmem:[#allocation80_spill] sm:$0xff] }
 0x5c9   : > { %v10096_v57 = vpop.f32.mrf.mxu1 }
 0x5ca   : > { %v7471_v23 = vmul.f32 %v13688_v38, %v7448_v26  ;;  %v7446_v62 = vadd.f32 %v13685_v11, %v7423_v31  ;;  %v7426_v56 = vadd.f32 %v10096_v57, %v14128_v9 }
 0x5cb   : > { %v7363_v17 = vpop.f32.mrf.mxu1 }
 0x5cc   : > { %v7494_v21 = vadd.f32 %v13692_v14, %v7471_v23  ;;  %v7469_v45 = vmul.f32 %v13688_v38, %v7446_v62  ;;  %v7449_v50 = vadd.f32 %v13685_v11, %v7426_v56  ;;  %v7424_v51 = vadd.f32 %v7363_v17, %v14129_v20  ;;  %v14135_v17 = vld [vmem:[#allocation82_spill] sm:$0xff] }
 0x5ce   : > { %v7472_v24 = vmul.f32 %v13688_v38, %v7449_v50  ;;  %v7492_v54 = vadd.f32 %v13692_v14, %v7469_v45  ;;  %v7447_v10 = vadd.f32 %v13685_v11, %v7424_v51  ;;  %v7526_v32 = vmul.f32 0.01, %v7494_v21  ;;  %v14136_v51 = vld [vmem:[#allocation74_spill] sm:$0xff] }
 0x5cf   : > { %vm7510_vm2 = vcmp.ge.f32.partialorder %v7494_v21, 0.0 }
 0x5d0   : > { %v7495_v60 = vadd.f32 %v13692_v14, %v7472_v24  ;;  %v7470_v58 = vmul.f32 %v13688_v38, %v7447_v10  ;;  %v7524_v39 = vmul.f32 0.01, %v7492_v54  ;;  %v7542_v59 = vsel %vm7510_vm2, %v7494_v21, %v7526_v32 }
 0x5d1   : > { %vm7508_vm7 = vcmp.ge.f32.partialorder %v7492_v54, 0.0 }
 0x5d2   : > { %vm7511_vm6 = vcmp.ge.f32.partialorder %v7495_v60, 0.0  ;;  %v7527_v13 = vmul.f32 0.01, %v7495_v60  ;;  %v7493_v0 = vadd.f32 %v13692_v14, %v7470_v58  ;;  %v7540_v48 = vsel %vm7508_vm7, %v7492_v54, %v7524_v39  ;;  %v14137_v58 = vld [vmem:[#allocation84_spill] sm:$0xff] }
 0x5d4   : > { %v7543_v52 = vsel %vm7511_vm6, %v7495_v60, %v7527_v13  ;;  %vm7509_vm8 = vcmp.ge.f32.partialorder %v7493_v0, 0.0  ;;  %v7525_v33 = vmul.f32 0.01, %v7493_v0 }
 0x5d5   : > { %v8918_v41 = vpack.c.bf16 %v7543_v52, %v7542_v59  ;;  %v10099_v61 = vpop.f32.mrf.mxu1 }
 0x5d6   : > { %v7429_v8 = vadd.f32 %v10099_v61, %v14130_v18  ;;  %v7541_v1 = vsel %vm7509_vm8, %v7493_v0, %v7525_v33 }
 0x5d7   : > { %8950 = vst [vmem:[%s11349_s6 + $0x8] sm:$0xff] %v8918_v41   ;;  %v7376_v34 = vpop.f32.mrf.mxu1  ;;  %v8913_v12 = vpack.c.bf16 %v7541_v1, %v7540_v48 }
 0x5d8   : > { %v7452_v47 = vadd.f32 %v13685_v11, %v7429_v8  ;;  %v7427_v5 = vadd.f32 %v7376_v34, %v14131_v22  ;;  %v14138_v22 = vld [vmem:[#allocation75_spill] sm:$0xff] }
 0x5d9   : > { %v10100_v15 = vpop.f32.mrf.mxu1  ;;  %8914 = vst [vmem:[%s11349_s6] sm:$0xff] %v8913_v12  }
 0x5da   : > { %v7475_v53 = vmul.f32 %v13688_v38, %v7452_v47  ;;  %v7450_v49 = vadd.f32 %v13685_v11, %v7427_v5  ;;  %v7430_v30 = vadd.f32 %v10100_v15, %v14132_v37 }
 0x5db   : > { %v7379_v19 = vpop.f32.mrf.mxu1 }
 0x5dc   : > { %v7498_v42 = vadd.f32 %v13692_v14, %v7475_v53  ;;  %v7473_v29 = vmul.f32 %v13688_v38, %v7450_v49  ;;  %v7453_v7 = vadd.f32 %v13685_v11, %v7430_v30  ;;  %v7428_v36 = vadd.f32 %v7379_v19, %v14133_v44  ;;  %v14139_v19 = vld [vmem:[#allocation77_spill] sm:$0xff] }
 0x5de   : > { %v7476_v6 = vmul.f32 %v13688_v38, %v7453_v7  ;;  %v7496_v3 = vadd.f32 %v13692_v14, %v7473_v29  ;;  %v7451_v28 = vadd.f32 %v13685_v11, %v7428_v36  ;;  %v7530_v2 = vmul.f32 0.01, %v7498_v42  ;;  %v14140_v36 = vld [vmem:[#allocation85_spill] sm:$0xff] }
 0x5df   : > { %vm7514_vm9 = vcmp.ge.f32.partialorder %v7498_v42, 0.0 }
 0x5e0   : > { %v7499_v63 = vadd.f32 %v13692_v14, %v7476_v6  ;;  %v7474_v55 = vmul.f32 %v13688_v38, %v7451_v28  ;;  %v7528_v4 = vmul.f32 0.01, %v7496_v3  ;;  %v7546_v16 = vsel %vm7514_vm9, %v7498_v42, %v7530_v2 }
 0x5e1   : > { %vm7512_vm11 = vcmp.ge.f32.partialorder %v7496_v3, 0.0 }
 0x5e2   : > { %vm7515_vm10 = vcmp.ge.f32.partialorder %v7499_v63, 0.0  ;;  %v7531_v40 = vmul.f32 0.01, %v7499_v63  ;;  %v7497_v25 = vadd.f32 %v13692_v14, %v7474_v55  ;;  %v7544_v57 = vsel %vm7512_vm11, %v7496_v3, %v7528_v4  ;;  %v14141_v55 = vld [vmem:[#allocation86_spill] sm:$0xff] }
 0x5e4   : > { %v7547_v46 = vsel %vm7515_vm10, %v7499_v63, %v7531_v40  ;;  %vm7513_vm12 = vcmp.ge.f32.partialorder %v7497_v25, 0.0  ;;  %v7529_v43 = vmul.f32 0.01, %v7497_v25 }
 0x5e5   : > { %v8928_v27 = vpack.c.bf16 %v7547_v46, %v7546_v16  ;;  %v10103_v26 = vpop.f32.mrf.mxu1 }
 0x5e6   : > { %v7433_v31 = vadd.f32 %v10103_v26, %v14134_v35  ;;  %v7545_v23 = vsel %vm7513_vm12, %v7497_v25, %v7529_v43 }
 0x5e7   : > { %8952 = vst [vmem:[%s11349_s6 + $0x18] sm:$0xff] %v8928_v27   ;;  %v7392_v62 = vpop.f32.mrf.mxu1  ;;  %v8923_v9 = vpack.c.bf16 %v7545_v23, %v7544_v57 }
 0x5e8   : > { %v7456_v56 = vadd.f32 %v13685_v11, %v7433_v31  ;;  %v7431_v21 = vadd.f32 %v7392_v62, %v14135_v17 }
 0x5e9   : > { %v10104_v45 = vpop.f32.mrf.mxu1  ;;  %8951 = vst [vmem:[%s11349_s6 + $0x10] sm:$0xff] %v8923_v9  }
 0x5ea   : > { %v7479_v50 = vmul.f32 %v13688_v38, %v7456_v56  ;;  %v7454_v20 = vadd.f32 %v13685_v11, %v7431_v21  ;;  %v7434_v24 = vadd.f32 %v10104_v45, %v14136_v51 }
 0x5eb   : > { %v7395_v54 = vpop.f32.mrf.mxu1 }
 0x5ec   : > { %v7502_v10 = vadd.f32 %v13692_v14, %v7479_v50  ;;  %v7477_v32 = vmul.f32 %v13688_v38, %v7454_v20  ;;  %v7457_v60 = vadd.f32 %v13685_v11, %v7434_v24  ;;  %v7432_v13 = vadd.f32 %v7395_v54, %v14137_v58 }
 0x5ee   : > { %v7480_v39 = vmul.f32 %v13688_v38, %v7457_v60  ;;  %v7500_v0 = vadd.f32 %v13692_v14, %v7477_v32  ;;  %v7455_v59 = vadd.f32 %v13685_v11, %v7432_v13  ;;  %v7534_v52 = vmul.f32 0.01, %v7502_v10 }
 0x5ef   : > { %vm7518_vm13 = vcmp.ge.f32.partialorder %v7502_v10, 0.0 }
 0x5f0   : > { %v7503_v41 = vadd.f32 %v13692_v14, %v7480_v39  ;;  %v7478_v33 = vmul.f32 %v13688_v38, %v7455_v59  ;;  %v7532_v18 = vmul.f32 0.01, %v7500_v0  ;;  %v7550_v48 = vsel %vm7518_vm13, %v7502_v10, %v7534_v52 }
 0x5f1   : > { %vm7516_vm15 = vcmp.ge.f32.partialorder %v7500_v0, 0.0 }
 0x5f2   : > { %vm7519_vm14 = vcmp.ge.f32.partialorder %v7503_v41, 0.0  ;;  %v7535_v61 = vmul.f32 0.01, %v7503_v41  ;;  %v7501_v8 = vadd.f32 %v13692_v14, %v7478_v33  ;;  %v7548_v15 = vsel %vm7516_vm15, %v7500_v0, %v7532_v18 }
 0x5f4   : > { %v7551_v1 = vsel %vm7519_vm14, %v7503_v41, %v7535_v61  ;;  %vm7517_vm0 = vcmp.ge.f32.partialorder %v7501_v8, 0.0  ;;  %v7533_v12 = vmul.f32 0.01, %v7501_v8 }
 0x5f5   : > { %v8938_v34 = vpack.c.bf16 %v7551_v1, %v7550_v48  ;;  %v10107_v47 = vpop.f32.mrf.mxu1 }
 0x5f6   : > { %v7437_v5 = vadd.f32 %v10107_v47, %v14138_v22  ;;  %v7549_v53 = vsel %vm7517_vm0, %v7501_v8, %v7533_v12 }
 0x5f7   : > { %8954 = vst [vmem:[%s11349_s6 + $0x28] sm:$0xff] %v8938_v34   ;;  %v7408_v49 = vpop.f32.mrf.mxu1  ;;  %v8933_v37 = vpack.c.bf16 %v7549_v53, %v7548_v15 }
 0x5f8   : > { %v7460_v30 = vadd.f32 %v13685_v11, %v7437_v5  ;;  %v7435_v42 = vadd.f32 %v7408_v49, %v14139_v19 }
 0x5f9   : > { %v10108_v29 = vpop.f32.mrf.mxu1  ;;  %8953 = vst [vmem:[%s11349_s6 + $0x20] sm:$0xff] %v8933_v37  }
 0x5fa   : > { %v7483_v7 = vmul.f32 %v13688_v38, %v7460_v30  ;;  %v7458_v44 = vadd.f32 %v13685_v11, %v7435_v42  ;;  %v7438_v6 = vadd.f32 %v10108_v29, %v14140_v36 }
 0x5fb   : > { %v7411_v3 = vpop.f32.mrf.mxu1 }
 0x5fc   : > { %v7506_v28 = vadd.f32 %v13692_v14, %v7483_v7  ;;  %v7481_v2 = vmul.f32 %v13688_v38, %v7458_v44  ;;  %v7461_v63 = vadd.f32 %v13685_v11, %v7438_v6  ;;  %v7436_v40 = vadd.f32 %v7411_v3, %v14141_v55 }
 0x5fe   : > { %v7484_v4 = vmul.f32 %v13688_v38, %v7461_v63  ;;  %v7504_v25 = vadd.f32 %v13692_v14, %v7481_v2  ;;  %v7459_v16 = vadd.f32 %v13685_v11, %v7436_v40  ;;  %v7538_v46 = vmul.f32 0.01, %v7506_v28 }
 0x5ff   : > { %vm7522_vm1 = vcmp.ge.f32.partialorder %v7506_v28, 0.0 }
 0x600   : > { %v7507_v27 = vadd.f32 %v13692_v14, %v7484_v4  ;;  %v7482_v43 = vmul.f32 %v13688_v38, %v7459_v16  ;;  %v7536_v35 = vmul.f32 0.01, %v7504_v25  ;;  %v7554_v57 = vsel %vm7522_vm1, %v7506_v28, %v7538_v46 }
 0x601   : > { %vm7520_vm4 = vcmp.ge.f32.partialorder %v7504_v25, 0.0 }
 0x602   : > { %vm7523_vm3 = vcmp.ge.f32.partialorder %v7507_v27, 0.0  ;;  %v7539_v26 = vmul.f32 0.01, %v7507_v27  ;;  %v7505_v31 = vadd.f32 %v13692_v14, %v7482_v43  ;;  %v7552_v9 = vsel %vm7520_vm4, %v7504_v25, %v7536_v35 }
 0x604   : > { %v7555_v23 = vsel %vm7523_vm3, %v7507_v27, %v7539_v26  ;;  %vm7521_vm5 = vcmp.ge.f32.partialorder %v7505_v31, 0.0  ;;  %v7537_v62 = vmul.f32 0.01, %v7505_v31 }
 0x605   : > { %v8948_v11 = vpack.c.bf16 %v7555_v23, %v7554_v57 }
 0x606   : > { %v7553_v38 = vsel %vm7521_vm5, %v7505_v31, %v7537_v62 }
 0x607   : > { %8956 = vst [vmem:[%s11349_s6 + $0x38] sm:$0xff] %v8948_v11   ;;  %v8943_v14 = vpack.c.bf16 %v7553_v38, %v7552_v9 }
 0x609   : > { %8955 = vst [vmem:[%s11349_s6 + $0x30] sm:$0xff] %v8943_v14  }
 0x60a   : > { %10887 = shalt.err (!%p10884_p10)
}
 0x60b   : > { %s10888_s6 = scalar_lea.hbm %s13768_s17, 1024  ;;  %s10892_s20 = scalar_lea.hbm %s14142_s16, 4096 }
 0x60c   : > { %p10889_p3 = scmp.ne.s32.totalorder %s13768_s17, %s10888_s6  ;;  %p10893_p12 = scmp.lt.s32.totalorder %s13768_s17, %s14142_s16 }
 0x60d   : > { %p10894_p1 = scmp.lt.s32.totalorder %s10892_s20, %s10888_s6 }
 0x60e   : > { %p10890_p5 = pnand %p10889_p3, %p11243_p2 }
 0x60f   : > { %p10895_p7 = por %p10894_p1, %p10893_p12 }
 0x610   : > { %p10891_p9 = pneg %p10890_p5 }
 0x612   : > { %p10896_p6 = pnand %p10895_p7, %p10891_p9 }
 0x614   : > { %10899 = shalt.err (!%p10896_p6)
}
 0x615   : > { %s11031_s13 = smov 64   ;;  %s11032_s24 = smov 4  }
 0x616   : > { %10139 = dma.vmem_to_hbm [thread:$0]  (%p11243_p2), %s13770_s12, 1024, %s13768_s17, %s13775_s14, %s11031_s13, %s11031_s13, %s11032_s24  }
 0x617 PF: > { %p10183_p11 = scmp.ge.s32.totalorder %s11016_s15, 2  ;;  %s7667_s19 = sand.u32 1, %s10976_s27  }
 0x618   : > { %p14144_p0 = scmp.ne.s32.totalorder %s13913_s3, 0  ;;  %s7668_s11 = scalar_lea.sflag [#allocation6], %s7667_s19 }
 0x61a   : > { %p10165_p13 = pnand %p10183_p11, %p14144_p0 }
 0x61c   : > { %p10166_p4 = pneg %p10165_p13 }
 0x61e   : > { %10971 = dma.done.wait (%p10166_p4), %s7668_s11, 1024  }
 0x61f   : > { %10973 = vsyncadd (%p10166_p4), %s7668_s11, 4294966272  ;;  %s24_s15 = sadd.s32 1, %s11016_s15   ;;  %s14145_s2 = sld [smem:[#allocation34_spill]] }
 0x620   : > { %p21_p8 = scmp.ge.s32.totalorder %s24_s15, 6   ;;  %s14146_s11 = sld [smem:[#allocation30_spill]] }
 0x621   : > { %s14147_s12 = sld [smem:[#allocation31_spill]]  ;;  %s14150_s27 = smov %s10980_s28 }
 0x622   : > { %s14148_s13 = sld [smem:[#allocation32_spill]]  ;;  %s14151_s28 = smov %s10984_s29 }
 0x623   : > { %s14149_s14 = sld [smem:[#allocation33_spill]]  ;;  %s14152_s29 = smov %s11251_s8 }
 0x624   : > { %s14153_s30 = smov %s10992_s9  ;;  %s14154_s9 = smov %s10996_s10 }
 0x625   : > { %s14155_s10 = smov %s14145_s2  ;;  %23 = sbr.rel (!%p21_p8) target bundleno = 20 (0x14), region = 154 }
 0x62a   :  { %7673 = vsyncpa [#allocation5], 1 }
 0x62b   :  { %7675 = vsyncpa [#allocation5 + $0x1], 1 }
 0x62c   :  { %7676 = vsyncpa [#allocation8], 1 }
 0x62d   :  { %7677 = vsyncpa [#allocation11], 1 }
 0x62e   :  { %7678 = vsyncpa [#allocation6], 1 }
 0x62f   :  { %7680 = vsyncpa [#allocation6 + $0x1], 1 }
 0x630   :  { %7681 = vsyncmov [#allocation3] }
 0x633   :  { %s7682_s3 = vpop.sfrf %7681 }
 0x634   :  { %p8889_p2 = scmp.ne.s32.totalorder %s7682_s3, 0 }
 0x636   :  { %7686 = shalt.err (%p8889_p2)  }
 0x637   :  { %7688 = vsyncmov [#allocation3 + $0x1] }
 0x63a   :  { %s7689_s8 = vpop.sfrf %7688 }
 0x63b   :  { %p8890_p10 = scmp.ne.s32.totalorder %s7689_s8, 0 }
 0x63d   :  { %7693 = shalt.err (%p8890_p10)  }

</bundles_post_ra>
